<compile_context>
chip_gen: v6e
topology: v6e:2x2x1
jax: 0.10.0
libtpu: 0.0.40
codegen_flags: <defaults>
</compile_context>

<pallas_src>
import math

import jax
import jax.numpy as jnp
from jax.experimental import pallas as pl
from jax.experimental.pallas import tpu as pltpu

# ---------------- config (small, consistent with the module) ----------------
B = 2
T = 16
ENC_DIM = 32
NUM_ENC_LAYERS = 2
DEC_DIM = 16            # divisible by nhead=8 and divides ENC_DIM (grouped convs)
DEC_BUF_LEN = 4         # ctx_len
DEC_CHUNK = 4           # chunk_size
NUM_DEC_LAYERS = 2
NHEAD = 8
FF_DIM = 2 * DEC_DIM
KSIZE = 3
LN_EPS = 1e-5
BUF_TOTAL = (KSIZE - 1) * (2 ** NUM_ENC_LAYERS - 1)   # 6
N_W = 2 * NUM_ENC_LAYERS + 3 + 8 * NUM_DEC_LAYERS      # packed weight refs


def _layernorm(v, g, b):
    mu = jnp.mean(v, axis=-1, keepdims=True)
    var = jnp.mean((v - mu) ** 2, axis=-1, keepdims=True)
    return (v - mu) * jax.lax.rsqrt(var + LN_EPS) * g + b


# ---------------------------- the fused kernel ----------------------------

def masknet_kernel(x_ref, lbl_ref, ebuf_ref, dbuf_ref, *rest):
    """Entire MaskNet forward for one batch element (grid axis = batch).

    x_ref:    [T, Ce]        input (channels-last)
    lbl_ref:  [1, Ce]        label embedding
    ebuf_ref: [BUF_TOTAL, Ce] encoder context buffer
    dbuf_ref: [ND+1, CTX, Cd] decoder context buffer
    rest: N_W packed weight refs, then (m_ref, ebuf_o_ref, dbuf_o_ref).
    """
    wrefs = rest[:N_W]
    m_ref, ebuf_o_ref, dbuf_o_ref = rest[N_W:]

    Tt = x_ref.shape[0]
    Cd = DEC_DIM
    H = NHEAD
    hd = Cd // H                       # head_dim (=2)
    CTX = DEC_BUF_LEN
    CH = DEC_CHUNK
    KW = CTX + CH                      # window length
    L = Tt // CH                       # number of decoder windows
    scale = 1.0 / math.sqrt(hd)

    def mm_b(v, wb_ref):
        # bias-packed matmul: wb = [W (Cin x Cout); b (1 x Cout)]
        wb = wb_ref[...]
        return (jnp.dot(v, wb[:-1, :], preferred_element_type=jnp.float32)
                + wb[-1:, :])

    x = x_ref[...]                     # [T, Ce]
    label = lbl_ref[...]               # [1, Ce]
    ebuf = ebuf_ref[...]               # [BUF_TOTAL, Ce]

    # ---------------- dilated causal conv encoder ----------------
    wi = 0
    off = 0
    for i in range(NUM_ENC_LAYERS):
        d = 2 ** i
        blen = (KSIZE - 1) * d
        vec = wrefs[wi][...]           # [8, Ce]: dw0,dw1,dw2,db,g1,be1,g2,be2
        pw_b = wrefs[wi + 1]           # [Ce+1, Ce] pointwise conv (+bias row)
        wi += 2

        dcc_in = jnp.concatenate([ebuf[off:off + blen, :], x], axis=0)  # [T+blen, Ce]
        ebuf_o_ref[off:off + blen, :] = dcc_in[Tt:Tt + blen, :]         # last blen rows

        # depthwise dilated conv (k=3) -> LN -> ReLU -> 1x1 conv -> LN -> ReLU
        y = (dcc_in[0:Tt, :] * vec[0:1, :]
             + dcc_in[d:d + Tt, :] * vec[1:2, :]
             + dcc_in[2 * d:2 * d + Tt, :] * vec[2:3, :]) + vec[3:4, :]
        y = _layernorm(y, vec[4:5, :], vec[5:6, :])
        y = jnp.maximum(y, 0.0)
        z = mm_b(y, pw_b)
        z = _layernorm(z, vec[6:7, :], vec[7:8, :])
        x = x + jnp.maximum(z, 0.0)
        off += blen

    e = x                              # encoder output  [T, Ce]
    l = label * e                      # label mask      [T, Ce]

    # grouped 1x1 projections (expressed as dense block-diagonal matmuls)
    e2de_ref, e2dl_ref, d2e_ref = wrefs[wi], wrefs[wi + 1], wrefs[wi + 2]
    wi += 3
    mem = jnp.maximum(mm_b(e, e2de_ref), 0.0)   # [T, Cd]  decoder memory
    tgt = jnp.maximum(mm_b(l, e2dl_ref), 0.0)   # [T, Cd]  decoder input

    # ---------------- causal transformer decoder ----------------
    dbuf = dbuf_ref[...]                                        # [ND+1, CTX, Cd]
    mem_full = jnp.concatenate([dbuf[0], mem], axis=0)          # [CTX+T, Cd]
    dbuf_o_ref[0:1, :, :] = mem_full[Tt:Tt + CTX, :][None, :, :]

    def attn(Qc, Kc, Vc, wo_ref):
        """Multi-head attention over L causal windows.
        Qc: hd x [T, H] per-dim query components; Kc/Vc: hd x [CTX+T, H].
        Scores/context are computed on the VPU (head_dim=2 -> 2 MACs/elem);
        a single matmul does the output projection for all windows."""
        outs = []
        for w in range(L):
            s = (Qc[0][w * CH:(w + 1) * CH, :][:, None, :]
                 * Kc[0][w * CH:w * CH + KW, :][None, :, :])
            for dd in range(1, hd):
                s = s + (Qc[dd][w * CH:(w + 1) * CH, :][:, None, :]
                         * Kc[dd][w * CH:w * CH + KW, :][None, :, :])
            s = s * scale                                        # [CH, KW, H]
            s = s - jnp.max(s, axis=1, keepdims=True)
            p = jnp.exp(s)
            p = p * pl.reciprocal(jnp.sum(p, axis=1, keepdims=True), approx=True)
            ctx = [jnp.sum(p * Vc[dd][w * CH:w * CH + KW, :][None, :, :], axis=1)
                   for dd in range(hd)]                          # hd x [CH, H]
            outs.append(jnp.concatenate(ctx, axis=-1))           # [CH, Cd]
        ctx_all = jnp.concatenate(outs, axis=0)                  # [T, Cd]
        return mm_b(ctx_all, wo_ref)

    for li in range(NUM_DEC_LAYERS):
        (wqkv1_r, wo1_r, wq2_r, wkv2_r, wo2_r, w1_r, w2_r, ln_r) = wrefs[wi:wi + 8]
        wi += 8
        ln = ln_r[...]                                           # [6, Cd]

        tgt_full = jnp.concatenate([dbuf[li + 1], tgt], axis=0)  # [CTX+T, Cd]
        dbuf_o_ref[li + 1:li + 2, :, :] = tgt_full[Tt:Tt + CTX, :][None, :, :]

        # --- self attention: one fused QKV matmul over the full window ---
        qkv = mm_b(tgt_full, wqkv1_r)                            # [CTX+T, 3Cd]
        Qc = [qkv[CTX:, dd * H:(dd + 1) * H] for dd in range(hd)]
        Kc = [qkv[:, Cd + dd * H:Cd + (dd + 1) * H] for dd in range(hd)]
        Vc = [qkv[:, 2 * Cd + dd * H:2 * Cd + (dd + 1) * H] for dd in range(hd)]
        xa = _layernorm(tgt + attn(Qc, Kc, Vc, wo1_r), ln[0:1, :], ln[1:2, :])

        # --- cross attention over the (shared) memory windows ---
        q2 = mm_b(xa, wq2_r)                                     # [T, Cd]
        kv2 = mm_b(mem_full, wkv2_r)                             # [CTX+T, 2Cd]
        Q2 = [q2[:, dd * H:(dd + 1) * H] for dd in range(hd)]
        K2 = [kv2[:, dd * H:(dd + 1) * H] for dd in range(hd)]
        V2 = [kv2[:, Cd + dd * H:Cd + (dd + 1) * H] for dd in range(hd)]
        xa = _layernorm(xa + attn(Q2, K2, V2, wo2_r), ln[2:3, :], ln[3:4, :])

        # --- feed-forward ---
        hft = jnp.maximum(mm_b(xa, w1_r), 0.0)
        tgt = _layernorm(xa + mm_b(hft, w2_r), ln[4:5, :], ln[5:6, :])

    # ---------------- d2e projection + skip connection ----------------
    mdec = jnp.maximum(mm_b(tgt, d2e_ref), 0.0)                  # [T, Ce]
    m_ref[...] = l + mdec


# ---------------------------- wrapper ----------------------------

def masknet_forward(packed_weights, x_bct, label, enc_buf_bct, dec_buf):
    x = jnp.transpose(x_bct, (0, 2, 1))                # [B, T, Ce]
    enc_buf = jnp.transpose(enc_buf_bct, (0, 2, 1))    # [B, BUF_TOTAL, Ce]
    lbl = label[:, None, :]                            # [B, 1, Ce]
    Bn, Tt, Ce = x.shape
    assert Tt % DEC_CHUNK == 0 and Tt >= DEC_BUF_LEN   # TODO(synk): mod_pad path

    in_specs = [
        pl.BlockSpec((None, Tt, Ce), lambda b: (b, 0, 0)),
        pl.BlockSpec((None, 1, Ce), lambda b: (b, 0, 0)),
        pl.BlockSpec((None, BUF_TOTAL, Ce), lambda b: (b, 0, 0)),
        pl.BlockSpec((None, NUM_DEC_LAYERS + 1, DEC_BUF_LEN, DEC_DIM),
                     lambda b: (b, 0, 0, 0)),
    ] + [pl.BlockSpec(w.shape, lambda b: (0, 0)) for w in packed_weights]

    out_shape = (
        jax.ShapeDtypeStruct((Bn, Tt, Ce), jnp.float32),
        jax.ShapeDtypeStruct((Bn, BUF_TOTAL, Ce), jnp.float32),
        jax.ShapeDtypeStruct((Bn, NUM_DEC_LAYERS + 1, DEC_BUF_LEN, DEC_DIM),
                             jnp.float32),
    )
    out_specs = (
        pl.BlockSpec((None, Tt, Ce), lambda b: (b, 0, 0)),
        pl.BlockSpec((None, BUF_TOTAL, Ce), lambda b: (b, 0, 0)),
        pl.BlockSpec((None, NUM_DEC_LAYERS + 1, DEC_BUF_LEN, DEC_DIM),
                     lambda b: (b, 0, 0, 0)),
    )

    m, enc_buf_o, dec_buf_o = pl.pallas_call(
        masknet_kernel,
        out_shape=out_shape,
        grid=(Bn,),
        in_specs=in_specs,
        out_specs=out_specs,
        compiler_params=pltpu.CompilerParams(dimension_semantics=("parallel",)),
    )(x, lbl, enc_buf, dec_buf, *packed_weights)

    return (jnp.transpose(m, (0, 2, 1)),
            jnp.transpose(enc_buf_o, (0, 2, 1)),
            dec_buf_o)


# ---------------------------- parameters ----------------------------

def init_params(key):
    ks = iter(jax.random.split(key, 256))

    def nrm(shape, scale=0.1):
        return scale * jax.random.normal(next(ks), shape, jnp.float32)

    C = ENC_DIM
    enc = []
    for _ in range(NUM_ENC_LAYERS):
        enc.append(dict(
            dw=nrm((3, C), 0.3), db=nrm((1, C), 0.05),
            g1=jnp.ones((1, C), jnp.float32), be1=jnp.zeros((1, C), jnp.float32),
            pw=nrm((C, C), 0.1), pb=nrm((1, C), 0.05),
            g2=jnp.ones((1, C), jnp.float32), be2=jnp.zeros((1, C), jnp.float32)))

    # grouped 1x1 convs as dense block-diagonal matrices
    ipg = ENC_DIM // DEC_DIM     # in-channels per group (e2d)
    opg = ENC_DIM // DEC_DIM     # out-channels per group (d2e)

    def e2d_dense():
        w_small = nrm((DEC_DIM, ipg), 0.3)
        rows = jnp.arange(ENC_DIM)
        return (jnp.zeros((ENC_DIM, DEC_DIM), jnp.float32)
                .at[rows, rows // ipg].set(w_small.reshape(-1)))

    def d2e_dense():
        w_small = nrm((ENC_DIM,), 0.3)
        cols = jnp.arange(ENC_DIM)
        return (jnp.zeros((DEC_DIM, ENC_DIM), jnp.float32)
                .at[cols // opg, cols].set(w_small))

    proj = dict(e2d_e_w=e2d_dense(), e2d_e_b=nrm((1, DEC_DIM), 0.05),
                e2d_l_w=e2d_dense(), e2d_l_b=nrm((1, DEC_DIM), 0.05),
                d2e_w=d2e_dense(), d2e_b=nrm((1, ENC_DIM), 0.05))

    Cd = DEC_DIM
    dec = []
    for _ in range(NUM_DEC_LAYERS):
        layer = {}
        for pre in ('1', '2'):                 # 1 = self-attn, 2 = cross-attn
            for nm in ('q', 'k', 'v', 'o'):
                layer['w' + nm + pre] = nrm((Cd, Cd), 0.2)
                layer['b' + nm + pre] = nrm((1, Cd), 0.02)
        layer['w1'] = nrm((Cd, FF_DIM), 0.2); layer['b1'] = nrm((1, FF_DIM), 0.02)
        layer['w2'] = nrm((FF_DIM, Cd), 0.2); layer['b2'] = nrm((1, Cd), 0.02)
        for n in ('1', '2', '3'):
            layer['g' + n] = jnp.ones((1, Cd), jnp.float32)
            layer['be' + n] = jnp.zeros((1, Cd), jnp.float32)
        dec.append(layer)

    return dict(enc=enc, proj=proj, dec=dec)


def pack_params(p):
    """Pack raw params into the flat, fused, bias-row-packed list the kernel expects."""
    hd = DEC_DIM // NHEAD

    def cols(w):   # reorder columns per-head-dim-major: [comp0 heads | comp1 heads]
        return jnp.concatenate([w[:, d::hd] for d in range(hd)], axis=1)

    def rows(w):   # matching row reorder for the output projection
        return jnp.concatenate([w[d::hd, :] for d in range(hd)], axis=0)

    packed = []
    for lp in p['enc']:
        vec = jnp.concatenate([lp['dw'], lp['db'], lp['g1'], lp['be1'],
                               lp['g2'], lp['be2']], axis=0)          # [8, Ce]
        packed.append(vec)
        packed.append(jnp.concatenate([lp['pw'], lp['pb']], axis=0))  # [Ce+1, Ce]

    pr = p['proj']
    packed.append(jnp.concatenate([pr['e2d_e_w'], pr['e2d_e_b']], axis=0))
    packed.append(jnp.concatenate([pr['e2d_l_w'], pr['e2d_l_b']], axis=0))
    packed.append(jnp.concatenate([pr['d2e_w'], pr['d2e_b']], axis=0))

    for lp in p['dec']:
        wqkv = jnp.concatenate(
            [jnp.concatenate([cols(lp['wq1']), cols(lp['wk1']), cols(lp['wv1'])], axis=1),
             jnp.concatenate([cols(lp['bq1']), cols(lp['bk1']), cols(lp['bv1'])], axis=1)],
            axis=0)                                                    # [Cd+1, 3Cd]
        wo1 = jnp.concatenate([rows(lp['wo1']), lp['bo1']], axis=0)    # [Cd+1, Cd]
        wq2 = jnp.concatenate([cols(lp['wq2']), cols(lp['bq2'])], axis=0)
        wkv2 = jnp.concatenate(
            [jnp.concatenate([cols(lp['wk2']), cols(lp['wv2'])], axis=1),
             jnp.concatenate([cols(lp['bk2']), cols(lp['bv2'])], axis=1)],
            axis=0)                                                    # [Cd+1, 2Cd]
        wo2 = jnp.concatenate([rows(lp['wo2']), lp['bo2']], axis=0)
        w1 = jnp.concatenate([lp['w1'], lp['b1']], axis=0)             # [Cd+1, FF]
        w2 = jnp.concatenate([lp['w2'], lp['b2']], axis=0)             # [FF+1, Cd]
        ln = jnp.concatenate([lp['g1'], lp['be1'], lp['g2'], lp['be2'],
                              lp['g3'], lp['be3']], axis=0)            # [6, Cd]
        packed += [wqkv, wo1, wq2, wkv2, wo2, w1, w2, ln]

    assert len(packed) == N_W
    return packed


# ---------------------------- main ----------------------------

if __name__ == "__main__":
    key = jax.random.PRNGKey(0)
    kp, kx, kl = jax.random.split(key, 3)
    params = init_params(kp)
    packed = pack_params(params)

    x = jax.random.normal(kx, (B, ENC_DIM, T), jnp.float32)
    label = jax.random.normal(kl, (B, ENC_DIM), jnp.float32)
    enc_buf = jnp.zeros((B, ENC_DIM, BUF_TOTAL), jnp.float32)
    dec_buf = jnp.zeros((B, NUM_DEC_LAYERS + 1, DEC_BUF_LEN, DEC_DIM), jnp.float32)

    fwd = jax.jit(masknet_forward)
    m, enc_buf_out, dec_buf_out = fwd(packed, x, label, enc_buf, dec_buf)
    jax.block_until_ready((m, enc_buf_out, dec_buf_out))

    assert m.shape == (B, ENC_DIM, T)
    assert enc_buf_out.shape == enc_buf.shape
    assert dec_buf_out.shape == dec_buf.shape
    assert bool(jnp.all(jnp.isfinite(m)))
    print("KERNEL_OK")
</pallas_src>

<mosaic_0001>
module attributes {stable_mosaic.version = 11 : i64} {
  func.func @masknet_kernel(%arg0: i32, %arg1: memref<1x16x32xf32, #tpu.memory_space<vmem>>, %arg2: memref<1x1x32xf32, #tpu.memory_space<vmem>>, %arg3: memref<1x6x32xf32, #tpu.memory_space<vmem>>, %arg4: memref<1x3x4x16xf32, #tpu.memory_space<vmem>>, %arg5: memref<8x32xf32, #tpu.memory_space<vmem>>, %arg6: memref<33x32xf32, #tpu.memory_space<vmem>>, %arg7: memref<8x32xf32, #tpu.memory_space<vmem>>, %arg8: memref<33x32xf32, #tpu.memory_space<vmem>>, %arg9: memref<33x16xf32, #tpu.memory_space<vmem>>, %arg10: memref<33x16xf32, #tpu.memory_space<vmem>>, %arg11: memref<17x32xf32, #tpu.memory_space<vmem>>, %arg12: memref<17x48xf32, #tpu.memory_space<vmem>>, %arg13: memref<17x16xf32, #tpu.memory_space<vmem>>, %arg14: memref<17x16xf32, #tpu.memory_space<vmem>>, %arg15: memref<17x32xf32, #tpu.memory_space<vmem>>, %arg16: memref<17x16xf32, #tpu.memory_space<vmem>>, %arg17: memref<17x32xf32, #tpu.memory_space<vmem>>, %arg18: memref<33x16xf32, #tpu.memory_space<vmem>>, %arg19: memref<6x16xf32, #tpu.memory_space<vmem>>, %arg20: memref<17x48xf32, #tpu.memory_space<vmem>>, %arg21: memref<17x16xf32, #tpu.memory_space<vmem>>, %arg22: memref<17x16xf32, #tpu.memory_space<vmem>>, %arg23: memref<17x32xf32, #tpu.memory_space<vmem>>, %arg24: memref<17x16xf32, #tpu.memory_space<vmem>>, %arg25: memref<17x32xf32, #tpu.memory_space<vmem>>, %arg26: memref<33x16xf32, #tpu.memory_space<vmem>>, %arg27: memref<6x16xf32, #tpu.memory_space<vmem>>, %arg28: memref<1x16x32xf32, #tpu.memory_space<vmem>>, %arg29: memref<1x6x32xf32, #tpu.memory_space<vmem>>, %arg30: memref<1x3x4x16xf32, #tpu.memory_space<vmem>>) attributes {dimension_semantics = [#tpu.dimension_semantics<parallel>], iteration_bounds = array<i64: 2>, scalar_prefetch = 0 : i64, scratch_operands = 0 : i64, tpu.core_type = #tpu.core_type<tc>, window_params = [{transform_indices = @transform_0, window_bounds = array<i64: 1, 16, 32>}, {transform_indices = @transform_1, window_bounds = array<i64: 1, 1, 32>}, {transform_indices = @transform_2, window_bounds = array<i64: 1, 6, 32>}, {transform_indices = @transform_3, window_bounds = array<i64: 1, 3, 4, 16>}, {pipeline_mode = #tpu.pipeline_mode<synchronous>, transform_indices = @transform_4, window_bounds = array<i64: 8, 32>}, {pipeline_mode = #tpu.pipeline_mode<synchronous>, transform_indices = @transform_5, window_bounds = array<i64: 33, 32>}, {pipeline_mode = #tpu.pipeline_mode<synchronous>, transform_indices = @transform_6, window_bounds = array<i64: 8, 32>}, {pipeline_mode = #tpu.pipeline_mode<synchronous>, transform_indices = @transform_7, window_bounds = array<i64: 33, 32>}, {pipeline_mode = #tpu.pipeline_mode<synchronous>, transform_indices = @transform_8, window_bounds = array<i64: 33, 16>}, {pipeline_mode = #tpu.pipeline_mode<synchronous>, transform_indices = @transform_9, window_bounds = array<i64: 33, 16>}, {pipeline_mode = #tpu.pipeline_mode<synchronous>, transform_indices = @transform_10, window_bounds = array<i64: 17, 32>}, {pipeline_mode = #tpu.pipeline_mode<synchronous>, transform_indices = @transform_11, window_bounds = array<i64: 17, 48>}, {pipeline_mode = #tpu.pipeline_mode<synchronous>, transform_indices = @transform_12, window_bounds = array<i64: 17, 16>}, {pipeline_mode = #tpu.pipeline_mode<synchronous>, transform_indices = @transform_13, window_bounds = array<i64: 17, 16>}, {pipeline_mode = #tpu.pipeline_mode<synchronous>, transform_indices = @transform_14, window_bounds = array<i64: 17, 32>}, {pipeline_mode = #tpu.pipeline_mode<synchronous>, transform_indices = @transform_15, window_bounds = array<i64: 17, 16>}, {pipeline_mode = #tpu.pipeline_mode<synchronous>, transform_indices = @transform_16, window_bounds = array<i64: 17, 32>}, {pipeline_mode = #tpu.pipeline_mode<synchronous>, transform_indices = @transform_17, window_bounds = array<i64: 33, 16>}, {pipeline_mode = #tpu.pipeline_mode<synchronous>, transform_indices = @transform_18, window_bounds = array<i64: 6, 16>}, {pipeline_mode = #tpu.pipeline_mode<synchronous>, transform_indices = @transform_19, window_bounds = array<i64: 17, 48>}, {pipeline_mode = #tpu.pipeline_mode<synchronous>, transform_indices = @transform_20, window_bounds = array<i64: 17, 16>}, {pipeline_mode = #tpu.pipeline_mode<synchronous>, transform_indices = @transform_21, window_bounds = array<i64: 17, 16>}, {pipeline_mode = #tpu.pipeline_mode<synchronous>, transform_indices = @transform_22, window_bounds = array<i64: 17, 32>}, {pipeline_mode = #tpu.pipeline_mode<synchronous>, transform_indices = @transform_23, window_bounds = array<i64: 17, 16>}, {pipeline_mode = #tpu.pipeline_mode<synchronous>, transform_indices = @transform_24, window_bounds = array<i64: 17, 32>}, {pipeline_mode = #tpu.pipeline_mode<synchronous>, transform_indices = @transform_25, window_bounds = array<i64: 33, 16>}, {pipeline_mode = #tpu.pipeline_mode<synchronous>, transform_indices = @transform_26, window_bounds = array<i64: 6, 16>}, {transform_indices = @transform_27, window_bounds = array<i64: 1, 16, 32>}, {transform_indices = @transform_28, window_bounds = array<i64: 1, 6, 32>}, {transform_indices = @transform_29, window_bounds = array<i64: 1, 3, 4, 16>}]} {
    %c0 = arith.constant 0 : index
    %c0_0 = arith.constant 0 : index
    %c0_1 = arith.constant 0 : index
    %0 = vector.load %arg1[%c0, %c0_0, %c0_1] : memref<1x16x32xf32, #tpu.memory_space<vmem>>, vector<1x16x32xf32>
    %1 = vector.shape_cast %0 : vector<1x16x32xf32> to vector<16x32xf32>
    %c0_2 = arith.constant 0 : index
    %c0_3 = arith.constant 0 : index
    %c0_4 = arith.constant 0 : index
    %2 = vector.load %arg2[%c0_2, %c0_3, %c0_4] : memref<1x1x32xf32, #tpu.memory_space<vmem>>, vector<1x1x32xf32>
    %3 = vector.shape_cast %2 : vector<1x1x32xf32> to vector<1x32xf32>
    %c0_5 = arith.constant 0 : index
    %c0_6 = arith.constant 0 : index
    %c0_7 = arith.constant 0 : index
    %4 = vector.load %arg3[%c0_5, %c0_6, %c0_7] : memref<1x6x32xf32, #tpu.memory_space<vmem>>, vector<1x6x32xf32>
    %5 = vector.shape_cast %4 : vector<1x6x32xf32> to vector<6x32xf32>
    %c0_8 = arith.constant 0 : index
    %c0_9 = arith.constant 0 : index
    %6 = vector.load %arg5[%c0_8, %c0_9] : memref<8x32xf32, #tpu.memory_space<vmem>>, vector<8x32xf32>
    %7 = vector.extract_strided_slice %5 {offsets = [0, 0], sizes = [2, 32], strides = [1, 1]} : vector<6x32xf32> to vector<2x32xf32>
    %8 = tpu.concatenate %7, %1 in 0 : vector<2x32xf32>, vector<16x32xf32> -> vector<18x32xf32>
    %9 = vector.extract_strided_slice %8 {offsets = [16, 0], sizes = [2, 32], strides = [1, 1]} : vector<18x32xf32> to vector<2x32xf32>
    %c0_10 = arith.constant 0 : index
    %c0_11 = arith.constant 0 : index
    %c0_12 = arith.constant 0 : index
    %10 = vector.load %arg29[%c0_10, %c0_11, %c0_12] : memref<1x6x32xf32, #tpu.memory_space<vmem>>, vector<1x2x32xf32>
    %11 = vector.shape_cast %10 : vector<1x2x32xf32> to vector<2x32xf32>
    %12 = vector.shape_cast %9 : vector<2x32xf32> to vector<1x2x32xf32>
    tpu.vector_store %arg29[%c0_10, %c0_11, %c0_12], %12 {strides = array<i32>} : memref<1x6x32xf32, #tpu.memory_space<vmem>>, vector<1x2x32xf32>,
    %13 = vector.extract_strided_slice %8 {offsets = [0, 0], sizes = [16, 32], strides = [1, 1]} : vector<18x32xf32> to vector<16x32xf32>
    %14 = vector.extract_strided_slice %6 {offsets = [0, 0], sizes = [1, 32], strides = [1, 1]} : vector<8x32xf32> to vector<1x32xf32>
    %15 = vector.broadcast %14 : vector<1x32xf32> to vector<16x32xf32>
    %16 = arith.mulf %13, %15 : vector<16x32xf32>
    %17 = vector.extract_strided_slice %8 {offsets = [1, 0], sizes = [16, 32], strides = [1, 1]} : vector<18x32xf32> to vector<16x32xf32>
    %18 = vector.extract_strided_slice %6 {offsets = [1, 0], sizes = [1, 32], strides = [1, 1]} : vector<8x32xf32> to vector<1x32xf32>
    %19 = vector.broadcast %18 : vector<1x32xf32> to vector<16x32xf32>
    %20 = arith.mulf %17, %19 : vector<16x32xf32>
    %21 = arith.addf %16, %20 : vector<16x32xf32>
    %22 = vector.extract_strided_slice %8 {offsets = [2, 0], sizes = [16, 32], strides = [1, 1]} : vector<18x32xf32> to vector<16x32xf32>
    %23 = vector.extract_strided_slice %6 {offsets = [2, 0], sizes = [1, 32], strides = [1, 1]} : vector<8x32xf32> to vector<1x32xf32>
    %24 = vector.broadcast %23 : vector<1x32xf32> to vector<16x32xf32>
    %25 = arith.mulf %22, %24 : vector<16x32xf32>
    %26 = arith.addf %21, %25 : vector<16x32xf32>
    %27 = vector.extract_strided_slice %6 {offsets = [3, 0], sizes = [1, 32], strides = [1, 1]} : vector<8x32xf32> to vector<1x32xf32>
    %28 = vector.broadcast %27 : vector<1x32xf32> to vector<16x32xf32>
    %29 = arith.addf %26, %28 : vector<16x32xf32>
    %30 = vector.extract_strided_slice %6 {offsets = [4, 0], sizes = [1, 32], strides = [1, 1]} : vector<8x32xf32> to vector<1x32xf32>
    %31 = vector.extract_strided_slice %6 {offsets = [5, 0], sizes = [1, 32], strides = [1, 1]} : vector<8x32xf32> to vector<1x32xf32>
    %cst = arith.constant dense<0.000000e+00> : vector<16xf32>
    %32 = vector.multi_reduction <add>, %29, %cst [1] : vector<16x32xf32> to vector<16xf32>
    %33 = vector.shape_cast %32 : vector<16xf32> to vector<16x1xf32>
    %cst_13 = arith.constant 3.200000e+01 : f32
    %34 = vector.broadcast %cst_13 : f32 to vector<16x1xf32>
    %35 = arith.divf %33, %34 : vector<16x1xf32>
    %36 = vector.broadcast %35 : vector<16x1xf32> to vector<16x32xf32>
    %37 = arith.subf %29, %36 : vector<16x32xf32>
    %38 = arith.mulf %37, %37 : vector<16x32xf32>
    %cst_14 = arith.constant dense<0.000000e+00> : vector<16xf32>
    %39 = vector.multi_reduction <add>, %38, %cst_14 [1] : vector<16x32xf32> to vector<16xf32>
    %40 = vector.shape_cast %39 : vector<16xf32> to vector<16x1xf32>
    %cst_15 = arith.constant 3.200000e+01 : f32
    %41 = vector.broadcast %cst_15 : f32 to vector<16x1xf32>
    %42 = arith.divf %40, %41 : vector<16x1xf32>
    %43 = vector.broadcast %35 : vector<16x1xf32> to vector<16x32xf32>
    %44 = arith.subf %29, %43 : vector<16x32xf32>
    %cst_16 = arith.constant 9.99999974E-6 : f32
    %45 = vector.broadcast %cst_16 : f32 to vector<16x1xf32>
    %46 = arith.addf %42, %45 : vector<16x1xf32>
    %47 = math.rsqrt %46 : vector<16x1xf32>
    %48 = vector.broadcast %47 : vector<16x1xf32> to vector<16x32xf32>
    %49 = arith.mulf %44, %48 : vector<16x32xf32>
    %50 = vector.broadcast %30 : vector<1x32xf32> to vector<16x32xf32>
    %51 = arith.mulf %49, %50 : vector<16x32xf32>
    %52 = vector.broadcast %31 : vector<1x32xf32> to vector<16x32xf32>
    %53 = arith.addf %51, %52 : vector<16x32xf32>
    %cst_17 = arith.constant 0.000000e+00 : f32
    %54 = vector.broadcast %cst_17 : f32 to vector<16x32xf32>
    %55 = arith.maximumf %53, %54 : vector<16x32xf32>
    %c0_18 = arith.constant 0 : index
    %c0_19 = arith.constant 0 : index
    %56 = vector.load %arg6[%c0_18, %c0_19] : memref<33x32xf32, #tpu.memory_space<vmem>>, vector<33x32xf32>
    %57 = vector.extract_strided_slice %56 {offsets = [0, 0], sizes = [32, 32], strides = [1, 1]} : vector<33x32xf32> to vector<32x32xf32>
    %cst_20 = arith.constant dense<0.000000e+00> : vector<16x32xf32>
    %58 = tpu.matmul %55, %57, %cst_20 {dimension_numbers = #tpu.dot_dimension_numbers<[1], [0], [0], [1], [0, 0, 1, 1], [], []>} : vector<16x32xf32>, vector<32x32xf32>, vector<16x32xf32> -> vector<16x32xf32>
    %59 = vector.extract_strided_slice %56 {offsets = [32, 0], sizes = [1, 32], strides = [1, 1]} : vector<33x32xf32> to vector<1x32xf32>
    %60 = vector.broadcast %59 : vector<1x32xf32> to vector<16x32xf32>
    %61 = arith.addf %58, %60 : vector<16x32xf32>
    %62 = vector.extract_strided_slice %6 {offsets = [6, 0], sizes = [1, 32], strides = [1, 1]} : vector<8x32xf32> to vector<1x32xf32>
    %63 = vector.extract_strided_slice %6 {offsets = [7, 0], sizes = [1, 32], strides = [1, 1]} : vector<8x32xf32> to vector<1x32xf32>
    %cst_21 = arith.constant dense<0.000000e+00> : vector<16xf32>
    %64 = vector.multi_reduction <add>, %61, %cst_21 [1] : vector<16x32xf32> to vector<16xf32>
    %65 = vector.shape_cast %64 : vector<16xf32> to vector<16x1xf32>
    %cst_22 = arith.constant 3.200000e+01 : f32
    %66 = vector.broadcast %cst_22 : f32 to vector<16x1xf32>
    %67 = arith.divf %65, %66 : vector<16x1xf32>
    %68 = vector.broadcast %67 : vector<16x1xf32> to vector<16x32xf32>
    %69 = arith.subf %61, %68 : vector<16x32xf32>
    %70 = arith.mulf %69, %69 : vector<16x32xf32>
    %cst_23 = arith.constant dense<0.000000e+00> : vector<16xf32>
    %71 = vector.multi_reduction <add>, %70, %cst_23 [1] : vector<16x32xf32> to vector<16xf32>
    %72 = vector.shape_cast %71 : vector<16xf32> to vector<16x1xf32>
    %cst_24 = arith.constant 3.200000e+01 : f32
    %73 = vector.broadcast %cst_24 : f32 to vector<16x1xf32>
    %74 = arith.divf %72, %73 : vector<16x1xf32>
    %75 = vector.broadcast %67 : vector<16x1xf32> to vector<16x32xf32>
    %76 = arith.subf %61, %75 : vector<16x32xf32>
    %cst_25 = arith.constant 9.99999974E-6 : f32
    %77 = vector.broadcast %cst_25 : f32 to vector<16x1xf32>
    %78 = arith.addf %74, %77 : vector<16x1xf32>
    %79 = math.rsqrt %78 : vector<16x1xf32>
    %80 = vector.broadcast %79 : vector<16x1xf32> to vector<16x32xf32>
    %81 = arith.mulf %76, %80 : vector<16x32xf32>
    %82 = vector.broadcast %62 : vector<1x32xf32> to vector<16x32xf32>
    %83 = arith.mulf %81, %82 : vector<16x32xf32>
    %84 = vector.broadcast %63 : vector<1x32xf32> to vector<16x32xf32>
    %85 = arith.addf %83, %84 : vector<16x32xf32>
    %cst_26 = arith.constant 0.000000e+00 : f32
    %86 = vector.broadcast %cst_26 : f32 to vector<16x32xf32>
    %87 = arith.maximumf %85, %86 : vector<16x32xf32>
    %88 = arith.addf %1, %87 : vector<16x32xf32>
    %c0_27 = arith.constant 0 : index
    %c0_28 = arith.constant 0 : index
    %89 = vector.load %arg7[%c0_27, %c0_28] : memref<8x32xf32, #tpu.memory_space<vmem>>, vector<8x32xf32>
    %90 = vector.extract_strided_slice %5 {offsets = [2, 0], sizes = [4, 32], strides = [1, 1]} : vector<6x32xf32> to vector<4x32xf32>
    %91 = tpu.concatenate %90, %88 in 0 : vector<4x32xf32>, vector<16x32xf32> -> vector<20x32xf32>
    %92 = vector.extract_strided_slice %91 {offsets = [16, 0], sizes = [4, 32], strides = [1, 1]} : vector<20x32xf32> to vector<4x32xf32>
    %c0_29 = arith.constant 0 : index
    %c2 = arith.constant 2 : index
    %c0_30 = arith.constant 0 : index
    %93 = vector.load %arg29[%c0_29, %c2, %c0_30] : memref<1x6x32xf32, #tpu.memory_space<vmem>>, vector<1x4x32xf32>
    %94 = vector.shape_cast %93 : vector<1x4x32xf32> to vector<4x32xf32>
    %95 = vector.shape_cast %92 : vector<4x32xf32> to vector<1x4x32xf32>
    tpu.vector_store %arg29[%c0_29, %c2, %c0_30], %95 {strides = array<i32>} : memref<1x6x32xf32, #tpu.memory_space<vmem>>, vector<1x4x32xf32>,
    %96 = vector.extract_strided_slice %91 {offsets = [0, 0], sizes = [16, 32], strides = [1, 1]} : vector<20x32xf32> to vector<16x32xf32>
    %97 = vector.extract_strided_slice %89 {offsets = [0, 0], sizes = [1, 32], strides = [1, 1]} : vector<8x32xf32> to vector<1x32xf32>
    %98 = vector.broadcast %97 : vector<1x32xf32> to vector<16x32xf32>
    %99 = arith.mulf %96, %98 : vector<16x32xf32>
    %100 = vector.extract_strided_slice %91 {offsets = [2, 0], sizes = [16, 32], strides = [1, 1]} : vector<20x32xf32> to vector<16x32xf32>
    %101 = vector.extract_strided_slice %89 {offsets = [1, 0], sizes = [1, 32], strides = [1, 1]} : vector<8x32xf32> to vector<1x32xf32>
    %102 = vector.broadcast %101 : vector<1x32xf32> to vector<16x32xf32>
    %103 = arith.mulf %100, %102 : vector<16x32xf32>
    %104 = arith.addf %99, %103 : vector<16x32xf32>
    %105 = vector.extract_strided_slice %91 {offsets = [4, 0], sizes = [16, 32], strides = [1, 1]} : vector<20x32xf32> to vector<16x32xf32>
    %106 = vector.extract_strided_slice %89 {offsets = [2, 0], sizes = [1, 32], strides = [1, 1]} : vector<8x32xf32> to vector<1x32xf32>
    %107 = vector.broadcast %106 : vector<1x32xf32> to vector<16x32xf32>
    %108 = arith.mulf %105, %107 : vector<16x32xf32>
    %109 = arith.addf %104, %108 : vector<16x32xf32>
    %110 = vector.extract_strided_slice %89 {offsets = [3, 0], sizes = [1, 32], strides = [1, 1]} : vector<8x32xf32> to vector<1x32xf32>
    %111 = vector.broadcast %110 : vector<1x32xf32> to vector<16x32xf32>
    %112 = arith.addf %109, %111 : vector<16x32xf32>
    %113 = vector.extract_strided_slice %89 {offsets = [4, 0], sizes = [1, 32], strides = [1, 1]} : vector<8x32xf32> to vector<1x32xf32>
    %114 = vector.extract_strided_slice %89 {offsets = [5, 0], sizes = [1, 32], strides = [1, 1]} : vector<8x32xf32> to vector<1x32xf32>
    %cst_31 = arith.constant dense<0.000000e+00> : vector<16xf32>
    %115 = vector.multi_reduction <add>, %112, %cst_31 [1] : vector<16x32xf32> to vector<16xf32>
    %116 = vector.shape_cast %115 : vector<16xf32> to vector<16x1xf32>
    %cst_32 = arith.constant 3.200000e+01 : f32
    %117 = vector.broadcast %cst_32 : f32 to vector<16x1xf32>
    %118 = arith.divf %116, %117 : vector<16x1xf32>
    %119 = vector.broadcast %118 : vector<16x1xf32> to vector<16x32xf32>
    %120 = arith.subf %112, %119 : vector<16x32xf32>
    %121 = arith.mulf %120, %120 : vector<16x32xf32>
    %cst_33 = arith.constant dense<0.000000e+00> : vector<16xf32>
    %122 = vector.multi_reduction <add>, %121, %cst_33 [1] : vector<16x32xf32> to vector<16xf32>
    %123 = vector.shape_cast %122 : vector<16xf32> to vector<16x1xf32>
    %cst_34 = arith.constant 3.200000e+01 : f32
    %124 = vector.broadcast %cst_34 : f32 to vector<16x1xf32>
    %125 = arith.divf %123, %124 : vector<16x1xf32>
    %126 = vector.broadcast %118 : vector<16x1xf32> to vector<16x32xf32>
    %127 = arith.subf %112, %126 : vector<16x32xf32>
    %cst_35 = arith.constant 9.99999974E-6 : f32
    %128 = vector.broadcast %cst_35 : f32 to vector<16x1xf32>
    %129 = arith.addf %125, %128 : vector<16x1xf32>
    %130 = math.rsqrt %129 : vector<16x1xf32>
    %131 = vector.broadcast %130 : vector<16x1xf32> to vector<16x32xf32>
    %132 = arith.mulf %127, %131 : vector<16x32xf32>
    %133 = vector.broadcast %113 : vector<1x32xf32> to vector<16x32xf32>
    %134 = arith.mulf %132, %133 : vector<16x32xf32>
    %135 = vector.broadcast %114 : vector<1x32xf32> to vector<16x32xf32>
    %136 = arith.addf %134, %135 : vector<16x32xf32>
    %cst_36 = arith.constant 0.000000e+00 : f32
    %137 = vector.broadcast %cst_36 : f32 to vector<16x32xf32>
    %138 = arith.maximumf %136, %137 : vector<16x32xf32>
    %c0_37 = arith.constant 0 : index
    %c0_38 = arith.constant 0 : index
    %139 = vector.load %arg8[%c0_37, %c0_38] : memref<33x32xf32, #tpu.memory_space<vmem>>, vector<33x32xf32>
    %140 = vector.extract_strided_slice %139 {offsets = [0, 0], sizes = [32, 32], strides = [1, 1]} : vector<33x32xf32> to vector<32x32xf32>
    %cst_39 = arith.constant dense<0.000000e+00> : vector<16x32xf32>
    %141 = tpu.matmul %138, %140, %cst_39 {dimension_numbers = #tpu.dot_dimension_numbers<[1], [0], [0], [1], [0, 0, 1, 1], [], []>} : vector<16x32xf32>, vector<32x32xf32>, vector<16x32xf32> -> vector<16x32xf32>
    %142 = vector.extract_strided_slice %139 {offsets = [32, 0], sizes = [1, 32], strides = [1, 1]} : vector<33x32xf32> to vector<1x32xf32>
    %143 = vector.broadcast %142 : vector<1x32xf32> to vector<16x32xf32>
    %144 = arith.addf %141, %143 : vector<16x32xf32>
    %145 = vector.extract_strided_slice %89 {offsets = [6, 0], sizes = [1, 32], strides = [1, 1]} : vector<8x32xf32> to vector<1x32xf32>
    %146 = vector.extract_strided_slice %89 {offsets = [7, 0], sizes = [1, 32], strides = [1, 1]} : vector<8x32xf32> to vector<1x32xf32>
    %cst_40 = arith.constant dense<0.000000e+00> : vector<16xf32>
    %147 = vector.multi_reduction <add>, %144, %cst_40 [1] : vector<16x32xf32> to vector<16xf32>
    %148 = vector.shape_cast %147 : vector<16xf32> to vector<16x1xf32>
    %cst_41 = arith.constant 3.200000e+01 : f32
    %149 = vector.broadcast %cst_41 : f32 to vector<16x1xf32>
    %150 = arith.divf %148, %149 : vector<16x1xf32>
    %151 = vector.broadcast %150 : vector<16x1xf32> to vector<16x32xf32>
    %152 = arith.subf %144, %151 : vector<16x32xf32>
    %153 = arith.mulf %152, %152 : vector<16x32xf32>
    %cst_42 = arith.constant dense<0.000000e+00> : vector<16xf32>
    %154 = vector.multi_reduction <add>, %153, %cst_42 [1] : vector<16x32xf32> to vector<16xf32>
    %155 = vector.shape_cast %154 : vector<16xf32> to vector<16x1xf32>
    %cst_43 = arith.constant 3.200000e+01 : f32
    %156 = vector.broadcast %cst_43 : f32 to vector<16x1xf32>
    %157 = arith.divf %155, %156 : vector<16x1xf32>
    %158 = vector.broadcast %150 : vector<16x1xf32> to vector<16x32xf32>
    %159 = arith.subf %144, %158 : vector<16x32xf32>
    %cst_44 = arith.constant 9.99999974E-6 : f32
    %160 = vector.broadcast %cst_44 : f32 to vector<16x1xf32>
    %161 = arith.addf %157, %160 : vector<16x1xf32>
    %162 = math.rsqrt %161 : vector<16x1xf32>
    %163 = vector.broadcast %162 : vector<16x1xf32> to vector<16x32xf32>
    %164 = arith.mulf %159, %163 : vector<16x32xf32>
    %165 = vector.broadcast %145 : vector<1x32xf32> to vector<16x32xf32>
    %166 = arith.mulf %164, %165 : vector<16x32xf32>
    %167 = vector.broadcast %146 : vector<1x32xf32> to vector<16x32xf32>
    %168 = arith.addf %166, %167 : vector<16x32xf32>
    %cst_45 = arith.constant 0.000000e+00 : f32
    %169 = vector.broadcast %cst_45 : f32 to vector<16x32xf32>
    %170 = arith.maximumf %168, %169 : vector<16x32xf32>
    %171 = arith.addf %88, %170 : vector<16x32xf32>
    %172 = vector.broadcast %3 : vector<1x32xf32> to vector<16x32xf32>
    %173 = arith.mulf %172, %171 : vector<16x32xf32>
    %c0_46 = arith.constant 0 : index
    %c0_47 = arith.constant 0 : index
    %174 = vector.load %arg9[%c0_46, %c0_47] : memref<33x16xf32, #tpu.memory_space<vmem>>, vector<33x16xf32>
    %175 = vector.extract_strided_slice %174 {offsets = [0, 0], sizes = [32, 16], strides = [1, 1]} : vector<33x16xf32> to vector<32x16xf32>
    %cst_48 = arith.constant dense<0.000000e+00> : vector<16x16xf32>
    %176 = tpu.matmul %171, %175, %cst_48 {dimension_numbers = #tpu.dot_dimension_numbers<[1], [0], [0], [1], [0, 0, 1, 1], [], []>} : vector<16x32xf32>, vector<32x16xf32>, vector<16x16xf32> -> vector<16x16xf32>
    %177 = vector.extract_strided_slice %174 {offsets = [32, 0], sizes = [1, 16], strides = [1, 1]} : vector<33x16xf32> to vector<1x16xf32>
    %178 = vector.broadcast %177 : vector<1x16xf32> to vector<16x16xf32>
    %179 = arith.addf %176, %178 : vector<16x16xf32>
    %cst_49 = arith.constant 0.000000e+00 : f32
    %180 = vector.broadcast %cst_49 : f32 to vector<16x16xf32>
    %181 = arith.maximumf %179, %180 : vector<16x16xf32>
    %c0_50 = arith.constant 0 : index
    %c0_51 = arith.constant 0 : index
    %182 = vector.load %arg10[%c0_50, %c0_51] : memref<33x16xf32, #tpu.memory_space<vmem>>, vector<33x16xf32>
    %183 = vector.extract_strided_slice %182 {offsets = [0, 0], sizes = [32, 16], strides = [1, 1]} : vector<33x16xf32> to vector<32x16xf32>
    %cst_52 = arith.constant dense<0.000000e+00> : vector<16x16xf32>
    %184 = tpu.matmul %173, %183, %cst_52 {dimension_numbers = #tpu.dot_dimension_numbers<[1], [0], [0], [1], [0, 0, 1, 1], [], []>} : vector<16x32xf32>, vector<32x16xf32>, vector<16x16xf32> -> vector<16x16xf32>
    %185 = vector.extract_strided_slice %182 {offsets = [32, 0], sizes = [1, 16], strides = [1, 1]} : vector<33x16xf32> to vector<1x16xf32>
    %186 = vector.broadcast %185 : vector<1x16xf32> to vector<16x16xf32>
    %187 = arith.addf %184, %186 : vector<16x16xf32>
    %cst_53 = arith.constant 0.000000e+00 : f32
    %188 = vector.broadcast %cst_53 : f32 to vector<16x16xf32>
    %189 = arith.maximumf %187, %188 : vector<16x16xf32>
    %c0_54 = arith.constant 0 : index
    %c0_55 = arith.constant 0 : index
    %c0_56 = arith.constant 0 : index
    %c0_57 = arith.constant 0 : index
    %190 = vector.load %arg4[%c0_54, %c0_55, %c0_56, %c0_57] : memref<1x3x4x16xf32, #tpu.memory_space<vmem>>, vector<1x3x4x16xf32>
    %191 = vector.shape_cast %190 : vector<1x3x4x16xf32> to vector<3x4x16xf32>
    %192 = vector.extract_strided_slice %191 {offsets = [0, 0, 0], sizes = [1, 4, 16], strides = [1, 1, 1]} : vector<3x4x16xf32> to vector<1x4x16xf32>
    %193 = vector.shape_cast %192 : vector<1x4x16xf32> to vector<4x16xf32>
    %194 = tpu.concatenate %193, %181 in 0 : vector<4x16xf32>, vector<16x16xf32> -> vector<20x16xf32>
    %195 = vector.extract_strided_slice %194 {offsets = [16, 0], sizes = [4, 16], strides = [1, 1]} : vector<20x16xf32> to vector<4x16xf32>
    %196 = vector.shape_cast %195 : vector<4x16xf32> to vector<1x4x16xf32>
    %c0_58 = arith.constant 0 : index
    %c0_59 = arith.constant 0 : index
    %c0_60 = arith.constant 0 : index
    %c0_61 = arith.constant 0 : index
    %197 = vector.load %arg30[%c0_58, %c0_59, %c0_60, %c0_61] : memref<1x3x4x16xf32, #tpu.memory_space<vmem>>, vector<1x1x4x16xf32>
    %198 = vector.shape_cast %197 : vector<1x1x4x16xf32> to vector<1x4x16xf32>
    %199 = vector.shape_cast %196 : vector<1x4x16xf32> to vector<1x1x4x16xf32>
    tpu.vector_store %arg30[%c0_58, %c0_59, %c0_60, %c0_61], %199 {strides = array<i32>} : memref<1x3x4x16xf32, #tpu.memory_space<vmem>>, vector<1x1x4x16xf32>,
    %c0_62 = arith.constant 0 : index
    %c0_63 = arith.constant 0 : index
    %200 = vector.load %arg19[%c0_62, %c0_63] : memref<6x16xf32, #tpu.memory_space<vmem>>, vector<6x16xf32>
    %201 = vector.extract_strided_slice %191 {offsets = [1, 0, 0], sizes = [1, 4, 16], strides = [1, 1, 1]} : vector<3x4x16xf32> to vector<1x4x16xf32>
    %202 = vector.shape_cast %201 : vector<1x4x16xf32> to vector<4x16xf32>
    %203 = tpu.concatenate %202, %189 in 0 : vector<4x16xf32>, vector<16x16xf32> -> vector<20x16xf32>
    %204 = vector.extract_strided_slice %203 {offsets = [16, 0], sizes = [4, 16], strides = [1, 1]} : vector<20x16xf32> to vector<4x16xf32>
    %205 = vector.shape_cast %204 : vector<4x16xf32> to vector<1x4x16xf32>
    %c0_64 = arith.constant 0 : index
    %c1 = arith.constant 1 : index
    %c0_65 = arith.constant 0 : index
    %c0_66 = arith.constant 0 : index
    %206 = vector.load %arg30[%c0_64, %c1, %c0_65, %c0_66] : memref<1x3x4x16xf32, #tpu.memory_space<vmem>>, vector<1x1x4x16xf32>
    %207 = vector.shape_cast %206 : vector<1x1x4x16xf32> to vector<1x4x16xf32>
    %208 = vector.shape_cast %205 : vector<1x4x16xf32> to vector<1x1x4x16xf32>
    tpu.vector_store %arg30[%c0_64, %c1, %c0_65, %c0_66], %208 {strides = array<i32>} : memref<1x3x4x16xf32, #tpu.memory_space<vmem>>, vector<1x1x4x16xf32>,
    %c0_67 = arith.constant 0 : index
    %c0_68 = arith.constant 0 : index
    %209 = vector.load %arg12[%c0_67, %c0_68] : memref<17x48xf32, #tpu.memory_space<vmem>>, vector<17x48xf32>
    %210 = vector.extract_strided_slice %209 {offsets = [0, 0], sizes = [16, 48], strides = [1, 1]} : vector<17x48xf32> to vector<16x48xf32>
    %cst_69 = arith.constant dense<0.000000e+00> : vector<20x48xf32>
    %211 = tpu.matmul %203, %210, %cst_69 {dimension_numbers = #tpu.dot_dimension_numbers<[1], [0], [0], [1], [0, 0, 1, 1], [], []>} : vector<20x16xf32>, vector<16x48xf32>, vector<20x48xf32> -> vector<20x48xf32>
    %212 = vector.extract_strided_slice %209 {offsets = [16, 0], sizes = [1, 48], strides = [1, 1]} : vector<17x48xf32> to vector<1x48xf32>
    %213 = vector.broadcast %212 : vector<1x48xf32> to vector<20x48xf32>
    %214 = arith.addf %211, %213 : vector<20x48xf32>
    %215 = vector.extract_strided_slice %214 {offsets = [4, 0], sizes = [16, 8], strides = [1, 1]} : vector<20x48xf32> to vector<16x8xf32>
    %216 = vector.extract_strided_slice %214 {offsets = [4, 8], sizes = [16, 8], strides = [1, 1]} : vector<20x48xf32> to vector<16x8xf32>
    %217 = vector.extract_strided_slice %214 {offsets = [0, 16], sizes = [20, 8], strides = [1, 1]} : vector<20x48xf32> to vector<20x8xf32>
    %218 = vector.extract_strided_slice %214 {offsets = [0, 24], sizes = [20, 8], strides = [1, 1]} : vector<20x48xf32> to vector<20x8xf32>
    %219 = vector.extract_strided_slice %214 {offsets = [0, 32], sizes = [20, 8], strides = [1, 1]} : vector<20x48xf32> to vector<20x8xf32>
    %220 = vector.extract_strided_slice %214 {offsets = [0, 40], sizes = [20, 8], strides = [1, 1]} : vector<20x48xf32> to vector<20x8xf32>
    %221 = vector.extract_strided_slice %215 {offsets = [0, 0], sizes = [4, 8], strides = [1, 1]} : vector<16x8xf32> to vector<4x8xf32>
    %222 = vector.shape_cast %221 : vector<4x8xf32> to vector<4x1x8xf32>
    %223 = vector.extract_strided_slice %217 {offsets = [0, 0], sizes = [8, 8], strides = [1, 1]} : vector<20x8xf32> to vector<8x8xf32>
    %224 = vector.shape_cast %223 : vector<8x8xf32> to vector<1x8x8xf32>
    %225 = vector.broadcast %222 : vector<4x1x8xf32> to vector<4x8x8xf32>
    %226 = vector.broadcast %224 : vector<1x8x8xf32> to vector<4x8x8xf32>
    %227 = arith.mulf %225, %226 : vector<4x8x8xf32>
    %228 = vector.extract_strided_slice %216 {offsets = [0, 0], sizes = [4, 8], strides = [1, 1]} : vector<16x8xf32> to vector<4x8xf32>
    %229 = vector.shape_cast %228 : vector<4x8xf32> to vector<4x1x8xf32>
    %230 = vector.extract_strided_slice %218 {offsets = [0, 0], sizes = [8, 8], strides = [1, 1]} : vector<20x8xf32> to vector<8x8xf32>
    %231 = vector.shape_cast %230 : vector<8x8xf32> to vector<1x8x8xf32>
    %232 = vector.broadcast %229 : vector<4x1x8xf32> to vector<4x8x8xf32>
    %233 = vector.broadcast %231 : vector<1x8x8xf32> to vector<4x8x8xf32>
    %234 = arith.mulf %232, %233 : vector<4x8x8xf32>
    %235 = arith.addf %227, %234 : vector<4x8x8xf32>
    %cst_70 = arith.constant 0.707106769 : f32
    %236 = vector.broadcast %cst_70 : f32 to vector<4x8x8xf32>
    %237 = arith.mulf %235, %236 : vector<4x8x8xf32>
    %cst_71 = arith.constant dense<0xFF800000> : vector<4x8xf32>
    %238 = vector.multi_reduction <maximumf>, %237, %cst_71 [1] : vector<4x8x8xf32> to vector<4x8xf32>
    %239 = vector.shape_cast %238 : vector<4x8xf32> to vector<4x1x8xf32>
    %240 = vector.broadcast %239 : vector<4x1x8xf32> to vector<4x8x8xf32>
    %241 = arith.subf %237, %240 : vector<4x8x8xf32>
    %242 = math.exp %241 : vector<4x8x8xf32>
    %cst_72 = arith.constant dense<0.000000e+00> : vector<4x8xf32>
    %243 = vector.multi_reduction <add>, %242, %cst_72 [1] : vector<4x8x8xf32> to vector<4x8xf32>
    %244 = vector.shape_cast %243 : vector<4x8xf32> to vector<4x1x8xf32>
    %245 = tpu.reciprocal %244 {approx = true} : vector<4x1x8xf32> -> vector<4x1x8xf32>
    %246 = vector.broadcast %245 : vector<4x1x8xf32> to vector<4x8x8xf32>
    %247 = arith.mulf %242, %246 : vector<4x8x8xf32>
    %248 = vector.extract_strided_slice %219 {offsets = [0, 0], sizes = [8, 8], strides = [1, 1]} : vector<20x8xf32> to vector<8x8xf32>
    %249 = vector.shape_cast %248 : vector<8x8xf32> to vector<1x8x8xf32>
    %250 = vector.broadcast %249 : vector<1x8x8xf32> to vector<4x8x8xf32>
    %251 = arith.mulf %247, %250 : vector<4x8x8xf32>
    %cst_73 = arith.constant dense<0.000000e+00> : vector<4x8xf32>
    %252 = vector.multi_reduction <add>, %251, %cst_73 [1] : vector<4x8x8xf32> to vector<4x8xf32>
    %253 = vector.extract_strided_slice %220 {offsets = [0, 0], sizes = [8, 8], strides = [1, 1]} : vector<20x8xf32> to vector<8x8xf32>
    %254 = vector.shape_cast %253 : vector<8x8xf32> to vector<1x8x8xf32>
    %255 = vector.broadcast %254 : vector<1x8x8xf32> to vector<4x8x8xf32>
    %256 = arith.mulf %247, %255 : vector<4x8x8xf32>
    %cst_74 = arith.constant dense<0.000000e+00> : vector<4x8xf32>
    %257 = vector.multi_reduction <add>, %256, %cst_74 [1] : vector<4x8x8xf32> to vector<4x8xf32>
    %258 = tpu.concatenate %252, %257 in 1 : vector<4x8xf32>, vector<4x8xf32> -> vector<4x16xf32>
    %259 = vector.extract_strided_slice %215 {offsets = [4, 0], sizes = [4, 8], strides = [1, 1]} : vector<16x8xf32> to vector<4x8xf32>
    %260 = vector.shape_cast %259 : vector<4x8xf32> to vector<4x1x8xf32>
    %261 = vector.extract_strided_slice %217 {offsets = [4, 0], sizes = [8, 8], strides = [1, 1]} : vector<20x8xf32> to vector<8x8xf32>
    %262 = vector.shape_cast %261 : vector<8x8xf32> to vector<1x8x8xf32>
    %263 = vector.broadcast %260 : vector<4x1x8xf32> to vector<4x8x8xf32>
    %264 = vector.broadcast %262 : vector<1x8x8xf32> to vector<4x8x8xf32>
    %265 = arith.mulf %263, %264 : vector<4x8x8xf32>
    %266 = vector.extract_strided_slice %216 {offsets = [4, 0], sizes = [4, 8], strides = [1, 1]} : vector<16x8xf32> to vector<4x8xf32>
    %267 = vector.shape_cast %266 : vector<4x8xf32> to vector<4x1x8xf32>
    %268 = vector.extract_strided_slice %218 {offsets = [4, 0], sizes = [8, 8], strides = [1, 1]} : vector<20x8xf32> to vector<8x8xf32>
    %269 = vector.shape_cast %268 : vector<8x8xf32> to vector<1x8x8xf32>
    %270 = vector.broadcast %267 : vector<4x1x8xf32> to vector<4x8x8xf32>
    %271 = vector.broadcast %269 : vector<1x8x8xf32> to vector<4x8x8xf32>
    %272 = arith.mulf %270, %271 : vector<4x8x8xf32>
    %273 = arith.addf %265, %272 : vector<4x8x8xf32>
    %cst_75 = arith.constant 0.707106769 : f32
    %274 = vector.broadcast %cst_75 : f32 to vector<4x8x8xf32>
    %275 = arith.mulf %273, %274 : vector<4x8x8xf32>
    %cst_76 = arith.constant dense<0xFF800000> : vector<4x8xf32>
    %276 = vector.multi_reduction <maximumf>, %275, %cst_76 [1] : vector<4x8x8xf32> to vector<4x8xf32>
    %277 = vector.shape_cast %276 : vector<4x8xf32> to vector<4x1x8xf32>
    %278 = vector.broadcast %277 : vector<4x1x8xf32> to vector<4x8x8xf32>
    %279 = arith.subf %275, %278 : vector<4x8x8xf32>
    %280 = math.exp %279 : vector<4x8x8xf32>
    %cst_77 = arith.constant dense<0.000000e+00> : vector<4x8xf32>
    %281 = vector.multi_reduction <add>, %280, %cst_77 [1] : vector<4x8x8xf32> to vector<4x8xf32>
    %282 = vector.shape_cast %281 : vector<4x8xf32> to vector<4x1x8xf32>
    %283 = tpu.reciprocal %282 {approx = true} : vector<4x1x8xf32> -> vector<4x1x8xf32>
    %284 = vector.broadcast %283 : vector<4x1x8xf32> to vector<4x8x8xf32>
    %285 = arith.mulf %280, %284 : vector<4x8x8xf32>
    %286 = vector.extract_strided_slice %219 {offsets = [4, 0], sizes = [8, 8], strides = [1, 1]} : vector<20x8xf32> to vector<8x8xf32>
    %287 = vector.shape_cast %286 : vector<8x8xf32> to vector<1x8x8xf32>
    %288 = vector.broadcast %287 : vector<1x8x8xf32> to vector<4x8x8xf32>
    %289 = arith.mulf %285, %288 : vector<4x8x8xf32>
    %cst_78 = arith.constant dense<0.000000e+00> : vector<4x8xf32>
    %290 = vector.multi_reduction <add>, %289, %cst_78 [1] : vector<4x8x8xf32> to vector<4x8xf32>
    %291 = vector.extract_strided_slice %220 {offsets = [4, 0], sizes = [8, 8], strides = [1, 1]} : vector<20x8xf32> to vector<8x8xf32>
    %292 = vector.shape_cast %291 : vector<8x8xf32> to vector<1x8x8xf32>
    %293 = vector.broadcast %292 : vector<1x8x8xf32> to vector<4x8x8xf32>
    %294 = arith.mulf %285, %293 : vector<4x8x8xf32>
    %cst_79 = arith.constant dense<0.000000e+00> : vector<4x8xf32>
    %295 = vector.multi_reduction <add>, %294, %cst_79 [1] : vector<4x8x8xf32> to vector<4x8xf32>
    %296 = tpu.concatenate %290, %295 in 1 : vector<4x8xf32>, vector<4x8xf32> -> vector<4x16xf32>
    %297 = vector.extract_strided_slice %215 {offsets = [8, 0], sizes = [4, 8], strides = [1, 1]} : vector<16x8xf32> to vector<4x8xf32>
    %298 = vector.shape_cast %297 : vector<4x8xf32> to vector<4x1x8xf32>
    %299 = vector.extract_strided_slice %217 {offsets = [8, 0], sizes = [8, 8], strides = [1, 1]} : vector<20x8xf32> to vector<8x8xf32>
    %300 = vector.shape_cast %299 : vector<8x8xf32> to vector<1x8x8xf32>
    %301 = vector.broadcast %298 : vector<4x1x8xf32> to vector<4x8x8xf32>
    %302 = vector.broadcast %300 : vector<1x8x8xf32> to vector<4x8x8xf32>
    %303 = arith.mulf %301, %302 : vector<4x8x8xf32>
    %304 = vector.extract_strided_slice %216 {offsets = [8, 0], sizes = [4, 8], strides = [1, 1]} : vector<16x8xf32> to vector<4x8xf32>
    %305 = vector.shape_cast %304 : vector<4x8xf32> to vector<4x1x8xf32>
    %306 = vector.extract_strided_slice %218 {offsets = [8, 0], sizes = [8, 8], strides = [1, 1]} : vector<20x8xf32> to vector<8x8xf32>
    %307 = vector.shape_cast %306 : vector<8x8xf32> to vector<1x8x8xf32>
    %308 = vector.broadcast %305 : vector<4x1x8xf32> to vector<4x8x8xf32>
    %309 = vector.broadcast %307 : vector<1x8x8xf32> to vector<4x8x8xf32>
    %310 = arith.mulf %308, %309 : vector<4x8x8xf32>
    %311 = arith.addf %303, %310 : vector<4x8x8xf32>
    %cst_80 = arith.constant 0.707106769 : f32
    %312 = vector.broadcast %cst_80 : f32 to vector<4x8x8xf32>
    %313 = arith.mulf %311, %312 : vector<4x8x8xf32>
    %cst_81 = arith.constant dense<0xFF800000> : vector<4x8xf32>
    %314 = vector.multi_reduction <maximumf>, %313, %cst_81 [1] : vector<4x8x8xf32> to vector<4x8xf32>
    %315 = vector.shape_cast %314 : vector<4x8xf32> to vector<4x1x8xf32>
    %316 = vector.broadcast %315 : vector<4x1x8xf32> to vector<4x8x8xf32>
    %317 = arith.subf %313, %316 : vector<4x8x8xf32>
    %318 = math.exp %317 : vector<4x8x8xf32>
    %cst_82 = arith.constant dense<0.000000e+00> : vector<4x8xf32>
    %319 = vector.multi_reduction <add>, %318, %cst_82 [1] : vector<4x8x8xf32> to vector<4x8xf32>
    %320 = vector.shape_cast %319 : vector<4x8xf32> to vector<4x1x8xf32>
    %321 = tpu.reciprocal %320 {approx = true} : vector<4x1x8xf32> -> vector<4x1x8xf32>
    %322 = vector.broadcast %321 : vector<4x1x8xf32> to vector<4x8x8xf32>
    %323 = arith.mulf %318, %322 : vector<4x8x8xf32>
    %324 = vector.extract_strided_slice %219 {offsets = [8, 0], sizes = [8, 8], strides = [1, 1]} : vector<20x8xf32> to vector<8x8xf32>
    %325 = vector.shape_cast %324 : vector<8x8xf32> to vector<1x8x8xf32>
    %326 = vector.broadcast %325 : vector<1x8x8xf32> to vector<4x8x8xf32>
    %327 = arith.mulf %323, %326 : vector<4x8x8xf32>
    %cst_83 = arith.constant dense<0.000000e+00> : vector<4x8xf32>
    %328 = vector.multi_reduction <add>, %327, %cst_83 [1] : vector<4x8x8xf32> to vector<4x8xf32>
    %329 = vector.extract_strided_slice %220 {offsets = [8, 0], sizes = [8, 8], strides = [1, 1]} : vector<20x8xf32> to vector<8x8xf32>
    %330 = vector.shape_cast %329 : vector<8x8xf32> to vector<1x8x8xf32>
    %331 = vector.broadcast %330 : vector<1x8x8xf32> to vector<4x8x8xf32>
    %332 = arith.mulf %323, %331 : vector<4x8x8xf32>
    %cst_84 = arith.constant dense<0.000000e+00> : vector<4x8xf32>
    %333 = vector.multi_reduction <add>, %332, %cst_84 [1] : vector<4x8x8xf32> to vector<4x8xf32>
    %334 = tpu.concatenate %328, %333 in 1 : vector<4x8xf32>, vector<4x8xf32> -> vector<4x16xf32>
    %335 = vector.extract_strided_slice %215 {offsets = [12, 0], sizes = [4, 8], strides = [1, 1]} : vector<16x8xf32> to vector<4x8xf32>
    %336 = vector.shape_cast %335 : vector<4x8xf32> to vector<4x1x8xf32>
    %337 = vector.extract_strided_slice %217 {offsets = [12, 0], sizes = [8, 8], strides = [1, 1]} : vector<20x8xf32> to vector<8x8xf32>
    %338 = vector.shape_cast %337 : vector<8x8xf32> to vector<1x8x8xf32>
    %339 = vector.broadcast %336 : vector<4x1x8xf32> to vector<4x8x8xf32>
    %340 = vector.broadcast %338 : vector<1x8x8xf32> to vector<4x8x8xf32>
    %341 = arith.mulf %339, %340 : vector<4x8x8xf32>
    %342 = vector.extract_strided_slice %216 {offsets = [12, 0], sizes = [4, 8], strides = [1, 1]} : vector<16x8xf32> to vector<4x8xf32>
    %343 = vector.shape_cast %342 : vector<4x8xf32> to vector<4x1x8xf32>
    %344 = vector.extract_strided_slice %218 {offsets = [12, 0], sizes = [8, 8], strides = [1, 1]} : vector<20x8xf32> to vector<8x8xf32>
    %345 = vector.shape_cast %344 : vector<8x8xf32> to vector<1x8x8xf32>
    %346 = vector.broadcast %343 : vector<4x1x8xf32> to vector<4x8x8xf32>
    %347 = vector.broadcast %345 : vector<1x8x8xf32> to vector<4x8x8xf32>
    %348 = arith.mulf %346, %347 : vector<4x8x8xf32>
    %349 = arith.addf %341, %348 : vector<4x8x8xf32>
    %cst_85 = arith.constant 0.707106769 : f32
    %350 = vector.broadcast %cst_85 : f32 to vector<4x8x8xf32>
    %351 = arith.mulf %349, %350 : vector<4x8x8xf32>
    %cst_86 = arith.constant dense<0xFF800000> : vector<4x8xf32>
    %352 = vector.multi_reduction <maximumf>, %351, %cst_86 [1] : vector<4x8x8xf32> to vector<4x8xf32>
    %353 = vector.shape_cast %352 : vector<4x8xf32> to vector<4x1x8xf32>
    %354 = vector.broadcast %353 : vector<4x1x8xf32> to vector<4x8x8xf32>
    %355 = arith.subf %351, %354 : vector<4x8x8xf32>
    %356 = math.exp %355 : vector<4x8x8xf32>
    %cst_87 = arith.constant dense<0.000000e+00> : vector<4x8xf32>
    %357 = vector.multi_reduction <add>, %356, %cst_87 [1] : vector<4x8x8xf32> to vector<4x8xf32>
    %358 = vector.shape_cast %357 : vector<4x8xf32> to vector<4x1x8xf32>
    %359 = tpu.reciprocal %358 {approx = true} : vector<4x1x8xf32> -> vector<4x1x8xf32>
    %360 = vector.broadcast %359 : vector<4x1x8xf32> to vector<4x8x8xf32>
    %361 = arith.mulf %356, %360 : vector<4x8x8xf32>
    %362 = vector.extract_strided_slice %219 {offsets = [12, 0], sizes = [8, 8], strides = [1, 1]} : vector<20x8xf32> to vector<8x8xf32>
    %363 = vector.shape_cast %362 : vector<8x8xf32> to vector<1x8x8xf32>
    %364 = vector.broadcast %363 : vector<1x8x8xf32> to vector<4x8x8xf32>
    %365 = arith.mulf %361, %364 : vector<4x8x8xf32>
    %cst_88 = arith.constant dense<0.000000e+00> : vector<4x8xf32>
    %366 = vector.multi_reduction <add>, %365, %cst_88 [1] : vector<4x8x8xf32> to vector<4x8xf32>
    %367 = vector.extract_strided_slice %220 {offsets = [12, 0], sizes = [8, 8], strides = [1, 1]} : vector<20x8xf32> to vector<8x8xf32>
    %368 = vector.shape_cast %367 : vector<8x8xf32> to vector<1x8x8xf32>
    %369 = vector.broadcast %368 : vector<1x8x8xf32> to vector<4x8x8xf32>
    %370 = arith.mulf %361, %369 : vector<4x8x8xf32>
    %cst_89 = arith.constant dense<0.000000e+00> : vector<4x8xf32>
    %371 = vector.multi_reduction <add>, %370, %cst_89 [1] : vector<4x8x8xf32> to vector<4x8xf32>
    %372 = tpu.concatenate %366, %371 in 1 : vector<4x8xf32>, vector<4x8xf32> -> vector<4x16xf32>
    %373 = tpu.concatenate %258, %296, %334, %372 in 0 : vector<4x16xf32>, vector<4x16xf32>, vector<4x16xf32>, vector<4x16xf32> -> vector<16x16xf32>
    %c0_90 = arith.constant 0 : index
    %c0_91 = arith.constant 0 : index
    %374 = vector.load %arg13[%c0_90, %c0_91] : memref<17x16xf32, #tpu.memory_space<vmem>>, vector<17x16xf32>
    %375 = vector.extract_strided_slice %374 {offsets = [0, 0], sizes = [16, 16], strides = [1, 1]} : vector<17x16xf32> to vector<16x16xf32>
    %cst_92 = arith.constant dense<0.000000e+00> : vector<16x16xf32>
    %376 = tpu.matmul %373, %375, %cst_92 {dimension_numbers = #tpu.dot_dimension_numbers<[1], [0], [0], [1], [0, 0, 1, 1], [], []>} : vector<16x16xf32>, vector<16x16xf32>, vector<16x16xf32> -> vector<16x16xf32>
    %377 = vector.extract_strided_slice %374 {offsets = [16, 0], sizes = [1, 16], strides = [1, 1]} : vector<17x16xf32> to vector<1x16xf32>
    %378 = vector.broadcast %377 : vector<1x16xf32> to vector<16x16xf32>
    %379 = arith.addf %376, %378 : vector<16x16xf32>
    %380 = arith.addf %189, %379 : vector<16x16xf32>
    %381 = vector.extract_strided_slice %200 {offsets = [0, 0], sizes = [1, 16], strides = [1, 1]} : vector<6x16xf32> to vector<1x16xf32>
    %382 = vector.extract_strided_slice %200 {offsets = [1, 0], sizes = [1, 16], strides = [1, 1]} : vector<6x16xf32> to vector<1x16xf32>
    %cst_93 = arith.constant dense<0.000000e+00> : vector<16xf32>
    %383 = vector.multi_reduction <add>, %380, %cst_93 [1] : vector<16x16xf32> to vector<16xf32>
    %384 = vector.shape_cast %383 : vector<16xf32> to vector<16x1xf32>
    %cst_94 = arith.constant 1.600000e+01 : f32
    %385 = vector.broadcast %cst_94 : f32 to vector<16x1xf32>
    %386 = arith.divf %384, %385 : vector<16x1xf32>
    %387 = vector.broadcast %386 : vector<16x1xf32> to vector<16x16xf32>
    %388 = arith.subf %380, %387 : vector<16x16xf32>
    %389 = arith.mulf %388, %388 : vector<16x16xf32>
    %cst_95 = arith.constant dense<0.000000e+00> : vector<16xf32>
    %390 = vector.multi_reduction <add>, %389, %cst_95 [1] : vector<16x16xf32> to vector<16xf32>
    %391 = vector.shape_cast %390 : vector<16xf32> to vector<16x1xf32>
    %cst_96 = arith.constant 1.600000e+01 : f32
    %392 = vector.broadcast %cst_96 : f32 to vector<16x1xf32>
    %393 = arith.divf %391, %392 : vector<16x1xf32>
    %394 = vector.broadcast %386 : vector<16x1xf32> to vector<16x16xf32>
    %395 = arith.subf %380, %394 : vector<16x16xf32>
    %cst_97 = arith.constant 9.99999974E-6 : f32
    %396 = vector.broadcast %cst_97 : f32 to vector<16x1xf32>
    %397 = arith.addf %393, %396 : vector<16x1xf32>
    %398 = math.rsqrt %397 : vector<16x1xf32>
    %399 = vector.broadcast %398 : vector<16x1xf32> to vector<16x16xf32>
    %400 = arith.mulf %395, %399 : vector<16x16xf32>
    %401 = vector.broadcast %381 : vector<1x16xf32> to vector<16x16xf32>
    %402 = arith.mulf %400, %401 : vector<16x16xf32>
    %403 = vector.broadcast %382 : vector<1x16xf32> to vector<16x16xf32>
    %404 = arith.addf %402, %403 : vector<16x16xf32>
    %c0_98 = arith.constant 0 : index
    %c0_99 = arith.constant 0 : index
    %405 = vector.load %arg14[%c0_98, %c0_99] : memref<17x16xf32, #tpu.memory_space<vmem>>, vector<17x16xf32>
    %406 = vector.extract_strided_slice %405 {offsets = [0, 0], sizes = [16, 16], strides = [1, 1]} : vector<17x16xf32> to vector<16x16xf32>
    %cst_100 = arith.constant dense<0.000000e+00> : vector<16x16xf32>
    %407 = tpu.matmul %404, %406, %cst_100 {dimension_numbers = #tpu.dot_dimension_numbers<[1], [0], [0], [1], [0, 0, 1, 1], [], []>} : vector<16x16xf32>, vector<16x16xf32>, vector<16x16xf32> -> vector<16x16xf32>
    %408 = vector.extract_strided_slice %405 {offsets = [16, 0], sizes = [1, 16], strides = [1, 1]} : vector<17x16xf32> to vector<1x16xf32>
    %409 = vector.broadcast %408 : vector<1x16xf32> to vector<16x16xf32>
    %410 = arith.addf %407, %409 : vector<16x16xf32>
    %c0_101 = arith.constant 0 : index
    %c0_102 = arith.constant 0 : index
    %411 = vector.load %arg15[%c0_101, %c0_102] : memref<17x32xf32, #tpu.memory_space<vmem>>, vector<17x32xf32>
    %412 = vector.extract_strided_slice %411 {offsets = [0, 0], sizes = [16, 32], strides = [1, 1]} : vector<17x32xf32> to vector<16x32xf32>
    %cst_103 = arith.constant dense<0.000000e+00> : vector<20x32xf32>
    %413 = tpu.matmul %194, %412, %cst_103 {dimension_numbers = #tpu.dot_dimension_numbers<[1], [0], [0], [1], [0, 0, 1, 1], [], []>} : vector<20x16xf32>, vector<16x32xf32>, vector<20x32xf32> -> vector<20x32xf32>
    %414 = vector.extract_strided_slice %411 {offsets = [16, 0], sizes = [1, 32], strides = [1, 1]} : vector<17x32xf32> to vector<1x32xf32>
    %415 = vector.broadcast %414 : vector<1x32xf32> to vector<20x32xf32>
    %416 = arith.addf %413, %415 : vector<20x32xf32>
    %417 = vector.extract_strided_slice %410 {offsets = [0, 0], sizes = [16, 8], strides = [1, 1]} : vector<16x16xf32> to vector<16x8xf32>
    %418 = vector.extract_strided_slice %410 {offsets = [0, 8], sizes = [16, 8], strides = [1, 1]} : vector<16x16xf32> to vector<16x8xf32>
    %419 = vector.extract_strided_slice %416 {offsets = [0, 0], sizes = [20, 8], strides = [1, 1]} : vector<20x32xf32> to vector<20x8xf32>
    %420 = vector.extract_strided_slice %416 {offsets = [0, 8], sizes = [20, 8], strides = [1, 1]} : vector<20x32xf32> to vector<20x8xf32>
    %421 = vector.extract_strided_slice %416 {offsets = [0, 16], sizes = [20, 8], strides = [1, 1]} : vector<20x32xf32> to vector<20x8xf32>
    %422 = vector.extract_strided_slice %416 {offsets = [0, 24], sizes = [20, 8], strides = [1, 1]} : vector<20x32xf32> to vector<20x8xf32>
    %423 = vector.extract_strided_slice %417 {offsets = [0, 0], sizes = [4, 8], strides = [1, 1]} : vector<16x8xf32> to vector<4x8xf32>
    %424 = vector.shape_cast %423 : vector<4x8xf32> to vector<4x1x8xf32>
    %425 = vector.extract_strided_slice %419 {offsets = [0, 0], sizes = [8, 8], strides = [1, 1]} : vector<20x8xf32> to vector<8x8xf32>
    %426 = vector.shape_cast %425 : vector<8x8xf32> to vector<1x8x8xf32>
    %427 = vector.broadcast %424 : vector<4x1x8xf32> to vector<4x8x8xf32>
    %428 = vector.broadcast %426 : vector<1x8x8xf32> to vector<4x8x8xf32>
    %429 = arith.mulf %427, %428 : vector<4x8x8xf32>
    %430 = vector.extract_strided_slice %418 {offsets = [0, 0], sizes = [4, 8], strides = [1, 1]} : vector<16x8xf32> to vector<4x8xf32>
    %431 = vector.shape_cast %430 : vector<4x8xf32> to vector<4x1x8xf32>
    %432 = vector.extract_strided_slice %420 {offsets = [0, 0], sizes = [8, 8], strides = [1, 1]} : vector<20x8xf32> to vector<8x8xf32>
    %433 = vector.shape_cast %432 : vector<8x8xf32> to vector<1x8x8xf32>
    %434 = vector.broadcast %431 : vector<4x1x8xf32> to vector<4x8x8xf32>
    %435 = vector.broadcast %433 : vector<1x8x8xf32> to vector<4x8x8xf32>
    %436 = arith.mulf %434, %435 : vector<4x8x8xf32>
    %437 = arith.addf %429, %436 : vector<4x8x8xf32>
    %cst_104 = arith.constant 0.707106769 : f32
    %438 = vector.broadcast %cst_104 : f32 to vector<4x8x8xf32>
    %439 = arith.mulf %437, %438 : vector<4x8x8xf32>
    %cst_105 = arith.constant dense<0xFF800000> : vector<4x8xf32>
    %440 = vector.multi_reduction <maximumf>, %439, %cst_105 [1] : vector<4x8x8xf32> to vector<4x8xf32>
    %441 = vector.shape_cast %440 : vector<4x8xf32> to vector<4x1x8xf32>
    %442 = vector.broadcast %441 : vector<4x1x8xf32> to vector<4x8x8xf32>
    %443 = arith.subf %439, %442 : vector<4x8x8xf32>
    %444 = math.exp %443 : vector<4x8x8xf32>
    %cst_106 = arith.constant dense<0.000000e+00> : vector<4x8xf32>
    %445 = vector.multi_reduction <add>, %444, %cst_106 [1] : vector<4x8x8xf32> to vector<4x8xf32>
    %446 = vector.shape_cast %445 : vector<4x8xf32> to vector<4x1x8xf32>
    %447 = tpu.reciprocal %446 {approx = true} : vector<4x1x8xf32> -> vector<4x1x8xf32>
    %448 = vector.broadcast %447 : vector<4x1x8xf32> to vector<4x8x8xf32>
    %449 = arith.mulf %444, %448 : vector<4x8x8xf32>
    %450 = vector.extract_strided_slice %421 {offsets = [0, 0], sizes = [8, 8], strides = [1, 1]} : vector<20x8xf32> to vector<8x8xf32>
    %451 = vector.shape_cast %450 : vector<8x8xf32> to vector<1x8x8xf32>
    %452 = vector.broadcast %451 : vector<1x8x8xf32> to vector<4x8x8xf32>
    %453 = arith.mulf %449, %452 : vector<4x8x8xf32>
    %cst_107 = arith.constant dense<0.000000e+00> : vector<4x8xf32>
    %454 = vector.multi_reduction <add>, %453, %cst_107 [1] : vector<4x8x8xf32> to vector<4x8xf32>
    %455 = vector.extract_strided_slice %422 {offsets = [0, 0], sizes = [8, 8], strides = [1, 1]} : vector<20x8xf32> to vector<8x8xf32>
    %456 = vector.shape_cast %455 : vector<8x8xf32> to vector<1x8x8xf32>
    %457 = vector.broadcast %456 : vector<1x8x8xf32> to vector<4x8x8xf32>
    %458 = arith.mulf %449, %457 : vector<4x8x8xf32>
    %cst_108 = arith.constant dense<0.000000e+00> : vector<4x8xf32>
    %459 = vector.multi_reduction <add>, %458, %cst_108 [1] : vector<4x8x8xf32> to vector<4x8xf32>
    %460 = tpu.concatenate %454, %459 in 1 : vector<4x8xf32>, vector<4x8xf32> -> vector<4x16xf32>
    %461 = vector.extract_strided_slice %417 {offsets = [4, 0], sizes = [4, 8], strides = [1, 1]} : vector<16x8xf32> to vector<4x8xf32>
    %462 = vector.shape_cast %461 : vector<4x8xf32> to vector<4x1x8xf32>
    %463 = vector.extract_strided_slice %419 {offsets = [4, 0], sizes = [8, 8], strides = [1, 1]} : vector<20x8xf32> to vector<8x8xf32>
    %464 = vector.shape_cast %463 : vector<8x8xf32> to vector<1x8x8xf32>
    %465 = vector.broadcast %462 : vector<4x1x8xf32> to vector<4x8x8xf32>
    %466 = vector.broadcast %464 : vector<1x8x8xf32> to vector<4x8x8xf32>
    %467 = arith.mulf %465, %466 : vector<4x8x8xf32>
    %468 = vector.extract_strided_slice %418 {offsets = [4, 0], sizes = [4, 8], strides = [1, 1]} : vector<16x8xf32> to vector<4x8xf32>
    %469 = vector.shape_cast %468 : vector<4x8xf32> to vector<4x1x8xf32>
    %470 = vector.extract_strided_slice %420 {offsets = [4, 0], sizes = [8, 8], strides = [1, 1]} : vector<20x8xf32> to vector<8x8xf32>
    %471 = vector.shape_cast %470 : vector<8x8xf32> to vector<1x8x8xf32>
    %472 = vector.broadcast %469 : vector<4x1x8xf32> to vector<4x8x8xf32>
    %473 = vector.broadcast %471 : vector<1x8x8xf32> to vector<4x8x8xf32>
    %474 = arith.mulf %472, %473 : vector<4x8x8xf32>
    %475 = arith.addf %467, %474 : vector<4x8x8xf32>
    %cst_109 = arith.constant 0.707106769 : f32
    %476 = vector.broadcast %cst_109 : f32 to vector<4x8x8xf32>
    %477 = arith.mulf %475, %476 : vector<4x8x8xf32>
    %cst_110 = arith.constant dense<0xFF800000> : vector<4x8xf32>
    %478 = vector.multi_reduction <maximumf>, %477, %cst_110 [1] : vector<4x8x8xf32> to vector<4x8xf32>
    %479 = vector.shape_cast %478 : vector<4x8xf32> to vector<4x1x8xf32>
    %480 = vector.broadcast %479 : vector<4x1x8xf32> to vector<4x8x8xf32>
    %481 = arith.subf %477, %480 : vector<4x8x8xf32>
    %482 = math.exp %481 : vector<4x8x8xf32>
    %cst_111 = arith.constant dense<0.000000e+00> : vector<4x8xf32>
    %483 = vector.multi_reduction <add>, %482, %cst_111 [1] : vector<4x8x8xf32> to vector<4x8xf32>
    %484 = vector.shape_cast %483 : vector<4x8xf32> to vector<4x1x8xf32>
    %485 = tpu.reciprocal %484 {approx = true} : vector<4x1x8xf32> -> vector<4x1x8xf32>
    %486 = vector.broadcast %485 : vector<4x1x8xf32> to vector<4x8x8xf32>
    %487 = arith.mulf %482, %486 : vector<4x8x8xf32>
    %488 = vector.extract_strided_slice %421 {offsets = [4, 0], sizes = [8, 8], strides = [1, 1]} : vector<20x8xf32> to vector<8x8xf32>
    %489 = vector.shape_cast %488 : vector<8x8xf32> to vector<1x8x8xf32>
    %490 = vector.broadcast %489 : vector<1x8x8xf32> to vector<4x8x8xf32>
    %491 = arith.mulf %487, %490 : vector<4x8x8xf32>
    %cst_112 = arith.constant dense<0.000000e+00> : vector<4x8xf32>
    %492 = vector.multi_reduction <add>, %491, %cst_112 [1] : vector<4x8x8xf32> to vector<4x8xf32>
    %493 = vector.extract_strided_slice %422 {offsets = [4, 0], sizes = [8, 8], strides = [1, 1]} : vector<20x8xf32> to vector<8x8xf32>
    %494 = vector.shape_cast %493 : vector<8x8xf32> to vector<1x8x8xf32>
    %495 = vector.broadcast %494 : vector<1x8x8xf32> to vector<4x8x8xf32>
    %496 = arith.mulf %487, %495 : vector<4x8x8xf32>
    %cst_113 = arith.constant dense<0.000000e+00> : vector<4x8xf32>
    %497 = vector.multi_reduction <add>, %496, %cst_113 [1] : vector<4x8x8xf32> to vector<4x8xf32>
    %498 = tpu.concatenate %492, %497 in 1 : vector<4x8xf32>, vector<4x8xf32> -> vector<4x16xf32>
    %499 = vector.extract_strided_slice %417 {offsets = [8, 0], sizes = [4, 8], strides = [1, 1]} : vector<16x8xf32> to vector<4x8xf32>
    %500 = vector.shape_cast %499 : vector<4x8xf32> to vector<4x1x8xf32>
    %501 = vector.extract_strided_slice %419 {offsets = [8, 0], sizes = [8, 8], strides = [1, 1]} : vector<20x8xf32> to vector<8x8xf32>
    %502 = vector.shape_cast %501 : vector<8x8xf32> to vector<1x8x8xf32>
    %503 = vector.broadcast %500 : vector<4x1x8xf32> to vector<4x8x8xf32>
    %504 = vector.broadcast %502 : vector<1x8x8xf32> to vector<4x8x8xf32>
    %505 = arith.mulf %503, %504 : vector<4x8x8xf32>
    %506 = vector.extract_strided_slice %418 {offsets = [8, 0], sizes = [4, 8], strides = [1, 1]} : vector<16x8xf32> to vector<4x8xf32>
    %507 = vector.shape_cast %506 : vector<4x8xf32> to vector<4x1x8xf32>
    %508 = vector.extract_strided_slice %420 {offsets = [8, 0], sizes = [8, 8], strides = [1, 1]} : vector<20x8xf32> to vector<8x8xf32>
    %509 = vector.shape_cast %508 : vector<8x8xf32> to vector<1x8x8xf32>
    %510 = vector.broadcast %507 : vector<4x1x8xf32> to vector<4x8x8xf32>
    %511 = vector.broadcast %509 : vector<1x8x8xf32> to vector<4x8x8xf32>
    %512 = arith.mulf %510, %511 : vector<4x8x8xf32>
    %513 = arith.addf %505, %512 : vector<4x8x8xf32>
    %cst_114 = arith.constant 0.707106769 : f32
    %514 = vector.broadcast %cst_114 : f32 to vector<4x8x8xf32>
    %515 = arith.mulf %513, %514 : vector<4x8x8xf32>
    %cst_115 = arith.constant dense<0xFF800000> : vector<4x8xf32>
    %516 = vector.multi_reduction <maximumf>, %515, %cst_115 [1] : vector<4x8x8xf32> to vector<4x8xf32>
    %517 = vector.shape_cast %516 : vector<4x8xf32> to vector<4x1x8xf32>
    %518 = vector.broadcast %517 : vector<4x1x8xf32> to vector<4x8x8xf32>
    %519 = arith.subf %515, %518 : vector<4x8x8xf32>
    %520 = math.exp %519 : vector<4x8x8xf32>
    %cst_116 = arith.constant dense<0.000000e+00> : vector<4x8xf32>
    %521 = vector.multi_reduction <add>, %520, %cst_116 [1] : vector<4x8x8xf32> to vector<4x8xf32>
    %522 = vector.shape_cast %521 : vector<4x8xf32> to vector<4x1x8xf32>
    %523 = tpu.reciprocal %522 {approx = true} : vector<4x1x8xf32> -> vector<4x1x8xf32>
    %524 = vector.broadcast %523 : vector<4x1x8xf32> to vector<4x8x8xf32>
    %525 = arith.mulf %520, %524 : vector<4x8x8xf32>
    %526 = vector.extract_strided_slice %421 {offsets = [8, 0], sizes = [8, 8], strides = [1, 1]} : vector<20x8xf32> to vector<8x8xf32>
    %527 = vector.shape_cast %526 : vector<8x8xf32> to vector<1x8x8xf32>
    %528 = vector.broadcast %527 : vector<1x8x8xf32> to vector<4x8x8xf32>
    %529 = arith.mulf %525, %528 : vector<4x8x8xf32>
    %cst_117 = arith.constant dense<0.000000e+00> : vector<4x8xf32>
    %530 = vector.multi_reduction <add>, %529, %cst_117 [1] : vector<4x8x8xf32> to vector<4x8xf32>
    %531 = vector.extract_strided_slice %422 {offsets = [8, 0], sizes = [8, 8], strides = [1, 1]} : vector<20x8xf32> to vector<8x8xf32>
    %532 = vector.shape_cast %531 : vector<8x8xf32> to vector<1x8x8xf32>
    %533 = vector.broadcast %532 : vector<1x8x8xf32> to vector<4x8x8xf32>
    %534 = arith.mulf %525, %533 : vector<4x8x8xf32>
    %cst_118 = arith.constant dense<0.000000e+00> : vector<4x8xf32>
    %535 = vector.multi_reduction <add>, %534, %cst_118 [1] : vector<4x8x8xf32> to vector<4x8xf32>
    %536 = tpu.concatenate %530, %535 in 1 : vector<4x8xf32>, vector<4x8xf32> -> vector<4x16xf32>
    %537 = vector.extract_strided_slice %417 {offsets = [12, 0], sizes = [4, 8], strides = [1, 1]} : vector<16x8xf32> to vector<4x8xf32>
    %538 = vector.shape_cast %537 : vector<4x8xf32> to vector<4x1x8xf32>
    %539 = vector.extract_strided_slice %419 {offsets = [12, 0], sizes = [8, 8], strides = [1, 1]} : vector<20x8xf32> to vector<8x8xf32>
    %540 = vector.shape_cast %539 : vector<8x8xf32> to vector<1x8x8xf32>
    %541 = vector.broadcast %538 : vector<4x1x8xf32> to vector<4x8x8xf32>
    %542 = vector.broadcast %540 : vector<1x8x8xf32> to vector<4x8x8xf32>
    %543 = arith.mulf %541, %542 : vector<4x8x8xf32>
    %544 = vector.extract_strided_slice %418 {offsets = [12, 0], sizes = [4, 8], strides = [1, 1]} : vector<16x8xf32> to vector<4x8xf32>
    %545 = vector.shape_cast %544 : vector<4x8xf32> to vector<4x1x8xf32>
    %546 = vector.extract_strided_slice %420 {offsets = [12, 0], sizes = [8, 8], strides = [1, 1]} : vector<20x8xf32> to vector<8x8xf32>
    %547 = vector.shape_cast %546 : vector<8x8xf32> to vector<1x8x8xf32>
    %548 = vector.broadcast %545 : vector<4x1x8xf32> to vector<4x8x8xf32>
    %549 = vector.broadcast %547 : vector<1x8x8xf32> to vector<4x8x8xf32>
    %550 = arith.mulf %548, %549 : vector<4x8x8xf32>
    %551 = arith.addf %543, %550 : vector<4x8x8xf32>
    %cst_119 = arith.constant 0.707106769 : f32
    %552 = vector.broadcast %cst_119 : f32 to vector<4x8x8xf32>
    %553 = arith.mulf %551, %552 : vector<4x8x8xf32>
    %cst_120 = arith.constant dense<0xFF800000> : vector<4x8xf32>
    %554 = vector.multi_reduction <maximumf>, %553, %cst_120 [1] : vector<4x8x8xf32> to vector<4x8xf32>
    %555 = vector.shape_cast %554 : vector<4x8xf32> to vector<4x1x8xf32>
    %556 = vector.broadcast %555 : vector<4x1x8xf32> to vector<4x8x8xf32>
    %557 = arith.subf %553, %556 : vector<4x8x8xf32>
    %558 = math.exp %557 : vector<4x8x8xf32>
    %cst_121 = arith.constant dense<0.000000e+00> : vector<4x8xf32>
    %559 = vector.multi_reduction <add>, %558, %cst_121 [1] : vector<4x8x8xf32> to vector<4x8xf32>
    %560 = vector.shape_cast %559 : vector<4x8xf32> to vector<4x1x8xf32>
    %561 = tpu.reciprocal %560 {approx = true} : vector<4x1x8xf32> -> vector<4x1x8xf32>
    %562 = vector.broadcast %561 : vector<4x1x8xf32> to vector<4x8x8xf32>
    %563 = arith.mulf %558, %562 : vector<4x8x8xf32>
    %564 = vector.extract_strided_slice %421 {offsets = [12, 0], sizes = [8, 8], strides = [1, 1]} : vector<20x8xf32> to vector<8x8xf32>
    %565 = vector.shape_cast %564 : vector<8x8xf32> to vector<1x8x8xf32>
    %566 = vector.broadcast %565 : vector<1x8x8xf32> to vector<4x8x8xf32>
    %567 = arith.mulf %563, %566 : vector<4x8x8xf32>
    %cst_122 = arith.constant dense<0.000000e+00> : vector<4x8xf32>
    %568 = vector.multi_reduction <add>, %567, %cst_122 [1] : vector<4x8x8xf32> to vector<4x8xf32>
    %569 = vector.extract_strided_slice %422 {offsets = [12, 0], sizes = [8, 8], strides = [1, 1]} : vector<20x8xf32> to vector<8x8xf32>
    %570 = vector.shape_cast %569 : vector<8x8xf32> to vector<1x8x8xf32>
    %571 = vector.broadcast %570 : vector<1x8x8xf32> to vector<4x8x8xf32>
    %572 = arith.mulf %563, %571 : vector<4x8x8xf32>
    %cst_123 = arith.constant dense<0.000000e+00> : vector<4x8xf32>
    %573 = vector.multi_reduction <add>, %572, %cst_123 [1] : vector<4x8x8xf32> to vector<4x8xf32>
    %574 = tpu.concatenate %568, %573 in 1 : vector<4x8xf32>, vector<4x8xf32> -> vector<4x16xf32>
    %575 = tpu.concatenate %460, %498, %536, %574 in 0 : vector<4x16xf32>, vector<4x16xf32>, vector<4x16xf32>, vector<4x16xf32> -> vector<16x16xf32>
    %c0_124 = arith.constant 0 : index
    %c0_125 = arith.constant 0 : index
    %576 = vector.load %arg16[%c0_124, %c0_125] : memref<17x16xf32, #tpu.memory_space<vmem>>, vector<17x16xf32>
    %577 = vector.extract_strided_slice %576 {offsets = [0, 0], sizes = [16, 16], strides = [1, 1]} : vector<17x16xf32> to vector<16x16xf32>
    %cst_126 = arith.constant dense<0.000000e+00> : vector<16x16xf32>
    %578 = tpu.matmul %575, %577, %cst_126 {dimension_numbers = #tpu.dot_dimension_numbers<[1], [0], [0], [1], [0, 0, 1, 1], [], []>} : vector<16x16xf32>, vector<16x16xf32>, vector<16x16xf32> -> vector<16x16xf32>
    %579 = vector.extract_strided_slice %576 {offsets = [16, 0], sizes = [1, 16], strides = [1, 1]} : vector<17x16xf32> to vector<1x16xf32>
    %580 = vector.broadcast %579 : vector<1x16xf32> to vector<16x16xf32>
    %581 = arith.addf %578, %580 : vector<16x16xf32>
    %582 = arith.addf %404, %581 : vector<16x16xf32>
    %583 = vector.extract_strided_slice %200 {offsets = [2, 0], sizes = [1, 16], strides = [1, 1]} : vector<6x16xf32> to vector<1x16xf32>
    %584 = vector.extract_strided_slice %200 {offsets = [3, 0], sizes = [1, 16], strides = [1, 1]} : vector<6x16xf32> to vector<1x16xf32>
    %cst_127 = arith.constant dense<0.000000e+00> : vector<16xf32>
    %585 = vector.multi_reduction <add>, %582, %cst_127 [1] : vector<16x16xf32> to vector<16xf32>
    %586 = vector.shape_cast %585 : vector<16xf32> to vector<16x1xf32>
    %cst_128 = arith.constant 1.600000e+01 : f32
    %587 = vector.broadcast %cst_128 : f32 to vector<16x1xf32>
    %588 = arith.divf %586, %587 : vector<16x1xf32>
    %589 = vector.broadcast %588 : vector<16x1xf32> to vector<16x16xf32>
    %590 = arith.subf %582, %589 : vector<16x16xf32>
    %591 = arith.mulf %590, %590 : vector<16x16xf32>
    %cst_129 = arith.constant dense<0.000000e+00> : vector<16xf32>
    %592 = vector.multi_reduction <add>, %591, %cst_129 [1] : vector<16x16xf32> to vector<16xf32>
    %593 = vector.shape_cast %592 : vector<16xf32> to vector<16x1xf32>
    %cst_130 = arith.constant 1.600000e+01 : f32
    %594 = vector.broadcast %cst_130 : f32 to vector<16x1xf32>
    %595 = arith.divf %593, %594 : vector<16x1xf32>
    %596 = vector.broadcast %588 : vector<16x1xf32> to vector<16x16xf32>
    %597 = arith.subf %582, %596 : vector<16x16xf32>
    %cst_131 = arith.constant 9.99999974E-6 : f32
    %598 = vector.broadcast %cst_131 : f32 to vector<16x1xf32>
    %599 = arith.addf %595, %598 : vector<16x1xf32>
    %600 = math.rsqrt %599 : vector<16x1xf32>
    %601 = vector.broadcast %600 : vector<16x1xf32> to vector<16x16xf32>
    %602 = arith.mulf %597, %601 : vector<16x16xf32>
    %603 = vector.broadcast %583 : vector<1x16xf32> to vector<16x16xf32>
    %604 = arith.mulf %602, %603 : vector<16x16xf32>
    %605 = vector.broadcast %584 : vector<1x16xf32> to vector<16x16xf32>
    %606 = arith.addf %604, %605 : vector<16x16xf32>
    %c0_132 = arith.constant 0 : index
    %c0_133 = arith.constant 0 : index
    %607 = vector.load %arg17[%c0_132, %c0_133] : memref<17x32xf32, #tpu.memory_space<vmem>>, vector<17x32xf32>
    %608 = vector.extract_strided_slice %607 {offsets = [0, 0], sizes = [16, 32], strides = [1, 1]} : vector<17x32xf32> to vector<16x32xf32>
    %cst_134 = arith.constant dense<0.000000e+00> : vector<16x32xf32>
    %609 = tpu.matmul %606, %608, %cst_134 {dimension_numbers = #tpu.dot_dimension_numbers<[1], [0], [0], [1], [0, 0, 1, 1], [], []>} : vector<16x16xf32>, vector<16x32xf32>, vector<16x32xf32> -> vector<16x32xf32>
    %610 = vector.extract_strided_slice %607 {offsets = [16, 0], sizes = [1, 32], strides = [1, 1]} : vector<17x32xf32> to vector<1x32xf32>
    %611 = vector.broadcast %610 : vector<1x32xf32> to vector<16x32xf32>
    %612 = arith.addf %609, %611 : vector<16x32xf32>
    %cst_135 = arith.constant 0.000000e+00 : f32
    %613 = vector.broadcast %cst_135 : f32 to vector<16x32xf32>
    %614 = arith.maximumf %612, %613 : vector<16x32xf32>
    %c0_136 = arith.constant 0 : index
    %c0_137 = arith.constant 0 : index
    %615 = vector.load %arg18[%c0_136, %c0_137] : memref<33x16xf32, #tpu.memory_space<vmem>>, vector<33x16xf32>
    %616 = vector.extract_strided_slice %615 {offsets = [0, 0], sizes = [32, 16], strides = [1, 1]} : vector<33x16xf32> to vector<32x16xf32>
    %cst_138 = arith.constant dense<0.000000e+00> : vector<16x16xf32>
    %617 = tpu.matmul %614, %616, %cst_138 {dimension_numbers = #tpu.dot_dimension_numbers<[1], [0], [0], [1], [0, 0, 1, 1], [], []>} : vector<16x32xf32>, vector<32x16xf32>, vector<16x16xf32> -> vector<16x16xf32>
    %618 = vector.extract_strided_slice %615 {offsets = [32, 0], sizes = [1, 16], strides = [1, 1]} : vector<33x16xf32> to vector<1x16xf32>
    %619 = vector.broadcast %618 : vector<1x16xf32> to vector<16x16xf32>
    %620 = arith.addf %617, %619 : vector<16x16xf32>
    %621 = arith.addf %606, %620 : vector<16x16xf32>
    %622 = vector.extract_strided_slice %200 {offsets = [4, 0], sizes = [1, 16], strides = [1, 1]} : vector<6x16xf32> to vector<1x16xf32>
    %623 = vector.extract_strided_slice %200 {offsets = [5, 0], sizes = [1, 16], strides = [1, 1]} : vector<6x16xf32> to vector<1x16xf32>
    %cst_139 = arith.constant dense<0.000000e+00> : vector<16xf32>
    %624 = vector.multi_reduction <add>, %621, %cst_139 [1] : vector<16x16xf32> to vector<16xf32>
    %625 = vector.shape_cast %624 : vector<16xf32> to vector<16x1xf32>
    %cst_140 = arith.constant 1.600000e+01 : f32
    %626 = vector.broadcast %cst_140 : f32 to vector<16x1xf32>
    %627 = arith.divf %625, %626 : vector<16x1xf32>
    %628 = vector.broadcast %627 : vector<16x1xf32> to vector<16x16xf32>
    %629 = arith.subf %621, %628 : vector<16x16xf32>
    %630 = arith.mulf %629, %629 : vector<16x16xf32>
    %cst_141 = arith.constant dense<0.000000e+00> : vector<16xf32>
    %631 = vector.multi_reduction <add>, %630, %cst_141 [1] : vector<16x16xf32> to vector<16xf32>
    %632 = vector.shape_cast %631 : vector<16xf32> to vector<16x1xf32>
    %cst_142 = arith.constant 1.600000e+01 : f32
    %633 = vector.broadcast %cst_142 : f32 to vector<16x1xf32>
    %634 = arith.divf %632, %633 : vector<16x1xf32>
    %635 = vector.broadcast %627 : vector<16x1xf32> to vector<16x16xf32>
    %636 = arith.subf %621, %635 : vector<16x16xf32>
    %cst_143 = arith.constant 9.99999974E-6 : f32
    %637 = vector.broadcast %cst_143 : f32 to vector<16x1xf32>
    %638 = arith.addf %634, %637 : vector<16x1xf32>
    %639 = math.rsqrt %638 : vector<16x1xf32>
    %640 = vector.broadcast %639 : vector<16x1xf32> to vector<16x16xf32>
    %641 = arith.mulf %636, %640 : vector<16x16xf32>
    %642 = vector.broadcast %622 : vector<1x16xf32> to vector<16x16xf32>
    %643 = arith.mulf %641, %642 : vector<16x16xf32>
    %644 = vector.broadcast %623 : vector<1x16xf32> to vector<16x16xf32>
    %645 = arith.addf %643, %644 : vector<16x16xf32>
    %c0_144 = arith.constant 0 : index
    %c0_145 = arith.constant 0 : index
    %646 = vector.load %arg27[%c0_144, %c0_145] : memref<6x16xf32, #tpu.memory_space<vmem>>, vector<6x16xf32>
    %647 = vector.extract_strided_slice %191 {offsets = [2, 0, 0], sizes = [1, 4, 16], strides = [1, 1, 1]} : vector<3x4x16xf32> to vector<1x4x16xf32>
    %648 = vector.shape_cast %647 : vector<1x4x16xf32> to vector<4x16xf32>
    %649 = tpu.concatenate %648, %645 in 0 : vector<4x16xf32>, vector<16x16xf32> -> vector<20x16xf32>
    %650 = vector.extract_strided_slice %649 {offsets = [16, 0], sizes = [4, 16], strides = [1, 1]} : vector<20x16xf32> to vector<4x16xf32>
    %651 = vector.shape_cast %650 : vector<4x16xf32> to vector<1x4x16xf32>
    %c0_146 = arith.constant 0 : index
    %c2_147 = arith.constant 2 : index
    %c0_148 = arith.constant 0 : index
    %c0_149 = arith.constant 0 : index
    %652 = vector.load %arg30[%c0_146, %c2_147, %c0_148, %c0_149] : memref<1x3x4x16xf32, #tpu.memory_space<vmem>>, vector<1x1x4x16xf32>
    %653 = vector.shape_cast %652 : vector<1x1x4x16xf32> to vector<1x4x16xf32>
    %654 = vector.shape_cast %651 : vector<1x4x16xf32> to vector<1x1x4x16xf32>
    tpu.vector_store %arg30[%c0_146, %c2_147, %c0_148, %c0_149], %654 {strides = array<i32>} : memref<1x3x4x16xf32, #tpu.memory_space<vmem>>, vector<1x1x4x16xf32>,
    %c0_150 = arith.constant 0 : index
    %c0_151 = arith.constant 0 : index
    %655 = vector.load %arg20[%c0_150, %c0_151] : memref<17x48xf32, #tpu.memory_space<vmem>>, vector<17x48xf32>
    %656 = vector.extract_strided_slice %655 {offsets = [0, 0], sizes = [16, 48], strides = [1, 1]} : vector<17x48xf32> to vector<16x48xf32>
    %cst_152 = arith.constant dense<0.000000e+00> : vector<20x48xf32>
    %657 = tpu.matmul %649, %656, %cst_152 {dimension_numbers = #tpu.dot_dimension_numbers<[1], [0], [0], [1], [0, 0, 1, 1], [], []>} : vector<20x16xf32>, vector<16x48xf32>, vector<20x48xf32> -> vector<20x48xf32>
    %658 = vector.extract_strided_slice %655 {offsets = [16, 0], sizes = [1, 48], strides = [1, 1]} : vector<17x48xf32> to vector<1x48xf32>
    %659 = vector.broadcast %658 : vector<1x48xf32> to vector<20x48xf32>
    %660 = arith.addf %657, %659 : vector<20x48xf32>
    %661 = vector.extract_strided_slice %660 {offsets = [4, 0], sizes = [16, 8], strides = [1, 1]} : vector<20x48xf32> to vector<16x8xf32>
    %662 = vector.extract_strided_slice %660 {offsets = [4, 8], sizes = [16, 8], strides = [1, 1]} : vector<20x48xf32> to vector<16x8xf32>
    %663 = vector.extract_strided_slice %660 {offsets = [0, 16], sizes = [20, 8], strides = [1, 1]} : vector<20x48xf32> to vector<20x8xf32>
    %664 = vector.extract_strided_slice %660 {offsets = [0, 24], sizes = [20, 8], strides = [1, 1]} : vector<20x48xf32> to vector<20x8xf32>
    %665 = vector.extract_strided_slice %660 {offsets = [0, 32], sizes = [20, 8], strides = [1, 1]} : vector<20x48xf32> to vector<20x8xf32>
    %666 = vector.extract_strided_slice %660 {offsets = [0, 40], sizes = [20, 8], strides = [1, 1]} : vector<20x48xf32> to vector<20x8xf32>
    %667 = vector.extract_strided_slice %661 {offsets = [0, 0], sizes = [4, 8], strides = [1, 1]} : vector<16x8xf32> to vector<4x8xf32>
    %668 = vector.shape_cast %667 : vector<4x8xf32> to vector<4x1x8xf32>
    %669 = vector.extract_strided_slice %663 {offsets = [0, 0], sizes = [8, 8], strides = [1, 1]} : vector<20x8xf32> to vector<8x8xf32>
    %670 = vector.shape_cast %669 : vector<8x8xf32> to vector<1x8x8xf32>
    %671 = vector.broadcast %668 : vector<4x1x8xf32> to vector<4x8x8xf32>
    %672 = vector.broadcast %670 : vector<1x8x8xf32> to vector<4x8x8xf32>
    %673 = arith.mulf %671, %672 : vector<4x8x8xf32>
    %674 = vector.extract_strided_slice %662 {offsets = [0, 0], sizes = [4, 8], strides = [1, 1]} : vector<16x8xf32> to vector<4x8xf32>
    %675 = vector.shape_cast %674 : vector<4x8xf32> to vector<4x1x8xf32>
    %676 = vector.extract_strided_slice %664 {offsets = [0, 0], sizes = [8, 8], strides = [1, 1]} : vector<20x8xf32> to vector<8x8xf32>
    %677 = vector.shape_cast %676 : vector<8x8xf32> to vector<1x8x8xf32>
    %678 = vector.broadcast %675 : vector<4x1x8xf32> to vector<4x8x8xf32>
    %679 = vector.broadcast %677 : vector<1x8x8xf32> to vector<4x8x8xf32>
    %680 = arith.mulf %678, %679 : vector<4x8x8xf32>
    %681 = arith.addf %673, %680 : vector<4x8x8xf32>
    %cst_153 = arith.constant 0.707106769 : f32
    %682 = vector.broadcast %cst_153 : f32 to vector<4x8x8xf32>
    %683 = arith.mulf %681, %682 : vector<4x8x8xf32>
    %cst_154 = arith.constant dense<0xFF800000> : vector<4x8xf32>
    %684 = vector.multi_reduction <maximumf>, %683, %cst_154 [1] : vector<4x8x8xf32> to vector<4x8xf32>
    %685 = vector.shape_cast %684 : vector<4x8xf32> to vector<4x1x8xf32>
    %686 = vector.broadcast %685 : vector<4x1x8xf32> to vector<4x8x8xf32>
    %687 = arith.subf %683, %686 : vector<4x8x8xf32>
    %688 = math.exp %687 : vector<4x8x8xf32>
    %cst_155 = arith.constant dense<0.000000e+00> : vector<4x8xf32>
    %689 = vector.multi_reduction <add>, %688, %cst_155 [1] : vector<4x8x8xf32> to vector<4x8xf32>
    %690 = vector.shape_cast %689 : vector<4x8xf32> to vector<4x1x8xf32>
    %691 = tpu.reciprocal %690 {approx = true} : vector<4x1x8xf32> -> vector<4x1x8xf32>
    %692 = vector.broadcast %691 : vector<4x1x8xf32> to vector<4x8x8xf32>
    %693 = arith.mulf %688, %692 : vector<4x8x8xf32>
    %694 = vector.extract_strided_slice %665 {offsets = [0, 0], sizes = [8, 8], strides = [1, 1]} : vector<20x8xf32> to vector<8x8xf32>
    %695 = vector.shape_cast %694 : vector<8x8xf32> to vector<1x8x8xf32>
    %696 = vector.broadcast %695 : vector<1x8x8xf32> to vector<4x8x8xf32>
    %697 = arith.mulf %693, %696 : vector<4x8x8xf32>
    %cst_156 = arith.constant dense<0.000000e+00> : vector<4x8xf32>
    %698 = vector.multi_reduction <add>, %697, %cst_156 [1] : vector<4x8x8xf32> to vector<4x8xf32>
    %699 = vector.extract_strided_slice %666 {offsets = [0, 0], sizes = [8, 8], strides = [1, 1]} : vector<20x8xf32> to vector<8x8xf32>
    %700 = vector.shape_cast %699 : vector<8x8xf32> to vector<1x8x8xf32>
    %701 = vector.broadcast %700 : vector<1x8x8xf32> to vector<4x8x8xf32>
    %702 = arith.mulf %693, %701 : vector<4x8x8xf32>
    %cst_157 = arith.constant dense<0.000000e+00> : vector<4x8xf32>
    %703 = vector.multi_reduction <add>, %702, %cst_157 [1] : vector<4x8x8xf32> to vector<4x8xf32>
    %704 = tpu.concatenate %698, %703 in 1 : vector<4x8xf32>, vector<4x8xf32> -> vector<4x16xf32>
    %705 = vector.extract_strided_slice %661 {offsets = [4, 0], sizes = [4, 8], strides = [1, 1]} : vector<16x8xf32> to vector<4x8xf32>
    %706 = vector.shape_cast %705 : vector<4x8xf32> to vector<4x1x8xf32>
    %707 = vector.extract_strided_slice %663 {offsets = [4, 0], sizes = [8, 8], strides = [1, 1]} : vector<20x8xf32> to vector<8x8xf32>
    %708 = vector.shape_cast %707 : vector<8x8xf32> to vector<1x8x8xf32>
    %709 = vector.broadcast %706 : vector<4x1x8xf32> to vector<4x8x8xf32>
    %710 = vector.broadcast %708 : vector<1x8x8xf32> to vector<4x8x8xf32>
    %711 = arith.mulf %709, %710 : vector<4x8x8xf32>
    %712 = vector.extract_strided_slice %662 {offsets = [4, 0], sizes = [4, 8], strides = [1, 1]} : vector<16x8xf32> to vector<4x8xf32>
    %713 = vector.shape_cast %712 : vector<4x8xf32> to vector<4x1x8xf32>
    %714 = vector.extract_strided_slice %664 {offsets = [4, 0], sizes = [8, 8], strides = [1, 1]} : vector<20x8xf32> to vector<8x8xf32>
    %715 = vector.shape_cast %714 : vector<8x8xf32> to vector<1x8x8xf32>
    %716 = vector.broadcast %713 : vector<4x1x8xf32> to vector<4x8x8xf32>
    %717 = vector.broadcast %715 : vector<1x8x8xf32> to vector<4x8x8xf32>
    %718 = arith.mulf %716, %717 : vector<4x8x8xf32>
    %719 = arith.addf %711, %718 : vector<4x8x8xf32>
    %cst_158 = arith.constant 0.707106769 : f32
    %720 = vector.broadcast %cst_158 : f32 to vector<4x8x8xf32>
    %721 = arith.mulf %719, %720 : vector<4x8x8xf32>
    %cst_159 = arith.constant dense<0xFF800000> : vector<4x8xf32>
    %722 = vector.multi_reduction <maximumf>, %721, %cst_159 [1] : vector<4x8x8xf32> to vector<4x8xf32>
    %723 = vector.shape_cast %722 : vector<4x8xf32> to vector<4x1x8xf32>
    %724 = vector.broadcast %723 : vector<4x1x8xf32> to vector<4x8x8xf32>
    %725 = arith.subf %721, %724 : vector<4x8x8xf32>
    %726 = math.exp %725 : vector<4x8x8xf32>
    %cst_160 = arith.constant dense<0.000000e+00> : vector<4x8xf32>
    %727 = vector.multi_reduction <add>, %726, %cst_160 [1] : vector<4x8x8xf32> to vector<4x8xf32>
    %728 = vector.shape_cast %727 : vector<4x8xf32> to vector<4x1x8xf32>
    %729 = tpu.reciprocal %728 {approx = true} : vector<4x1x8xf32> -> vector<4x1x8xf32>
    %730 = vector.broadcast %729 : vector<4x1x8xf32> to vector<4x8x8xf32>
    %731 = arith.mulf %726, %730 : vector<4x8x8xf32>
    %732 = vector.extract_strided_slice %665 {offsets = [4, 0], sizes = [8, 8], strides = [1, 1]} : vector<20x8xf32> to vector<8x8xf32>
    %733 = vector.shape_cast %732 : vector<8x8xf32> to vector<1x8x8xf32>
    %734 = vector.broadcast %733 : vector<1x8x8xf32> to vector<4x8x8xf32>
    %735 = arith.mulf %731, %734 : vector<4x8x8xf32>
    %cst_161 = arith.constant dense<0.000000e+00> : vector<4x8xf32>
    %736 = vector.multi_reduction <add>, %735, %cst_161 [1] : vector<4x8x8xf32> to vector<4x8xf32>
    %737 = vector.extract_strided_slice %666 {offsets = [4, 0], sizes = [8, 8], strides = [1, 1]} : vector<20x8xf32> to vector<8x8xf32>
    %738 = vector.shape_cast %737 : vector<8x8xf32> to vector<1x8x8xf32>
    %739 = vector.broadcast %738 : vector<1x8x8xf32> to vector<4x8x8xf32>
    %740 = arith.mulf %731, %739 : vector<4x8x8xf32>
    %cst_162 = arith.constant dense<0.000000e+00> : vector<4x8xf32>
    %741 = vector.multi_reduction <add>, %740, %cst_162 [1] : vector<4x8x8xf32> to vector<4x8xf32>
    %742 = tpu.concatenate %736, %741 in 1 : vector<4x8xf32>, vector<4x8xf32> -> vector<4x16xf32>
    %743 = vector.extract_strided_slice %661 {offsets = [8, 0], sizes = [4, 8], strides = [1, 1]} : vector<16x8xf32> to vector<4x8xf32>
    %744 = vector.shape_cast %743 : vector<4x8xf32> to vector<4x1x8xf32>
    %745 = vector.extract_strided_slice %663 {offsets = [8, 0], sizes = [8, 8], strides = [1, 1]} : vector<20x8xf32> to vector<8x8xf32>
    %746 = vector.shape_cast %745 : vector<8x8xf32> to vector<1x8x8xf32>
    %747 = vector.broadcast %744 : vector<4x1x8xf32> to vector<4x8x8xf32>
    %748 = vector.broadcast %746 : vector<1x8x8xf32> to vector<4x8x8xf32>
    %749 = arith.mulf %747, %748 : vector<4x8x8xf32>
    %750 = vector.extract_strided_slice %662 {offsets = [8, 0], sizes = [4, 8], strides = [1, 1]} : vector<16x8xf32> to vector<4x8xf32>
    %751 = vector.shape_cast %750 : vector<4x8xf32> to vector<4x1x8xf32>
    %752 = vector.extract_strided_slice %664 {offsets = [8, 0], sizes = [8, 8], strides = [1, 1]} : vector<20x8xf32> to vector<8x8xf32>
    %753 = vector.shape_cast %752 : vector<8x8xf32> to vector<1x8x8xf32>
    %754 = vector.broadcast %751 : vector<4x1x8xf32> to vector<4x8x8xf32>
    %755 = vector.broadcast %753 : vector<1x8x8xf32> to vector<4x8x8xf32>
    %756 = arith.mulf %754, %755 : vector<4x8x8xf32>
    %757 = arith.addf %749, %756 : vector<4x8x8xf32>
    %cst_163 = arith.constant 0.707106769 : f32
    %758 = vector.broadcast %cst_163 : f32 to vector<4x8x8xf32>
    %759 = arith.mulf %757, %758 : vector<4x8x8xf32>
    %cst_164 = arith.constant dense<0xFF800000> : vector<4x8xf32>
    %760 = vector.multi_reduction <maximumf>, %759, %cst_164 [1] : vector<4x8x8xf32> to vector<4x8xf32>
    %761 = vector.shape_cast %760 : vector<4x8xf32> to vector<4x1x8xf32>
    %762 = vector.broadcast %761 : vector<4x1x8xf32> to vector<4x8x8xf32>
    %763 = arith.subf %759, %762 : vector<4x8x8xf32>
    %764 = math.exp %763 : vector<4x8x8xf32>
    %cst_165 = arith.constant dense<0.000000e+00> : vector<4x8xf32>
    %765 = vector.multi_reduction <add>, %764, %cst_165 [1] : vector<4x8x8xf32> to vector<4x8xf32>
    %766 = vector.shape_cast %765 : vector<4x8xf32> to vector<4x1x8xf32>
    %767 = tpu.reciprocal %766 {approx = true} : vector<4x1x8xf32> -> vector<4x1x8xf32>
    %768 = vector.broadcast %767 : vector<4x1x8xf32> to vector<4x8x8xf32>
    %769 = arith.mulf %764, %768 : vector<4x8x8xf32>
    %770 = vector.extract_strided_slice %665 {offsets = [8, 0], sizes = [8, 8], strides = [1, 1]} : vector<20x8xf32> to vector<8x8xf32>
    %771 = vector.shape_cast %770 : vector<8x8xf32> to vector<1x8x8xf32>
    %772 = vector.broadcast %771 : vector<1x8x8xf32> to vector<4x8x8xf32>
    %773 = arith.mulf %769, %772 : vector<4x8x8xf32>
    %cst_166 = arith.constant dense<0.000000e+00> : vector<4x8xf32>
    %774 = vector.multi_reduction <add>, %773, %cst_166 [1] : vector<4x8x8xf32> to vector<4x8xf32>
    %775 = vector.extract_strided_slice %666 {offsets = [8, 0], sizes = [8, 8], strides = [1, 1]} : vector<20x8xf32> to vector<8x8xf32>
    %776 = vector.shape_cast %775 : vector<8x8xf32> to vector<1x8x8xf32>
    %777 = vector.broadcast %776 : vector<1x8x8xf32> to vector<4x8x8xf32>
    %778 = arith.mulf %769, %777 : vector<4x8x8xf32>
    %cst_167 = arith.constant dense<0.000000e+00> : vector<4x8xf32>
    %779 = vector.multi_reduction <add>, %778, %cst_167 [1] : vector<4x8x8xf32> to vector<4x8xf32>
    %780 = tpu.concatenate %774, %779 in 1 : vector<4x8xf32>, vector<4x8xf32> -> vector<4x16xf32>
    %781 = vector.extract_strided_slice %661 {offsets = [12, 0], sizes = [4, 8], strides = [1, 1]} : vector<16x8xf32> to vector<4x8xf32>
    %782 = vector.shape_cast %781 : vector<4x8xf32> to vector<4x1x8xf32>
    %783 = vector.extract_strided_slice %663 {offsets = [12, 0], sizes = [8, 8], strides = [1, 1]} : vector<20x8xf32> to vector<8x8xf32>
    %784 = vector.shape_cast %783 : vector<8x8xf32> to vector<1x8x8xf32>
    %785 = vector.broadcast %782 : vector<4x1x8xf32> to vector<4x8x8xf32>
    %786 = vector.broadcast %784 : vector<1x8x8xf32> to vector<4x8x8xf32>
    %787 = arith.mulf %785, %786 : vector<4x8x8xf32>
    %788 = vector.extract_strided_slice %662 {offsets = [12, 0], sizes = [4, 8], strides = [1, 1]} : vector<16x8xf32> to vector<4x8xf32>
    %789 = vector.shape_cast %788 : vector<4x8xf32> to vector<4x1x8xf32>
    %790 = vector.extract_strided_slice %664 {offsets = [12, 0], sizes = [8, 8], strides = [1, 1]} : vector<20x8xf32> to vector<8x8xf32>
    %791 = vector.shape_cast %790 : vector<8x8xf32> to vector<1x8x8xf32>
    %792 = vector.broadcast %789 : vector<4x1x8xf32> to vector<4x8x8xf32>
    %793 = vector.broadcast %791 : vector<1x8x8xf32> to vector<4x8x8xf32>
    %794 = arith.mulf %792, %793 : vector<4x8x8xf32>
    %795 = arith.addf %787, %794 : vector<4x8x8xf32>
    %cst_168 = arith.constant 0.707106769 : f32
    %796 = vector.broadcast %cst_168 : f32 to vector<4x8x8xf32>
    %797 = arith.mulf %795, %796 : vector<4x8x8xf32>
    %cst_169 = arith.constant dense<0xFF800000> : vector<4x8xf32>
    %798 = vector.multi_reduction <maximumf>, %797, %cst_169 [1] : vector<4x8x8xf32> to vector<4x8xf32>
    %799 = vector.shape_cast %798 : vector<4x8xf32> to vector<4x1x8xf32>
    %800 = vector.broadcast %799 : vector<4x1x8xf32> to vector<4x8x8xf32>
    %801 = arith.subf %797, %800 : vector<4x8x8xf32>
    %802 = math.exp %801 : vector<4x8x8xf32>
    %cst_170 = arith.constant dense<0.000000e+00> : vector<4x8xf32>
    %803 = vector.multi_reduction <add>, %802, %cst_170 [1] : vector<4x8x8xf32> to vector<4x8xf32>
    %804 = vector.shape_cast %803 : vector<4x8xf32> to vector<4x1x8xf32>
    %805 = tpu.reciprocal %804 {approx = true} : vector<4x1x8xf32> -> vector<4x1x8xf32>
    %806 = vector.broadcast %805 : vector<4x1x8xf32> to vector<4x8x8xf32>
    %807 = arith.mulf %802, %806 : vector<4x8x8xf32>
    %808 = vector.extract_strided_slice %665 {offsets = [12, 0], sizes = [8, 8], strides = [1, 1]} : vector<20x8xf32> to vector<8x8xf32>
    %809 = vector.shape_cast %808 : vector<8x8xf32> to vector<1x8x8xf32>
    %810 = vector.broadcast %809 : vector<1x8x8xf32> to vector<4x8x8xf32>
    %811 = arith.mulf %807, %810 : vector<4x8x8xf32>
    %cst_171 = arith.constant dense<0.000000e+00> : vector<4x8xf32>
    %812 = vector.multi_reduction <add>, %811, %cst_171 [1] : vector<4x8x8xf32> to vector<4x8xf32>
    %813 = vector.extract_strided_slice %666 {offsets = [12, 0], sizes = [8, 8], strides = [1, 1]} : vector<20x8xf32> to vector<8x8xf32>
    %814 = vector.shape_cast %813 : vector<8x8xf32> to vector<1x8x8xf32>
    %815 = vector.broadcast %814 : vector<1x8x8xf32> to vector<4x8x8xf32>
    %816 = arith.mulf %807, %815 : vector<4x8x8xf32>
    %cst_172 = arith.constant dense<0.000000e+00> : vector<4x8xf32>
    %817 = vector.multi_reduction <add>, %816, %cst_172 [1] : vector<4x8x8xf32> to vector<4x8xf32>
    %818 = tpu.concatenate %812, %817 in 1 : vector<4x8xf32>, vector<4x8xf32> -> vector<4x16xf32>
    %819 = tpu.concatenate %704, %742, %780, %818 in 0 : vector<4x16xf32>, vector<4x16xf32>, vector<4x16xf32>, vector<4x16xf32> -> vector<16x16xf32>
    %c0_173 = arith.constant 0 : index
    %c0_174 = arith.constant 0 : index
    %820 = vector.load %arg21[%c0_173, %c0_174] : memref<17x16xf32, #tpu.memory_space<vmem>>, vector<17x16xf32>
    %821 = vector.extract_strided_slice %820 {offsets = [0, 0], sizes = [16, 16], strides = [1, 1]} : vector<17x16xf32> to vector<16x16xf32>
    %cst_175 = arith.constant dense<0.000000e+00> : vector<16x16xf32>
    %822 = tpu.matmul %819, %821, %cst_175 {dimension_numbers = #tpu.dot_dimension_numbers<[1], [0], [0], [1], [0, 0, 1, 1], [], []>} : vector<16x16xf32>, vector<16x16xf32>, vector<16x16xf32> -> vector<16x16xf32>
    %823 = vector.extract_strided_slice %820 {offsets = [16, 0], sizes = [1, 16], strides = [1, 1]} : vector<17x16xf32> to vector<1x16xf32>
    %824 = vector.broadcast %823 : vector<1x16xf32> to vector<16x16xf32>
    %825 = arith.addf %822, %824 : vector<16x16xf32>
    %826 = arith.addf %645, %825 : vector<16x16xf32>
    %827 = vector.extract_strided_slice %646 {offsets = [0, 0], sizes = [1, 16], strides = [1, 1]} : vector<6x16xf32> to vector<1x16xf32>
    %828 = vector.extract_strided_slice %646 {offsets = [1, 0], sizes = [1, 16], strides = [1, 1]} : vector<6x16xf32> to vector<1x16xf32>
    %cst_176 = arith.constant dense<0.000000e+00> : vector<16xf32>
    %829 = vector.multi_reduction <add>, %826, %cst_176 [1] : vector<16x16xf32> to vector<16xf32>
    %830 = vector.shape_cast %829 : vector<16xf32> to vector<16x1xf32>
    %cst_177 = arith.constant 1.600000e+01 : f32
    %831 = vector.broadcast %cst_177 : f32 to vector<16x1xf32>
    %832 = arith.divf %830, %831 : vector<16x1xf32>
    %833 = vector.broadcast %832 : vector<16x1xf32> to vector<16x16xf32>
    %834 = arith.subf %826, %833 : vector<16x16xf32>
    %835 = arith.mulf %834, %834 : vector<16x16xf32>
    %cst_178 = arith.constant dense<0.000000e+00> : vector<16xf32>
    %836 = vector.multi_reduction <add>, %835, %cst_178 [1] : vector<16x16xf32> to vector<16xf32>
    %837 = vector.shape_cast %836 : vector<16xf32> to vector<16x1xf32>
    %cst_179 = arith.constant 1.600000e+01 : f32
    %838 = vector.broadcast %cst_179 : f32 to vector<16x1xf32>
    %839 = arith.divf %837, %838 : vector<16x1xf32>
    %840 = vector.broadcast %832 : vector<16x1xf32> to vector<16x16xf32>
    %841 = arith.subf %826, %840 : vector<16x16xf32>
    %cst_180 = arith.constant 9.99999974E-6 : f32
    %842 = vector.broadcast %cst_180 : f32 to vector<16x1xf32>
    %843 = arith.addf %839, %842 : vector<16x1xf32>
    %844 = math.rsqrt %843 : vector<16x1xf32>
    %845 = vector.broadcast %844 : vector<16x1xf32> to vector<16x16xf32>
    %846 = arith.mulf %841, %845 : vector<16x16xf32>
    %847 = vector.broadcast %827 : vector<1x16xf32> to vector<16x16xf32>
    %848 = arith.mulf %846, %847 : vector<16x16xf32>
    %849 = vector.broadcast %828 : vector<1x16xf32> to vector<16x16xf32>
    %850 = arith.addf %848, %849 : vector<16x16xf32>
    %c0_181 = arith.constant 0 : index
    %c0_182 = arith.constant 0 : index
    %851 = vector.load %arg22[%c0_181, %c0_182] : memref<17x16xf32, #tpu.memory_space<vmem>>, vector<17x16xf32>
    %852 = vector.extract_strided_slice %851 {offsets = [0, 0], sizes = [16, 16], strides = [1, 1]} : vector<17x16xf32> to vector<16x16xf32>
    %cst_183 = arith.constant dense<0.000000e+00> : vector<16x16xf32>
    %853 = tpu.matmul %850, %852, %cst_183 {dimension_numbers = #tpu.dot_dimension_numbers<[1], [0], [0], [1], [0, 0, 1, 1], [], []>} : vector<16x16xf32>, vector<16x16xf32>, vector<16x16xf32> -> vector<16x16xf32>
    %854 = vector.extract_strided_slice %851 {offsets = [16, 0], sizes = [1, 16], strides = [1, 1]} : vector<17x16xf32> to vector<1x16xf32>
    %855 = vector.broadcast %854 : vector<1x16xf32> to vector<16x16xf32>
    %856 = arith.addf %853, %855 : vector<16x16xf32>
    %c0_184 = arith.constant 0 : index
    %c0_185 = arith.constant 0 : index
    %857 = vector.load %arg23[%c0_184, %c0_185] : memref<17x32xf32, #tpu.memory_space<vmem>>, vector<17x32xf32>
    %858 = vector.extract_strided_slice %857 {offsets = [0, 0], sizes = [16, 32], strides = [1, 1]} : vector<17x32xf32> to vector<16x32xf32>
    %cst_186 = arith.constant dense<0.000000e+00> : vector<20x32xf32>
    %859 = tpu.matmul %194, %858, %cst_186 {dimension_numbers = #tpu.dot_dimension_numbers<[1], [0], [0], [1], [0, 0, 1, 1], [], []>} : vector<20x16xf32>, vector<16x32xf32>, vector<20x32xf32> -> vector<20x32xf32>
    %860 = vector.extract_strided_slice %857 {offsets = [16, 0], sizes = [1, 32], strides = [1, 1]} : vector<17x32xf32> to vector<1x32xf32>
    %861 = vector.broadcast %860 : vector<1x32xf32> to vector<20x32xf32>
    %862 = arith.addf %859, %861 : vector<20x32xf32>
    %863 = vector.extract_strided_slice %856 {offsets = [0, 0], sizes = [16, 8], strides = [1, 1]} : vector<16x16xf32> to vector<16x8xf32>
    %864 = vector.extract_strided_slice %856 {offsets = [0, 8], sizes = [16, 8], strides = [1, 1]} : vector<16x16xf32> to vector<16x8xf32>
    %865 = vector.extract_strided_slice %862 {offsets = [0, 0], sizes = [20, 8], strides = [1, 1]} : vector<20x32xf32> to vector<20x8xf32>
    %866 = vector.extract_strided_slice %862 {offsets = [0, 8], sizes = [20, 8], strides = [1, 1]} : vector<20x32xf32> to vector<20x8xf32>
    %867 = vector.extract_strided_slice %862 {offsets = [0, 16], sizes = [20, 8], strides = [1, 1]} : vector<20x32xf32> to vector<20x8xf32>
    %868 = vector.extract_strided_slice %862 {offsets = [0, 24], sizes = [20, 8], strides = [1, 1]} : vector<20x32xf32> to vector<20x8xf32>
    %869 = vector.extract_strided_slice %863 {offsets = [0, 0], sizes = [4, 8], strides = [1, 1]} : vector<16x8xf32> to vector<4x8xf32>
    %870 = vector.shape_cast %869 : vector<4x8xf32> to vector<4x1x8xf32>
    %871 = vector.extract_strided_slice %865 {offsets = [0, 0], sizes = [8, 8], strides = [1, 1]} : vector<20x8xf32> to vector<8x8xf32>
    %872 = vector.shape_cast %871 : vector<8x8xf32> to vector<1x8x8xf32>
    %873 = vector.broadcast %870 : vector<4x1x8xf32> to vector<4x8x8xf32>
    %874 = vector.broadcast %872 : vector<1x8x8xf32> to vector<4x8x8xf32>
    %875 = arith.mulf %873, %874 : vector<4x8x8xf32>
    %876 = vector.extract_strided_slice %864 {offsets = [0, 0], sizes = [4, 8], strides = [1, 1]} : vector<16x8xf32> to vector<4x8xf32>
    %877 = vector.shape_cast %876 : vector<4x8xf32> to vector<4x1x8xf32>
    %878 = vector.extract_strided_slice %866 {offsets = [0, 0], sizes = [8, 8], strides = [1, 1]} : vector<20x8xf32> to vector<8x8xf32>
    %879 = vector.shape_cast %878 : vector<8x8xf32> to vector<1x8x8xf32>
    %880 = vector.broadcast %877 : vector<4x1x8xf32> to vector<4x8x8xf32>
    %881 = vector.broadcast %879 : vector<1x8x8xf32> to vector<4x8x8xf32>
    %882 = arith.mulf %880, %881 : vector<4x8x8xf32>
    %883 = arith.addf %875, %882 : vector<4x8x8xf32>
    %cst_187 = arith.constant 0.707106769 : f32
    %884 = vector.broadcast %cst_187 : f32 to vector<4x8x8xf32>
    %885 = arith.mulf %883, %884 : vector<4x8x8xf32>
    %cst_188 = arith.constant dense<0xFF800000> : vector<4x8xf32>
    %886 = vector.multi_reduction <maximumf>, %885, %cst_188 [1] : vector<4x8x8xf32> to vector<4x8xf32>
    %887 = vector.shape_cast %886 : vector<4x8xf32> to vector<4x1x8xf32>
    %888 = vector.broadcast %887 : vector<4x1x8xf32> to vector<4x8x8xf32>
    %889 = arith.subf %885, %888 : vector<4x8x8xf32>
    %890 = math.exp %889 : vector<4x8x8xf32>
    %cst_189 = arith.constant dense<0.000000e+00> : vector<4x8xf32>
    %891 = vector.multi_reduction <add>, %890, %cst_189 [1] : vector<4x8x8xf32> to vector<4x8xf32>
    %892 = vector.shape_cast %891 : vector<4x8xf32> to vector<4x1x8xf32>
    %893 = tpu.reciprocal %892 {approx = true} : vector<4x1x8xf32> -> vector<4x1x8xf32>
    %894 = vector.broadcast %893 : vector<4x1x8xf32> to vector<4x8x8xf32>
    %895 = arith.mulf %890, %894 : vector<4x8x8xf32>
    %896 = vector.extract_strided_slice %867 {offsets = [0, 0], sizes = [8, 8], strides = [1, 1]} : vector<20x8xf32> to vector<8x8xf32>
    %897 = vector.shape_cast %896 : vector<8x8xf32> to vector<1x8x8xf32>
    %898 = vector.broadcast %897 : vector<1x8x8xf32> to vector<4x8x8xf32>
    %899 = arith.mulf %895, %898 : vector<4x8x8xf32>
    %cst_190 = arith.constant dense<0.000000e+00> : vector<4x8xf32>
    %900 = vector.multi_reduction <add>, %899, %cst_190 [1] : vector<4x8x8xf32> to vector<4x8xf32>
    %901 = vector.extract_strided_slice %868 {offsets = [0, 0], sizes = [8, 8], strides = [1, 1]} : vector<20x8xf32> to vector<8x8xf32>
    %902 = vector.shape_cast %901 : vector<8x8xf32> to vector<1x8x8xf32>
    %903 = vector.broadcast %902 : vector<1x8x8xf32> to vector<4x8x8xf32>
    %904 = arith.mulf %895, %903 : vector<4x8x8xf32>
    %cst_191 = arith.constant dense<0.000000e+00> : vector<4x8xf32>
    %905 = vector.multi_reduction <add>, %904, %cst_191 [1] : vector<4x8x8xf32> to vector<4x8xf32>
    %906 = tpu.concatenate %900, %905 in 1 : vector<4x8xf32>, vector<4x8xf32> -> vector<4x16xf32>
    %907 = vector.extract_strided_slice %863 {offsets = [4, 0], sizes = [4, 8], strides = [1, 1]} : vector<16x8xf32> to vector<4x8xf32>
    %908 = vector.shape_cast %907 : vector<4x8xf32> to vector<4x1x8xf32>
    %909 = vector.extract_strided_slice %865 {offsets = [4, 0], sizes = [8, 8], strides = [1, 1]} : vector<20x8xf32> to vector<8x8xf32>
    %910 = vector.shape_cast %909 : vector<8x8xf32> to vector<1x8x8xf32>
    %911 = vector.broadcast %908 : vector<4x1x8xf32> to vector<4x8x8xf32>
    %912 = vector.broadcast %910 : vector<1x8x8xf32> to vector<4x8x8xf32>
    %913 = arith.mulf %911, %912 : vector<4x8x8xf32>
    %914 = vector.extract_strided_slice %864 {offsets = [4, 0], sizes = [4, 8], strides = [1, 1]} : vector<16x8xf32> to vector<4x8xf32>
    %915 = vector.shape_cast %914 : vector<4x8xf32> to vector<4x1x8xf32>
    %916 = vector.extract_strided_slice %866 {offsets = [4, 0], sizes = [8, 8], strides = [1, 1]} : vector<20x8xf32> to vector<8x8xf32>
    %917 = vector.shape_cast %916 : vector<8x8xf32> to vector<1x8x8xf32>
    %918 = vector.broadcast %915 : vector<4x1x8xf32> to vector<4x8x8xf32>
    %919 = vector.broadcast %917 : vector<1x8x8xf32> to vector<4x8x8xf32>
    %920 = arith.mulf %918, %919 : vector<4x8x8xf32>
    %921 = arith.addf %913, %920 : vector<4x8x8xf32>
    %cst_192 = arith.constant 0.707106769 : f32
    %922 = vector.broadcast %cst_192 : f32 to vector<4x8x8xf32>
    %923 = arith.mulf %921, %922 : vector<4x8x8xf32>
    %cst_193 = arith.constant dense<0xFF800000> : vector<4x8xf32>
    %924 = vector.multi_reduction <maximumf>, %923, %cst_193 [1] : vector<4x8x8xf32> to vector<4x8xf32>
    %925 = vector.shape_cast %924 : vector<4x8xf32> to vector<4x1x8xf32>
    %926 = vector.broadcast %925 : vector<4x1x8xf32> to vector<4x8x8xf32>
    %927 = arith.subf %923, %926 : vector<4x8x8xf32>
    %928 = math.exp %927 : vector<4x8x8xf32>
    %cst_194 = arith.constant dense<0.000000e+00> : vector<4x8xf32>
    %929 = vector.multi_reduction <add>, %928, %cst_194 [1] : vector<4x8x8xf32> to vector<4x8xf32>
    %930 = vector.shape_cast %929 : vector<4x8xf32> to vector<4x1x8xf32>
    %931 = tpu.reciprocal %930 {approx = true} : vector<4x1x8xf32> -> vector<4x1x8xf32>
    %932 = vector.broadcast %931 : vector<4x1x8xf32> to vector<4x8x8xf32>
    %933 = arith.mulf %928, %932 : vector<4x8x8xf32>
    %934 = vector.extract_strided_slice %867 {offsets = [4, 0], sizes = [8, 8], strides = [1, 1]} : vector<20x8xf32> to vector<8x8xf32>
    %935 = vector.shape_cast %934 : vector<8x8xf32> to vector<1x8x8xf32>
    %936 = vector.broadcast %935 : vector<1x8x8xf32> to vector<4x8x8xf32>
    %937 = arith.mulf %933, %936 : vector<4x8x8xf32>
    %cst_195 = arith.constant dense<0.000000e+00> : vector<4x8xf32>
    %938 = vector.multi_reduction <add>, %937, %cst_195 [1] : vector<4x8x8xf32> to vector<4x8xf32>
    %939 = vector.extract_strided_slice %868 {offsets = [4, 0], sizes = [8, 8], strides = [1, 1]} : vector<20x8xf32> to vector<8x8xf32>
    %940 = vector.shape_cast %939 : vector<8x8xf32> to vector<1x8x8xf32>
    %941 = vector.broadcast %940 : vector<1x8x8xf32> to vector<4x8x8xf32>
    %942 = arith.mulf %933, %941 : vector<4x8x8xf32>
    %cst_196 = arith.constant dense<0.000000e+00> : vector<4x8xf32>
    %943 = vector.multi_reduction <add>, %942, %cst_196 [1] : vector<4x8x8xf32> to vector<4x8xf32>
    %944 = tpu.concatenate %938, %943 in 1 : vector<4x8xf32>, vector<4x8xf32> -> vector<4x16xf32>
    %945 = vector.extract_strided_slice %863 {offsets = [8, 0], sizes = [4, 8], strides = [1, 1]} : vector<16x8xf32> to vector<4x8xf32>
    %946 = vector.shape_cast %945 : vector<4x8xf32> to vector<4x1x8xf32>
    %947 = vector.extract_strided_slice %865 {offsets = [8, 0], sizes = [8, 8], strides = [1, 1]} : vector<20x8xf32> to vector<8x8xf32>
    %948 = vector.shape_cast %947 : vector<8x8xf32> to vector<1x8x8xf32>
    %949 = vector.broadcast %946 : vector<4x1x8xf32> to vector<4x8x8xf32>
    %950 = vector.broadcast %948 : vector<1x8x8xf32> to vector<4x8x8xf32>
    %951 = arith.mulf %949, %950 : vector<4x8x8xf32>
    %952 = vector.extract_strided_slice %864 {offsets = [8, 0], sizes = [4, 8], strides = [1, 1]} : vector<16x8xf32> to vector<4x8xf32>
    %953 = vector.shape_cast %952 : vector<4x8xf32> to vector<4x1x8xf32>
    %954 = vector.extract_strided_slice %866 {offsets = [8, 0], sizes = [8, 8], strides = [1, 1]} : vector<20x8xf32> to vector<8x8xf32>
    %955 = vector.shape_cast %954 : vector<8x8xf32> to vector<1x8x8xf32>
    %956 = vector.broadcast %953 : vector<4x1x8xf32> to vector<4x8x8xf32>
    %957 = vector.broadcast %955 : vector<1x8x8xf32> to vector<4x8x8xf32>
    %958 = arith.mulf %956, %957 : vector<4x8x8xf32>
    %959 = arith.addf %951, %958 : vector<4x8x8xf32>
    %cst_197 = arith.constant 0.707106769 : f32
    %960 = vector.broadcast %cst_197 : f32 to vector<4x8x8xf32>
    %961 = arith.mulf %959, %960 : vector<4x8x8xf32>
    %cst_198 = arith.constant dense<0xFF800000> : vector<4x8xf32>
    %962 = vector.multi_reduction <maximumf>, %961, %cst_198 [1] : vector<4x8x8xf32> to vector<4x8xf32>
    %963 = vector.shape_cast %962 : vector<4x8xf32> to vector<4x1x8xf32>
    %964 = vector.broadcast %963 : vector<4x1x8xf32> to vector<4x8x8xf32>
    %965 = arith.subf %961, %964 : vector<4x8x8xf32>
    %966 = math.exp %965 : vector<4x8x8xf32>
    %cst_199 = arith.constant dense<0.000000e+00> : vector<4x8xf32>
    %967 = vector.multi_reduction <add>, %966, %cst_199 [1] : vector<4x8x8xf32> to vector<4x8xf32>
    %968 = vector.shape_cast %967 : vector<4x8xf32> to vector<4x1x8xf32>
    %969 = tpu.reciprocal %968 {approx = true} : vector<4x1x8xf32> -> vector<4x1x8xf32>
    %970 = vector.broadcast %969 : vector<4x1x8xf32> to vector<4x8x8xf32>
    %971 = arith.mulf %966, %970 : vector<4x8x8xf32>
    %972 = vector.extract_strided_slice %867 {offsets = [8, 0], sizes = [8, 8], strides = [1, 1]} : vector<20x8xf32> to vector<8x8xf32>
    %973 = vector.shape_cast %972 : vector<8x8xf32> to vector<1x8x8xf32>
    %974 = vector.broadcast %973 : vector<1x8x8xf32> to vector<4x8x8xf32>
    %975 = arith.mulf %971, %974 : vector<4x8x8xf32>
    %cst_200 = arith.constant dense<0.000000e+00> : vector<4x8xf32>
    %976 = vector.multi_reduction <add>, %975, %cst_200 [1] : vector<4x8x8xf32> to vector<4x8xf32>
    %977 = vector.extract_strided_slice %868 {offsets = [8, 0], sizes = [8, 8], strides = [1, 1]} : vector<20x8xf32> to vector<8x8xf32>
    %978 = vector.shape_cast %977 : vector<8x8xf32> to vector<1x8x8xf32>
    %979 = vector.broadcast %978 : vector<1x8x8xf32> to vector<4x8x8xf32>
    %980 = arith.mulf %971, %979 : vector<4x8x8xf32>
    %cst_201 = arith.constant dense<0.000000e+00> : vector<4x8xf32>
    %981 = vector.multi_reduction <add>, %980, %cst_201 [1] : vector<4x8x8xf32> to vector<4x8xf32>
    %982 = tpu.concatenate %976, %981 in 1 : vector<4x8xf32>, vector<4x8xf32> -> vector<4x16xf32>
    %983 = vector.extract_strided_slice %863 {offsets = [12, 0], sizes = [4, 8], strides = [1, 1]} : vector<16x8xf32> to vector<4x8xf32>
    %984 = vector.shape_cast %983 : vector<4x8xf32> to vector<4x1x8xf32>
    %985 = vector.extract_strided_slice %865 {offsets = [12, 0], sizes = [8, 8], strides = [1, 1]} : vector<20x8xf32> to vector<8x8xf32>
    %986 = vector.shape_cast %985 : vector<8x8xf32> to vector<1x8x8xf32>
    %987 = vector.broadcast %984 : vector<4x1x8xf32> to vector<4x8x8xf32>
    %988 = vector.broadcast %986 : vector<1x8x8xf32> to vector<4x8x8xf32>
    %989 = arith.mulf %987, %988 : vector<4x8x8xf32>
    %990 = vector.extract_strided_slice %864 {offsets = [12, 0], sizes = [4, 8], strides = [1, 1]} : vector<16x8xf32> to vector<4x8xf32>
    %991 = vector.shape_cast %990 : vector<4x8xf32> to vector<4x1x8xf32>
    %992 = vector.extract_strided_slice %866 {offsets = [12, 0], sizes = [8, 8], strides = [1, 1]} : vector<20x8xf32> to vector<8x8xf32>
    %993 = vector.shape_cast %992 : vector<8x8xf32> to vector<1x8x8xf32>
    %994 = vector.broadcast %991 : vector<4x1x8xf32> to vector<4x8x8xf32>
    %995 = vector.broadcast %993 : vector<1x8x8xf32> to vector<4x8x8xf32>
    %996 = arith.mulf %994, %995 : vector<4x8x8xf32>
    %997 = arith.addf %989, %996 : vector<4x8x8xf32>
    %cst_202 = arith.constant 0.707106769 : f32
    %998 = vector.broadcast %cst_202 : f32 to vector<4x8x8xf32>
    %999 = arith.mulf %997, %998 : vector<4x8x8xf32>
    %cst_203 = arith.constant dense<0xFF800000> : vector<4x8xf32>
    %1000 = vector.multi_reduction <maximumf>, %999, %cst_203 [1] : vector<4x8x8xf32> to vector<4x8xf32>
    %1001 = vector.shape_cast %1000 : vector<4x8xf32> to vector<4x1x8xf32>
    %1002 = vector.broadcast %1001 : vector<4x1x8xf32> to vector<4x8x8xf32>
    %1003 = arith.subf %999, %1002 : vector<4x8x8xf32>
    %1004 = math.exp %1003 : vector<4x8x8xf32>
    %cst_204 = arith.constant dense<0.000000e+00> : vector<4x8xf32>
    %1005 = vector.multi_reduction <add>, %1004, %cst_204 [1] : vector<4x8x8xf32> to vector<4x8xf32>
    %1006 = vector.shape_cast %1005 : vector<4x8xf32> to vector<4x1x8xf32>
    %1007 = tpu.reciprocal %1006 {approx = true} : vector<4x1x8xf32> -> vector<4x1x8xf32>
    %1008 = vector.broadcast %1007 : vector<4x1x8xf32> to vector<4x8x8xf32>
    %1009 = arith.mulf %1004, %1008 : vector<4x8x8xf32>
    %1010 = vector.extract_strided_slice %867 {offsets = [12, 0], sizes = [8, 8], strides = [1, 1]} : vector<20x8xf32> to vector<8x8xf32>
    %1011 = vector.shape_cast %1010 : vector<8x8xf32> to vector<1x8x8xf32>
    %1012 = vector.broadcast %1011 : vector<1x8x8xf32> to vector<4x8x8xf32>
    %1013 = arith.mulf %1009, %1012 : vector<4x8x8xf32>
    %cst_205 = arith.constant dense<0.000000e+00> : vector<4x8xf32>
    %1014 = vector.multi_reduction <add>, %1013, %cst_205 [1] : vector<4x8x8xf32> to vector<4x8xf32>
    %1015 = vector.extract_strided_slice %868 {offsets = [12, 0], sizes = [8, 8], strides = [1, 1]} : vector<20x8xf32> to vector<8x8xf32>
    %1016 = vector.shape_cast %1015 : vector<8x8xf32> to vector<1x8x8xf32>
    %1017 = vector.broadcast %1016 : vector<1x8x8xf32> to vector<4x8x8xf32>
    %1018 = arith.mulf %1009, %1017 : vector<4x8x8xf32>
    %cst_206 = arith.constant dense<0.000000e+00> : vector<4x8xf32>
    %1019 = vector.multi_reduction <add>, %1018, %cst_206 [1] : vector<4x8x8xf32> to vector<4x8xf32>
    %1020 = tpu.concatenate %1014, %1019 in 1 : vector<4x8xf32>, vector<4x8xf32> -> vector<4x16xf32>
    %1021 = tpu.concatenate %906, %944, %982, %1020 in 0 : vector<4x16xf32>, vector<4x16xf32>, vector<4x16xf32>, vector<4x16xf32> -> vector<16x16xf32>
    %c0_207 = arith.constant 0 : index
    %c0_208 = arith.constant 0 : index
    %1022 = vector.load %arg24[%c0_207, %c0_208] : memref<17x16xf32, #tpu.memory_space<vmem>>, vector<17x16xf32>
    %1023 = vector.extract_strided_slice %1022 {offsets = [0, 0], sizes = [16, 16], strides = [1, 1]} : vector<17x16xf32> to vector<16x16xf32>
    %cst_209 = arith.constant dense<0.000000e+00> : vector<16x16xf32>
    %1024 = tpu.matmul %1021, %1023, %cst_209 {dimension_numbers = #tpu.dot_dimension_numbers<[1], [0], [0], [1], [0, 0, 1, 1], [], []>} : vector<16x16xf32>, vector<16x16xf32>, vector<16x16xf32> -> vector<16x16xf32>
    %1025 = vector.extract_strided_slice %1022 {offsets = [16, 0], sizes = [1, 16], strides = [1, 1]} : vector<17x16xf32> to vector<1x16xf32>
    %1026 = vector.broadcast %1025 : vector<1x16xf32> to vector<16x16xf32>
    %1027 = arith.addf %1024, %1026 : vector<16x16xf32>
    %1028 = arith.addf %850, %1027 : vector<16x16xf32>
    %1029 = vector.extract_strided_slice %646 {offsets = [2, 0], sizes = [1, 16], strides = [1, 1]} : vector<6x16xf32> to vector<1x16xf32>
    %1030 = vector.extract_strided_slice %646 {offsets = [3, 0], sizes = [1, 16], strides = [1, 1]} : vector<6x16xf32> to vector<1x16xf32>
    %cst_210 = arith.constant dense<0.000000e+00> : vector<16xf32>
    %1031 = vector.multi_reduction <add>, %1028, %cst_210 [1] : vector<16x16xf32> to vector<16xf32>
    %1032 = vector.shape_cast %1031 : vector<16xf32> to vector<16x1xf32>
    %cst_211 = arith.constant 1.600000e+01 : f32
    %1033 = vector.broadcast %cst_211 : f32 to vector<16x1xf32>
    %1034 = arith.divf %1032, %1033 : vector<16x1xf32>
    %1035 = vector.broadcast %1034 : vector<16x1xf32> to vector<16x16xf32>
    %1036 = arith.subf %1028, %1035 : vector<16x16xf32>
    %1037 = arith.mulf %1036, %1036 : vector<16x16xf32>
    %cst_212 = arith.constant dense<0.000000e+00> : vector<16xf32>
    %1038 = vector.multi_reduction <add>, %1037, %cst_212 [1] : vector<16x16xf32> to vector<16xf32>
    %1039 = vector.shape_cast %1038 : vector<16xf32> to vector<16x1xf32>
    %cst_213 = arith.constant 1.600000e+01 : f32
    %1040 = vector.broadcast %cst_213 : f32 to vector<16x1xf32>
    %1041 = arith.divf %1039, %1040 : vector<16x1xf32>
    %1042 = vector.broadcast %1034 : vector<16x1xf32> to vector<16x16xf32>
    %1043 = arith.subf %1028, %1042 : vector<16x16xf32>
    %cst_214 = arith.constant 9.99999974E-6 : f32
    %1044 = vector.broadcast %cst_214 : f32 to vector<16x1xf32>
    %1045 = arith.addf %1041, %1044 : vector<16x1xf32>
    %1046 = math.rsqrt %1045 : vector<16x1xf32>
    %1047 = vector.broadcast %1046 : vector<16x1xf32> to vector<16x16xf32>
    %1048 = arith.mulf %1043, %1047 : vector<16x16xf32>
    %1049 = vector.broadcast %1029 : vector<1x16xf32> to vector<16x16xf32>
    %1050 = arith.mulf %1048, %1049 : vector<16x16xf32>
    %1051 = vector.broadcast %1030 : vector<1x16xf32> to vector<16x16xf32>
    %1052 = arith.addf %1050, %1051 : vector<16x16xf32>
    %c0_215 = arith.constant 0 : index
    %c0_216 = arith.constant 0 : index
    %1053 = vector.load %arg25[%c0_215, %c0_216] : memref<17x32xf32, #tpu.memory_space<vmem>>, vector<17x32xf32>
    %1054 = vector.extract_strided_slice %1053 {offsets = [0, 0], sizes = [16, 32], strides = [1, 1]} : vector<17x32xf32> to vector<16x32xf32>
    %cst_217 = arith.constant dense<0.000000e+00> : vector<16x32xf32>
    %1055 = tpu.matmul %1052, %1054, %cst_217 {dimension_numbers = #tpu.dot_dimension_numbers<[1], [0], [0], [1], [0, 0, 1, 1], [], []>} : vector<16x16xf32>, vector<16x32xf32>, vector<16x32xf32> -> vector<16x32xf32>
    %1056 = vector.extract_strided_slice %1053 {offsets = [16, 0], sizes = [1, 32], strides = [1, 1]} : vector<17x32xf32> to vector<1x32xf32>
    %1057 = vector.broadcast %1056 : vector<1x32xf32> to vector<16x32xf32>
    %1058 = arith.addf %1055, %1057 : vector<16x32xf32>
    %cst_218 = arith.constant 0.000000e+00 : f32
    %1059 = vector.broadcast %cst_218 : f32 to vector<16x32xf32>
    %1060 = arith.maximumf %1058, %1059 : vector<16x32xf32>
    %c0_219 = arith.constant 0 : index
    %c0_220 = arith.constant 0 : index
    %1061 = vector.load %arg26[%c0_219, %c0_220] : memref<33x16xf32, #tpu.memory_space<vmem>>, vector<33x16xf32>
    %1062 = vector.extract_strided_slice %1061 {offsets = [0, 0], sizes = [32, 16], strides = [1, 1]} : vector<33x16xf32> to vector<32x16xf32>
    %cst_221 = arith.constant dense<0.000000e+00> : vector<16x16xf32>
    %1063 = tpu.matmul %1060, %1062, %cst_221 {dimension_numbers = #tpu.dot_dimension_numbers<[1], [0], [0], [1], [0, 0, 1, 1], [], []>} : vector<16x32xf32>, vector<32x16xf32>, vector<16x16xf32> -> vector<16x16xf32>
    %1064 = vector.extract_strided_slice %1061 {offsets = [32, 0], sizes = [1, 16], strides = [1, 1]} : vector<33x16xf32> to vector<1x16xf32>
    %1065 = vector.broadcast %1064 : vector<1x16xf32> to vector<16x16xf32>
    %1066 = arith.addf %1063, %1065 : vector<16x16xf32>
    %1067 = arith.addf %1052, %1066 : vector<16x16xf32>
    %1068 = vector.extract_strided_slice %646 {offsets = [4, 0], sizes = [1, 16], strides = [1, 1]} : vector<6x16xf32> to vector<1x16xf32>
    %1069 = vector.extract_strided_slice %646 {offsets = [5, 0], sizes = [1, 16], strides = [1, 1]} : vector<6x16xf32> to vector<1x16xf32>
    %cst_222 = arith.constant dense<0.000000e+00> : vector<16xf32>
    %1070 = vector.multi_reduction <add>, %1067, %cst_222 [1] : vector<16x16xf32> to vector<16xf32>
    %1071 = vector.shape_cast %1070 : vector<16xf32> to vector<16x1xf32>
    %cst_223 = arith.constant 1.600000e+01 : f32
    %1072 = vector.broadcast %cst_223 : f32 to vector<16x1xf32>
    %1073 = arith.divf %1071, %1072 : vector<16x1xf32>
    %1074 = vector.broadcast %1073 : vector<16x1xf32> to vector<16x16xf32>
    %1075 = arith.subf %1067, %1074 : vector<16x16xf32>
    %1076 = arith.mulf %1075, %1075 : vector<16x16xf32>
    %cst_224 = arith.constant dense<0.000000e+00> : vector<16xf32>
    %1077 = vector.multi_reduction <add>, %1076, %cst_224 [1] : vector<16x16xf32> to vector<16xf32>
    %1078 = vector.shape_cast %1077 : vector<16xf32> to vector<16x1xf32>
    %cst_225 = arith.constant 1.600000e+01 : f32
    %1079 = vector.broadcast %cst_225 : f32 to vector<16x1xf32>
    %1080 = arith.divf %1078, %1079 : vector<16x1xf32>
    %1081 = vector.broadcast %1073 : vector<16x1xf32> to vector<16x16xf32>
    %1082 = arith.subf %1067, %1081 : vector<16x16xf32>
    %cst_226 = arith.constant 9.99999974E-6 : f32
    %1083 = vector.broadcast %cst_226 : f32 to vector<16x1xf32>
    %1084 = arith.addf %1080, %1083 : vector<16x1xf32>
    %1085 = math.rsqrt %1084 : vector<16x1xf32>
    %1086 = vector.broadcast %1085 : vector<16x1xf32> to vector<16x16xf32>
    %1087 = arith.mulf %1082, %1086 : vector<16x16xf32>
    %1088 = vector.broadcast %1068 : vector<1x16xf32> to vector<16x16xf32>
    %1089 = arith.mulf %1087, %1088 : vector<16x16xf32>
    %1090 = vector.broadcast %1069 : vector<1x16xf32> to vector<16x16xf32>
    %1091 = arith.addf %1089, %1090 : vector<16x16xf32>
    %c0_227 = arith.constant 0 : index
    %c0_228 = arith.constant 0 : index
    %1092 = vector.load %arg11[%c0_227, %c0_228] : memref<17x32xf32, #tpu.memory_space<vmem>>, vector<17x32xf32>
    %1093 = vector.extract_strided_slice %1092 {offsets = [0, 0], sizes = [16, 32], strides = [1, 1]} : vector<17x32xf32> to vector<16x32xf32>
    %cst_229 = arith.constant dense<0.000000e+00> : vector<16x32xf32>
    %1094 = tpu.matmul %1091, %1093, %cst_229 {dimension_numbers = #tpu.dot_dimension_numbers<[1], [0], [0], [1], [0, 0, 1, 1], [], []>} : vector<16x16xf32>, vector<16x32xf32>, vector<16x32xf32> -> vector<16x32xf32>
    %1095 = vector.extract_strided_slice %1092 {offsets = [16, 0], sizes = [1, 32], strides = [1, 1]} : vector<17x32xf32> to vector<1x32xf32>
    %1096 = vector.broadcast %1095 : vector<1x32xf32> to vector<16x32xf32>
    %1097 = arith.addf %1094, %1096 : vector<16x32xf32>
    %cst_230 = arith.constant 0.000000e+00 : f32
    %1098 = vector.broadcast %cst_230 : f32 to vector<16x32xf32>
    %1099 = arith.maximumf %1097, %1098 : vector<16x32xf32>
    %1100 = arith.addf %173, %1099 : vector<16x32xf32>
    %c0_231 = arith.constant 0 : index
    %c0_232 = arith.constant 0 : index
    %c0_233 = arith.constant 0 : index
    %1101 = vector.load %arg28[%c0_231, %c0_232, %c0_233] : memref<1x16x32xf32, #tpu.memory_space<vmem>>, vector<1x16x32xf32>
    %1102 = vector.shape_cast %1101 : vector<1x16x32xf32> to vector<16x32xf32>
    %1103 = vector.shape_cast %1100 : vector<16x32xf32> to vector<1x16x32xf32>
    tpu.vector_store %arg28[%c0_231, %c0_232, %c0_233], %1103 {strides = array<i32>} : memref<1x16x32xf32, #tpu.memory_space<vmem>>, vector<1x16x32xf32>,
    return
  }
  func.func @transform_0(%arg0: i32) -> (i32, i32, i32) {
    %c0_i32 = arith.constant 0 : i32
    %c0_i32_0 = arith.constant 0 : i32
    %c0_i32_1 = arith.constant 0 : i32
    return %arg0, %c0_i32, %c0_i32_0 : i32, i32, i32
  }
  func.func @transform_1(%arg0: i32) -> (i32, i32, i32) {
    %c0_i32 = arith.constant 0 : i32
    %c0_i32_0 = arith.constant 0 : i32
    %c0_i32_1 = arith.constant 0 : i32
    return %arg0, %c0_i32, %c0_i32_0 : i32, i32, i32
  }
  func.func @transform_2(%arg0: i32) -> (i32, i32, i32) {
    %c0_i32 = arith.constant 0 : i32
    %c0_i32_0 = arith.constant 0 : i32
    %c0_i32_1 = arith.constant 0 : i32
    return %arg0, %c0_i32, %c0_i32_0 : i32, i32, i32
  }
  func.func @transform_3(%arg0: i32) -> (i32, i32, i32, i32) {
    %c0_i32 = arith.constant 0 : i32
    %c0_i32_0 = arith.constant 0 : i32
    %c0_i32_1 = arith.constant 0 : i32
    %c0_i32_2 = arith.constant 0 : i32
    return %arg0, %c0_i32, %c0_i32_0, %c0_i32_1 : i32, i32, i32, i32
  }
  func.func @transform_4(%arg0: i32) -> (i32, i32) {
    %c0_i32 = arith.constant 0 : i32
    %c0_i32_0 = arith.constant 0 : i32
    %c0_i32_1 = arith.constant 0 : i32
    return %c0_i32, %c0_i32_0 : i32, i32
  }
  func.func @transform_5(%arg0: i32) -> (i32, i32) {
    %c0_i32 = arith.constant 0 : i32
    %c0_i32_0 = arith.constant 0 : i32
    %c0_i32_1 = arith.constant 0 : i32
    return %c0_i32, %c0_i32_0 : i32, i32
  }
  func.func @transform_6(%arg0: i32) -> (i32, i32) {
    %c0_i32 = arith.constant 0 : i32
    %c0_i32_0 = arith.constant 0 : i32
    %c0_i32_1 = arith.constant 0 : i32
    return %c0_i32, %c0_i32_0 : i32, i32
  }
  func.func @transform_7(%arg0: i32) -> (i32, i32) {
    %c0_i32 = arith.constant 0 : i32
    %c0_i32_0 = arith.constant 0 : i32
    %c0_i32_1 = arith.constant 0 : i32
    return %c0_i32, %c0_i32_0 : i32, i32
  }
  func.func @transform_8(%arg0: i32) -> (i32, i32) {
    %c0_i32 = arith.constant 0 : i32
    %c0_i32_0 = arith.constant 0 : i32
    %c0_i32_1 = arith.constant 0 : i32
    return %c0_i32, %c0_i32_0 : i32, i32
  }
  func.func @transform_9(%arg0: i32) -> (i32, i32) {
    %c0_i32 = arith.constant 0 : i32
    %c0_i32_0 = arith.constant 0 : i32
    %c0_i32_1 = arith.constant 0 : i32
    return %c0_i32, %c0_i32_0 : i32, i32
  }
  func.func @transform_10(%arg0: i32) -> (i32, i32) {
    %c0_i32 = arith.constant 0 : i32
    %c0_i32_0 = arith.constant 0 : i32
    %c0_i32_1 = arith.constant 0 : i32
    return %c0_i32, %c0_i32_0 : i32, i32
  }
  func.func @transform_11(%arg0: i32) -> (i32, i32) {
    %c0_i32 = arith.constant 0 : i32
    %c0_i32_0 = arith.constant 0 : i32
    %c0_i32_1 = arith.constant 0 : i32
    return %c0_i32, %c0_i32_0 : i32, i32
  }
  func.func @transform_12(%arg0: i32) -> (i32, i32) {
    %c0_i32 = arith.constant 0 : i32
    %c0_i32_0 = arith.constant 0 : i32
    %c0_i32_1 = arith.constant 0 : i32
    return %c0_i32, %c0_i32_0 : i32, i32
  }
  func.func @transform_13(%arg0: i32) -> (i32, i32) {
    %c0_i32 = arith.constant 0 : i32
    %c0_i32_0 = arith.constant 0 : i32
    %c0_i32_1 = arith.constant 0 : i32
    return %c0_i32, %c0_i32_0 : i32, i32
  }
  func.func @transform_14(%arg0: i32) -> (i32, i32) {
    %c0_i32 = arith.constant 0 : i32
    %c0_i32_0 = arith.constant 0 : i32
    %c0_i32_1 = arith.constant 0 : i32
    return %c0_i32, %c0_i32_0 : i32, i32
  }
  func.func @transform_15(%arg0: i32) -> (i32, i32) {
    %c0_i32 = arith.constant 0 : i32
    %c0_i32_0 = arith.constant 0 : i32
    %c0_i32_1 = arith.constant 0 : i32
    return %c0_i32, %c0_i32_0 : i32, i32
  }
  func.func @transform_16(%arg0: i32) -> (i32, i32) {
    %c0_i32 = arith.constant 0 : i32
    %c0_i32_0 = arith.constant 0 : i32
    %c0_i32_1 = arith.constant 0 : i32
    return %c0_i32, %c0_i32_0 : i32, i32
  }
  func.func @transform_17(%arg0: i32) -> (i32, i32) {
    %c0_i32 = arith.constant 0 : i32
    %c0_i32_0 = arith.constant 0 : i32
    %c0_i32_1 = arith.constant 0 : i32
    return %c0_i32, %c0_i32_0 : i32, i32
  }
  func.func @transform_18(%arg0: i32) -> (i32, i32) {
    %c0_i32 = arith.constant 0 : i32
    %c0_i32_0 = arith.constant 0 : i32
    %c0_i32_1 = arith.constant 0 : i32
    return %c0_i32, %c0_i32_0 : i32, i32
  }
  func.func @transform_19(%arg0: i32) -> (i32, i32) {
    %c0_i32 = arith.constant 0 : i32
    %c0_i32_0 = arith.constant 0 : i32
    %c0_i32_1 = arith.constant 0 : i32
    return %c0_i32, %c0_i32_0 : i32, i32
  }
  func.func @transform_20(%arg0: i32) -> (i32, i32) {
    %c0_i32 = arith.constant 0 : i32
    %c0_i32_0 = arith.constant 0 : i32
    %c0_i32_1 = arith.constant 0 : i32
    return %c0_i32, %c0_i32_0 : i32, i32
  }
  func.func @transform_21(%arg0: i32) -> (i32, i32) {
    %c0_i32 = arith.constant 0 : i32
    %c0_i32_0 = arith.constant 0 : i32
    %c0_i32_1 = arith.constant 0 : i32
    return %c0_i32, %c0_i32_0 : i32, i32
  }
  func.func @transform_22(%arg0: i32) -> (i32, i32) {
    %c0_i32 = arith.constant 0 : i32
    %c0_i32_0 = arith.constant 0 : i32
    %c0_i32_1 = arith.constant 0 : i32
    return %c0_i32, %c0_i32_0 : i32, i32
  }
  func.func @transform_23(%arg0: i32) -> (i32, i32) {
    %c0_i32 = arith.constant 0 : i32
    %c0_i32_0 = arith.constant 0 : i32
    %c0_i32_1 = arith.constant 0 : i32
    return %c0_i32, %c0_i32_0 : i32, i32
  }
  func.func @transform_24(%arg0: i32) -> (i32, i32) {
    %c0_i32 = arith.constant 0 : i32
    %c0_i32_0 = arith.constant 0 : i32
    %c0_i32_1 = arith.constant 0 : i32
    return %c0_i32, %c0_i32_0 : i32, i32
  }
  func.func @transform_25(%arg0: i32) -> (i32, i32) {
    %c0_i32 = arith.constant 0 : i32
    %c0_i32_0 = arith.constant 0 : i32
    %c0_i32_1 = arith.constant 0 : i32
    return %c0_i32, %c0_i32_0 : i32, i32
  }
  func.func @transform_26(%arg0: i32) -> (i32, i32) {
    %c0_i32 = arith.constant 0 : i32
    %c0_i32_0 = arith.constant 0 : i32
    %c0_i32_1 = arith.constant 0 : i32
    return %c0_i32, %c0_i32_0 : i32, i32
  }
  func.func @transform_27(%arg0: i32) -> (i32, i32, i32) {
    %c0_i32 = arith.constant 0 : i32
    %c0_i32_0 = arith.constant 0 : i32
    %c0_i32_1 = arith.constant 0 : i32
    return %arg0, %c0_i32, %c0_i32_0 : i32, i32, i32
  }
  func.func @transform_28(%arg0: i32) -> (i32, i32, i32) {
    %c0_i32 = arith.constant 0 : i32
    %c0_i32_0 = arith.constant 0 : i32
    %c0_i32_1 = arith.constant 0 : i32
    return %arg0, %c0_i32, %c0_i32_0 : i32, i32, i32
  }
  func.func @transform_29(%arg0: i32) -> (i32, i32, i32, i32) {
    %c0_i32 = arith.constant 0 : i32
    %c0_i32_0 = arith.constant 0 : i32
    %c0_i32_1 = arith.constant 0 : i32
    %c0_i32_2 = arith.constant 0 : i32
    return %arg0, %c0_i32, %c0_i32_0, %c0_i32_1 : i32, i32, i32, i32
  }
}

</mosaic_0001>

<bundles_post_ra>
// kernel: masknet_forward.1
= control target key start
LH: loop header
LB: loop body
LE: loop exit
PB: predicated region body
PF: predicated region fallthrough
CT: control target
= control target key end

     0   :  { %s8766_s6 = smov 1   ;;  %s8767_s10 = smov 2   ;;  %s12119_s0 = inlined_call_operand.smem [shape: u32[30], index: -1, kind: input, shape index: {}] }
   0x1   :  { %s8817_s5 = sld [smem:[%s12119_s0]]   ;;  %s8768_s14 = smov 3  }
   0x2   :  { %s8822_s9 = sld [smem:[%s12119_s0 + %s8766_s6]]   ;;  %s8769_s18 = smov 4  }
   0x3   :  { %s8827_s13 = sld [smem:[%s12119_s0 + %s8767_s10]]   ;;  %s8770_s22 = smov 5  }
   0x4   :  { %s8832_s17 = sld [smem:[%s12119_s0 + %s8768_s14]]   ;;  %s8771_s26 = smov 6  }
   0x5   :  { %s8837_s21 = sld [smem:[%s12119_s0 + %s8769_s18]]   ;;  %s8772_s30 = smov 7  }
   0x6   :  { %s8842_s25 = sld [smem:[%s12119_s0 + %s8770_s22]]   ;;  %s8773_s4 = smov 8  }
   0x7   :  { %12183 = sst [smem:[#allocation8_spill]] %s8817_s5  ;;  %s8774_s10 = smov 9  }
   0x8   :  { %12184 = sst [smem:[#allocation9_spill]] %s8822_s9  ;;  %s8775_s15 = smov 10  }
   0x9   :  { %12185 = sst [smem:[#allocation10_spill]] %s8827_s13  ;;  %s8776_s20 = smov 11  }
   0xa   :  { %s8847_s29 = sld [smem:[%s12119_s0 + %s8771_s26]]   ;;  %s8777_s26 = smov 12  }
   0xb   :  { %s8852_s3 = sld [smem:[%s12119_s0 + %s8772_s30]]   ;;  %s8778_s1 = smov 13  }
   0xc   :  { %s8857_s8 = sld [smem:[%s12119_s0 + %s8773_s4]]   ;;  %s8779_s7 = smov 14  }
   0xd   :  { %s8862_s14 = sld [smem:[%s12119_s0 + %s8774_s10]]   ;;  %s8781_s22 = smov 16  }
   0xe   :  { %s8867_s19 = sld [smem:[%s12119_s0 + %s8775_s15]]   ;;  %s8780_s15 = smov 15  }
   0xf   :  { %s8872_s24 = sld [smem:[%s12119_s0 + %s8776_s20]]   ;;  %s8782_s28 = smov 17  }
  0x10   :  { %s8877_s30 = sld [smem:[%s12119_s0 + %s8777_s26]]  }
  0x11   :  { %12186 = sst [smem:[#allocation11_spill]] %s8852_s3 }
  0x12   :  { %12187 = sst [smem:[#allocation12_spill]] %s8857_s8 }
  0x13   :  { %12188 = sst [smem:[#allocation13_spill]] %s8862_s14 }
  0x14   :  { %12189 = sst [smem:[#allocation14_spill]] %s8867_s19 }
  0x15   :  { %s8882_s6 = sld [smem:[%s12119_s0 + %s8778_s1]]  }
  0x16   :  { %s8887_s12 = sld [smem:[%s12119_s0 + %s8779_s7]]   ;;  %s8783_s7 = smov 18  }
  0x17   :  { %s8892_s20 = sld [smem:[%s12119_s0 + %s8780_s15]]   ;;  %s8784_s15 = smov 19  }
  0x18   :  { %s8897_s27 = sld [smem:[%s12119_s0 + %s8781_s22]]   ;;  %s8785_s22 = smov 20  }
  0x19   :  { %s8902_s4 = sld [smem:[%s12119_s0 + %s8782_s28]]   ;;  %s8786_s28 = smov 21  }
  0x1a   :  { %s8907_s19 = sld [smem:[%s12119_s0 + %s8783_s7]]   ;;  %s8787_s7 = smov 22  }
  0x1b   :  { %12190 = sst [smem:[#allocation15_spill]] %s8882_s6 }
  0x1c   :  { %12191 = sst [smem:[#allocation16_spill]] %s8887_s12 }
  0x1d   :  { %12192 = sst [smem:[#allocation17_spill]] %s8892_s20 }
  0x1e   :  { %12193 = sst [smem:[#allocation18_spill]] %s8897_s27 }
  0x1f   :  { %12194 = sst [smem:[#allocation19_spill]] %s8902_s4 }
  0x20   :  { %s8912_s20 = sld [smem:[%s12119_s0 + %s8784_s15]]   ;;  %s8788_s15 = smov 23  }
  0x21   :  { %s8917_s27 = sld [smem:[%s12119_s0 + %s8785_s22]]   ;;  %s8789_s22 = smov 24  }
  0x22   :  { %s8922_s4 = sld [smem:[%s12119_s0 + %s8786_s28]]   ;;  %s8790_s28 = smov 25  }
  0x23   :  { %s8927_s12 = sld [smem:[%s12119_s0 + %s8787_s7]]   ;;  %s8791_s7 = smov 26  }
  0x26   :  { %12195 = sst [smem:[#allocation20_spill]] %s8912_s20 }
  0x27   :  { %12196 = sst [smem:[#allocation21_spill]] %s8917_s27 }
  0x28   :  { %12197 = sst [smem:[#allocation22_spill]] %s8922_s4 }
  0x29   :  { %12198 = sst [smem:[#allocation23_spill]] %s8927_s12 }
  0x2a   :  { %s8932_s20 = sld [smem:[%s12119_s0 + %s8788_s15]]   ;;  %s8792_s15 = smov 27  }
  0x2b   :  { %s8937_s27 = sld [smem:[%s12119_s0 + %s8789_s22]]   ;;  %s8793_s22 = smov 28  }
  0x2c   :  { %s8942_s4 = sld [smem:[%s12119_s0 + %s8790_s28]]   ;;  %s8794_s28 = smov 29  }
  0x2d   :  { %s8947_s12 = sld [smem:[%s12119_s0 + %s8791_s7]]  }
  0x30   :  { %12199 = sst [smem:[#allocation24_spill]] %s8932_s20 }
  0x31   :  { %12200 = sst [smem:[#allocation25_spill]] %s8937_s27 }
  0x32   :  { %12201 = sst [smem:[#allocation26_spill]] %s8942_s4 }
  0x33   :  { %12202 = sst [smem:[#allocation27_spill]] %s8947_s12 }
  0x34   :  { %s8952_s20 = sld [smem:[%s12119_s0 + %s8792_s15]]  }
  0x35   :  { %s8957_s27 = sld [smem:[%s12119_s0 + %s8793_s22]]  }
  0x36   :  { %s8962_s4 = sld [smem:[%s12119_s0 + %s8794_s28]]  }
  0x3c   :  { %12203 = sst [smem:[#allocation28_spill]] %s8962_s4 }
  0x3d   :  { %65 = vsyncpa [#allocation3], 0 }
  0x3e   :  { %67 = vsyncpa [#allocation3 + $0x1], 0 }
  0x3f   :  { %68 = vsyncpa [#allocation5], 0 }
  0x40   :  { %70 = vsyncpa [#allocation5 + $0x1], 0  ;;  %s8964_s7 = smov 0   ;;  %s8966_s10 = smov 0  }
  0x41   :  { %s8968_s11 = smov 0   ;;  %s8970_s15 = smov 0  }
  0x42 LB: > { %s12204_s4 = sld [smem:[#allocation28_spill]]  ;;  %s8985_s0 = sadd.s32 4294967295, %s8764_s15   ;;  %s8756_s10 = sphi %s8966_s10, %s12308_s10   ;;  %s8752_s7 = sphi %s8964_s7, %s12307_s7   ;;  %s8764_s15 = sphi %s8970_s15, %s12310_s15   ;;  %s8760_s11 = sphi %s8968_s11, %s12309_s11  }
  0x43   : > { %s12205_s14 = sld [smem:[#allocation13_spill]]  ;;  %s7900_s16 = sadd.s32 4294967294, %s8764_s15  }
  0x44   : > { %s12206_s12 = sld [smem:[#allocation27_spill]]  ;;  %s8989_s18 = sadd.s32 1, %s8764_s15  }
  0x45   : > { %s12207_s8 = sld [smem:[#allocation12_spill]]  ;;  %s670_s22 = sadd.s32 1, %s8760_s11 }
  0x46   : > { %s12208_s6 = sld [smem:[#allocation15_spill]]  ;;  %s667_s23 = ssub.s32 %s8764_s15, %s8989_s18 }
  0x47   : > { %s12209_s3 = sld [smem:[#allocation11_spill]]  ;;  %p680_p0 = scmp.ne.s32.totalorder %s8760_s11, %s8756_s10 }
  0x48   : > { %p668_p1 = scmp.eq.s32.totalorder %s667_s23, 0  ;;  %p681_p2 = scmp.eq.s32.totalorder %s8985_s0, 1 }
  0x49   : > { %p686_p3 = scmp.ne.s32.totalorder %s8756_s10, %s8752_s7  ;;  %p687_p4 = scmp.eq.s32.totalorder %s7900_s16, 1 }
  0x4a   : > { %s9000_s26 = scalar_select %p668_p1, %s8760_s11, %s670_s22  }
  0x4b   : > { %p9002_p5 = por %p681_p2, %p680_p0  ;;  %p9006_p6 = por %p687_p4, %p686_p3 }
  0x4c   : > { %12210 = sst [smem:[#allocation29_spill]] %s9000_s26  ;;  %p7903_p7 = scmp.ge.s32.totalorder %s8764_s15, 1 }
  0x4d   : > { %p855_p8 = scmp.lt.s32.totalorder %s8764_s15, 3 }
  0x4f   : > { %p856_p9 = pnand %p7903_p7, %p855_p8 }
  0x51   : > { %859 = sbr.rel (%p856_p9) target bundleno = 8291 (0x2063), region = 128 }
  0x56   : > { %s12213_s5 = sld [smem:[#allocation8_spill]]  ;;  %p952_p10 = scmp.lt.s32.totalorder %s8985_s0, 1  ;;  %v990_v0 = vlaneseq  ;;  %v9019_v2 = vld [vmem:[%s8837_s21] sm:$0xff]  ;;  %vm980_vm0 = vcmask 1041408   ;;  %vm988_vm1 = vcmask 254976   ;;  %vm1006_vm2 = vcmask 1046528  }
  0x57   : > { %s12214_s13 = sld [smem:[#allocation10_spill]]  ;;  %vm1026_vm3 = vcmask 1045504   ;;  %vm1042_vm4 = vcmask 261120   ;;  %v1087_v54 = vld [vmem:[%s8842_s25 + $0x18] sm:$0xff]  ;;  %v1086_v55 = vld [vmem:[%s8842_s25 + $0x10] sm:$0xff]  ;;  %v1085_v56 = vld [vmem:[%s8842_s25 + $0x8] sm:$0xff] }
  0x58   : > { %s9014_s2 = scalar_select %p952_p10, %s8985_s0, 1  ;;  %v9016_v1 = vshrl.u32 %v990_v0, 7  ;;  %8074 = vmatprep.subr.mxu0 %v1087_v54  ;;  %v1084_v57 = vld [vmem:[%s8842_s25] sm:$0xff]  ;;  %vm1230_vm5 = vcmask 257024   ;;  %vm1222_vm6 = vcmask 1043456   ;;  %vm8796_vm7 = vmmov 0  }
  0x59   : > { %8075 = vmatpush3.msra.mxu0 %v1087_v54  ;;  %s12221_s9 = sld [smem:[#allocation9_spill]]  ;;  %vm1657_vm8 = vcmask 125952   ;;  %vm1677_vm9 = vcmask 130048   ;;  %vm1842_vm10 = vcmask 64512   ;;  %vm1993_vm11 = vcmask 1041409  }
  0x5a   : > { %s7980_s16 = sshll.u32 %s9014_s2, 4  ;;  %s7907_s22 = sshll.u32 %s9014_s2, 3  ;;  %v9024_v3 = vsub.s32 0, %v9016_v1  ;;  %v9027_v4 = vsub.s32 1, %v9016_v1  ;;  %v9030_v5 = vsub.s32 2, %v9016_v1  ;;  %v9052_v14 = vsub.s32 3, %v9016_v1  ;;  %8076 = vmatprep.subr.mxu0 %v1086_v55 }
  0x5b   : > { %8077 = vmatpush3.msra.mxu0 %v1086_v55  ;;  %v9071_v0 = vsub.s32 4, %v9016_v1  ;;  %vm1995_vm12 = vcmask 1042434   ;;  %vm1997_vm13 = vcmask 1043459   ;;  %vm3400_vm14 = vcmask 60416  }
  0x5c   : > { %12215 = vst [vmem:[#allocation30_spill] sm:$0xff] %v9024_v3  ;;  %12216 = vst [vmem:[#allocation31_spill] sm:$0xff] %v9027_v4  ;;  %s956_s23 = scalar_lea.vmem %s12213_s5, %s7980_s16  ;;  %v993_v9 = vrot.slane %v9019_v2, %v9024_v3  ;;  %v999_v10 = vrot.slane %v9019_v2, %v9027_v4  ;;  %v1019_v11 = vrot.slane %v9019_v2, %v9030_v5  ;;  %s9049_s16 = scalar_lea.vmem %s8957_s27, %s7907_s22  ;;  %8078 = vmatprep.subr.mxu0 %v1085_v56  ;;  %vm3398_vm15 = vcmask 64516  }
  0x5d   : > { %12217 = vst [vmem:[#allocation32_spill] sm:$0xff] %v9030_v5  ;;  %s963_s26 = scalar_lea.vmem %s12214_s13, %s7907_s22  ;;  %v9034_v6 = vld [vmem:[%s956_s23] sm:$0xff]  ;;  %v9036_v7 = vld [vmem:[%s956_s23 + $0x8] sm:$0xff]  ;;  %12218 = vst [vmem:[#allocation33_spill] sm:$0xff] %v9052_v14  ;;  %v1039_v32 = vrot.slane %v9019_v2, %v9052_v14  ;;  %8079 = vmatpush3.msra.mxu0 %v1085_v56  ;;  %s9176_s22 = sand.u32 1, %s8756_s10  }
  0x5e   : > { %v9038_v8 = vld [vmem:[%s963_s26] sm:$0x3f]  ;;  %v981_v12 = vrot.slane %v9034_v6, 6  ;;  %v982_v13 = vrot.slane %v9036_v7, 6  ;;  %8080 = vmatprep.subr.mxu0 %v1084_v57  ;;  %12219 = vst [vmem:[#allocation34_spill] sm:$0xff] %v9071_v0  ;;  %s8255_s23 = smul.u32 12, %s9176_s22 }
  0x5f   : > { %8081 = vmatpush3.msra.mxu0 %v1084_v57  ;;  %s959_s26 = scalar_lea.vmem %s12221_s9, %s9014_s2  ;;  %s12245_s5 = smov 112  }
  0x60   : > { %v983_v15 = vsel %vm980_vm0, %v981_v12, %v982_v13  ;;  %v987_v16 = vsel %vm980_vm0, %v9038_v8, %v981_v12  ;;  %989 = vst.msk [vmem:[%s9049_s16] sm:$0x3] %vm988_vm1, %v982_v13  ;;  %v1002_v17 = vmul.f32 %v999_v10, %v982_v13  ;;  %v1022_v18 = vmul.f32 %v1019_v11, %v982_v13 }
  0x61   : > { %v994_v19 = vmul.f32 %v993_v9, %v987_v16  ;;  %v1000_v20 = vmul.f32 %v999_v10, %v987_v16  ;;  %v1001_v21 = vmul.f32 %v999_v10, %v983_v15  ;;  %v1020_v22 = vmul.f32 %v1019_v11, %v987_v16 }
  0x62   : > { %v1021_v23 = vmul.f32 %v1019_v11, %v983_v15  ;;  %v995_v24 = vmul.f32 %v993_v9, %v983_v15  ;;  %v1010_v25 = vrot.slane %v1002_v17, 1  ;;  %v1030_v26 = vrot.slane %v1022_v18, 2 }
  0x63   : > { %v1007_v27 = vrot.slane %v1000_v20, 1  ;;  %v1008_v28 = vrot.slane %v1001_v21, 1  ;;  %v1027_v29 = vrot.slane %v1020_v22, 2  ;;  %v9074_v9 = vsub.s32 5, %v9016_v1 }
  0x64   : > { %v1028_v30 = vrot.slane %v1021_v23, 2  ;;  %v1073_v10 = vrot.slane %v9019_v2, %v9071_v0  ;;  %v7910_v23 = vld [vmem:[%s8842_s25 + $0x20] ss:$0 sm:$0xff] }
  0x65   : > { %v1009_v31 = vsel %vm1006_vm2, %v1007_v27, %v1008_v28  ;;  %v1011_v33 = vsel %vm1006_vm2, %v1008_v28, %v1010_v25  ;;  %12220 = vst [vmem:[#allocation35_spill] sm:$0xff] %v9074_v9  ;;  %v1079_v13 = vrot.slane %v9019_v2, %v9074_v9 }
  0x66   : > { %v1014_v34 = vadd.f32 %v1009_v31, %v994_v19  ;;  %v1029_v35 = vsel %vm1026_vm3, %v1027_v29, %v1028_v30  ;;  %v1015_v36 = vadd.f32 %v1011_v33, %v995_v24  ;;  %v1031_v37 = vsel %vm1026_vm3, %v1028_v30, %v1030_v26 }
  0x68   : > { %v1034_v38 = vadd.f32 %v1029_v35, %v1014_v34  ;;  %v1035_v39 = vadd.f32 %v1031_v37, %v1015_v36 }
  0x6a   : > { %v1040_v40 = vadd.f32 %v1039_v32, %v1034_v38  ;;  %v1041_v41 = vadd.f32 %v1039_v32, %v1035_v39 }
  0x6c   : > { %v1043_v42 = vsel %vm1042_vm4, %v1040_v40, 0.0  ;;  %v1046_v43 = vsel %vm1042_vm4, %v1041_v41, 0.0 }
  0x6d   : > { %1044 = vadd.xlane.f32.xlu0 %v1043_v42 }
  0x71   : > { %1047 = vadd.xlane.f32.xlu0 %v1046_v43 }
  0xf6   : > { %v1045_v44 = vpop.xlane.xlu0 %1044 }
  0xf7   : > { %v1050_v45 = vmul.f32 0.03125, %v1045_v44 }
  0xf9   : > { %v1052_v46 = vsub.f32 %v1040_v40, %v1050_v45 }
  0xfa   : > { %v1048_v47 = vpop.xlane.xlu0 %1047 }
  0xfb   : > { %v1051_v48 = vmul.f32 0.03125, %v1048_v47  ;;  %v1054_v49 = vmul.f32 %v1052_v46, %v1052_v46  ;;  %v1208_v47 = vsub.s32 7, %v9016_v1 }
  0xfd   : > { %v1053_v50 = vsub.f32 %v1041_v41, %v1051_v48  ;;  %v1056_v51 = vsel %vm1042_vm4, %v1054_v49, 0.0 }
  0xfe   : > { %1057 = vadd.xlane.f32.xlu1 %v1056_v51 }
  0xff   : > { %v1055_v52 = vmul.f32 %v1053_v50, %v1053_v50 }
 0x101   : > { %v1059_v53 = vsel %vm1042_vm4, %v1055_v52, 0.0 }
 0x102   : > { %1060 = vadd.xlane.f32.xlu1 %v1059_v53 }
 0x187   : > { %v1058_v58 = vpop.xlane.xlu1 %1057 }
 0x188   : > { %v1062_v59 = vmul.f32 0.03125, %v1058_v58 }
 0x18a   : > { %v1064_v60 = vadd.f32 1e-05, %v1062_v59  ;;  %v9096_v59 = vld [vmem:[%s8847_s29] sm:$0xff] }
 0x18b   : > { %v1061_v61 = vpop.xlane.xlu1 %1060 }
 0x18c   : > { %8343 = vrsqrt.f32 %v1064_v60  ;;  %v1063_v62 = vmul.f32 0.03125, %v1061_v61 }
 0x18e   : > { %v1065_v63 = vadd.f32 1e-05, %v1063_v62  ;;  %v1241_v62 = vrot.slane %v9096_v59, %v9027_v4 }
 0x190   : > { %8345 = vrsqrt.f32 %v1065_v63 }
 0x199   : > { %v8344_v11 = vpop.eup %8343 }
 0x19a   : > { %v1068_v12 = vmul.f32 %v8344_v11, %v1052_v46  ;;  %v1202_v46 = vsub.s32 6, %v9016_v1  ;;  %v1260_v11 = vrot.slane %v9096_v59, %v9030_v5 }
 0x19c   : > { %v1074_v15 = vmul.f32 %v1073_v10, %v1068_v12  ;;  %v1203_v48 = vrot.slane %v9019_v2, %v1202_v46 }
 0x19d   : > { %v8346_v16 = vpop.eup %8345 }
 0x19e   : > { %v1069_v17 = vmul.f32 %v8346_v16, %v1053_v50  ;;  %v1080_v18 = vadd.f32 %v1079_v13, %v1074_v15  ;;  %v1209_v50 = vrot.slane %v9019_v2, %v1208_v47  ;;  %v1218_v2 = vrot.slane %v9038_v8, 2 }
 0x19f   : > { %v1235_v8 = vrot.slane %v9096_v59, %v9024_v3 }
 0x1a0   : > { %v1075_v19 = vmul.f32 %v1073_v10, %v1069_v17  ;;  %v1082_v20 = vmax.f32 %v1080_v18, 0.0 }
 0x1a2   : > { %v1081_v21 = vadd.f32 %v1079_v13, %v1075_v19  ;;  %8082 = vmatprep.mubr.msk.f32.mxu0 %vm1042_vm4, %v1082_v20 }
 0x1a4   : > { %v1083_v22 = vmax.f32 %v1081_v21, 0.0 }
 0x1a6   : > { %8083 = vmatmul.mubr.msk.f32.vlgmr.msra.gmra.mxu0 %vm1042_vm4, %v1083_v22 }
 0x266   : > { %v8084_v24 = vpop.f32.mrf.mxu0 }
 0x267   : > { %v1171_v25 = vadd.f32 %v8084_v24, %v7910_v23 }
 0x268   : > { %v1165_v26 = vpop.f32.mrf.mxu0 }
 0x269   : > { %v1166_v27 = vadd.f32 %v7910_v23, %v1165_v26  ;;  %v1177_v28 = vsel %vm1042_vm4, %v1171_v25, 0.0 }
 0x26a   : > { %1178 = vadd.xlane.f32.xlu1 %v1177_v28 }
 0x26b   : > { %v1174_v29 = vsel %vm1042_vm4, %v1166_v27, 0.0 }
 0x26c   : > { %1175 = vadd.xlane.f32.xlu0 %v1174_v29 }
 0x2f3   : > { %v1179_v30 = vpop.xlane.xlu1 %1178 }
 0x2f4   : > { %v1181_v31 = vmul.f32 0.03125, %v1179_v30 }
 0x2f5   : > { %v1176_v32 = vpop.xlane.xlu0 %1175 }
 0x2f6   : > { %v1183_v33 = vsub.f32 %v1171_v25, %v1181_v31  ;;  %v1180_v34 = vmul.f32 0.03125, %v1176_v32  ;;  %v1279_v31 = vrot.slane %v9096_v59, %v9052_v14 }
 0x2f8   : > { %v1182_v35 = vsub.f32 %v1166_v27, %v1180_v34  ;;  %v1185_v36 = vmul.f32 %v1183_v33, %v1183_v33 }
 0x2fa   : > { %v1189_v37 = vsel %vm1042_vm4, %v1185_v36, 0.0  ;;  %v1184_v38 = vmul.f32 %v1182_v35, %v1182_v35 }
 0x2fb   : > { %1190 = vadd.xlane.f32.xlu1 %v1189_v37 }
 0x2fc   : > { %v1186_v39 = vsel %vm1042_vm4, %v1184_v38, 0.0 }
 0x2fd   : > { %1187 = vadd.xlane.f32.xlu0 %v1186_v39 }
 0x384   : > { %v1191_v40 = vpop.xlane.xlu1 %1190 }
 0x385   : > { %v1193_v41 = vmul.f32 0.03125, %v1191_v40 }
 0x386   : > { %v1188_v42 = vpop.xlane.xlu0 %1187 }
 0x387   : > { %v1195_v43 = vadd.f32 1e-05, %v1193_v41  ;;  %v1192_v44 = vmul.f32 0.03125, %v1188_v42 }
 0x389   : > { %8347 = vrsqrt.f32 %v1195_v43  ;;  %v1194_v45 = vadd.f32 1e-05, %v1192_v44 }
 0x38b   : > { %8349 = vrsqrt.f32 %v1194_v45 }
 0x396   : > { %v8348_v49 = vpop.eup %8347 }
 0x397   : > { %v1199_v51 = vmul.f32 %v8348_v49, %v1183_v33 }
 0x398   : > { %v8350_v52 = vpop.eup %8349 }
 0x399   : > { %v1205_v53 = vmul.f32 %v1203_v48, %v1199_v51  ;;  %v1198_v54 = vmul.f32 %v8350_v52, %v1182_v35 }
 0x39b   : > { %v1211_v55 = vadd.f32 %v1209_v50, %v1205_v53  ;;  %v1204_v56 = vmul.f32 %v1203_v48, %v1198_v54  ;;  %v1325_v53 = vld [vmem:[%s12209_s3 + $0x18] sm:$0xff]  ;;  %v1324_v54 = vld [vmem:[%s12209_s3 + $0x10] sm:$0xff] }
 0x39c   : > { %8085 = vmatprep.subr.mxu1 %v1325_v53 }
 0x39d   : > { %v1213_v57 = vmax.f32 %v1211_v55, 0.0  ;;  %v1210_v58 = vadd.f32 %v1209_v50, %v1204_v56  ;;  %8086 = vmatpush3.msra.mxu1 %v1325_v53  ;;  %v1323_v55 = vld [vmem:[%s12209_s3 + $0x8] sm:$0xff]  ;;  %v1322_v56 = vld [vmem:[%s12209_s3] sm:$0xff] }
 0x39e   : > { %8087 = vmatprep.subr.mxu1 %v1324_v54 }
 0x39f   : > { %v1212_v60 = vmax.f32 %v1210_v58, 0.0  ;;  %v9099_v61 = vadd.f32 %v1213_v57, %v9036_v7  ;;  %8088 = vmatpush3.msra.mxu1 %v1324_v54  ;;  %v1441_v54 = vrot.slane %v9096_v59, %v1202_v46 }
 0x3a0   : > { %8089 = vmatprep.subr.mxu1 %v1323_v55 }
 0x3a1   : > { %v9105_v63 = vadd.f32 %v1212_v60, %v9034_v6  ;;  %v1224_v10 = vrot.slane %v9099_v61, 4  ;;  %8090 = vmatpush3.msra.mxu1 %v1323_v55 }
 0x3a2   : > { %8091 = vmatprep.subr.mxu1 %v1322_v56 }
 0x3a3   : > { %v1223_v12 = vrot.slane %v9105_v63, 4  ;;  %1231 = vst.msk [vmem:[%s9049_s16 + $0x2] sm:$0xf] %vm1230_vm5, %v1224_v10  ;;  %v1244_v7 = vmul.f32 %v1241_v62, %v1224_v10  ;;  %v1263_v18 = vmul.f32 %v1260_v11, %v1224_v10  ;;  %8092 = vmatpush3.msra.mxu1 %v1322_v56  ;;  %s8256_s16 = smul.u32 12, %s9014_s2 }
 0x3a5   : > { %v1225_v13 = vsel %vm1222_vm6, %v1223_v12, %v1224_v10  ;;  %v1229_v15 = vsel %vm1222_vm6, %v1218_v2, %v1223_v12  ;;  %v1251_v23 = vrot.slane %v1244_v7, 2  ;;  %v1270_v29 = vrot.slane %v1263_v18, 4  ;;  %s9198_s2 = scalar_lea.vmem %s8832_s17, %s8256_s16  ;;  %s12166_s16 = smov 120  }
 0x3a6   : > { %v1242_v16 = vmul.f32 %v1241_v62, %v1229_v15  ;;  %v1243_v6 = vmul.f32 %v1241_v62, %v1225_v13  ;;  %v1261_v17 = vmul.f32 %v1260_v11, %v1229_v15  ;;  %v1262_v19 = vmul.f32 %v1260_v11, %v1225_v13 }
 0x3a7   : > { %v1236_v24 = vmul.f32 %v1235_v8, %v1229_v15  ;;  %v1237_v26 = vmul.f32 %v1235_v8, %v1225_v13  ;;  %v1311_v11 = vrot.slane %v9096_v59, %v9071_v0  ;;  %v1317_v15 = vrot.slane %v9096_v59, %v9074_v9 }
 0x3a8   : > { %v1248_v20 = vrot.slane %v1242_v16, 2  ;;  %v1249_v21 = vrot.slane %v1243_v6, 2  ;;  %v1267_v22 = vrot.slane %v1261_v17, 4  ;;  %v1268_v25 = vrot.slane %v1262_v19, 4 }
 0x3aa   : > { %v1250_v27 = vsel %vm1026_vm3, %v1248_v20, %v1249_v21  ;;  %v1252_v28 = vsel %vm1026_vm3, %v1249_v21, %v1251_v23  ;;  %v1269_v33 = vsel %vm1222_vm6, %v1267_v22, %v1268_v25  ;;  %v1271_v34 = vsel %vm1222_vm6, %v1268_v25, %v1270_v29  ;;  %v7913_v21 = vld [vmem:[%s12209_s3 + $0x20] ss:$0 sm:$0xff]  ;;  %s12141_s3 = smov 96  }
 0x3ab   : > { %v1255_v30 = vadd.f32 %v1250_v27, %v1236_v24  ;;  %v1256_v32 = vadd.f32 %v1252_v28, %v1237_v26 }
 0x3ad   : > { %v1274_v35 = vadd.f32 %v1269_v33, %v1255_v30  ;;  %v1275_v36 = vadd.f32 %v1271_v34, %v1256_v32 }
 0x3af   : > { %v1280_v37 = vadd.f32 %v1279_v31, %v1274_v35  ;;  %v1281_v38 = vadd.f32 %v1279_v31, %v1275_v36 }
 0x3b1   : > { %v1282_v39 = vsel %vm1042_vm4, %v1280_v37, 0.0  ;;  %v1285_v40 = vsel %vm1042_vm4, %v1281_v38, 0.0 }
 0x3b2   : > { %1283 = vadd.xlane.f32.xlu0 %v1282_v39  ;;  %1286 = vadd.xlane.f32.xlu1 %v1285_v40  ;;  %v1464_v39 = vld [vmem:[%s12207_s8 + $0x10] sm:$0xff]  ;;  %v1557_v40 = vld [vmem:[%s12205_s14 + $0x18] sm:$0xff] }
 0x3b3   : > { %8107 = vmatprep.subr.mxu1 %v1557_v40 }
 0x43b   : > { %v1284_v41 = vpop.xlane.xlu0 %1283  ;;  %v1287_v42 = vpop.xlane.xlu1 %1286 }
 0x43c   : > { %v1288_v43 = vmul.f32 0.03125, %v1284_v41  ;;  %v1289_v44 = vmul.f32 0.03125, %v1287_v42  ;;  %v1556_v41 = vld [vmem:[%s12205_s14 + $0x10] sm:$0xff]  ;;  %v1463_v42 = vld [vmem:[%s12207_s8 + $0x8] sm:$0xff] }
 0x43e   : > { %v1290_v45 = vsub.f32 %v1280_v37, %v1288_v43  ;;  %v1291_v48 = vsub.f32 %v1281_v38, %v1289_v44  ;;  %v1465_v38 = vld [vmem:[%s12207_s8 + $0x18] sm:$0xff]  ;;  %v1555_v43 = vld [vmem:[%s12205_s14 + $0x8] sm:$0xff]  ;;  %v1462_v44 = vld [vmem:[%s12207_s8] sm:$0xff] }
 0x43f   : > { %8096 = vmatprep.subr.mxu0 %v1465_v38 }
 0x440   : > { %v1292_v49 = vmul.f32 %v1290_v45, %v1290_v45  ;;  %v1293_v50 = vmul.f32 %v1291_v48, %v1291_v48  ;;  %8097 = vmatpush3.msra.mxu0 %v1465_v38 }
 0x441   : > { %8098 = vmatprep.subr.mxu0 %v1464_v39 }
 0x442   : > { %v1294_v51 = vsel %vm1042_vm4, %v1292_v49, 0.0  ;;  %v1297_v52 = vsel %vm1042_vm4, %v1293_v50, 0.0  ;;  %8099 = vmatpush3.msra.mxu0 %v1464_v39 }
 0x443   : > { %1295 = vadd.xlane.f32.xlu0 %v1294_v51  ;;  %1298 = vadd.xlane.f32.xlu1 %v1297_v52 }
 0x444   : > { %8100 = vmatprep.subr.mxu0 %v1463_v42 }
 0x445   : > { %8101 = vmatpush3.msra.mxu0 %v1463_v42 }
 0x446   : > { %8102 = vmatprep.subr.mxu0 %v1462_v44 }
 0x447   : > { %8103 = vmatpush3.msra.mxu0 %v1462_v44 }
 0x4cc   : > { %v1296_v57 = vpop.xlane.xlu0 %1295  ;;  %v1299_v58 = vpop.xlane.xlu1 %1298 }
 0x4cd   : > { %v1300_v60 = vmul.f32 0.03125, %v1296_v57  ;;  %v1301_v62 = vmul.f32 0.03125, %v1299_v58  ;;  %v1447_v57 = vrot.slane %v9096_v59, %v1208_v47 }
 0x4cf   : > { %v1302_v2 = vadd.f32 1e-05, %v1300_v60  ;;  %v1303_v10 = vadd.f32 1e-05, %v1301_v62 }
 0x4d1   : > { %8351 = vrsqrt.f32 %v1302_v2 }
 0x4d2   : > { %8353 = vrsqrt.f32 %v1303_v10 }
 0x4de   : > { %v8352_v12 = vpop.eup %8351 }
 0x4df   : > { %v8354_v7 = vpop.eup %8353  ;;  %v1306_v13 = vmul.f32 %v8352_v12, %v1290_v45  ;;  %v1554_v45 = vld [vmem:[%s12205_s14] sm:$0xff] }
 0x4e0   : > { %v1307_v8 = vmul.f32 %v8354_v7, %v1291_v48 }
 0x4e1   : > { %v1312_v16 = vmul.f32 %v1311_v11, %v1306_v13 }
 0x4e2   : > { %v1313_v6 = vmul.f32 %v1311_v11, %v1307_v8  ;;  %v1670_v8 = vld [vmem:[%s8872_s24] sm:$0xff] }
 0x4e3   : > { %v1318_v17 = vadd.f32 %v1317_v15, %v1312_v16  ;;  %v7917_v16 = vld [vmem:[%s12207_s8 + $0x20] ss:$0 sm:$0xff] }
 0x4e4   : > { %v1319_v18 = vadd.f32 %v1317_v15, %v1313_v6  ;;  %v7916_v15 = vld [vmem:[%s959_s26] ss:$0 sm:$0xff]  ;;  %s9189_s26 = scalar_lea.vmem [#allocation4], %s8255_s23  ;;  %s12132_s23 = smov 112  }
 0x4e5   : > { %v1320_v19 = vmax.f32 %v1318_v17, 0.0  ;;  %v7920_v17 = vld [vmem:[%s12205_s14 + $0x20] ss:$0 sm:$0xff] }
 0x4e6   : > { %v1321_v20 = vmax.f32 %v1319_v18, 0.0 }
 0x4e7   : > { %8093 = vmatprep.mubr.msk.f32.mxu1 %vm1042_vm4, %v1320_v19 }
 0x4e8   : > { %8094 = vmatmul.mubr.msk.f32.vlgmr.msra.gmra.mxu1 %vm1042_vm4, %v1321_v20 }
 0x4e9   : > { %8108 = vmatpush3.msra.mxu1 %v1557_v40 }
 0x4ea   : > { %8109 = vmatprep.subr.mxu1 %v1556_v41 }
 0x4eb   : > { %8110 = vmatpush3.msra.mxu1 %v1556_v41 }
 0x4ec   : > { %8111 = vmatprep.subr.mxu1 %v1555_v43 }
 0x4ed   : > { %8112 = vmatpush3.msra.mxu1 %v1555_v43 }
 0x4ee   : > { %8113 = vmatprep.subr.mxu1 %v1554_v45 }
 0x4ef   : > { %8114 = vmatpush3.msra.mxu1 %v1554_v45 }
 0x5a8   : > { %v8095_v22 = vpop.f32.mrf.mxu1 }
 0x5a9   : > { %v1409_v23 = vadd.f32 %v8095_v22, %v7913_v21 }
 0x5aa   : > { %v1403_v24 = vpop.f32.mrf.mxu1 }
 0x5ab   : > { %v1404_v25 = vadd.f32 %v7913_v21, %v1403_v24  ;;  %v1415_v26 = vsel %vm1042_vm4, %v1409_v23, 0.0 }
 0x5ac   : > { %1416 = vadd.xlane.f32.xlu1 %v1415_v26 }
 0x5ad   : > { %v1412_v27 = vsel %vm1042_vm4, %v1404_v25, 0.0 }
 0x5ae   : > { %1413 = vadd.xlane.f32.xlu0 %v1412_v27 }
 0x635   : > { %v1417_v28 = vpop.xlane.xlu1 %1416 }
 0x636   : > { %v1419_v29 = vmul.f32 0.03125, %v1417_v28  ;;  %v1647_v28 = vld [vmem:[%s9198_s2 + $0x4] sm:$0xf] }
 0x637   : > { %v1414_v30 = vpop.xlane.xlu0 %1413 }
 0x638   : > { %v1421_v31 = vsub.f32 %v1409_v23, %v1419_v29  ;;  %v1418_v32 = vmul.f32 0.03125, %v1414_v30 }
 0x63a   : > { %v1420_v33 = vsub.f32 %v1404_v25, %v1418_v32  ;;  %v1423_v34 = vmul.f32 %v1421_v31, %v1421_v31 }
 0x63c   : > { %v1427_v35 = vsel %vm1042_vm4, %v1423_v34, 0.0  ;;  %v1422_v36 = vmul.f32 %v1420_v33, %v1420_v33 }
 0x63d   : > { %1428 = vadd.xlane.f32.xlu1 %v1427_v35 }
 0x63e   : > { %v1424_v37 = vsel %vm1042_vm4, %v1422_v36, 0.0 }
 0x63f   : > { %1425 = vadd.xlane.f32.xlu0 %v1424_v37 }
 0x6c6   : > { %v1429_v48 = vpop.xlane.xlu1 %1428 }
 0x6c7   : > { %v1431_v49 = vmul.f32 0.03125, %v1429_v48 }
 0x6c8   : > { %v1426_v50 = vpop.xlane.xlu0 %1425 }
 0x6c9   : > { %v1433_v51 = vadd.f32 1e-05, %v1431_v49  ;;  %v1430_v52 = vmul.f32 0.03125, %v1426_v50  ;;  %v8798_v50 = vmov 1966171168  }
 0x6cb   : > { %8355 = vrsqrt.f32 %v1433_v51  ;;  %v1432_v53 = vadd.f32 1e-05, %v1430_v52  ;;  %v1768_v51 = vunpack.c.l.s4 %v8798_v50 }
 0x6cd   : > { %8357 = vrsqrt.f32 %v1432_v53  ;;  %v1769_v52 = vunpack.c.0.s8 %v1768_v51 }
 0x6cf   : > { %v9238_v53 = vsub.s32 %v1769_v52, %v9016_v1 }
 0x6d1   : > { %12225 = vst [vmem:[#allocation39_spill] sm:$0xff] %v9238_v53 }
 0x6d8   : > { %v8356_v55 = vpop.eup %8355 }
 0x6d9   : > { %v1437_v56 = vmul.f32 %v8356_v55, %v1421_v31 }
 0x6da   : > { %v8358_v58 = vpop.eup %8357 }
 0x6db   : > { %v1436_v60 = vmul.f32 %v8358_v58, %v1420_v33  ;;  %v1443_v62 = vmul.f32 %v1441_v54, %v1437_v56  ;;  %v7924_v33 = vld [vmem:[%s8872_s24 + $0x10] ss:$0 sm:$0xff] }
 0x6dd   : > { %v1442_v2 = vmul.f32 %v1441_v54, %v1436_v60  ;;  %v1449_v10 = vadd.f32 %v1447_v57, %v1443_v62 }
 0x6df   : > { %v1448_v11 = vadd.f32 %v1447_v57, %v1442_v2  ;;  %v1451_v12 = vmax.f32 %v1449_v10, 0.0 }
 0x6e1   : > { %v1450_v7 = vmax.f32 %v1448_v11, 0.0  ;;  %v1453_v13 = vadd.f32 %v1451_v12, %v9099_v61  ;;  %v12135_v61 = vmov 0.0  }
 0x6e2   : > { %8118 = vmatprep.subr.mxu0 %v12135_v61 }
 0x6e3   : > { %v1452_v46 = vadd.f32 %v1450_v7, %v9105_v63  ;;  %v9163_v59 = vmul.f32 %v7916_v15, %v1453_v13  ;;  %v1671_v63 = vld [vmem:[%s8872_s24 + $0x8] sm:$0xff] }
 0x6e5   : > { %8104 = vmatprep.mubr.msk.f32.mxu0 %vm1042_vm4, %v1452_v46  ;;  %v9160_v47 = vmul.f32 %v7916_v15, %v1452_v46  ;;  %12223 = vst [vmem:[#allocation37_spill] sm:$0xff] %v9163_v59 }
 0x6e6   : > { %8105 = vmatmul.mubr.msk.f32.vlgmr.msra.gmra.mxu0 %vm1042_vm4, %v1453_v13 }
 0x6e7   : > { %12222 = vst [vmem:[#allocation36_spill] sm:$0xff] %v9160_v47  ;;  %8115 = vmatprep.mubr.msk.f32.mxu1 %vm1042_vm4, %v9160_v47  ;;  %8119 = vmatpush3.msra.mxu0 %v1671_v63 }
 0x6e8   : > { %8116 = vmatmul.mubr.msk.f32.vlgmr.msra.gmra.mxu1 %vm1042_vm4, %v9163_v59  ;;  %8122 = vmatprep.mubr.msk.f32.mxu0 %vm8796_vm7, %v12135_v61 }
 0x6e9   : > { %8120 = vmatprep.subr.mxu0 %v12135_v61 }
 0x6ea   : > { %8121 = vmatpush3.msra.mxu0 %v1670_v8 }
 0x7a6   : > { %v8106_v6 = vpop.f32.mrf.mxu0 }
 0x7a7   : > { %v1549_v18 = vadd.f32 %v8106_v6, %v7917_v16 }
 0x7a8   : > { %v8117_v19 = vpop.f32.mrf.mxu1  ;;  %v9214_v32 = vpop.f32.mrf.mxu0 }
 0x7a9   : > { %v1553_v20 = vmax.f32 %v1549_v18, 0.0  ;;  %v9181_v21 = vadd.f32 %v8117_v19, %v7920_v17 }
 0x7aa   : > { %v1635_v22 = vpop.f32.mrf.mxu1 }
 0x7ab   : > { %v9184_v23 = vrot.slane %v1553_v20, 4  ;;  %v12138_v24 = vmax.f32 %v9181_v21, 0.0  ;;  %v9187_v25 = vadd.f32 %v7920_v17, %v1635_v22 }
 0x7ad   : > { %12224 = vst [vmem:[#allocation38_spill] sm:$0xff] %v9184_v23  ;;  %1658 = vst.msk [vmem:[%s9189_s26] sm:$0xf] %vm1657_vm8, %v9184_v23  ;;  %v1663_v26 = vrot.slane %v12138_v24, 4  ;;  %v12137_v27 = vmax.f32 %v9187_v25, 0.0 }
 0x7af   : > { %7923 = vst.msk [vmem:[%s9189_s26 + $0x4] sm:$0xf] %vm1657_vm8, %v1663_v26  ;;  %v1662_v29 = vrot.slane %v12137_v27, 4 }
 0x7b1   : > { %v1667_v30 = vsel %vm1222_vm6, %v1647_v28, %v1662_v29  ;;  %v1664_v31 = vsel %vm1222_vm6, %v1662_v29, %v1663_v26 }
 0x7b2   : > { %8123 = vmatmul.mubr.msk.f32.vlgmr.msra.gmra.mxu0 %vm1677_vm9, %v1667_v30 }
 0x7b3   : > { %8125 = vmatprep.mubr.msk.f32.mxu0 %vm8796_vm7, %v12135_v61 }
 0x7b6   : > { %8126 = vmatmul.mubr.msk.f32.gmra.mxu0 %vm1677_vm9, %v1664_v31 }
 0x7b7   : > { %8128 = vmatprep.mubr.msk.f32.mxu0 %vm8796_vm7, %v12135_v61 }
 0x7ba   : > { %8129 = vmatmul.mubr.msk.f32.gmra.mxu0 %vm1677_vm9, %v1663_v26 }
 0x872   : > { %v1751_v34 = vpop.f32.mrf.mxu0 }
 0x873   : > { %v9217_v35 = vadd.f32 %v7924_v33, %v1751_v34 }
 0x874   : > { %v8124_v36 = vpop.f32.mrf.mxu0 }
 0x875   : > { %1811 = vrot.lane.b32.xlu1 %v9217_v35, %s12132_s23  ;;  %v2056_v40 = vrot.slane %v9217_v35, 4  ;;  %v1766_v54 = vcombine.high %v9217_v35, %v9217_v35 }
 0x876   : > { %v1756_v37 = vpop.f32.mrf.mxu0 }
 0x877   : > { %v9221_v38 = vadd.f32 %v7924_v33, %v1756_v37  ;;  %v1773_v55 = vrot.slane %v1766_v54, %v9238_v53 }
 0x878   : > { %v8127_v39 = vpop.f32.mrf.mxu0 }
 0x879   : > { %v2057_v41 = vrot.slane %v9221_v38, 4  ;;  %v1774_v56 = vcombine.high %v1773_v55, %v1773_v55  ;;  %v1781_v58 = vrot.slane %v1773_v55, %v9238_v53  ;;  %v2255_v60 = vcombine.high %v9221_v38, %v9221_v38 }
 0x87a   : > { %v1761_v42 = vpop.f32.mrf.mxu0  ;;  %v2018_v63 = vrot.slane %v9221_v38, %v9238_v53 }
 0x87b   : > { %v1762_v43 = vadd.f32 %v7924_v33, %v1761_v42  ;;  %v9226_v44 = vsel %vm1222_vm6, %v2056_v40, %v2057_v41  ;;  %v1788_v57 = vrot.slane %v1774_v56, %v9238_v53  ;;  %v1794_v2 = vrot.slane %v1781_v58, %v9024_v3 }
 0x87c   : > { %2059 = vrot.lane.b32.xlu0 %v9226_v44, %s12132_s23  ;;  %v8130_v45 = vpop.f32.mrf.mxu0  ;;  %v1789_v10 = vcombine.high %v1781_v58, %v1781_v58  ;;  %v2262_v7 = vrot.slane %v2255_v60, %v9238_v53  ;;  %v2019_v17 = vcombine.high %v2018_v63, %v2018_v63  ;;  %v2026_v30 = vrot.slane %v2018_v63, %v9238_v53 }
 0x87d   : > { %v2541_v48 = vrot.slane %v1762_v43, 4  ;;  %v1798_v62 = vrot.slane %v1788_v57, %v9024_v3  ;;  %v1790_v46 = vcombine.high %v1788_v57, %v1788_v57  ;;  %v2503_v22 = vrot.slane %v1762_v43, %v9238_v53 }
 0x87e   : > { %v1802_v13 = vrot.slane %v1789_v10, %v9024_v3  ;;  %v2263_v8 = vcombine.high %v2262_v7, %v2262_v7  ;;  %v2270_v19 = vrot.slane %v2262_v7, %v9238_v53  ;;  %v2033_v26 = vrot.slane %v2019_v17, %v9238_v53 }
 0x87f   : > { %v9231_v49 = vsel %vm1222_vm6, %v2057_v41, %v2541_v48  ;;  %v1806_v16 = vrot.slane %v1790_v46, %v9024_v3  ;;  %v2504_v36 = vcombine.high %v2503_v22, %v2503_v22  ;;  %v2039_v40 = vrot.slane %v2026_v30, %v9024_v3 }
 0x880   : > { %2543 = vrot.lane.b32.xlu1 %v9231_v49, %s12132_s23  ;;  %v2277_v18 = vrot.slane %v2263_v8, %v9238_v53  ;;  %v2283_v29 = vrot.slane %v2270_v19, %v9024_v3  ;;  %v2043_v39 = vrot.slane %v2033_v26, %v9024_v3  ;;  %v2035_v41 = vcombine.high %v2033_v26, %v2033_v26 }
 0x881   : > { %v2034_v42 = vcombine.high %v2026_v30, %v2026_v30  ;;  %v2511_v48 = vrot.slane %v2503_v22, %v9238_v53  ;;  %v2518_v50 = vrot.slane %v2504_v36, %v9238_v53  ;;  %v2278_v8 = vcombine.high %v2270_v19, %v2270_v19 }
 0x882   : > { %v2287_v28 = vrot.slane %v2277_v18, %v9024_v3  ;;  %v2051_v51 = vrot.slane %v2035_v41, %v9024_v3  ;;  %v2279_v60 = vcombine.high %v2277_v18, %v2277_v18 }
 0x883   : > { %v2047_v52 = vrot.slane %v2034_v42, %v9024_v3  ;;  %v2519_v56 = vcombine.high %v2511_v48, %v2511_v48  ;;  %v2524_v57 = vrot.slane %v2511_v48, %v9024_v3  ;;  %v2528_v58 = vrot.slane %v2518_v50, %v9024_v3 }
 0x884   : > { %2300 = vrot.lane.b32.xlu1 %v9221_v38, %s12132_s23  ;;  %v2295_v10 = vrot.slane %v2279_v60, %v9024_v3  ;;  %v2520_v7 = vcombine.high %v2518_v50, %v2518_v50  ;;  %s12143_s23 = smov 88   ;;  %v2291_v17 = vrot.slane %v2278_v8, %v9024_v3 }
 0x886   : > { %v2536_v63 = vrot.slane %v2520_v7, %v9024_v3 }
 0x8e7   : > { %v1812_v1 = vpop.permute.xlu1 %1811 }
 0x8e8   : > { %v9249_v11 = vmul.f32 %v1812_v1, %v1798_v62  ;;  %v9251_v12 = vmul.f32 %v1812_v1, %v1794_v2  ;;  %v9259_v15 = vmul.f32 %v1812_v1, %v1802_v13  ;;  %v9266_v6 = vmul.f32 %v1812_v1, %v1806_v16 }
 0x8e9   : > { %v2532_v1 = vrot.slane %v2519_v56, %v9024_v3 }
 0x8ea   : > { %1824 = vrot.lane.b32.xlu0 %v9249_v11, %s12166_s16  ;;  %1822 = vrot.lane.b32.xlu1 %v9251_v12, %s12166_s16 }
 0x8ee   : > { %1826 = vrot.lane.b32.xlu1 %v9259_v15, %s12166_s16  ;;  %v2060_v37 = vpop.permute.xlu0 %2059 }
 0x8ef   : > { %v9287_v43 = vmul.f32 %v2060_v37, %v2043_v39  ;;  %v9289_v45 = vmul.f32 %v2060_v37, %v2039_v40  ;;  %v9299_v54 = vmul.f32 %v2060_v37, %v2051_v51  ;;  %v9301_v55 = vmul.f32 %v2060_v37, %v2047_v52 }
 0x8f2   : > { %1828 = vrot.lane.b32.xlu1 %v9266_v6, %s12166_s16  ;;  %v2544_v20 = vpop.permute.xlu1 %2543 }
 0x8f3   : > { %v9309_v62 = vmul.f32 %v2544_v20, %v2524_v57  ;;  %v9311_v2 = vmul.f32 %v2544_v20, %v2528_v58  ;;  %v9321_v46 = vmul.f32 %v2544_v20, %v2532_v1  ;;  %v9328_v16 = vmul.f32 %v2544_v20, %v2536_v63 }
 0x8f6   : > { %v2301_v31 = vpop.permute.xlu1 %2300 }
 0x8f7   : > { %v9277_v33 = vmul.f32 %v2301_v31, %v2287_v28  ;;  %v9279_v34 = vmul.f32 %v2301_v31, %v2283_v29  ;;  %v9319_v13 = vmul.f32 %v2301_v31, %v2295_v10  ;;  %v9335_v18 = vmul.f32 %v2301_v31, %v2291_v17 }
 0x8f9   : > { %2313 = vrot.lane.b32.xlu1 %v9277_v33, %s12166_s16  ;;  %2311 = vrot.lane.b32.xlu0 %v9279_v34, %s12166_s16 }
 0x8fd   : > { %2072 = vrot.lane.b32.xlu1 %v9287_v43, %s12166_s16  ;;  %2070 = vrot.lane.b32.xlu0 %v9289_v45, %s12166_s16 }
 0x901   : > { %2076 = vrot.lane.b32.xlu1 %v9299_v54, %s12166_s16  ;;  %2074 = vrot.lane.b32.xlu0 %v9301_v55, %s12166_s16 }
 0x905   : > { %2554 = vrot.lane.b32.xlu1 %v9309_v62, %s12166_s16  ;;  %2556 = vrot.lane.b32.xlu0 %v9311_v2, %s12166_s16 }
 0x909   : > { %2317 = vrot.lane.b32.xlu1 %v9319_v13, %s12166_s16  ;;  %2558 = vrot.lane.b32.xlu0 %v9321_v46, %s12166_s16 }
 0x90d   : > { %2685 = vrot.lane.b32.xlu1 %v9231_v49, %s12143_s23  ;;  %2560 = vrot.lane.b32.xlu0 %v9328_v16, %s12166_s16 }
 0x911   : > { %2442 = vrot.lane.b32.xlu1 %v9221_v38, %s12143_s23  ;;  %2315 = vrot.lane.b32.xlu0 %v9335_v18, %s12166_s16 }
 0x915   : > { %2650 = vrot.lane.b32.xlu1 %v9231_v49, %s12141_s3  ;;  %2201 = vrot.lane.b32.xlu0 %v9226_v44, %s12143_s23 }
 0x919   : > { %2407 = vrot.lane.b32.xlu1 %v9221_v38, %s12141_s3  ;;  %1954 = vrot.lane.b32.xlu0 %v9217_v35, %s12143_s23  ;;  %s12242_s23 = sld [smem:[#allocation16_spill]] }
 0x91d   : > { %2166 = vrot.lane.b32.xlu0 %v9226_v44, %s12141_s3 }
 0x921   : > { %1919 = vrot.lane.b32.xlu0 %v9217_v35, %s12141_s3  ;;  %s12145_s3 = smov 8  }
 0x95c   : > { %v1825_v19 = vpop.permute.xlu0 %1824  ;;  %v1823_v20 = vpop.permute.xlu1 %1822 }
 0x95d   : > { %v1835_v22 = vadd.f32 %v1825_v19, %v9249_v11  ;;  %v1834_v49 = vadd.f32 %v1823_v20, %v9251_v12 }
 0x95f   : > { %v1839_v26 = vmul.f32 0.70710677, %v1835_v22  ;;  %v1838_v28 = vmul.f32 0.70710677, %v1834_v49 }
 0x960   : > { %v1827_v29 = vpop.permute.xlu1 %1826 }
 0x961   : > { %v1850_v38 = vsel %vm1842_vm10, %v1839_v26, -inf  ;;  %v1843_v30 = vsel %vm1842_vm10, %v1838_v28, -inf  ;;  %v1836_v31 = vadd.f32 %v1827_v29, %v9259_v15 }
 0x962   : > { %v1851_v44 = vrot.slane %v1850_v38, 4  ;;  %v1844_v36 = vrot.slane %v1843_v30, 4 }
 0x963   : > { %v1840_v37 = vmul.f32 0.70710677, %v1836_v31 }
 0x964   : > { %v1852_v35 = vmax.f32 %v1850_v38, %v1851_v44  ;;  %v1845_v39 = vmax.f32 %v1843_v30, %v1844_v36  ;;  %v1829_v40 = vpop.permute.xlu1 %1828 }
 0x965   : > { %v1857_v11 = vsel %vm1842_vm10, %v1840_v37, -inf  ;;  %v1837_v12 = vadd.f32 %v1829_v40, %v9266_v6 }
 0x966   : > { %v1853_v41 = vrot.slane %v1852_v35, 2  ;;  %v1846_v42 = vrot.slane %v1845_v39, 2  ;;  %v1858_v48 = vrot.slane %v1857_v11, 4 }
 0x967   : > { %v1841_v50 = vmul.f32 0.70710677, %v1837_v12 }
 0x968   : > { %v1854_v51 = vmax.f32 %v1852_v35, %v1853_v41  ;;  %v1847_v52 = vmax.f32 %v1845_v39, %v1846_v42  ;;  %v1859_v56 = vmax.f32 %v1857_v11, %v1858_v48 }
 0x969   : > { %v1864_v57 = vsel %vm1842_vm10, %v1841_v50, -inf }
 0x96a   : > { %v1855_v15 = vrot.slane %v1854_v51, 1  ;;  %v1848_v58 = vrot.slane %v1847_v52, 1  ;;  %v1860_v60 = vrot.slane %v1859_v56, 2  ;;  %v1865_v10 = vrot.slane %v1864_v57, 4 }
 0x96b   : > { %v2312_v1 = vpop.permute.xlu0 %2311  ;;  %v2314_v7 = vpop.permute.xlu1 %2313 }
 0x96c   : > { %v1856_v63 = vmax.f32 %v1854_v51, %v1855_v15  ;;  %v1849_v8 = vmax.f32 %v1847_v52, %v1848_v58  ;;  %v1861_v17 = vmax.f32 %v1859_v56, %v1860_v60  ;;  %v1866_v19 = vmax.f32 %v1864_v57, %v1865_v10 }
 0x96d   : > { %v2323_v6 = vadd.f32 %v2312_v1, %v9279_v34  ;;  %v2324_v20 = vadd.f32 %v2314_v7, %v9277_v33 }
 0x96e   : > { %v1872_v22 = vsub.f32 %v1839_v26, %v1856_v63  ;;  %v1871_v49 = vsub.f32 %v1838_v28, %v1849_v8  ;;  %v1862_v29 = vrot.slane %v1861_v17, 1  ;;  %v1867_v38 = vrot.slane %v1866_v19, 2 }
 0x96f   : > { %v9363_v30 = vmul.f32 0.70710677, %v2323_v6  ;;  %v9365_v31 = vmul.f32 0.70710677, %v2324_v20  ;;  %v2071_v44 = vpop.permute.xlu0 %2070  ;;  %v2073_v36 = vpop.permute.xlu1 %2072 }
 0x970   : > { %v1877_v35 = vmul.f32 1.442695, %v1872_v22  ;;  %v1875_v39 = vmul.f32 1.442695, %v1871_v49  ;;  %v1863_v40 = vmax.f32 %v1861_v17, %v1862_v29  ;;  %v1868_v11 = vmax.f32 %v1866_v19, %v1867_v38 }
 0x971   : > { %v2331_v12 = vsel %vm1842_vm10, %v9363_v30, -inf  ;;  %v2338_v33 = vsel %vm1842_vm10, %v9365_v31, -inf  ;;  %v2082_v34 = vadd.f32 %v2071_v44, %v9289_v45  ;;  %v2083_v26 = vadd.f32 %v2073_v36, %v9287_v43 }
 0x972   : > { %8359 = vpow2.f32 %v1877_v35  ;;  %v1873_v28 = vsub.f32 %v1840_v37, %v1863_v40  ;;  %v1869_v41 = vrot.slane %v1868_v11, 1  ;;  %v2332_v42 = vrot.slane %v2331_v12, 4 }
 0x973   : > { %8361 = vpow2.f32 %v1875_v39  ;;  %v2339_v48 = vrot.slane %v2338_v33, 4  ;;  %v9373_v51 = vmul.f32 0.70710677, %v2082_v34  ;;  %v9375_v52 = vmul.f32 0.70710677, %v2083_v26  ;;  %v2075_v56 = vpop.permute.xlu0 %2074  ;;  %v2077_v57 = vpop.permute.xlu1 %2076 }
 0x974   : > { %v1879_v15 = vmul.f32 1.442695, %v1873_v28  ;;  %v1870_v58 = vmax.f32 %v1868_v11, %v1869_v41  ;;  %v2333_v60 = vmax.f32 %v2331_v12, %v2332_v42  ;;  %v2084_v10 = vadd.f32 %v2075_v56, %v9301_v55 }
 0x975   : > { %v2340_v45 = vmax.f32 %v2338_v33, %v2339_v48  ;;  %v2090_v43 = vsel %vm1842_vm10, %v9373_v51, -inf  ;;  %v2097_v37 = vsel %vm1842_vm10, %v9375_v52, -inf  ;;  %v2085_v1 = vadd.f32 %v2077_v57, %v9299_v54 }
 0x976   : > { %8363 = vpow2.f32 %v1879_v15  ;;  %v1874_v7 = vsub.f32 %v1841_v50, %v1870_v58  ;;  %v2334_v63 = vrot.slane %v2333_v60, 2  ;;  %v2091_v8 = vrot.slane %v2090_v43, 4 }
 0x977   : > { %v2341_v17 = vrot.slane %v2340_v45, 2  ;;  %v2098_v19 = vrot.slane %v2097_v37, 4  ;;  %v9383_v6 = vmul.f32 0.70710677, %v2084_v10  ;;  %v9385_v20 = vmul.f32 0.70710677, %v2085_v1  ;;  %v2555_v55 = vpop.permute.xlu1 %2554  ;;  %v2557_v26 = vpop.permute.xlu0 %2556 }
 0x978   : > { %v1881_v22 = vmul.f32 1.442695, %v1874_v7  ;;  %v2335_v49 = vmax.f32 %v2333_v60, %v2334_v63  ;;  %v2092_v29 = vmax.f32 %v2090_v43, %v2091_v8  ;;  %v2566_v38 = vadd.f32 %v2555_v55, %v9309_v62 }
 0x979   : > { %v2342_v44 = vmax.f32 %v2340_v45, %v2341_v17  ;;  %v2099_v36 = vmax.f32 %v2097_v37, %v2098_v19  ;;  %v2104_v54 = vsel %vm1842_vm10, %v9383_v6, -inf  ;;  %v2111_v50 = vsel %vm1842_vm10, %v9385_v20, -inf }
 0x97a   : > { %8365 = vpow2.f32 %v1881_v22  ;;  %v2336_v35 = vrot.slane %v2335_v49, 1  ;;  %v2093_v39 = vrot.slane %v2092_v29, 2  ;;  %v2105_v40 = vrot.slane %v2104_v54, 4 }
 0x97b   : > { %v2343_v11 = vrot.slane %v2342_v44, 1  ;;  %v2100_v12 = vrot.slane %v2099_v36, 2  ;;  %v2112_v33 = vrot.slane %v2111_v50, 4  ;;  %v9392_v34 = vmul.f32 0.70710677, %v2566_v38 }
 0x97c   : > { %v2337_v28 = vmax.f32 %v2335_v49, %v2336_v35  ;;  %v2094_v62 = vmax.f32 %v2092_v29, %v2093_v39  ;;  %v2106_v41 = vmax.f32 %v2104_v54, %v2105_v40  ;;  %v2567_v10 = vadd.f32 %v2557_v26, %v9311_v2 }
 0x97d   : > { %v2344_v42 = vmax.f32 %v2342_v44, %v2343_v11  ;;  %v2101_v48 = vmax.f32 %v2099_v36, %v2100_v12  ;;  %v2113_v56 = vmax.f32 %v2111_v50, %v2112_v33  ;;  %v2574_v57 = vsel %vm1842_vm10, %v9392_v34, -inf  ;;  %v2559_v12 = vpop.permute.xlu0 %2558 }
 0x97e   : > { %v2359_v15 = vsub.f32 %v9363_v30, %v2337_v28  ;;  %v2095_v58 = vrot.slane %v2094_v62, 1  ;;  %v2107_v60 = vrot.slane %v2106_v41, 2  ;;  %v2575_v7 = vrot.slane %v2574_v57, 4 }
 0x97f   : > { %v9398_v45 = vpop.eup %8359  ;;  %v2360_v43 = vsub.f32 %v9365_v31, %v2344_v42  ;;  %v2102_v37 = vrot.slane %v2101_v48, 1  ;;  %v2114_v1 = vrot.slane %v2113_v56, 2 }
 0x980   : > { %v9401_v63 = vpop.eup %8361  ;;  %v1890_v8 = vsel %vm1842_vm10, %v9398_v45, 0.0  ;;  %v2363_v17 = vmul.f32 1.442695, %v2359_v15  ;;  %v2096_v19 = vmax.f32 %v2094_v62, %v2095_v58  ;;  %v2108_v55 = vmax.f32 %v2106_v41, %v2107_v60 }
 0x981   : > { %v1891_v30 = vrot.slane %v1890_v8, 4  ;;  %v1883_v22 = vsel %vm1842_vm10, %v9401_v63, 0.0  ;;  %v2365_v2 = vmul.f32 1.442695, %v2360_v43  ;;  %v2103_v49 = vmax.f32 %v2101_v48, %v2102_v37 }
 0x982   : > { %v1884_v29 = vrot.slane %v1883_v22, 4  ;;  %8367 = vpow2.f32 %v2363_v17  ;;  %v2118_v31 = vsub.f32 %v9373_v51, %v2096_v19  ;;  %v2109_v38 = vrot.slane %v2108_v55, 1 }
 0x983   : > { %v9408_v44 = vpop.eup %8363  ;;  %v1892_v36 = vadd.f32 %v1891_v30, %v1890_v8  ;;  %8369 = vpow2.f32 %v2365_v2  ;;  %v2119_v54 = vsub.f32 %v9375_v52, %v2103_v49  ;;  %v2115_v50 = vmax.f32 %v2113_v56, %v2114_v1  ;;  %v2318_v8 = vpop.permute.xlu1 %2317 }
 0x984   : > { %v1885_v35 = vadd.f32 %v1884_v29, %v1883_v22  ;;  %v1897_v39 = vsel %vm1842_vm10, %v9408_v44, 0.0  ;;  %v2122_v40 = vmul.f32 1.442695, %v2118_v31  ;;  %v2110_v11 = vmax.f32 %v2108_v55, %v2109_v38 }
 0x985   : > { %v1898_v33 = vrot.slane %v1897_v39, 4  ;;  %v2124_v26 = vmul.f32 1.442695, %v2119_v54  ;;  %v2116_v28 = vrot.slane %v2115_v50, 1  ;;  %v9413_v62 = vmul.f32 0.70710677, %v2567_v10 }
 0x986   : > { %v1893_v51 = vrot.slane %v1892_v36, 2  ;;  %8371 = vpow2.f32 %v2122_v40  ;;  %v2120_v41 = vsub.f32 %v9383_v6, %v2110_v11  ;;  %v2576_v42 = vmax.f32 %v2574_v57, %v2575_v7  ;;  %v2561_v7 = vpop.permute.xlu0 %2560 }
 0x987   : > { %v9416_v48 = vpop.eup %8365  ;;  %v1886_v52 = vrot.slane %v1885_v35, 2  ;;  %v1899_v56 = vadd.f32 %v1898_v33, %v1897_v39  ;;  %8373 = vpow2.f32 %v2124_v26  ;;  %v2117_v15 = vmax.f32 %v2115_v50, %v2116_v28 }
 0x988   : > { %v1904_v58 = vsel %vm1842_vm10, %v9416_v48, 0.0  ;;  %v2126_v60 = vmul.f32 1.442695, %v2120_v41  ;;  %v2577_v43 = vrot.slane %v2576_v42, 2  ;;  %v9421_v17 = vadd.f32 %v1893_v51, %v1892_v36 }
 0x989   : > { %v1900_v37 = vrot.slane %v1899_v56, 2  ;;  %v1905_v1 = vrot.slane %v1904_v58, 4  ;;  %v2121_v10 = vsub.f32 %v9385_v20, %v2117_v15  ;;  %v2581_v57 = vsel %vm1842_vm10, %v9413_v62, -inf }
 0x98a   : > { %8375 = vpow2.f32 %v2126_v60  ;;  %v2578_v6 = vmax.f32 %v2576_v42, %v2577_v43  ;;  %v9425_v19 = vadd.f32 %v1886_v52, %v1885_v35  ;;  %v2582_v49 = vrot.slane %v2581_v57, 4  ;;  %v2316_v51 = vpop.permute.xlu0 %2315 }
 0x98b   : > { %v9427_v55 = vadd.f32 %v1900_v37, %v1899_v56  ;;  %v1906_v30 = vadd.f32 %v1905_v1, %v1904_v58  ;;  %v2128_v22 = vmul.f32 1.442695, %v2121_v10  ;;  %v2326_v29 = vadd.f32 %v2318_v8, %v9319_v13 }
 0x98c   : > { %v2579_v2 = vrot.slane %v2578_v6, 1  ;;  %v2568_v31 = vadd.f32 %v2559_v12, %v9321_v46  ;;  %v1895_v38 = vrot.slane %v9421_v17, 1  ;;  %v2583_v54 = vmax.f32 %v2581_v57, %v2582_v49 }
 0x98d   : > { %v1907_v20 = vrot.slane %v1906_v30, 2  ;;  %8377 = vpow2.f32 %v2128_v22  ;;  %v9432_v50 = vmul.f32 0.70710677, %v2326_v29  ;;  %v1888_v39 = vrot.slane %v9425_v19, 1 }
 0x98e   : > { %v2580_v36 = vmax.f32 %v2578_v6, %v2579_v2  ;;  %v1902_v40 = vrot.slane %v9427_v55, 1  ;;  %v9438_v11 = vmul.f32 0.70710677, %v2568_v31  ;;  %v2569_v13 = vadd.f32 %v2561_v7, %v9328_v16 }
 0x98f   : > { %v9434_v35 = vpop.eup %8367  ;;  %v2584_v26 = vrot.slane %v2583_v54, 2  ;;  %v2352_v28 = vsel %vm1842_vm10, %v9432_v50, -inf  ;;  %v9448_v41 = vadd.f32 %v1907_v20, %v1906_v30  ;;  %v2325_v10 = vadd.f32 %v2316_v51, %v9335_v18 }
 0x990   : > { %v9441_v33 = vpop.eup %8369  ;;  %v2371_v46 = vsel %vm1842_vm10, %v9434_v35, 0.0  ;;  %v2602_v12 = vsub.f32 %v9392_v34, %v2580_v36  ;;  %v2353_v56 = vrot.slane %v2352_v28, 4  ;;  %v2588_v60 = vsel %vm1842_vm10, %v9438_v11, -inf }
 0x991   : > { %v2372_v42 = vrot.slane %v2371_v46, 4  ;;  %v2378_v52 = vsel %vm1842_vm10, %v9441_v33, 0.0  ;;  %v2585_v58 = vmax.f32 %v2583_v54, %v2584_v26  ;;  %v2589_v1 = vrot.slane %v2588_v60, 4 }
 0x992   : > { %v2379_v16 = vrot.slane %v2378_v52, 4  ;;  %v2606_v15 = vmul.f32 1.442695, %v2602_v12  ;;  %v2354_v37 = vmax.f32 %v2352_v28, %v2353_v56  ;;  %v9465_v26 = vmul.f32 0.70710677, %v2569_v13 }
 0x993   : > { %v9454_v43 = vpop.eup %8371  ;;  %v2373_v34 = vadd.f32 %v2372_v42, %v2371_v46  ;;  %v2586_v7 = vrot.slane %v2585_v58, 1  ;;  %v2590_v36 = vmax.f32 %v2588_v60, %v2589_v1 }
 0x994   : > { %v9457_v8 = vpop.eup %8373  ;;  %v2380_v6 = vadd.f32 %v2379_v16, %v2378_v52  ;;  %v2130_v57 = vsel %vm1842_vm10, %v9454_v43, 0.0  ;;  %8379 = vpow2.f32 %v2606_v15  ;;  %v2355_v49 = vrot.slane %v2354_v37, 2 }
 0x995   : > { %v2374_v30 = vrot.slane %v2373_v34, 2  ;;  %v2131_v22 = vrot.slane %v2130_v57, 4  ;;  %v2137_v2 = vsel %vm1842_vm10, %v9457_v8, 0.0  ;;  %v2587_v31 = vmax.f32 %v2585_v58, %v2586_v7 }
 0x996   : > { %v2381_v29 = vrot.slane %v2380_v6, 2  ;;  %v2138_v20 = vrot.slane %v2137_v2, 4  ;;  %v2356_v12 = vmax.f32 %v2354_v37, %v2355_v49 }
 0x997   : > { %v9463_v54 = vpop.eup %8375  ;;  %v2375_v18 = vadd.f32 %v2374_v30, %v2373_v34  ;;  %v2132_v46 = vadd.f32 %v2131_v22, %v2130_v57  ;;  %v2603_v52 = vsub.f32 %v9413_v62, %v2587_v31  ;;  %v2591_v57 = vrot.slane %v2590_v36, 2  ;;  %v9474_v62 = vpop.permute.xlu1 %2685 }
 0x998   : > { %v2382_v28 = vadd.f32 %v2381_v29, %v2380_v6  ;;  %v2139_v51 = vadd.f32 %v2138_v20, %v2137_v2  ;;  %v2144_v42 = vsel %vm1842_vm10, %v9463_v54, 0.0  ;;  %v2357_v61 = vrot.slane %v2356_v12, 1 }
 0x999   : > { %v2376_v56 = vrot.slane %v2375_v18, 1  ;;  %v2133_v16 = vrot.slane %v2132_v46, 2  ;;  %v2145_v15 = vrot.slane %v2144_v42, 4  ;;  %v2608_v34 = vmul.f32 1.442695, %v2603_v52 }
 0x99a   : > { %v9470_v58 = vpop.eup %8377  ;;  %v2383_v60 = vrot.slane %v2382_v28, 1  ;;  %v2140_v1 = vrot.slane %v2139_v51, 2  ;;  %v2358_v20 = vmax.f32 %v2356_v12, %v2357_v61  ;;  %v2592_v31 = vmax.f32 %v2590_v36, %v2591_v57 }
 0x99b   : > { %v2377_v37 = vadd.f32 %v2376_v56, %v2375_v18  ;;  %v2134_v13 = vadd.f32 %v2133_v16, %v2132_v46  ;;  %v2146_v7 = vadd.f32 %v2145_v15, %v2144_v42  ;;  %v2151_v6 = vsel %vm1842_vm10, %v9470_v58, 0.0 }
 0x99c   : > { %v2384_v30 = vadd.f32 %v2383_v60, %v2382_v28  ;;  %v2141_v22 = vadd.f32 %v2140_v1, %v2139_v51  ;;  %v2152_v2 = vrot.slane %v2151_v6, 4  ;;  %8381 = vpow2.f32 %v2608_v34 }
 0x99d   : > { %v2135_v49 = vrot.slane %v2134_v13, 1  ;;  %v2147_v29 = vrot.slane %v2146_v7, 2  ;;  %v2595_v18 = vsel %vm1842_vm10, %v9465_v26, -inf  ;;  %8383 = vrcp.f32 %v2377_v37  ;;  %v9485_v37 = vpop.permute.xlu1 %2442 }
 0x99e   : > { %v2142_v27 = vrot.slane %v2141_v22, 1  ;;  %v2153_v24 = vadd.f32 %v2152_v2, %v2151_v6  ;;  %v2362_v52 = vsub.f32 %v9432_v50, %v2358_v20  ;;  %v2593_v28 = vrot.slane %v2592_v31, 1 }
 0x99f   : > { %v2136_v46 = vadd.f32 %v2135_v49, %v2134_v13  ;;  %v2148_v42 = vadd.f32 %v2147_v29, %v2146_v7  ;;  %v2596_v16 = vrot.slane %v2595_v18, 4  ;;  %8385 = vrcp.f32 %v2384_v30 }
 0x9a0   : > { %v2143_v51 = vadd.f32 %v2142_v27, %v2141_v22  ;;  %v2154_v56 = vrot.slane %v2153_v24, 2  ;;  %v2369_v61 = vmul.f32 1.442695, %v2362_v52  ;;  %v2594_v36 = vmax.f32 %v2592_v31, %v2593_v28 }
 0x9a1   : > { %v9479_v15 = vpop.eup %8379  ;;  %v2149_v60 = vrot.slane %v2148_v42, 1  ;;  %v9481_v12 = vmul.f32 0.70710677, %v2325_v10  ;;  %v2597_v57 = vmax.f32 %v2595_v18, %v2596_v16  ;;  %8387 = vrcp.f32 %v2136_v46 }
 0x9a2   : > { %v2155_v1 = vadd.f32 %v2154_v56, %v2153_v24  ;;  %v2614_v34 = vsel %vm1842_vm10, %v9479_v15, 0.0  ;;  %8389 = vpow2.f32 %v2369_v61  ;;  %v2604_v13 = vsub.f32 %v9438_v11, %v2594_v36 }
 0x9a3   : > { %v2150_v50 = vadd.f32 %v2149_v60, %v2148_v42  ;;  %v2615_v27 = vrot.slane %v2614_v34, 4  ;;  %v2598_v6 = vrot.slane %v2597_v57, 2  ;;  %v2345_v30 = vsel %vm1842_vm10, %v9481_v12, -inf  ;;  %v9497_v42 = vpop.permute.xlu1 %2650 }
 0x9a4   : > { %v2156_v7 = vrot.slane %v2155_v1, 1  ;;  %8391 = vrcp.f32 %v2143_v51  ;;  %v2610_v24 = vmul.f32 1.442695, %v2604_v13  ;;  %v2346_v22 = vrot.slane %v2345_v30, 4 }
 0x9a5   : > { %v2616_v10 = vadd.f32 %v2615_v27, %v2614_v34  ;;  %8393 = vrcp.f32 %v2150_v50  ;;  %v1909_v2 = vrot.slane %v9448_v41, 1  ;;  %v2599_v29 = vmax.f32 %v2597_v57, %v2598_v6 }
 0x9a6   : > { %v2157_v49 = vadd.f32 %v2156_v7, %v2155_v1  ;;  %v1889_v20 = vadd.f32 %v1888_v39, %v9425_v19  ;;  %8395 = vpow2.f32 %v2610_v24  ;;  %v2347_v11 = vmax.f32 %v2345_v30, %v2346_v22 }
 0x9a7   : > { %v2617_v31 = vrot.slane %v2616_v10, 2  ;;  %v1896_v18 = vadd.f32 %v1895_v38, %v9421_v17  ;;  %v2600_v46 = vrot.slane %v2599_v29, 1  ;;  %v1903_v28 = vadd.f32 %v1902_v40, %v9427_v55  ;;  %v9511_v13 = vpop.permute.xlu1 %2407 }
 0x9a8   : > { %8397 = vrcp.f32 %v2157_v49  ;;  %v2348_v56 = vrot.slane %v2347_v11, 2  ;;  %v1910_v19 = vadd.f32 %v1909_v2, %v9448_v41 }
 0x9a9   : > { %v9499_v52 = vpop.eup %8381  ;;  %v2618_v51 = vadd.f32 %v2617_v31, %v2616_v10  ;;  %v2601_v16 = vmax.f32 %v2599_v29, %v2600_v46  ;;  %8399 = vrcp.f32 %v1889_v20  ;;  %v2202_v31 = vpop.permute.xlu0 %2201 }
 0x9aa   : > { %v2621_v39 = vsel %vm1842_vm10, %v9499_v52, 0.0  ;;  %v8384_v60 = vpop.eup %8383  ;;  %v2349_v61 = vmax.f32 %v2347_v11, %v2348_v56  ;;  %8401 = vrcp.f32 %v1896_v18 }
 0x9ab   : > { %v2619_v17 = vrot.slane %v2618_v51, 1  ;;  %v2622_v38 = vrot.slane %v2621_v39, 4  ;;  %v2605_v36 = vsub.f32 %v9465_v26, %v2601_v16  ;;  %v2403_v1 = vmul.f32 %v8384_v60, %v9434_v35 }
 0x9ac   : > { %v8386_v34 = vpop.eup %8385  ;;  %v2350_v57 = vrot.slane %v2349_v61, 1  ;;  %8403 = vrcp.f32 %v1903_v28 }
 0x9ad   : > { %v2620_v55 = vadd.f32 %v2619_v17, %v2618_v51  ;;  %v2623_v40 = vadd.f32 %v2622_v38, %v2621_v39  ;;  %v2612_v41 = vmul.f32 1.442695, %v2605_v36  ;;  %v2404_v50 = vmul.f32 %v8386_v34, %v9441_v33 }
 0x9ae   : > { %v2445_v27 = vmul.f32 %v9485_v37, %v2403_v1  ;;  %8405 = vrcp.f32 %v1910_v19  ;;  %v8388_v7 = vpop.eup %8387  ;;  %v2351_v26 = vmax.f32 %v2349_v61, %v2350_v57  ;;  %v2410_v35 = vmul.f32 %v9511_v13, %v2403_v1 }
 0x9af   : > { %v2624_v6 = vrot.slane %v2623_v40, 2  ;;  %8407 = vrcp.f32 %v2620_v55  ;;  %v9514_v30 = vpop.eup %8389  ;;  %v2446_v10 = vmul.f32 %v9485_v37, %v2404_v50  ;;  %v9519_v33 = vmul.f32 %v8388_v7, %v9454_v43 }
 0x9b0   : > { %8409 = vpow2.f32 %v2612_v41  ;;  %v2449_v24 = vsel %vm1842_vm10, %v2445_v27, 0.0  ;;  %v2392_v49 = vsel %vm1842_vm10, %v9514_v30, 0.0  ;;  %v2361_v20 = vsub.f32 %v9481_v12, %v2351_v26 }
 0x9b1   : > { %v8392_v22 = vpop.eup %8391  ;;  %v2625_v2 = vadd.f32 %v2624_v6, %v2623_v40  ;;  %v2450_v29 = vrot.slane %v2449_v24, 4  ;;  %v2393_v18 = vrot.slane %v2392_v49, 4  ;;  %v2456_v46 = vsel %vm1842_vm10, %v2446_v10, 0.0 }
 0x9b2   : > { %v8394_v11 = vpop.eup %8393  ;;  %v9526_v28 = vmul.f32 %v8392_v22, %v9457_v8  ;;  %v2204_v51 = vmul.f32 %v2202_v31, %v9519_v33  ;;  %v2457_v19 = vrot.slane %v2456_v46, 4  ;;  %v2367_v39 = vmul.f32 1.442695, %v2361_v20 }
 0x9b3   : > { %v2626_v43 = vrot.slane %v2625_v2, 1  ;;  %v9529_v56 = vadd.f32 %v2450_v29, %v2449_v24  ;;  %v9531_v16 = vpop.eup %8395  ;;  %v2394_v60 = vadd.f32 %v2393_v18, %v2392_v49  ;;  %v9534_v12 = vmul.f32 %v8394_v11, %v9463_v54 }
 0x9b4   : > { %v2205_v17 = vmul.f32 %v2202_v31, %v9526_v28  ;;  %v2208_v38 = vsel %vm1842_vm10, %v2204_v51, 0.0  ;;  %v2628_v36 = vsel %vm1842_vm10, %v9531_v16, 0.0  ;;  %v9541_v34 = vadd.f32 %v2457_v19, %v2456_v46 }
 0x9b5   : > { %v8398_v61 = vpop.eup %8397  ;;  %v2627_v8 = vadd.f32 %v2626_v43, %v2625_v2  ;;  %v2395_v55 = vrot.slane %v2394_v60, 2  ;;  %v2629_v40 = vrot.slane %v2628_v36, 4  ;;  %8411 = vpow2.f32 %v2367_v39 }
 0x9b6   : > { %v9544_v57 = vmul.f32 %v8398_v61, %v9470_v58  ;;  %v2206_v41 = vmul.f32 %v2202_v31, %v9534_v12  ;;  %v2209_v27 = vrot.slane %v2208_v38, 4  ;;  %v8400_v7 = vpop.eup %8399  ;;  %v2215_v24 = vsel %vm1842_vm10, %v2205_v17, 0.0 }
 0x9b7   : > { %8413 = vrcp.f32 %v2627_v8  ;;  %v2396_v6 = vadd.f32 %v2395_v55, %v2394_v60  ;;  %v2630_v26 = vadd.f32 %v2629_v40, %v2628_v36  ;;  %v8402_v22 = vpop.eup %8401  ;;  %v2216_v49 = vrot.slane %v2215_v24, 4 }
 0x9b8   : > { %v2207_v10 = vmul.f32 %v2202_v31, %v9544_v57  ;;  %v9550_v2 = vadd.f32 %v2209_v27, %v2208_v38  ;;  %v2222_v58 = vsel %vm1842_vm10, %v2206_v41, 0.0  ;;  %v2411_v29 = vmul.f32 %v9511_v13, %v2404_v50 }
 0x9b9   : > { %v8404_v20 = vpop.eup %8403  ;;  %v2397_v11 = vrot.slane %v2396_v6, 1  ;;  %v2631_v18 = vrot.slane %v2630_v26, 2  ;;  %v2223_v46 = vrot.slane %v2222_v58, 4  ;;  %v9558_v19 = vadd.f32 %v2216_v49, %v2215_v24 }
 0x9ba   : > { %v9555_v51 = vsel %vm1842_vm10, %v2207_v10, 0.0  ;;  %v2414_v60 = vsel %vm1842_vm10, %v2410_v35, 0.0  ;;  %v2421_v41 = vsel %vm1842_vm10, %v2411_v29, 0.0  ;;  %v9570_v27 = vmul.f32 %v8400_v7, %v9401_v63 }
 0x9bb   : > { %v8406_v43 = vpop.eup %8405  ;;  %v2398_v38 = vadd.f32 %v2397_v11, %v2396_v6  ;;  %v2632_v61 = vadd.f32 %v2631_v18, %v2630_v26  ;;  %v9562_v50 = vadd.f32 %v2223_v46, %v2222_v58  ;;  %v2415_v8 = vrot.slane %v2414_v60, 4 }
 0x9bc   : > { %v8408_v17 = vpop.eup %8407  ;;  %v2422_v58 = vrot.slane %v2421_v41, 4  ;;  %v9577_v18 = vmul.f32 %v8402_v22, %v9398_v45  ;;  %v9580_v63 = vmul.f32 %v8404_v20, %v9408_v44  ;;  %v9589_v22 = vmul.f32 %v8406_v43, %v9416_v48 }
 0x9bd   : > { %v9564_v36 = vpop.eup %8409  ;;  %v2646_v55 = vmul.f32 %v8408_v17, %v9479_v15  ;;  %v2633_v10 = vrot.slane %v2632_v61, 1  ;;  %8415 = vrcp.f32 %v2398_v38  ;;  %v2416_v6 = vadd.f32 %v2415_v8, %v2414_v60 }
 0x9be   : > { %v2635_v35 = vsel %vm1842_vm10, %v9564_v36, 0.0  ;;  %v2423_v60 = vadd.f32 %v2422_v58, %v2421_v41 }
 0x9bf   : > { %v2688_v26 = vmul.f32 %v9474_v62, %v2646_v55  ;;  %v2636_v24 = vrot.slane %v2635_v35, 4  ;;  %v2653_v49 = vmul.f32 %v9497_v42, %v2646_v55  ;;  %v2634_v15 = vadd.f32 %v2633_v10, %v2632_v61  ;;  %v1955_v55 = vpop.permute.xlu0 %1954 }
 0x9c0   : > { %v2417_v11 = vrot.slane %v2416_v6, 2  ;;  %v2424_v45 = vrot.slane %v2423_v60, 2  ;;  %v1957_v44 = vmul.f32 %v1955_v55, %v9570_v27 }
 0x9c1   : > { %v2692_v7 = vsel %vm1842_vm10, %v2688_v26, 0.0  ;;  %v2637_v29 = vadd.f32 %v2636_v24, %v2635_v35  ;;  %v2657_v46 = vsel %vm1842_vm10, %v2653_v49, 0.0  ;;  %8417 = vrcp.f32 %v2634_v15 }
 0x9c2   : > { %v2693_v17 = vrot.slane %v2692_v7, 4  ;;  %v2658_v38 = vrot.slane %v2657_v46, 4  ;;  %v9584_v8 = vadd.f32 %v2417_v11, %v2416_v6  ;;  %v9586_v61 = vpop.eup %8411  ;;  %v1958_v6 = vmul.f32 %v1955_v55, %v9577_v18 }
 0x9c3   : > { %v2638_v10 = vrot.slane %v2637_v29, 2  ;;  %v2385_v41 = vsel %vm1842_vm10, %v9586_v61, 0.0  ;;  %v9598_v15 = vadd.f32 %v2424_v45, %v2423_v60  ;;  %v1959_v11 = vmul.f32 %v1955_v55, %v9580_v63 }
 0x9c4   : > { %v8414_v20 = vpop.eup %8413  ;;  %v9592_v35 = vadd.f32 %v2693_v17, %v2692_v7  ;;  %v2659_v26 = vadd.f32 %v2658_v38, %v2657_v46  ;;  %v2386_v58 = vrot.slane %v2385_v41, 4  ;;  %v1960_v7 = vmul.f32 %v1955_v55, %v9589_v22 }
 0x9c5   : > { %v2647_v24 = vmul.f32 %v8414_v20, %v9499_v52  ;;  %v2639_v49 = vadd.f32 %v2638_v10, %v2637_v29  ;;  %v1961_v52 = vsel %vm1842_vm10, %v1957_v44, 0.0  ;;  %v1968_v29 = vsel %vm1842_vm10, %v1958_v6, 0.0 }
 0x9c6   : > { %v2660_v43 = vrot.slane %v2659_v26, 2  ;;  %v2387_v1 = vadd.f32 %v2386_v58, %v2385_v41  ;;  %v1975_v60 = vsel %vm1842_vm10, %v1959_v11, 0.0  ;;  %v1962_v40 = vrot.slane %v1961_v52, 4 }
 0x9c7   : > { %v2689_v17 = vmul.f32 %v9474_v62, %v2647_v24  ;;  %v2640_v54 = vrot.slane %v2639_v49, 1  ;;  %v2654_v46 = vmul.f32 %v9497_v42, %v2647_v24  ;;  %v1969_v41 = vrot.slane %v1968_v29, 4 }
 0x9c8   : > { %v9605_v38 = vadd.f32 %v2660_v43, %v2659_v26  ;;  %v2388_v20 = vrot.slane %v2387_v1, 2  ;;  %v1976_v26 = vrot.slane %v1975_v60, 4  ;;  %v9613_v44 = vsel %vm1842_vm10, %v1960_v7, 0.0 }
 0x9c9   : > { %v2699_v10 = vsel %vm1842_vm10, %v2689_v17, 0.0  ;;  %v2641_v45 = vadd.f32 %v2640_v54, %v2639_v49  ;;  %v2664_v55 = vsel %vm1842_vm10, %v2654_v46, 0.0  ;;  %v9618_v54 = vadd.f32 %v1962_v40, %v1961_v52  ;;  %v2167_v49 = vpop.permute.xlu0 %2166 }
 0x9ca   : > { %v2700_v48 = vrot.slane %v2699_v10, 4  ;;  %v2665_v39 = vrot.slane %v2664_v55, 4  ;;  %v8416_v58 = vpop.eup %8415  ;;  %v2389_v24 = vadd.f32 %v2388_v20, %v2387_v1  ;;  %v9620_v46 = vadd.f32 %v1969_v41, %v1968_v29 }
 0x9cb   : > { %8419 = vrcp.f32 %v2641_v45  ;;  %v2406_v43 = vmul.f32 %v8416_v58, %v9514_v30  ;;  %v9622_v31 = vadd.f32 %v1976_v26, %v1975_v60  ;;  %v2169_v52 = vmul.f32 %v2167_v49, %v9519_v33 }
 0x9cc   : > { %v9615_v6 = vadd.f32 %v2700_v48, %v2699_v10  ;;  %v2666_v11 = vadd.f32 %v2665_v39, %v2664_v55  ;;  %v2390_v17 = vrot.slane %v2389_v24, 1  ;;  %v2171_v33 = vmul.f32 %v2167_v49, %v9534_v12 }
 0x9cd   : > { %v2448_v7 = vmul.f32 %v9485_v37, %v2406_v43  ;;  %v2413_v48 = vmul.f32 %v9511_v13, %v2406_v43 }
 0x9ce   : > { %v2667_v20 = vrot.slane %v2666_v11, 2  ;;  %v8418_v10 = vpop.eup %8417  ;;  %v2391_v30 = vadd.f32 %v2390_v17, %v2389_v24  ;;  %v2170_v24 = vmul.f32 %v2167_v49, %v9526_v28  ;;  %v2187_v12 = vsel %vm1842_vm10, %v2171_v33, 0.0 }
 0x9cf   : > { %v2648_v29 = vmul.f32 %v8418_v10, %v9531_v16  ;;  %v9633_v60 = vsel %vm1842_vm10, %v2448_v7, 0.0  ;;  %v2435_v41 = vsel %vm1842_vm10, %v2413_v48, 0.0  ;;  %v2172_v16 = vmul.f32 %v2167_v49, %v9544_v57  ;;  %v1920_v7 = vpop.permute.xlu0 %1919 }
 0x9d0   : > { %v9635_v55 = vadd.f32 %v2667_v20, %v2666_v11  ;;  %8421 = vrcp.f32 %v2391_v30  ;;  %v2436_v26 = vrot.slane %v2435_v41, 4  ;;  %v2173_v11 = vsel %vm1842_vm10, %v2169_v52, 0.0 }
 0x9d1   : > { %v2690_v43 = vmul.f32 %v9474_v62, %v2648_v29  ;;  %v2655_v17 = vmul.f32 %v9497_v42, %v2648_v29  ;;  %v2180_v20 = vsel %vm1842_vm10, %v2170_v24, 0.0  ;;  %v1922_v48 = vmul.f32 %v1920_v7, %v9570_v27 }
 0x9d2   : > { %v9644_v10 = vadd.f32 %v2436_v26, %v2435_v41  ;;  %v2174_v58 = vrot.slane %v2173_v11, 4  ;;  %v2181_v45 = vrot.slane %v2180_v20, 4  ;;  %v2194_v57 = vsel %vm1842_vm10, %v2172_v16, 0.0 }
 0x9d3   : > { %v2706_v30 = vsel %vm1842_vm10, %v2690_v43, 0.0  ;;  %v2671_v28 = vsel %vm1842_vm10, %v2655_v17, 0.0  ;;  %v2188_v26 = vrot.slane %v2187_v12, 4  ;;  %v2195_v52 = vrot.slane %v2194_v57, 4 }
 0x9d4   : > { %v2707_v29 = vrot.slane %v2706_v30, 4  ;;  %v2672_v1 = vrot.slane %v2671_v28, 4  ;;  %v2175_v49 = vadd.f32 %v2174_v58, %v2173_v11  ;;  %v2182_v41 = vadd.f32 %v2181_v45, %v2180_v20 }
 0x9d5   : > { %v1923_v27 = vmul.f32 %v1920_v7, %v9577_v18  ;;  %v1924_v43 = vmul.f32 %v1920_v7, %v9580_v63  ;;  %v9659_v59 = vadd.f32 %v2188_v26, %v2187_v12  ;;  %v9661_v33 = vadd.f32 %v2195_v52, %v2194_v57 }
 0x9d6   : > { %v9653_v40 = vadd.f32 %v2707_v29, %v2706_v30  ;;  %v9655_v24 = vadd.f32 %v2672_v1, %v2671_v28  ;;  %v2176_v39 = vrot.slane %v2175_v49, 2  ;;  %v2183_v47 = vrot.slane %v2182_v41, 2 }
 0x9d7   : > { %v1925_v16 = vmul.f32 %v1920_v7, %v9589_v22  ;;  %v1926_v1 = vsel %vm1842_vm10, %v1922_v48, 0.0  ;;  %v2190_v63 = vrot.slane %v9659_v59, 2  ;;  %v1940_v29 = vsel %vm1842_vm10, %v1924_v43, 0.0 }
 0x9d8   : > { %v8420_v17 = vpop.eup %8419  ;;  %v9667_v11 = vadd.f32 %v2176_v39, %v2175_v49  ;;  %v9669_v18 = vadd.f32 %v2183_v47, %v2182_v41  ;;  %v1927_v20 = vrot.slane %v1926_v1, 4  ;;  %v1941_v48 = vrot.slane %v1940_v29, 4 }
 0x9d9   : > { %v2649_v58 = vmul.f32 %v8420_v17, %v9564_v36  ;;  %v1933_v36 = vsel %vm1842_vm10, %v1923_v27, 0.0  ;;  %v1947_v39 = vsel %vm1842_vm10, %v1925_v16, 0.0  ;;  %v12226_v57 = vrot.slane %v9550_v2, 2 }
 0x9da   : > { %v1928_v22 = vadd.f32 %v1927_v20, %v1926_v1  ;;  %v1934_v7 = vrot.slane %v1933_v36, 4  ;;  %v1948_v12 = vrot.slane %v1947_v39, 4  ;;  %v9686_v43 = vadd.f32 %v1941_v48, %v1940_v29 }
 0x9db   : > { %v2656_v30 = vmul.f32 %v9497_v42, %v2649_v58  ;;  %v9674_v28 = vmul.f32 %v9474_v62, %v2649_v58  ;;  %v2212_v49 = vadd.f32 %v12226_v57, %v9550_v2  ;;  %v12227_v62 = vrot.slane %v9558_v19, 2 }
 0x9dc   : > { %v1929_v52 = vrot.slane %v1928_v22, 2  ;;  %v1935_v27 = vadd.f32 %v1934_v7, %v1933_v36  ;;  %v9689_v58 = vadd.f32 %v1948_v12, %v1947_v39  ;;  %v12228_v39 = vrot.slane %v9555_v51, 4 }
 0x9dd   : > { %v2678_v47 = vsel %vm1842_vm10, %v2656_v30, 0.0  ;;  %v2219_v42 = vadd.f32 %v12227_v62, %v9558_v19  ;;  %v8422_v41 = vpop.eup %8421  ;;  %v2213_v16 = vrot.slane %v2212_v49, 1 }
 0x9de   : > { %v2679_v26 = vrot.slane %v2678_v47, 4  ;;  %v2405_v17 = vmul.f32 %v8422_v41, %v9586_v61  ;;  %v9693_v30 = vadd.f32 %v1929_v52, %v1928_v22  ;;  %v1936_v2 = vrot.slane %v1935_v27, 2 }
 0x9df   : > { %v2220_v1 = vrot.slane %v2219_v42, 1  ;;  %v2214_v29 = vadd.f32 %v2213_v16, %v2212_v49  ;;  %v2225_v61 = vrot.slane %v9562_v50, 2  ;;  %v12229_v22 = vrot.slane %v9618_v54, 2 }
 0x9e0   : > { %v9691_v20 = vadd.f32 %v2679_v26, %v2678_v47  ;;  %v2412_v19 = vmul.f32 %v9511_v13, %v2405_v17  ;;  %v2447_v36 = vmul.f32 %v9485_v37, %v2405_v17  ;;  %v9698_v48 = vadd.f32 %v1936_v2, %v1935_v27 }
 0x9e1   : > { %v2221_v7 = vadd.f32 %v2220_v1, %v2219_v42  ;;  %v2231_v47 = vadd.f32 %v12228_v39, %v9555_v51  ;;  %v1965_v12 = vadd.f32 %v12229_v22, %v9618_v54  ;;  %v12230_v37 = vrot.slane %v9620_v46, 2 }
 0x9e2   : > { %v2428_v62 = vsel %vm1842_vm10, %v2412_v19, 0.0  ;;  %v1978_v42 = vrot.slane %v9622_v31, 2  ;;  %v2226_v26 = vadd.f32 %v2225_v61, %v9562_v50  ;;  %v12231_v54 = vrot.slane %v9613_v44, 4 }
 0x9e3   : > { %v2248_v13 = vsel %vm1993_vm11, %v2221_v7, %v2214_v29  ;;  %v1972_v49 = vadd.f32 %v12230_v37, %v9620_v46  ;;  %v2429_v41 = vrot.slane %v2428_v62, 4  ;;  %v2232_v52 = vrot.slane %v2231_v47, 2 }
 0x9e4   : > { %v1966_v51 = vrot.slane %v1965_v12, 1  ;;  %v1979_v17 = vadd.f32 %v1978_v42, %v9622_v31  ;;  %v1984_v16 = vadd.f32 %v12231_v54, %v9613_v44  ;;  %v12232_v1 = vrot.slane %v9592_v35, 2 }
 0x9e5   : > { %v1973_v27 = vrot.slane %v1972_v49, 1  ;;  %v9721_v19 = vadd.f32 %v2429_v41, %v2428_v62  ;;  %v2227_v46 = vrot.slane %v2226_v26, 1  ;;  %v2233_v29 = vadd.f32 %v2232_v52, %v2231_v47 }
 0x9e6   : > { %v2696_v2 = vadd.f32 %v12232_v1, %v9592_v35  ;;  %v1967_v7 = vadd.f32 %v1966_v51, %v1965_v12  ;;  %v1980_v50 = vrot.slane %v1979_v17, 1  ;;  %v1985_v61 = vrot.slane %v1984_v16, 2 }
 0x9e7   : > { %v1974_v39 = vadd.f32 %v1973_v27, %v1972_v49  ;;  %v2431_v37 = vrot.slane %v9721_v19, 2  ;;  %v2228_v31 = vadd.f32 %v2227_v46, %v2226_v26  ;;  %v2234_v42 = vrot.slane %v2233_v29, 1 }
 0x9e8   : > { %v2697_v22 = vrot.slane %v2696_v2, 1  ;;  %v12233_v44 = vrot.slane %v9615_v6, 2  ;;  %v1981_v45 = vadd.f32 %v1980_v50, %v1979_v17  ;;  %v1986_v57 = vadd.f32 %v1985_v61, %v1984_v16 }
 0x9e9   : > { %v2004_v35 = vsel %vm1993_vm11, %v1974_v39, %v1967_v7  ;;  %v2235_v41 = vadd.f32 %v2234_v42, %v2233_v29  ;;  %v2249_v47 = vsel %vm1995_vm12, %v2228_v31, %v2248_v13  ;;  %v2709_v49 = vrot.slane %v9653_v40, 2  ;;  %v2748_v7 = vld [vmem:[%s8877_s30 + $0x8] sm:$0xff]  ;;  %v2747_v39 = vld [vmem:[%s8877_s30] sm:$0xff] }
 0x9ea   : > { %v2703_v54 = vadd.f32 %v12233_v44, %v9615_v6  ;;  %v2698_v62 = vadd.f32 %v2697_v22, %v2696_v2  ;;  %v1987_v52 = vrot.slane %v1986_v57, 1  ;;  %v2005_v26 = vsel %vm1995_vm12, %v1981_v45, %v2004_v35  ;;  %8131 = vmatprep.subr.mxu1 %v2748_v7 }
 0x9eb   : > { %v2713_v51 = vsel %vm1842_vm10, %v9674_v28, 0.0  ;;  %v12234_v6 = vrot.slane %v9529_v56, 2  ;;  %v2250_v17 = vsel %vm1997_vm13, %v2235_v41, %v2249_v47  ;;  %v2710_v13 = vadd.f32 %v2709_v49, %v9653_v40  ;;  %8132 = vmatpush3.msra.mxu1 %v2748_v7 }
 0x9ec   : > { %v2704_v12 = vrot.slane %v2703_v54, 1  ;;  %v2714_v1 = vrot.slane %v2713_v51, 4  ;;  %2251 = vrot.lane.b32.xlu0 %v2250_v17, %s12145_s3  ;;  %v1988_v2 = vadd.f32 %v1987_v52, %v1986_v57  ;;  %v12235_v45 = vrot.slane %v9541_v34, 2  ;;  %8133 = vmatprep.subr.mxu1 %v2747_v39 }
 0x9ed   : > { %v2453_v27 = vadd.f32 %v12234_v6, %v9529_v56  ;;  %v2463_v28 = vsel %vm1842_vm10, %v2447_v36, 0.0  ;;  %v2711_v56 = vrot.slane %v2710_v13, 1  ;;  %v12236_v57 = vrot.slane %v9633_v60, 4  ;;  %8134 = vmatpush3.msra.mxu1 %v2747_v39 }
 0x9ee   : > { %v2705_v16 = vadd.f32 %v2704_v12, %v2703_v54  ;;  %v2460_v29 = vadd.f32 %v12235_v45, %v9541_v34  ;;  %v2715_v50 = vadd.f32 %v2714_v1, %v2713_v51  ;;  %v2464_v22 = vrot.slane %v2463_v28, 4 }
 0x9ef   : > { %v2454_v46 = vrot.slane %v2453_v27, 1  ;;  %v2006_v40 = vsel %vm1997_vm13, %v1988_v2, %v2005_v26  ;;  %v2472_v44 = vadd.f32 %v12236_v57, %v9633_v60  ;;  %v2712_v34 = vadd.f32 %v2711_v56, %v2710_v13 }
 0x9f0   : > { %v2732_v61 = vsel %vm1993_vm11, %v2705_v16, %v2698_v62  ;;  %v2461_v42 = vrot.slane %v2460_v29, 1  ;;  %v2716_v54 = vrot.slane %v2715_v50, 2  ;;  %v2465_v36 = vadd.f32 %v2464_v22, %v2463_v28  ;;  %2007 = vrot.lane.b32.xlu0 %v2006_v40, %s12145_s3 }
 0x9f1   : > { %v2455_v31 = vadd.f32 %v2454_v46, %v2453_v27  ;;  %v2178_v35 = vrot.slane %v9667_v11, 1  ;;  %v2473_v41 = vrot.slane %v2472_v44, 2  ;;  %v2185_v47 = vrot.slane %v9669_v18, 1 }
 0x9f2   : > { %v2462_v62 = vadd.f32 %v2461_v42, %v2460_v29  ;;  %v2191_v12 = vadd.f32 %v2190_v63, %v9659_v59  ;;  %v2717_v49 = vadd.f32 %v2716_v54, %v2715_v50  ;;  %v2733_v60 = vsel %vm1995_vm12, %v2712_v34, %v2732_v61 }
 0x9f3   : > { %v2466_v52 = vrot.slane %v2465_v36, 2  ;;  %v2179_v26 = vadd.f32 %v2178_v35, %v9667_v11  ;;  %v2474_v51 = vadd.f32 %v2473_v41, %v2472_v44  ;;  %v2186_v27 = vadd.f32 %v2185_v47, %v9669_v18 }
 0x9f4   : > { %v2489_v6 = vsel %vm1993_vm11, %v2462_v62, %v2455_v31  ;;  %v2192_v17 = vrot.slane %v2191_v12, 1  ;;  %v2718_v16 = vrot.slane %v2717_v49, 1  ;;  %v2197_v1 = vrot.slane %v9661_v33, 2 }
 0x9f5   : > { %v2467_v13 = vadd.f32 %v2466_v52, %v2465_v36  ;;  %v1931_v2 = vrot.slane %v9693_v30, 1  ;;  %v2475_v59 = vrot.slane %v2474_v51, 1  ;;  %v2240_v46 = vsel %vm1993_vm11, %v2186_v27, %v2179_v26 }
 0x9f6   : > { %v2193_v63 = vadd.f32 %v2192_v17, %v2191_v12  ;;  %v1938_v45 = vrot.slane %v9698_v48, 1  ;;  %v2719_v29 = vadd.f32 %v2718_v16, %v2717_v49  ;;  %v2198_v28 = vadd.f32 %v2197_v1, %v9661_v33 }
 0x9f7   : > { %v2468_v11 = vrot.slane %v2467_v13, 1  ;;  %v1932_v7 = vadd.f32 %v1931_v2, %v9693_v30  ;;  %v2476_v18 = vadd.f32 %v2475_v59, %v2474_v51  ;;  %v12237_v50 = vrot.slane %v9686_v43, 2 }
 0x9f8   : > { %v2241_v39 = vsel %vm1995_vm12, %v2193_v63, %v2240_v46  ;;  %v1939_v56 = vadd.f32 %v1938_v45, %v9698_v48  ;;  %v2734_v22 = vsel %vm1997_vm13, %v2719_v29, %v2733_v60  ;;  %v2199_v31 = vrot.slane %v2198_v28, 1 }
 0x9f9   : > { %v1944_v61 = vadd.f32 %v12237_v50, %v9686_v43  ;;  %v2469_v40 = vadd.f32 %v2468_v11, %v2467_v13  ;;  %v1950_v42 = vrot.slane %v9689_v58, 2  ;;  %2735 = vrot.lane.b32.xlu1 %v2734_v22, %s12145_s3  ;;  %v2662_v57 = vrot.slane %v9605_v38, 1 }
 0x9fa   : > { %v1994_v30 = vsel %vm1993_vm11, %v1939_v56, %v1932_v7  ;;  %v2669_v44 = vrot.slane %v9635_v55, 1  ;;  %v2200_v34 = vadd.f32 %v2199_v31, %v2198_v28  ;;  %v12238_v54 = vrot.slane %v9655_v24, 2 }
 0x9fb   : > { %v1945_v33 = vrot.slane %v1944_v61, 1  ;;  %v2490_v48 = vsel %vm1995_vm12, %v2469_v40, %v2489_v6  ;;  %v1951_v43 = vadd.f32 %v1950_v42, %v9689_v58  ;;  %v2663_v41 = vadd.f32 %v2662_v57, %v9605_v38 }
 0x9fc   : > { %v2675_v36 = vadd.f32 %v12238_v54, %v9655_v24  ;;  %v2491_v35 = vsel %vm1997_vm13, %v2476_v18, %v2490_v48  ;;  %v2670_v47 = vadd.f32 %v2669_v44, %v9635_v55  ;;  %v2242_v12 = vsel %vm1997_vm13, %v2200_v34, %v2241_v39 }
 0x9fd   : > { %v1946_v62 = vadd.f32 %v1945_v33, %v1944_v61  ;;  %v1952_v49 = vrot.slane %v1951_v43, 1  ;;  %v2681_v52 = vrot.slane %v9691_v20, 2  ;;  %2492 = vrot.lane.b32.xlu1 %v2491_v35, %s12145_s3  ;;  %v2419_v24 = vrot.slane %v9584_v8, 1  ;;  %v7928_v33 = vld [vmem:[%s8877_s30 + $0x10] ss:$0 sm:$0xff]  ;;  %s12147_s3 = smov 104  }
 0x9fe   : > { %v2676_v60 = vrot.slane %v2675_v36, 1  ;;  %v2724_v26 = vsel %vm1993_vm11, %v2670_v47, %v2663_v41  ;;  %v2426_v51 = vrot.slane %v9598_v15, 1  ;;  %v2438_v27 = vrot.slane %v9644_v10, 2 }
 0x9ff   : > { %v1996_v58 = vsel %vm1995_vm12, %v1946_v62, %v1994_v30  ;;  %v1953_v6 = vadd.f32 %v1952_v49, %v1951_v43  ;;  %v2682_v55 = vadd.f32 %v2681_v52, %v9691_v20  ;;  %v2420_v17 = vadd.f32 %v2419_v24, %v9584_v8  ;;  %v2877_v24 = vld [vmem:[%s12208_s6 + $0x8] sm:$0xff] }
 0xa00   : > { %v2677_v38 = vadd.f32 %v2676_v60, %v2675_v36  ;;  %v2427_v16 = vadd.f32 %v2426_v51, %v9598_v15  ;;  %v2432_v13 = vadd.f32 %v2431_v37, %v9721_v19  ;;  %v2439_v63 = vadd.f32 %v2438_v27, %v9644_v10  ;;  %8138 = vmatprep.subr.mxu1 %v2877_v24  ;;  %v2876_v51 = vld [vmem:[%s12208_s6] sm:$0xff] }
 0xa01   : > { %v1998_v1 = vsel %vm1997_vm13, %v1953_v6, %v1996_v58  ;;  %v2683_v59 = vrot.slane %v2682_v55, 1  ;;  %v12239_v34 = vmax.f32 %v9181_v21, 0.0  ;;  %v12240_v36 = vmax.f32 %v9187_v25, 0.0 }
 0xa02   : > { %v2725_v2 = vsel %vm1995_vm12, %v2677_v38, %v2724_v26  ;;  %v2481_v46 = vsel %vm1993_vm11, %v2427_v16, %v2420_v17  ;;  %v2433_v20 = vrot.slane %v2432_v13, 1  ;;  %v2440_v29 = vrot.slane %v2439_v63, 1 }
 0xa03   : > { %v2684_v45 = vadd.f32 %v2683_v59, %v2682_v55  ;;  %v12241_v6 = vmov 0.0  }
 0xa04   : > { %v2434_v11 = vadd.f32 %v2433_v20, %v2432_v13  ;;  %v2441_v15 = vadd.f32 %v2440_v29, %v2439_v63  ;;  %v8671_v20 = vld [vmem:[%s12207_s8 + $0x20] ss:$0 sm:$0xff]  ;;  %s12271_s8 = smov 96  }
 0xa05   : > { %v2726_v8 = vsel %vm1997_vm13, %v2684_v45, %v2725_v2  ;;  %v1544_v45 = vadd.f32 %v8671_v20, %v9214_v32  ;;  %v1646_v32 = vld [vmem:[%s9198_s2] sm:$0xf] }
 0xa06   : > { %v2482_v28 = vsel %vm1995_vm12, %v2434_v11, %v2481_v46 }
 0xa07   : > { %v2483_v19 = vsel %vm1997_vm13, %v2441_v15, %v2482_v28  ;;  %v1552_v28 = vmax.f32 %v1544_v45, 0.0 }
 0xa5e   : > { %v2252_v37 = vpop.permute.xlu0 %2251 }
 0xa5f   : > { %v2254_v7 = vsel %vm1842_vm10, %v2242_v12, %v2252_v37 }
 0xa60   : > { %v2740_v18 = vrot.slane %v2254_v7, 4  ;;  %v2965_v7 = vld [vmem:[%s12242_s23 + $0x8] sm:$0xff] }
 0xa62   : > { %v2008_v39 = vpop.permute.xlu0 %2007 }
 0xa63   : > { %v2010_v10 = vsel %vm1842_vm10, %v1998_v1, %v2008_v39  ;;  %v1659_v1 = vld [vmem:[%s8907_s19] sm:$0x3f] }
 0xa64   : > { %v2745_v56 = vsel %vm1222_vm6, %v2010_v10, %v2740_v18  ;;  %v2867_v2 = vrot.slane %v1659_v1, %v9024_v3  ;;  %v2873_v46 = vrot.slane %v1659_v1, %v9027_v4  ;;  %v1651_v18 = vrot.slane %v1552_v28, 4  ;;  %v2964_v39 = vld [vmem:[%s12242_s23] sm:$0xff] }
 0xa65   : > { %8135 = vmatprep.mubr.msk.f32.mxu1 %vm1677_vm9, %v2745_v56 }
 0xa66   : > { %v9846_v10 = vsel %vm1222_vm6, %v1646_v32, %v1651_v18  ;;  %v9854_v56 = vsel %vm1222_vm6, %v1651_v18, %v9184_v23 }
 0xa67   : > { %12243 = vst [vmem:[#allocation40_spill] sm:$0xff] %v9846_v10  ;;  %12244 = vst [vmem:[#allocation41_spill] sm:$0xff] %v9854_v56 }
 0xa6b   : > { %v2736_v50 = vpop.permute.xlu1 %2735 }
 0xa6c   : > { %v2738_v61 = vsel %vm1842_vm10, %v2726_v8, %v2736_v50  ;;  %v7931_v50 = vld [vmem:[%s12208_s6 + $0x10] ss:$0 sm:$0xff]  ;;  %s12255_s6 = sld [smem:[#allocation18_spill]] }
 0xa6d   : > { %v2743_v22 = vrot.slane %v2738_v61, 4 }
 0xa6f   : > { %v2493_v40 = vpop.permute.xlu1 %2492 }
 0xa70   : > { %v2495_v31 = vsel %vm1842_vm10, %v2483_v19, %v2493_v40 }
 0xa71   : > { %v2746_v42 = vsel %vm1222_vm6, %v2495_v31, %v2743_v22 }
 0xa72   : > { %8136 = vmatmul.mubr.msk.f32.vlgmr.msra.gmra.mxu1 %vm1677_vm9, %v2746_v42 }
 0xa73   : > { %8139 = vmatpush3.msra.mxu1 %v2877_v24 }
 0xa74   : > { %8140 = vmatprep.subr.mxu1 %v2876_v51 }
 0xa75   : > { %8141 = vmatpush3.msra.mxu1 %v2876_v51 }
 0xa76   : > { %8145 = vmatprep.subr.mxu1 %v12241_v6 }
 0xb32   : > { %v8137_v30 = vpop.f32.mrf.mxu1 }
 0xb33   : > { %v2832_v57 = vadd.f32 %v8137_v30, %v7928_v33 }
 0xb34   : > { %v2826_v44 = vpop.f32.mrf.mxu1 }
 0xb35   : > { %v2827_v48 = vadd.f32 %v7928_v33, %v2826_v44  ;;  %v2836_v43 = vadd.f32 %v2832_v57, %v12239_v34 }
 0xb37   : > { %v2840_v54 = vsel %vm1677_vm9, %v2836_v43, 0.0  ;;  %v2835_v35 = vadd.f32 %v2827_v48, %v12240_v36 }
 0xb38   : > { %2841 = vadd.xlane.f32.xlu1 %v2840_v54 }
 0xb39   : > { %v2837_v62 = vsel %vm1677_vm9, %v2835_v35, 0.0 }
 0xb3a   : > { %2838 = vadd.xlane.f32.xlu0 %v2837_v62 }
 0xbc1   : > { %v2842_v41 = vpop.xlane.xlu1 %2841 }
 0xbc2   : > { %v2845_v47 = vmul.f32 0.0625, %v2842_v41 }
 0xbc3   : > { %v2839_v12 = vpop.xlane.xlu0 %2838 }
 0xbc4   : > { %v2844_v49 = vmul.f32 0.0625, %v2839_v12  ;;  %v2847_v60 = vsub.f32 %v2836_v43, %v2845_v47 }
 0xbc6   : > { %v2846_v52 = vsub.f32 %v2835_v35, %v2844_v49  ;;  %v2849_v26 = vmul.f32 %v2847_v60, %v2847_v60  ;;  %v7934_v35 = vld [vmem:[%s12242_s23 + $0x10] ss:$0 sm:$0xff] }
 0xbc8   : > { %v2848_v58 = vmul.f32 %v2846_v52, %v2846_v52  ;;  %v2853_v25 = vsel %vm1677_vm9, %v2849_v26, 0.0 }
 0xbca   : > { %v2850_v21 = vsel %vm1677_vm9, %v2848_v58, 0.0 }
 0xbcb   : > { %2851 = vadd.xlane.f32.xlu0 %v2850_v21 }
 0xbcf   : > { %2854 = vadd.xlane.f32.xlu0 %v2853_v25 }
 0xc54   : > { %v2852_v38 = vpop.xlane.xlu0 %2851 }
 0xc55   : > { %v2856_v55 = vmul.f32 0.0625, %v2852_v38 }
 0xc57   : > { %v2858_v27 = vadd.f32 1e-05, %v2856_v55 }
 0xc58   : > { %v2855_v17 = vpop.xlane.xlu0 %2854 }
 0xc59   : > { %8423 = vrsqrt.f32 %v2858_v27  ;;  %v2857_v16 = vmul.f32 0.0625, %v2855_v17 }
 0xc5b   : > { %v2859_v13 = vadd.f32 1e-05, %v2857_v16 }
 0xc5d   : > { %8425 = vrsqrt.f32 %v2859_v13 }
 0xc66   : > { %v8424_v59 = vpop.eup %8423 }
 0xc67   : > { %v2862_v63 = vmul.f32 %v8424_v59, %v2846_v52 }
 0xc69   : > { %v2868_v29 = vmul.f32 %v2867_v2, %v2862_v63 }
 0xc6a   : > { %v8426_v11 = vpop.eup %8425 }
 0xc6b   : > { %v2863_v8 = vmul.f32 %v8426_v11, %v2847_v60  ;;  %v9831_v15 = vadd.f32 %v2873_v46, %v2868_v29 }
 0xc6d   : > { %v2869_v19 = vmul.f32 %v2867_v2, %v2863_v8  ;;  %8142 = vmatprep.mubr.msk.f32.mxu1 %vm1677_vm9, %v9831_v15 }
 0xc6f   : > { %v9835_v37 = vadd.f32 %v2873_v46, %v2869_v19 }
 0xc71   : > { %8143 = vmatmul.mubr.msk.f32.vlgmr.msra.gmra.mxu1 %vm1677_vm9, %v9835_v37 }
 0xc72   : > { %8146 = vmatpush3.msra.mxu1 %v2965_v7  ;;  %8149 = vmatprep.mubr.msk.f32.mxu1 %vm8796_vm7, %v12241_v6 }
 0xc73   : > { %8147 = vmatprep.subr.mxu1 %v12241_v6 }
 0xc74   : > { %8148 = vmatpush3.msra.mxu1 %v2964_v39 }
 0xc75   : > { %8150 = vmatmul.mubr.msk.f32.vlgmr.msra.gmra.mxu1 %vm1677_vm9, %v9846_v10 }
 0xc76   : > { %8152 = vmatprep.mubr.msk.f32.mxu1 %vm8796_vm7, %v12241_v6 }
 0xc79   : > { %8153 = vmatmul.mubr.msk.f32.gmra.mxu1 %vm1677_vm9, %v9854_v56 }
 0xc7a   : > { %8155 = vmatprep.mubr.msk.f32.mxu1 %vm8796_vm7, %v12241_v6 }
 0xc7d   : > { %8156 = vmatmul.mubr.msk.f32.gmra.mxu1 %vm1677_vm9, %v9184_v23 }
 0xd31   : > { %v8144_v61 = vpop.f32.mrf.mxu1 }
 0xd32   : > { %v2961_v22 = vadd.f32 %v8144_v61, %v7931_v50 }
 0xd33   : > { %v2955_v40 = vpop.f32.mrf.mxu1 }
 0xd34   : > { %v3902_v31 = vcombine.high %v2961_v22, %v2961_v22  ;;  %v2956_v42 = vadd.f32 %v7931_v50, %v2955_v40  ;;  %v3677_v32 = vrot.slane %v2961_v22, %v9238_v53 }
 0xd35   : > { %v3044_v33 = vpop.f32.mrf.mxu1 }
 0xd36   : > { %v3909_v30 = vrot.slane %v3902_v31, %v9238_v53  ;;  %v3065_v57 = vrot.slane %v2956_v42, %v9238_v53  ;;  %v3297_v44 = vcombine.high %v2956_v42, %v2956_v42  ;;  %v9884_v51 = vadd.f32 %v7934_v35, %v3044_v33 }
 0xd37   : > { %v8151_v48 = vpop.f32.mrf.mxu1  ;;  %v3678_v42 = vcombine.high %v3677_v32, %v3677_v32 }
 0xd38   : > { %v3917_v34 = vrot.slane %v3909_v30, %v9238_v53  ;;  %v3066_v43 = vcombine.high %v3065_v57, %v3065_v57  ;;  %v9867_v54 = vrot.slane %v3065_v57, %v9238_v53  ;;  %v3304_v36 = vrot.slane %v3297_v44, %v9238_v53 }
 0xd39   : > { %v3049_v62 = vpop.f32.mrf.mxu1  ;;  %v3910_v58 = vcombine.high %v3909_v30, %v3909_v30  ;;  %v3685_v44 = vrot.slane %v3677_v32, %v9238_v53  ;;  %v3692_v48 = vrot.slane %v3678_v42, %v9238_v53 }
 0xd3a   : > { %v9871_v41 = vadd.f32 %v7934_v35, %v3049_v62  ;;  %v3930_v47 = vrot.slane %v3917_v34, %v9024_v3  ;;  %v9875_v12 = vrot.slane %v3066_v43, %v9238_v53  ;;  %v3305_v49 = vcombine.high %v3304_v36, %v3304_v36 }
 0xd3b   : > { %v3312_v60 = vrot.slane %v3304_v36, %v9238_v53  ;;  %v8154_v52 = vpop.f32.mrf.mxu1  ;;  %v3086_v26 = vrot.slane %v9867_v54, %v9024_v3  ;;  %v3924_v13 = vrot.slane %v3910_v58, %v9238_v53  ;;  %v3925_v46 = vcombine.high %v3917_v34, %v3917_v34 }
 0xd3c   : > { %v9879_v21 = vmul.f32 %v3930_v47, %v9871_v41  ;;  %v3090_v27 = vrot.slane %v9875_v12, %v9024_v3  ;;  %v3319_v17 = vrot.slane %v3305_v49, %v9238_v53  ;;  %v3081_v33 = vcombine.high %v9867_v54, %v9867_v54 }
 0xd3d   : > { %v3054_v25 = vpop.f32.mrf.mxu1  ;;  %v3325_v24 = vrot.slane %v3312_v60, %v9024_v3  ;;  %v9895_v16 = vmul.f32 %v3086_v26, %v9884_v51  ;;  %v3934_v63 = vrot.slane %v3924_v13, %v9024_v3  ;;  %v3320_v45 = vcombine.high %v3312_v60, %v3312_v60 }
 0xd3e   : > { %3963 = vrot.lane.b32.xlu0 %v9879_v21, %s12166_s16  ;;  %v9903_v1 = vmul.f32 %v3090_v27, %v9884_v51  ;;  %v3329_v2 = vrot.slane %v3319_v17, %v9024_v3  ;;  %v3938_v11 = vrot.slane %v3925_v46, %v9024_v3  ;;  %v3926_v7 = vcombine.high %v3924_v13, %v3924_v13 }
 0xd3f   : > { %v8157_v38 = vpop.f32.mrf.mxu1  ;;  %v9889_v55 = vmul.f32 %v3325_v24, %v9871_v41  ;;  %v9907_v59 = vmul.f32 %v3325_v24, %v9884_v51  ;;  %v9918_v29 = vmul.f32 %v3934_v63, %v9871_v41  ;;  %v3333_v28 = vrot.slane %v3320_v45, %v9024_v3 }
 0xd40   : > { %v9915_v20 = vmul.f32 %v3329_v2, %v9884_v51  ;;  %v9926_v8 = vmul.f32 %v3329_v2, %v9871_v41  ;;  %v9930_v19 = vmul.f32 %v3938_v11, %v9871_v41  ;;  %v3055_v18 = vadd.f32 %v7934_v35, %v3054_v25 }
 0xd41   : > { %3360 = vrot.lane.b32.xlu1 %v9889_v55, %s12166_s16  ;;  %v9937_v39 = vmul.f32 %v3333_v28, %v9871_v41  ;;  %v9941_v50 = vmul.f32 %v3333_v28, %v9884_v51  ;;  %v3942_v61 = vrot.slane %v3926_v7, %v9024_v3  ;;  %v3321_v40 = vcombine.high %v3319_v17, %v3319_v17 }
 0xd42   : > { %3111 = vrot.lane.b32.xlu0 %v9895_v16, %s12166_s16  ;;  %v9948_v31 = vmul.f32 %v3930_v47, %v3055_v18  ;;  %v9960_v57 = vmul.f32 %v3934_v63, %v3055_v18  ;;  %v3094_v43 = vrot.slane %v3081_v33, %v9024_v3  ;;  %v9972_v54 = vmul.f32 %v3938_v11, %v3055_v18 }
 0xd43   : > { %v9953_v22 = vmul.f32 %v3942_v61, %v9871_v41  ;;  %v3337_v30 = vrot.slane %v3321_v40, %v9024_v3  ;;  %v3693_v36 = vcombine.high %v3685_v44, %v3685_v44  ;;  %v3702_v62 = vrot.slane %v3692_v48, %v9024_v3 }
 0xd44   : > { %v9975_v35 = vmul.f32 %v3094_v43, %v9884_v51  ;;  %v9982_v47 = vmul.f32 %v3942_v61, %v3055_v18  ;;  %v3082_v58 = vcombine.high %v9875_v12, %v9875_v12  ;;  %v3698_v25 = vrot.slane %v3685_v44, %v9024_v3 }
 0xd45   : > { %3113 = vrot.lane.b32.xlu1 %v9903_v1, %s12166_s16  ;;  %v9965_v34 = vmul.f32 %v3337_v30, %v9884_v51  ;;  %v9985_v49 = vmul.f32 %v3702_v62, %v9871_v41  ;;  %v3706_v60 = vrot.slane %v3693_v36, %v9024_v3  ;;  %v9993_v52 = vmul.f32 %v3337_v30, %v9871_v41 }
 0xd46   : > { %3358 = vrot.lane.b32.xlu0 %v9907_v59, %s12166_s16  ;;  %v10006_v24 = vmul.f32 %v3698_v25, %v9871_v41  ;;  %v3098_v38 = vrot.slane %v3082_v58, %v9024_v3  ;;  %v3694_v27 = vcombine.high %v3692_v48, %v3692_v48 }
 0xd47   : > { %v9998_v26 = vmul.f32 %v3706_v60, %v9871_v41 }
 0xd48   : > { %v10014_v12 = vmul.f32 %v3098_v38, %v9884_v51  ;;  %v3710_v17 = vrot.slane %v3694_v27, %v9024_v3 }
 0xd49   : > { %3362 = vrot.lane.b32.xlu1 %v9915_v20, %s12166_s16 }
 0xd4a   : > { %3967 = vrot.lane.b32.xlu0 %v9918_v29, %s12166_s16  ;;  %v10021_v13 = vmul.f32 %v3710_v17, %v9871_v41 }
 0xd4d   : > { %3364 = vrot.lane.b32.xlu1 %v9926_v8, %s12166_s16 }
 0xd4e   : > { %3971 = vrot.lane.b32.xlu0 %v9930_v19, %s12166_s16 }
 0xd51   : > { %3368 = vrot.lane.b32.xlu1 %v9937_v39, %s12166_s16 }
 0xd52   : > { %3366 = vrot.lane.b32.xlu0 %v9941_v50, %s12166_s16 }
 0xd55   : > { %3965 = vrot.lane.b32.xlu1 %v9948_v31, %s12166_s16 }
 0xd56   : > { %3975 = vrot.lane.b32.xlu0 %v9953_v22, %s12166_s16 }
 0xd59   : > { %3969 = vrot.lane.b32.xlu1 %v9960_v57, %s12166_s16 }
 0xd5a   : > { %3370 = vrot.lane.b32.xlu0 %v9965_v34, %s12166_s16 }
 0xd5d   : > { %3973 = vrot.lane.b32.xlu1 %v9972_v54, %s12166_s16 }
 0xd5e   : > { %3115 = vrot.lane.b32.xlu0 %v9975_v35, %s12166_s16 }
 0xd61   : > { %3977 = vrot.lane.b32.xlu1 %v9982_v47, %s12166_s16 }
 0xd62   : > { %3725 = vrot.lane.b32.xlu0 %v9985_v49, %s12166_s16 }
 0xd65   : > { %3372 = vrot.lane.b32.xlu1 %v9993_v52, %s12166_s16 }
 0xd66   : > { %3727 = vrot.lane.b32.xlu0 %v9998_v26, %s12166_s16 }
 0xd69   : > { %3723 = vrot.lane.b32.xlu1 %v10006_v24, %s12166_s16 }
 0xd6a   : > { %3243 = vrot.lane.b32.xlu0 %v9884_v51, %s12147_s3 }
 0xd6d   : > { %3117 = vrot.lane.b32.xlu1 %v10014_v12, %s12166_s16 }
 0xd6e   : > { %4191 = vrot.lane.b32.xlu0 %v3055_v18, %s12147_s3 }
 0xd71   : > { %3729 = vrot.lane.b32.xlu1 %v10021_v13, %s12166_s16  ;;  %s12251_s16 = smov 8  }
 0xd72   : > { %3525 = vrot.lane.b32.xlu0 %v9871_v41, %s12245_s5 }
 0xd75   : > { %3588 = vrot.lane.b32.xlu1 %v9871_v41, %s12147_s3  ;;  %s12246_s3 = sld [smem:[#allocation17_spill]] }
 0xd79   : > { %3208 = vrot.lane.b32.xlu1 %v9884_v51, %s12245_s5 }
 0xd7d   : > { %4128 = vrot.lane.b32.xlu1 %v3055_v18, %s12245_s5 }
 0xdb0   : > { %v3964_v2 = vpop.permute.xlu0 %3963 }
 0xdb1   : > { %v3987_v48 = vadd.f32 %v3964_v2, %v9879_v21 }
 0xdb3   : > { %v3361_v63 = vpop.permute.xlu1 %3360 }
 0xdb4   : > { %v3112_v46 = vpop.permute.xlu0 %3111  ;;  %v3383_v45 = vadd.f32 %v3361_v63, %v9889_v55 }
 0xdb5   : > { %v3123_v11 = vadd.f32 %v3112_v46, %v9895_v16  ;;  %v10051_v46 = vmul.f32 0.70710677, %v3987_v48 }
 0xdb6   : > { %v10035_v40 = vmul.f32 0.70710677, %v3383_v45 }
 0xdb7   : > { %v3127_v28 = vmul.f32 0.70710677, %v3123_v11  ;;  %v3114_v7 = vpop.permute.xlu1 %3113 }
 0xdb8   : > { %v3124_v32 = vadd.f32 %v3114_v7, %v9903_v1  ;;  %v3359_v61 = vpop.permute.xlu0 %3358  ;;  %v3401_v43 = vsel %vm3400_vm14, %v10035_v40, -inf }
 0xdb9   : > { %v3131_v41 = vsel %vm1842_vm10, %v3127_v28, -inf  ;;  %v3382_v51 = vadd.f32 %v3359_v61, %v9907_v59 }
 0xdba   : > { %v3132_v18 = vrot.slane %v3131_v41, 4  ;;  %v3128_v42 = vmul.f32 0.70710677, %v3124_v32 }
 0xdbb   : > { %v10039_v33 = vmul.f32 0.70710677, %v3382_v51  ;;  %v3363_v30 = vpop.permute.xlu1 %3362 }
 0xdbc   : > { %v3133_v55 = vmax.f32 %v3131_v41, %v3132_v18  ;;  %v3138_v16 = vsel %vm1842_vm10, %v3128_v42, -inf  ;;  %v3384_v44 = vadd.f32 %v3363_v30, %v9915_v20  ;;  %v3968_v1 = vpop.permute.xlu0 %3967 }
 0xdbd   : > { %v3139_v36 = vrot.slane %v3138_v16, 4  ;;  %v3399_v59 = vsel %vm3398_vm15, %v10039_v33, -inf  ;;  %v3989_v11 = vadd.f32 %v3968_v1, %v9918_v29  ;;  %v4003_v29 = vsel %vm3398_vm15, %v10051_v46, -inf }
 0xdbe   : > { %v3134_v62 = vrot.slane %v3133_v55, 2  ;;  %v3402_v60 = vmax.f32 %v3399_v59, %v3401_v43  ;;  %v10048_v25 = vmul.f32 0.70710677, %v3384_v44 }
 0xdbf   : > { %v3140_v58 = vmax.f32 %v3138_v16, %v3139_v36  ;;  %v3365_v38 = vpop.permute.xlu1 %3364  ;;  %v10065_v59 = vmul.f32 0.70710677, %v3989_v11 }
 0xdc0   : > { %v3135_v27 = vmax.f32 %v3133_v55, %v3134_v62  ;;  %v3403_v17 = vrot.slane %v3402_v60, 4  ;;  %v3385_v20 = vadd.f32 %v3365_v38, %v9926_v8  ;;  %v3972_v63 = vpop.permute.xlu0 %3971  ;;  %v3409_v61 = vsel %vm3398_vm15, %v10048_v25, -inf }
 0xdc1   : > { %v3141_v21 = vrot.slane %v3140_v58, 2  ;;  %v3991_v41 = vadd.f32 %v3972_v63, %v9930_v19 }
 0xdc2   : > { %v3136_v2 = vrot.slane %v3135_v27, 1  ;;  %v3404_v45 = vmax.f32 %v3402_v60, %v3403_v17  ;;  %v10054_v7 = vmul.f32 0.70710677, %v3385_v20 }
 0xdc3   : > { %v3142_v32 = vmax.f32 %v3140_v58, %v3141_v21  ;;  %v3369_v51 = vpop.permute.xlu1 %3368  ;;  %v10069_v58 = vmul.f32 0.70710677, %v3991_v41 }
 0xdc4   : > { %v3137_v18 = vmax.f32 %v3135_v27, %v3136_v2  ;;  %v3405_v30 = vrot.slane %v3404_v45, 2  ;;  %v3410_v8 = vsel %vm3400_vm14, %v10054_v7, -inf  ;;  %v3387_v55 = vadd.f32 %v3369_v51, %v9937_v39  ;;  %v3367_v16 = vpop.permute.xlu0 %3366 }
 0xdc5   : > { %v3143_v44 = vrot.slane %v3142_v32, 1  ;;  %v3411_v1 = vmax.f32 %v3409_v61, %v3410_v8  ;;  %v3386_v48 = vadd.f32 %v3367_v16, %v9941_v50  ;;  %v4012_v51 = vsel %vm3398_vm15, %v10065_v59, -inf }
 0xdc6   : > { %v3159_v43 = vsub.f32 %v3127_v28, %v3137_v18  ;;  %v3406_v36 = vmax.f32 %v3404_v45, %v3405_v30  ;;  %v10067_v19 = vmul.f32 0.70710677, %v3387_v55 }
 0xdc7   : > { %v3144_v62 = vmax.f32 %v3142_v32, %v3143_v44  ;;  %v3412_v60 = vrot.slane %v3411_v1, 4  ;;  %v10071_v38 = vmul.f32 0.70710677, %v3386_v48  ;;  %v3966_v39 = vpop.permute.xlu1 %3965 }
 0xdc8   : > { %v3163_v27 = vmul.f32 1.442695, %v3159_v43  ;;  %v3407_v17 = vrot.slane %v3406_v36, 1  ;;  %v3419_v20 = vsel %vm3400_vm14, %v10067_v19, -inf  ;;  %v3988_v50 = vadd.f32 %v3966_v39, %v9948_v31  ;;  %v3976_v28 = vpop.permute.xlu0 %3975 }
 0xdc9   : > { %v3160_v63 = vsub.f32 %v3128_v42, %v3144_v62  ;;  %v3413_v21 = vmax.f32 %v3411_v1, %v3412_v60  ;;  %v3418_v2 = vsel %vm3398_vm15, %v10071_v38, -inf  ;;  %v3993_v45 = vadd.f32 %v3976_v28, %v9953_v22 }
 0xdca   : > { %8427 = vpow2.f32 %v3163_v27  ;;  %v3408_v11 = vmax.f32 %v3406_v36, %v3407_v17  ;;  %v3420_v32 = vmax.f32 %v3418_v2, %v3419_v20  ;;  %v10079_v61 = vmul.f32 0.70710677, %v3988_v50 }
 0xdcb   : > { %v3165_v41 = vmul.f32 1.442695, %v3160_v63  ;;  %v3414_v18 = vrot.slane %v3413_v21, 2  ;;  %v10083_v30 = vmul.f32 0.70710677, %v3993_v45  ;;  %v3970_v31 = vpop.permute.xlu1 %3969  ;;  %v4021_v1 = vsel %vm3398_vm15, %v10069_v58, -inf }
 0xdcc   : > { %v3436_v42 = vsub.f32 %v10039_v33, %v3408_v11  ;;  %v3437_v8 = vsub.f32 %v10035_v40, %v3408_v11  ;;  %v3421_v55 = vrot.slane %v3420_v32, 4  ;;  %v4004_v22 = vsel %vm3400_vm14, %v10079_v61, -inf  ;;  %v3371_v16 = vpop.permute.xlu0 %3370 }
 0xdcd   : > { %8429 = vpow2.f32 %v3165_v41  ;;  %v3415_v44 = vmax.f32 %v3413_v21, %v3414_v18  ;;  %v4005_v48 = vmax.f32 %v4003_v29, %v4004_v22  ;;  %v3990_v60 = vadd.f32 %v3970_v31, %v9960_v57 }
 0xdce   : > { %v3444_v43 = vmul.f32 1.442695, %v3436_v42  ;;  %v3446_v36 = vmul.f32 1.442695, %v3437_v8  ;;  %v3422_v62 = vmax.f32 %v3420_v32, %v3421_v55  ;;  %v10094_v40 = vsel %vm3398_vm15, %v10083_v30, -inf }
 0xdcf   : > { %v3416_v39 = vrot.slane %v3415_v44, 1  ;;  %v4006_v33 = vrot.slane %v4005_v48, 4  ;;  %v3388_v27 = vadd.f32 %v3371_v16, %v9965_v34  ;;  %v3974_v17 = vpop.permute.xlu1 %3973  ;;  %v10097_v50 = vmul.f32 0.70710677, %v3990_v60 }
 0xdd0   : > { %8431 = vpow2.f32 %v3444_v43  ;;  %v3423_v20 = vrot.slane %v3422_v62, 2  ;;  %v3992_v29 = vadd.f32 %v3974_v17, %v9972_v54  ;;  %v3116_v28 = vpop.permute.xlu0 %3115 }
 0xdd1   : > { %8433 = vpow2.f32 %v3446_v36  ;;  %v3417_v63 = vmax.f32 %v3415_v44, %v3416_v39  ;;  %v4007_v21 = vmax.f32 %v4005_v48, %v4006_v33  ;;  %v10100_v57 = vmul.f32 0.70710677, %v3388_v27 }
 0xdd2   : > { %v3424_v2 = vmax.f32 %v3422_v62, %v3423_v20  ;;  %v4013_v45 = vsel %vm3400_vm14, %v10097_v50, -inf  ;;  %v10104_v11 = vmul.f32 0.70710677, %v3992_v29  ;;  %v3125_v34 = vadd.f32 %v3116_v28, %v9975_v35 }
 0xdd3   : > { %v3438_v32 = vsub.f32 %v10048_v25, %v3417_v63  ;;  %v3439_v41 = vsub.f32 %v10054_v7, %v3417_v63  ;;  %v4008_v18 = vrot.slane %v4007_v21, 2  ;;  %v4014_v54 = vmax.f32 %v4012_v51, %v4013_v45  ;;  %v3978_v31 = vpop.permute.xlu1 %3977 }
 0xdd4   : > { %v3425_v42 = vrot.slane %v3424_v2, 1  ;;  %v10111_v8 = vsel %vm3398_vm15, %v10100_v57, -inf  ;;  %v4022_v55 = vsel %vm3400_vm14, %v10104_v11, -inf  ;;  %v10115_v22 = vmul.f32 0.70710677, %v3125_v34 }
 0xdd5   : > { %v3448_v16 = vmul.f32 1.442695, %v3438_v32  ;;  %v3450_v44 = vmul.f32 1.442695, %v3439_v41  ;;  %v4009_v35 = vmax.f32 %v4007_v21, %v4008_v18  ;;  %v4015_v48 = vrot.slane %v4014_v54, 4 }
 0xdd6   : > { %v3426_v25 = vmax.f32 %v3424_v2, %v3425_v42  ;;  %v4023_v43 = vmax.f32 %v4021_v1, %v4022_v55  ;;  %v3145_v7 = vsel %vm1842_vm10, %v10115_v22, -inf  ;;  %v3994_v51 = vadd.f32 %v3978_v31, %v9982_v47 }
 0xdd7   : > { %v10120_v36 = vpop.eup %8427  ;;  %8435 = vpow2.f32 %v3448_v16  ;;  %v4010_v62 = vrot.slane %v4009_v35, 1  ;;  %v4016_v60 = vmax.f32 %v4014_v54, %v4015_v48  ;;  %v3146_v39 = vrot.slane %v3145_v7, 4 }
 0xdd8   : > { %v3171_v33 = vsel %vm1842_vm10, %v10120_v36, 0.0  ;;  %8437 = vpow2.f32 %v3450_v44  ;;  %v3440_v27 = vsub.f32 %v10071_v38, %v3426_v25  ;;  %v3441_v17 = vsub.f32 %v10067_v19, %v3426_v25 }
 0xdd9   : > { %v3172_v1 = vrot.slane %v3171_v33, 4  ;;  %v4011_v20 = vmax.f32 %v4009_v35, %v4010_v62  ;;  %v4017_v29 = vrot.slane %v4016_v60, 2  ;;  %v4024_v28 = vrot.slane %v4023_v43, 4 }
 0xdda   : > { %v10126_v63 = vpop.eup %8429  ;;  %v3452_v47 = vmul.f32 1.442695, %v3440_v27  ;;  %v3454_v21 = vmul.f32 1.442695, %v3441_v17  ;;  %v3147_v2 = vmax.f32 %v3145_v7, %v3146_v39  ;;  %v10128_v45 = vmul.f32 0.70710677, %v3994_v51 }
 0xddb   : > { %v3173_v34 = vadd.f32 %v3172_v1, %v3171_v33  ;;  %v3178_v32 = vsel %vm1842_vm10, %v10126_v63, 0.0  ;;  %v4039_v41 = vsub.f32 %v10051_v46, %v4011_v20  ;;  %v4040_v38 = vsub.f32 %v10079_v61, %v4011_v20 }
 0xddc   : > { %v3179_v19 = vrot.slane %v3178_v32, 4  ;;  %8439 = vpow2.f32 %v3452_v47  ;;  %v4018_v18 = vmax.f32 %v4016_v60, %v4017_v29  ;;  %v4025_v54 = vmax.f32 %v4023_v43, %v4024_v28  ;;  %v4282_v47 = vld [vmem:[%s12246_s3 + $0x8] sm:$0xff] }
 0xddd   : > { %v10134_v31 = vpop.eup %8431  ;;  %v3174_v42 = vrot.slane %v3173_v34, 2  ;;  %8441 = vpow2.f32 %v3454_v21  ;;  %v4047_v55 = vmul.f32 1.442695, %v4039_v41  ;;  %v4049_v16 = vmul.f32 1.442695, %v4040_v38  ;;  %8158 = vmatprep.subr.mxu0 %v4282_v47 }
 0xdde   : > { %v10136_v44 = vpop.eup %8433  ;;  %v3180_v35 = vadd.f32 %v3179_v19, %v3178_v32  ;;  %v3468_v48 = vrot.slane %v10134_v31, 4  ;;  %v4019_v25 = vrot.slane %v4018_v18, 1  ;;  %v4026_v7 = vrot.slane %v4025_v54, 2  ;;  %8159 = vmatpush3.msra.mxu0 %v4282_v47 }
 0xddf   : > { %v3175_v46 = vadd.f32 %v3174_v42, %v3173_v34  ;;  %v3469_v61 = vrot.slane %v10136_v44, 4  ;;  %8443 = vpow2.f32 %v4047_v55  ;;  %v3148_v51 = vrot.slane %v3147_v2, 2 }
 0xde0   : > { %v3181_v43 = vrot.slane %v3180_v35, 2  ;;  %8445 = vpow2.f32 %v4049_v16  ;;  %v4020_v62 = vmax.f32 %v4018_v18, %v4019_v25  ;;  %v4027_v60 = vmax.f32 %v4025_v54, %v4026_v7 }
 0xde1   : > { %v3176_v39 = vrot.slane %v3175_v46, 1  ;;  %v3470_v33 = vsel %vm1222_vm6, %v3468_v48, %v3469_v61  ;;  %v3149_v27 = vmax.f32 %v3147_v2, %v3148_v51  ;;  %v4031_v17 = vsel %vm3400_vm14, %v10128_v45, -inf }
 0xde2   : > { %v3182_v1 = vadd.f32 %v3181_v43, %v3180_v35  ;;  %v3484_v20 = vsel %vm1842_vm10, %v3470_v33, 0.0  ;;  %v4041_v29 = vsub.f32 %v10065_v59, %v4020_v62  ;;  %v4042_v28 = vsub.f32 %v10097_v50, %v4020_v62 }
 0xde3   : > { %v3177_v21 = vadd.f32 %v3176_v39, %v3175_v46  ;;  %v3485_v34 = vrot.slane %v3484_v20, 4  ;;  %v4028_v32 = vrot.slane %v4027_v60, 1  ;;  %v3150_v41 = vrot.slane %v3149_v27, 1 }
 0xde4   : > { %v10147_v38 = vpop.eup %8435  ;;  %v3183_v19 = vrot.slane %v3182_v1, 1  ;;  %v4051_v2 = vmul.f32 1.442695, %v4041_v29  ;;  %v4053_v18 = vmul.f32 1.442695, %v4042_v28  ;;  %v4032_v54 = vmax.f32 %v10094_v40, %v4031_v17  ;;  %v3726_v40 = vpop.permute.xlu0 %3725 }
 0xde5   : > { %v10150_v42 = vpop.eup %8437  ;;  %8447 = vrcp.f32 %v3177_v21  ;;  %v3486_v59 = vadd.f32 %v3485_v34, %v3484_v20  ;;  %v3471_v50 = vrot.slane %v10147_v38, 4  ;;  %v4029_v55 = vmax.f32 %v4027_v60, %v4028_v32  ;;  %v3373_v17 = vpop.permute.xlu1 %3372 }
 0xde6   : > { %v3184_v16 = vadd.f32 %v3183_v19, %v3182_v1  ;;  %v3472_v35 = vrot.slane %v10150_v42, 4  ;;  %8449 = vpow2.f32 %v4051_v2  ;;  %v3151_v48 = vmax.f32 %v3149_v27, %v3150_v41 }
 0xde7   : > { %v3487_v25 = vrot.slane %v3486_v59, 2  ;;  %8451 = vpow2.f32 %v4053_v18  ;;  %v4043_v7 = vsub.f32 %v10069_v58, %v4029_v55  ;;  %v4044_v46 = vsub.f32 %v10104_v11, %v4029_v55 }
 0xde8   : > { %8453 = vrcp.f32 %v3184_v16  ;;  %v3473_v61 = vsel %vm1222_vm6, %v3471_v50, %v3472_v35  ;;  %v3161_v51 = vsub.f32 %v10115_v22, %v3151_v48  ;;  %v4033_v43 = vrot.slane %v4032_v54, 4 }
 0xde9   : > { %v10158_v62 = vpop.eup %8439  ;;  %v3488_v60 = vadd.f32 %v3487_v25, %v3486_v59  ;;  %v3491_v39 = vsel %vm1842_vm10, %v3473_v61, 0.0  ;;  %v4055_v33 = vmul.f32 1.442695, %v4043_v7  ;;  %v4057_v27 = vmul.f32 1.442695, %v4044_v46  ;;  %v3728_v59 = vpop.permute.xlu0 %3727 }
 0xdea   : > { %v10161_v1 = vpop.eup %8441  ;;  %v3492_v58 = vrot.slane %v3491_v39, 4  ;;  %v3474_v11 = vrot.slane %v10158_v62, 4  ;;  %v3167_v20 = vmul.f32 1.442695, %v3161_v51  ;;  %v4034_v29 = vmax.f32 %v4032_v54, %v4033_v43 }
 0xdeb   : > { %v3489_v28 = vrot.slane %v3488_v60, 1  ;;  %v3475_v47 = vrot.slane %v10161_v1, 4  ;;  %8455 = vpow2.f32 %v4055_v33  ;;  %v3736_v22 = vadd.f32 %v3726_v40, %v9985_v49 }
 0xdec   : > { %v10166_v21 = vpop.eup %8443  ;;  %v3493_v34 = vadd.f32 %v3492_v58, %v3491_v39  ;;  %8457 = vpow2.f32 %v4057_v27  ;;  %v4035_v32 = vrot.slane %v4034_v29, 2  ;;  %v3389_v41 = vadd.f32 %v3373_v17, %v9993_v52 }
 0xded   : > { %v10169_v19 = vpop.eup %8445  ;;  %v3490_v2 = vadd.f32 %v3489_v28, %v3488_v60  ;;  %v3476_v18 = vsel %vm1222_vm6, %v3474_v11, %v3475_v47  ;;  %v4071_v54 = vrot.slane %v10166_v21, 4  ;;  %8459 = vpow2.f32 %v3167_v20 }
 0xdee   : > { %v3494_v50 = vrot.slane %v3493_v34, 2  ;;  %v3498_v55 = vsel %vm1842_vm10, %v3476_v18, 0.0  ;;  %v4072_v49 = vrot.slane %v10169_v19, 4  ;;  %v4036_v16 = vmax.f32 %v4034_v29, %v4035_v32 }
 0xdef   : > { %8461 = vrcp.f32 %v3490_v2  ;;  %v3499_v35 = vrot.slane %v3498_v55, 4  ;;  %v10175_v48 = vmul.f32 0.70710677, %v3736_v22  ;;  %v10177_v52 = vmul.f32 0.70710677, %v3389_v41  ;;  %v3724_v2 = vpop.permute.xlu1 %3723 }
 0xdf0   : > { %v3495_v25 = vadd.f32 %v3494_v50, %v3493_v34  ;;  %v4073_v7 = vsel %vm1222_vm6, %v4071_v54, %v4072_v49  ;;  %v4037_v46 = vrot.slane %v4036_v16, 1  ;;  %v3737_v40 = vadd.f32 %v3728_v59, %v9998_v26 }
 0xdf1   : > { %v3500_v61 = vadd.f32 %v3499_v35, %v3498_v55  ;;  %v4087_v51 = vsel %vm1842_vm10, %v4073_v7, 0.0  ;;  %v3750_v43 = vsel %vm1842_vm10, %v10175_v48, -inf  ;;  %v3428_v60 = vsel %vm3400_vm14, %v10177_v52, -inf }
 0xdf2   : > { %v8448_v39 = vpop.eup %8447  ;;  %v3496_v33 = vrot.slane %v3495_v25, 1  ;;  %v4088_v27 = vrot.slane %v4087_v51, 4  ;;  %v4038_v17 = vmax.f32 %v4036_v16, %v4037_v46  ;;  %v3751_v58 = vrot.slane %v3750_v43, 4 }
 0xdf3   : > { %v10186_v11 = vpop.eup %8449  ;;  %v10189_v20 = vmul.f32 %v8448_v39, %v10120_v36  ;;  %v3501_v26 = vrot.slane %v3500_v61, 2  ;;  %v3429_v29 = vmax.f32 %v10111_v8, %v3428_v60  ;;  %v10192_v28 = vmul.f32 0.70710677, %v3737_v40 }
 0xdf4   : > { %v10194_v47 = vpop.eup %8451  ;;  %v3497_v22 = vadd.f32 %v3496_v33, %v3495_v25  ;;  %v10196_v34 = vadd.f32 %v4088_v27, %v4087_v51  ;;  %v4074_v32 = vrot.slane %v10186_v11, 4  ;;  %v4045_v41 = vsub.f32 %v10083_v30, %v4038_v17 }
 0xdf5   : > { %v8454_v18 = vpop.eup %8453  ;;  %v3502_v54 = vadd.f32 %v3501_v26, %v3500_v61  ;;  %v4075_v36 = vrot.slane %v10194_v47, 4  ;;  %v4046_v59 = vsub.f32 %v10128_v45, %v4038_v17  ;;  %v3752_v50 = vmax.f32 %v3750_v43, %v3751_v58  ;;  %v3118_v58 = vpop.permute.xlu1 %3117 }
 0xdf6   : > { %v10203_v8 = vmul.f32 %v8454_v18, %v10126_v63  ;;  %8463 = vrcp.f32 %v3497_v22  ;;  %v4059_v55 = vmul.f32 1.442695, %v4045_v41  ;;  %v3430_v49 = vrot.slane %v3429_v29, 4 }
 0xdf7   : > { %v3503_v16 = vrot.slane %v3502_v54, 1  ;;  %v4076_v35 = vsel %vm1222_vm6, %v4074_v32, %v4075_v36  ;;  %v4061_v25 = vmul.f32 1.442695, %v4046_v59  ;;  %v3753_v7 = vrot.slane %v3752_v50, 2 }
 0xdf8   : > { %v10206_v30 = vpop.eup %8455  ;;  %v4094_v46 = vsel %vm1842_vm10, %v4076_v35, 0.0  ;;  %8465 = vpow2.f32 %v4059_v55  ;;  %v3431_v40 = vmax.f32 %v3429_v29, %v3430_v49  ;;  %v3757_v45 = vsel %vm1842_vm10, %v10192_v28, -inf }
 0xdf9   : > { %v10211_v61 = vpop.eup %8457  ;;  %v3504_v63 = vadd.f32 %v3503_v16, %v3502_v54  ;;  %v4095_v51 = vrot.slane %v4094_v46, 4  ;;  %v4077_v43 = vrot.slane %v10206_v30, 4  ;;  %8467 = vpow2.f32 %v4061_v25 }
 0xdfa   : > { %v10214_v60 = vpop.eup %8459  ;;  %v4078_v39 = vrot.slane %v10211_v61, 4  ;;  %v3754_v33 = vmax.f32 %v3752_v50, %v3753_v7  ;;  %v3432_v27 = vrot.slane %v3431_v40, 2  ;;  %v3758_v17 = vrot.slane %v3757_v45, 4 }
 0xdfb   : > { %8469 = vrcp.f32 %v3504_v63  ;;  %v10217_v26 = vadd.f32 %v4095_v51, %v4094_v46  ;;  %v3185_v29 = vsel %vm1842_vm10, %v10214_v60, 0.0  ;;  %v3735_v22 = vadd.f32 %v3724_v2, %v10006_v24  ;;  %v10230_v24 = vpop.permute.xlu0 %3243 }
 0xdfc   : > { %v8462_v32 = vpop.eup %8461  ;;  %v4079_v41 = vsel %vm1222_vm6, %v4077_v43, %v4078_v39  ;;  %v3186_v18 = vrot.slane %v3185_v29, 4  ;;  %v3755_v54 = vrot.slane %v3754_v33, 1  ;;  %v3433_v36 = vmax.f32 %v3431_v40, %v3432_v27  ;;  %v3730_v43 = vpop.permute.xlu1 %3729 }
 0xdfd   : > { %v10224_v59 = vmul.f32 %v8462_v32, %v10134_v31  ;;  %v10227_v50 = vmul.f32 %v8462_v32, %v10136_v44  ;;  %v4101_v55 = vsel %vm1842_vm10, %v4079_v41, 0.0  ;;  %v3759_v49 = vmax.f32 %v3757_v45, %v3758_v17 }
 0xdfe   : > { %v4102_v16 = vrot.slane %v4101_v55, 4  ;;  %v3187_v35 = vadd.f32 %v3186_v18, %v3185_v29  ;;  %v3756_v25 = vmax.f32 %v3754_v33, %v3755_v54  ;;  %v3434_v7 = vrot.slane %v3433_v36, 1 }
 0xdff   : > { %v3760_v2 = vrot.slane %v3759_v49, 2  ;;  %v10232_v46 = vmul.f32 0.70710677, %v3735_v22  ;;  %v10236_v40 = vmul.f32 %v10224_v59, %v10230_v24  ;;  %v3126_v31 = vadd.f32 %v3118_v58, %v10014_v12 }
 0xe00   : > { %v10239_v44 = vadd.f32 %v4102_v16, %v4101_v55  ;;  %v3188_v63 = vrot.slane %v3187_v35, 2  ;;  %v3772_v45 = vsub.f32 %v10175_v48, %v3756_v25  ;;  %v3435_v51 = vmax.f32 %v3433_v36, %v3434_v7 }
 0xe01   : > { %v3761_v39 = vmax.f32 %v3759_v49, %v3760_v2  ;;  %v3743_v33 = vsel %vm1842_vm10, %v10232_v46, -inf  ;;  %v10245_v17 = vmul.f32 0.70710677, %v3126_v31  ;;  %v4090_v54 = vrot.slane %v10196_v34, 2 }
 0xe02   : > { %v3189_v29 = vadd.f32 %v3188_v63, %v3187_v35  ;;  %v3777_v22 = vmul.f32 1.442695, %v3772_v45  ;;  %v3442_v32 = vsub.f32 %v10100_v57, %v3435_v51  ;;  %v3443_v12 = vsub.f32 %v10177_v52, %v3435_v51  ;;  %v10261_v45 = vpop.permute.xlu1 %3588 }
 0xe03   : > { %v8464_v58 = vpop.eup %8463  ;;  %v3762_v41 = vrot.slane %v3761_v39, 1  ;;  %v3744_v18 = vrot.slane %v3743_v33, 4  ;;  %v3152_v48 = vsel %vm1842_vm10, %v10245_v17, -inf }
 0xe04   : > { %v10253_v36 = vmul.f32 %v8464_v58, %v10150_v42  ;;  %v3190_v55 = vrot.slane %v3189_v29, 1  ;;  %8471 = vpow2.f32 %v3777_v22  ;;  %v3456_v49 = vmul.f32 1.442695, %v3442_v32 }
 0xe05   : > { %v10255_v16 = vpop.eup %8465  ;;  %v3458_v35 = vmul.f32 1.442695, %v3443_v12  ;;  %v3763_v57 = vmax.f32 %v3761_v39, %v3762_v41  ;;  %v3745_v25 = vmax.f32 %v3743_v33, %v3744_v18  ;;  %v3518_v52 = vmul.f32 %v8464_v58, %v10147_v38 }
 0xe06   : > { %v10258_v7 = vpop.eup %8467  ;;  %v3191_v2 = vadd.f32 %v3190_v55, %v3189_v29  ;;  %v4080_v31 = vrot.slane %v10255_v16, 4  ;;  %8473 = vpow2.f32 %v3456_v49  ;;  %v3153_v63 = vrot.slane %v3152_v48, 4 }
 0xe07   : > { %v4081_v42 = vrot.slane %v10258_v7, 4  ;;  %8475 = vpow2.f32 %v3458_v35  ;;  %v3773_v51 = vsub.f32 %v10192_v28, %v3763_v57  ;;  %v3746_v22 = vrot.slane %v3745_v25, 2 }
 0xe08   : > { %v10265_v32 = vpop.eup %8469  ;;  %8477 = vrcp.f32 %v3191_v2  ;;  %v10268_v38 = vmul.f32 %v3518_v52, %v10230_v24  ;;  %v3154_v39 = vmax.f32 %v3152_v48, %v3153_v63  ;;  %v4091_v33 = vadd.f32 %v4090_v54, %v10196_v34 }
 0xe09   : > { %v10273_v29 = vmul.f32 %v10265_v32, %v10158_v62  ;;  %v4082_v12 = vsel %vm1222_vm6, %v4080_v31, %v4081_v42  ;;  %v3779_v58 = vmul.f32 1.442695, %v3773_v51  ;;  %v3747_v41 = vmax.f32 %v3745_v25, %v3746_v22  ;;  %v10281_v31 = vpop.permute.xlu1 %3208 }
 0xe0a   : > { %v4108_v28 = vsel %vm1842_vm10, %v4082_v12, 0.0  ;;  %v3155_v55 = vrot.slane %v3154_v39, 2  ;;  %v4092_v49 = vrot.slane %v4091_v33, 1  ;;  %v4097_v48 = vrot.slane %v10217_v26, 2 }
 0xe0b   : > { %v4109_v35 = vrot.slane %v4108_v28, 4  ;;  %8479 = vpow2.f32 %v3779_v58  ;;  %v3748_v57 = vrot.slane %v3747_v41, 1  ;;  %v4104_v62 = vrot.slane %v10239_v44, 2 }
 0xe0c   : > { %v3156_v34 = vmax.f32 %v3154_v39, %v3155_v55  ;;  %v4093_v54 = vadd.f32 %v4092_v49, %v4091_v33  ;;  %v3738_v2 = vadd.f32 %v3730_v43, %v10021_v13  ;;  %v4098_v42 = vadd.f32 %v4097_v48, %v10217_v26 }
 0xe0d   : > { %v4110_v25 = vadd.f32 %v4109_v35, %v4108_v28  ;;  %v3749_v63 = vmax.f32 %v3747_v41, %v3748_v57  ;;  %v10286_v51 = vmul.f32 %v10281_v31, %v10189_v20  ;;  %v4105_v12 = vadd.f32 %v4104_v62, %v10239_v44 }
 0xe0e   : > { %v3157_v22 = vrot.slane %v3156_v34, 1  ;;  %8481 = vrcp.f32 %v4093_v54  ;;  %v10289_v39 = vmul.f32 0.70710677, %v3738_v2  ;;  %v4099_v58 = vrot.slane %v4098_v42, 1 }
 0xe0f   : > { %v3771_v33 = vsub.f32 %v10232_v46, %v3749_v63  ;;  %v4111_v13 = vrot.slane %v4110_v25, 2  ;;  %v10294_v43 = vmul.f32 %v10281_v31, %v10203_v8  ;;  %v4106_v26 = vrot.slane %v4105_v12, 1 }
 0xe10   : > { %v3158_v41 = vmax.f32 %v3156_v34, %v3157_v22  ;;  %v3764_v28 = vsel %vm1842_vm10, %v10289_v39, -inf  ;;  %v10300_v55 = vmul.f32 %v10224_v59, %v10281_v31  ;;  %v4100_v35 = vadd.f32 %v4099_v58, %v4098_v42 }
 0xe11   : > { %v10302_v44 = vpop.eup %8471  ;;  %v3775_v49 = vmul.f32 1.442695, %v3771_v33  ;;  %v4112_v46 = vadd.f32 %v4111_v13, %v4110_v25  ;;  %v3765_v57 = vrot.slane %v3764_v28, 4  ;;  %v4107_v34 = vadd.f32 %v4106_v26, %v4105_v12 }
 0xe12   : > { %v3790_v48 = vsel %vm1842_vm10, %v10302_v44, 0.0  ;;  %v3162_v54 = vsub.f32 %v10245_v17, %v3158_v41  ;;  %v10308_v62 = vmul.f32 %v3518_v52, %v10281_v31  ;;  %v10317_v33 = vmul.f32 %v10273_v29, %v10281_v31 }
 0xe13   : > { %v10310_v2 = vpop.eup %8473  ;;  %v3791_v63 = vrot.slane %v3790_v48, 4  ;;  %8483 = vpow2.f32 %v3775_v49  ;;  %v4113_v59 = vrot.slane %v4112_v46, 1  ;;  %v3766_v22 = vmax.f32 %v3764_v28, %v3765_v57 }
 0xe14   : > { %v10312_v18 = vpop.eup %8475  ;;  %v3477_v25 = vrot.slane %v10310_v2, 4  ;;  %v3169_v42 = vmul.f32 1.442695, %v3162_v54  ;;  %8485 = vrcp.f32 %v4100_v35  ;;  %v10325_v35 = vpop.permute.xlu0 %4191  ;;  %v12248_v10 = vrot.slane %v10268_v38, 4 }
 0xe15   : > { %v10319_v17 = vpop.eup %8477  ;;  %v3792_v52 = vadd.f32 %v3791_v63, %v3790_v48  ;;  %v3478_v12 = vrot.slane %v10312_v18, 4  ;;  %v4114_v58 = vadd.f32 %v4113_v59, %v4112_v46  ;;  %8487 = vrcp.f32 %v4107_v34 }
 0xe16   : > { %8489 = vpow2.f32 %v3169_v42  ;;  %v3767_v13 = vrot.slane %v3766_v22, 2  ;;  %v10333_v34 = vmul.f32 %v10265_v32, %v10161_v1  ;;  %v3592_v63 = vmul.f32 %v10261_v45, %v10227_v50 }
 0xe17   : > { %v3793_v28 = vrot.slane %v3792_v52, 2  ;;  %v3479_v49 = vsel %vm1222_vm6, %v3477_v25, %v3478_v12  ;;  %8491 = vrcp.f32 %v4114_v58  ;;  %v3594_v12 = vmul.f32 %v10261_v45, %v10253_v36 }
 0xe18   : > { %v10328_v54 = vpop.eup %8479  ;;  %v3505_v48 = vsel %vm1842_vm10, %v3479_v49, 0.0  ;;  %v3768_v46 = vmax.f32 %v3766_v22, %v3767_v13  ;;  %v10343_v22 = vmul.f32 %v10273_v29, %v10230_v24  ;;  %v10347_v1 = vmul.f32 %v10261_v45, %v10333_v34  ;;  %v10351_v23 = vpop.permute.xlu0 %3525 }
 0xe19   : > { %v3794_v59 = vadd.f32 %v3793_v28, %v3792_v52  ;;  %v3506_v42 = vrot.slane %v3505_v48, 4  ;;  %v3797_v25 = vsel %vm1842_vm10, %v10328_v54, 0.0  ;;  %v3608_v28 = vrot.slane %v3592_v63, 4 }
 0xe1a   : > { %v3798_v58 = vrot.slane %v3797_v25, 4  ;;  %v3769_v57 = vrot.slane %v3768_v46, 1  ;;  %v3611_v49 = vrot.slane %v3594_v12, 4  ;;  %v12247_v29 = vrot.slane %v10236_v40, 4 }
 0xe1b   : > { %v8482_v32 = vpop.eup %8481  ;;  %v3795_v13 = vrot.slane %v3794_v59, 1  ;;  %v3507_v52 = vadd.f32 %v3506_v42, %v3505_v48 }
 0xe1c   : > { %v3799_v26 = vadd.f32 %v3798_v58, %v3797_v25  ;;  %v4120_v41 = vmul.f32 %v8482_v32, %v10169_v19  ;;  %v3770_v27 = vmax.f32 %v3768_v46, %v3769_v57  ;;  %v4119_v4 = vmul.f32 %v8482_v32, %v10166_v21  ;;  %v4129_v46 = vpop.permute.xlu1 %4128 }
 0xe1d   : > { %v3796_v3 = vadd.f32 %v3795_v13, %v3794_v59  ;;  %v3508_v53 = vrot.slane %v3507_v52, 2  ;;  %v10356_v56 = vsel %vm1222_vm6, %v12247_v29, %v3608_v28  ;;  %v10361_v48 = vsel %vm1222_vm6, %v12248_v10, %v3611_v49 }
 0xe1e   : > { %v3800_v63 = vrot.slane %v3799_v26, 2  ;;  %v10364_v19 = vmul.f32 %v10325_v35, %v4120_v41  ;;  %v3774_v21 = vsub.f32 %v10289_v39, %v3770_v27  ;;  %v4131_v57 = vmul.f32 %v4119_v4, %v10351_v23 }
 0xe1f   : > { %8493 = vrcp.f32 %v3796_v3  ;;  %v3509_v59 = vadd.f32 %v3508_v53, %v3507_v52  ;;  %v10369_v40 = vmul.f32 %v4119_v4, %v10261_v45  ;;  %v4132_v42 = vmul.f32 %v4129_v46, %v4120_v41 }
 0xe20   : > { %v10371_v25 = vpop.eup %8483  ;;  %v3801_v38 = vadd.f32 %v3800_v63, %v3799_v26  ;;  %v3781_v12 = vmul.f32 1.442695, %v3774_v21  ;;  %v4147_v58 = vrot.slane %v4131_v57, 4 }
 0xe21   : > { %v8486_v32 = vpop.eup %8485  ;;  %v3510_v13 = vrot.slane %v3509_v59, 1  ;;  %v3783_v27 = vsel %vm1842_vm10, %v10371_v25, 0.0  ;;  %v4148_v3 = vrot.slane %v4132_v42, 4 }
 0xe22   : > { %v8488_v53 = vpop.eup %8487  ;;  %v3802_v52 = vrot.slane %v3801_v38, 1  ;;  %v3784_v4 = vrot.slane %v3783_v27, 4  ;;  %v4122_v41 = vmul.f32 %v8486_v32, %v10194_v47  ;;  %8495 = vpow2.f32 %v3781_v12 }
 0xe23   : > { %v10378_v28 = vpop.eup %8489  ;;  %v3511_v26 = vadd.f32 %v3510_v13, %v3509_v59  ;;  %v4124_v49 = vmul.f32 %v8488_v53, %v10211_v61  ;;  %v4121_v29 = vmul.f32 %v8486_v32, %v10186_v11  ;;  %v4123_v63 = vmul.f32 %v8488_v53, %v10206_v30 }
 0xe24   : > { %v8492_v21 = vpop.eup %8491  ;;  %v3803_v57 = vadd.f32 %v3802_v52, %v3801_v38  ;;  %v3785_v10 = vadd.f32 %v3784_v4, %v3783_v27  ;;  %v3192_v42 = vsel %vm1842_vm10, %v10378_v28, 0.0  ;;  %v10386_v39 = vmul.f32 %v10325_v35, %v4122_v41 }
 0xe25   : > { %8497 = vrcp.f32 %v3511_v26  ;;  %v3193_v47 = vrot.slane %v3192_v42, 4  ;;  %v4126_v12 = vmul.f32 %v8492_v21, %v10258_v7  ;;  %v10390_v59 = vmul.f32 %v10325_v35, %v4124_v49 }
 0xe26   : > { %8499 = vrcp.f32 %v3803_v57  ;;  %v3786_v11 = vrot.slane %v3785_v10, 2  ;;  %v4214_v30 = vrot.slane %v10386_v39, 4  ;;  %v4125_v61 = vmul.f32 %v8492_v21, %v10255_v16 }
 0xe27   : > { %v3194_v38 = vadd.f32 %v3193_v47, %v3192_v42  ;;  %v10395_v32 = vmul.f32 %v10325_v35, %v4126_v12  ;;  %v4217_v13 = vrot.slane %v10390_v59, 4  ;;  %v4133_v27 = vmul.f32 %v4121_v29, %v10351_v23 }
 0xe28   : > { %v3787_v53 = vadd.f32 %v3786_v11, %v3785_v10  ;;  %v4135_v7 = vmul.f32 %v4123_v63, %v10351_v23  ;;  %v4137_v52 = vmul.f32 %v4125_v61, %v10351_v23  ;;  %v4196_v4 = vmul.f32 %v4121_v29, %v10261_v45 }
 0xe29   : > { %v3195_v26 = vrot.slane %v3194_v38, 2  ;;  %v4220_v39 = vrot.slane %v10395_v32, 4  ;;  %v4150_v57 = vrot.slane %v4133_v27, 4  ;;  %v4134_v16 = vmul.f32 %v4129_v46, %v4122_v41 }
 0xe2a   : > { %v3788_v21 = vrot.slane %v3787_v53, 1  ;;  %v4153_v42 = vrot.slane %v4135_v7, 4  ;;  %v4156_v35 = vrot.slane %v4137_v52, 4  ;;  %v4213_v47 = vrot.slane %v4196_v4, 4 }
 0xe2b   : > { %v3196_v9 = vadd.f32 %v3195_v26, %v3194_v38  ;;  %v4136_v59 = vmul.f32 %v4129_v46, %v4124_v49  ;;  %v4138_v0 = vmul.f32 %v4129_v46, %v4126_v12  ;;  %v4149_v10 = vsel %vm1222_vm6, %v4147_v58, %v4148_v3 }
 0xe2c   : > { %v8494_v11 = vpop.eup %8493  ;;  %v3789_v14 = vadd.f32 %v3788_v21, %v3787_v53  ;;  %v4151_v5 = vrot.slane %v4134_v16, 4  ;;  %v4163_v6 = vsel %vm1842_vm10, %v4149_v10, 0.0  ;;  %v4198_v29 = vmul.f32 %v4123_v63, %v10261_v45 }
 0xe2d   : > { %v10407_v32 = vmul.f32 %v8494_v11, %v10302_v44  ;;  %v3197_v41 = vrot.slane %v3196_v9, 1  ;;  %v4154_v27 = vrot.slane %v4136_v59, 4  ;;  %v4157_v7 = vrot.slane %v4138_v0, 4 }
 0xe2e   : > { %8501 = vrcp.f32 %v3789_v14  ;;  %v4152_v38 = vsel %vm1222_vm6, %v4150_v57, %v4151_v5  ;;  %v4164_v49 = vrot.slane %v4163_v6, 4  ;;  %v4200_v46 = vmul.f32 %v4125_v61, %v10261_v45 }
 0xe2f   : > { %v10411_v58 = vpop.eup %8495  ;;  %v3198_v3 = vadd.f32 %v3197_v41, %v3196_v9  ;;  %v4155_v12 = vsel %vm1222_vm6, %v4153_v42, %v4154_v27  ;;  %v4158_v53 = vsel %vm1222_vm6, %v4156_v35, %v4157_v7  ;;  %v4170_v63 = vsel %vm1842_vm10, %v4152_v38, 0.0 }
 0xe30   : > { %v3804_v44 = vsel %vm1842_vm10, %v10411_v58, 0.0  ;;  %v4165_v52 = vadd.f32 %v4164_v49, %v4163_v6  ;;  %v4171_v0 = vrot.slane %v4170_v63, 4  ;;  %v4177_v14 = vsel %vm1842_vm10, %v4155_v12, 0.0 }
 0xe31   : > { %8503 = vrcp.f32 %v3198_v3  ;;  %v3805_v5 = vrot.slane %v3804_v44, 4  ;;  %v4178_v4 = vrot.slane %v4177_v14, 4  ;;  %v10420_v61 = vsel %vm1842_vm10, %v4158_v53, 0.0 }
 0xe32   : > { %v8498_v9 = vpop.eup %8497  ;;  %v4166_v26 = vrot.slane %v4165_v52, 2  ;;  %v4172_v57 = vadd.f32 %v4171_v0, %v4170_v63  ;;  %v4185_v16 = vrot.slane %v10420_v61, 4  ;;  %v12249_v21 = vrot.slane %v10364_v19, 4 }
 0xe33   : > { %v12250_v42 = vrot.slane %v10369_v40, 4  ;;  %v10428_v35 = vpop.eup %8499  ;;  %v3806_v59 = vadd.f32 %v3805_v5, %v3804_v44  ;;  %v10430_v10 = vadd.f32 %v4178_v4, %v4177_v14  ;;  %v4215_v11 = vsel %vm1222_vm6, %v4213_v47, %v4214_v30 }
 0xe34   : > { %v4216_v41 = vrot.slane %v4198_v29, 4  ;;  %v10433_v27 = vadd.f32 %v4166_v26, %v4165_v52  ;;  %v4173_v7 = vrot.slane %v4172_v57, 2  ;;  %v4219_v38 = vrot.slane %v4200_v46, 4 }
 0xe35   : > { %v4212_v6 = vsel %vm1222_vm6, %v12250_v42, %v12249_v21  ;;  %v3807_v3 = vrot.slane %v3806_v59, 2  ;;  %v4233_v12 = vsel %vm1842_vm10, %v4215_v11, 0.0  ;;  %v10444_v5 = vmul.f32 %v8498_v9, %v10310_v2 }
 0xe36   : > { %v4226_v49 = vsel %vm1842_vm10, %v4212_v6, 0.0  ;;  %v4218_v19 = vsel %vm1222_vm6, %v4216_v41, %v4217_v13  ;;  %v10438_v53 = vadd.f32 %v4173_v7, %v4172_v57  ;;  %v4221_v63 = vsel %vm1222_vm6, %v4219_v38, %v4220_v39 }
 0xe37   : > { %v4227_v40 = vrot.slane %v4226_v49, 4  ;;  %v4234_v44 = vrot.slane %v4233_v12, 4  ;;  %v4240_v30 = vsel %vm1842_vm10, %v4218_v19, 0.0  ;;  %v3808_v47 = vadd.f32 %v3807_v3, %v3806_v59 }
 0xe38   : > { %v4241_v52 = vrot.slane %v4240_v30, 4  ;;  %v4247_v46 = vsel %vm1842_vm10, %v4221_v63, 0.0  ;;  %v10447_v13 = vmul.f32 %v8498_v9, %v10312_v18  ;;  %v3613_v39 = vrot.slane %v10343_v22, 4 }
 0xe39   : > { %v4228_v29 = vadd.f32 %v4227_v40, %v4226_v49  ;;  %v4235_v0 = vadd.f32 %v4234_v44, %v4233_v12  ;;  %v4248_v14 = vrot.slane %v4247_v46, 4  ;;  %v3809_v4 = vrot.slane %v3808_v47, 1 }
 0xe3a   : > { %v4242_v57 = vadd.f32 %v4241_v52, %v4240_v30  ;;  %v3597_v6 = vmul.f32 %v10444_v5, %v10230_v24  ;;  %v3598_v59 = vmul.f32 %v10261_v45, %v10447_v13  ;;  %v3614_v18 = vrot.slane %v10347_v1, 4 }
 0xe3b   : > { %v4229_v26 = vrot.slane %v4228_v29, 2  ;;  %v4236_v21 = vrot.slane %v4235_v0, 2  ;;  %v4249_v42 = vadd.f32 %v4248_v14, %v4247_v46  ;;  %v8502_v11 = vpop.eup %8501  ;;  %v3810_v41 = vadd.f32 %v3809_v4, %v3808_v47 }
 0xe3c   : > { %v4243_v7 = vrot.slane %v4242_v57, 2  ;;  %v10456_v9 = vmul.f32 %v8502_v11, %v10371_v25  ;;  %v3616_v22 = vrot.slane %v3597_v6, 4  ;;  %v3615_v40 = vsel %vm1222_vm6, %v3613_v39, %v3614_v18 }
 0xe3d   : > { %v4230_v2 = vadd.f32 %v4229_v26, %v4228_v29  ;;  %v4237_v38 = vadd.f32 %v4236_v21, %v4235_v0  ;;  %v4250_v49 = vrot.slane %v4249_v42, 2  ;;  %8505 = vrcp.f32 %v3810_v41 }
 0xe3e   : > { %v4244_v19 = vadd.f32 %v4243_v7, %v4242_v57  ;;  %v8504_v12 = vpop.eup %8503  ;;  %v3617_v30 = vrot.slane %v3598_v59, 4  ;;  %v3623_v47 = vsel %vm1842_vm10, %v10356_v56, 0.0  ;;  %v3630_v25 = vsel %vm1842_vm10, %v10361_v48, 0.0 }
 0xe3f   : > { %v4231_v3 = vrot.slane %v4230_v2, 1  ;;  %v4238_v63 = vrot.slane %v4237_v38, 1  ;;  %v4251_v44 = vadd.f32 %v4250_v49, %v4249_v42  ;;  %v3624_v52 = vrot.slane %v3623_v47, 4 }
 0xe40   : > { %v4245_v1 = vrot.slane %v4244_v19, 1  ;;  %v3618_v14 = vsel %vm1222_vm6, %v3616_v22, %v3617_v30  ;;  %v3631_v4 = vrot.slane %v3630_v25, 4  ;;  %v3637_v39 = vsel %vm1842_vm10, %v3615_v40, 0.0  ;;  %v4281_v22 = vld [vmem:[%s12246_s3] sm:$0xff] }
 0xe41   : > { %v4232_v29 = vadd.f32 %v4231_v3, %v4230_v2  ;;  %v4239_v46 = vadd.f32 %v4238_v63, %v4237_v38  ;;  %v4252_v0 = vrot.slane %v4251_v44, 1  ;;  %v3625_v57 = vadd.f32 %v3624_v52, %v3623_v47  ;;  %8160 = vmatprep.subr.mxu0 %v4281_v22 }
 0xe42   : > { %v4246_v26 = vadd.f32 %v4245_v1, %v4244_v19  ;;  %v3644_v21 = vsel %vm1842_vm10, %v3618_v14, 0.0  ;;  %v3632_v6 = vadd.f32 %v3631_v4, %v3630_v25  ;;  %v3638_v59 = vrot.slane %v3637_v39, 4  ;;  %8161 = vmatpush3.msra.mxu0 %v4281_v22 }
 0xe43   : > { %v4253_v42 = vadd.f32 %v4252_v0, %v4251_v44  ;;  %v4266_v56 = vsel %vm1993_vm11, %v4239_v46, %v4232_v29  ;;  %v3626_v48 = vrot.slane %v3625_v57, 2  ;;  %v3645_v41 = vrot.slane %v3644_v21, 4 }
 0xe44   : > { %v4267_v11 = vsel %vm1995_vm12, %v4246_v26, %v4266_v56  ;;  %v10470_v2 = vmul.f32 %v10319_v17, %v10214_v60  ;;  %v3633_v18 = vrot.slane %v3632_v6, 2  ;;  %v3639_v38 = vadd.f32 %v3638_v59, %v3637_v39 }
 0xe45   : > { %v4268_v7 = vsel %vm1997_vm13, %v4253_v42, %v4267_v11  ;;  %v10474_v49 = vmul.f32 %v8504_v12, %v10378_v28  ;;  %v3627_v3 = vadd.f32 %v3626_v48, %v3625_v57  ;;  %v3646_v19 = vadd.f32 %v3645_v41, %v3644_v21 }
 0xe46   : > { %4269 = vrot.lane.b32.xlu1 %v4268_v7, %s12251_s16  ;;  %v3246_v40 = vmul.f32 %v10230_v24, %v10189_v20  ;;  %v3247_v63 = vmul.f32 %v10230_v24, %v10203_v8  ;;  %v3634_v60 = vadd.f32 %v3633_v18, %v3632_v6  ;;  %v3640_v17 = vrot.slane %v3639_v38, 2 }
 0xe47   : > { %v3248_v44 = vmul.f32 %v10230_v24, %v10470_v2  ;;  %v3249_v28 = vmul.f32 %v10230_v24, %v10474_v49  ;;  %v3628_v12 = vrot.slane %v3627_v3, 1  ;;  %v3647_v30 = vrot.slane %v3646_v19, 2 }
 0xe48   : > { %v3250_v47 = vsel %vm1842_vm10, %v3246_v40, 0.0  ;;  %v3257_v29 = vsel %vm1842_vm10, %v3247_v63, 0.0  ;;  %v3635_v20 = vrot.slane %v3634_v60, 1  ;;  %v3641_v1 = vadd.f32 %v3640_v17, %v3639_v38 }
 0xe49   : > { %v3251_v52 = vrot.slane %v3250_v47, 4  ;;  %v3258_v8 = vrot.slane %v3257_v29, 4  ;;  %v3629_v25 = vadd.f32 %v3628_v12, %v3627_v3  ;;  %v3648_v46 = vadd.f32 %v3647_v30, %v3646_v19 }
 0xe4a   : > { %v3264_v0 = vsel %vm1842_vm10, %v3248_v44, 0.0  ;;  %v3271_v14 = vsel %vm1842_vm10, %v3249_v28, 0.0  ;;  %v8506_v4 = vpop.eup %8505  ;;  %v3636_v24 = vadd.f32 %v3635_v20, %v3634_v60  ;;  %v3642_v26 = vrot.slane %v3641_v1, 1 }
 0xe4b   : > { %v3252_v57 = vadd.f32 %v3251_v52, %v3250_v47  ;;  %v3259_v39 = vadd.f32 %v3258_v8, %v3257_v29  ;;  %v3649_v21 = vrot.slane %v3648_v46, 1  ;;  %v3265_v42 = vrot.slane %v3264_v0, 4 }
 0xe4c   : > { %v3272_v56 = vrot.slane %v3271_v14, 4  ;;  %v10492_v6 = vmul.f32 %v10428_v35, %v10328_v54  ;;  %v3643_v59 = vadd.f32 %v3642_v26, %v3641_v1  ;;  %v3663_v11 = vsel %vm1993_vm11, %v3636_v24, %v3629_v25 }
 0xe4d   : > { %v3253_v48 = vrot.slane %v3252_v57, 2  ;;  %v3260_v41 = vrot.slane %v3259_v39, 2  ;;  %v3650_v7 = vadd.f32 %v3649_v21, %v3648_v46  ;;  %v3266_v18 = vadd.f32 %v3265_v42, %v3264_v0 }
 0xe4e   : > { %v3273_v38 = vadd.f32 %v3272_v56, %v3271_v14  ;;  %v10496_v22 = vmul.f32 %v8506_v4, %v10411_v58  ;;  %v3664_v3 = vsel %vm1995_vm12, %v3643_v59, %v3663_v11  ;;  %v3851_v63 = vmul.f32 %v10456_v9, %v10261_v45 }
 0xe4f   : > { %v3254_v19 = vadd.f32 %v3253_v48, %v3252_v57  ;;  %v3261_v40 = vadd.f32 %v3260_v41, %v3259_v39  ;;  %v3665_v54 = vsel %vm1997_vm13, %v3650_v7, %v3664_v3  ;;  %v3267_v35 = vrot.slane %v3266_v18, 2 }
 0xe50   : > { %v3274_v60 = vrot.slane %v3273_v38, 2  ;;  %v3852_v17 = vmul.f32 %v10407_v32, %v10261_v45  ;;  %3666 = vrot.lane.b32.xlu0 %v3665_v54, %s12251_s16  ;;  %v3853_v58 = vmul.f32 %v10492_v6, %v10261_v45  ;;  %v3854_v12 = vmul.f32 %v10496_v22, %v10261_v45 }
 0xe51   : > { %v3255_v44 = vrot.slane %v3254_v19, 1  ;;  %v3262_v28 = vrot.slane %v3261_v40, 1  ;;  %v3268_v30 = vadd.f32 %v3267_v35, %v3266_v18  ;;  %v3855_v29 = vsel %vm1842_vm10, %v3851_v63, 0.0 }
 0xe52   : > { %v3275_v47 = vadd.f32 %v3274_v60, %v3273_v38  ;;  %v3862_v20 = vsel %vm1842_vm10, %v3852_v17, 0.0  ;;  %v3856_v8 = vrot.slane %v3855_v29, 4  ;;  %v3869_v14 = vsel %vm1842_vm10, %v3853_v58, 0.0 }
 0xe53   : > { %v3256_v1 = vadd.f32 %v3255_v44, %v3254_v19  ;;  %v3263_v52 = vadd.f32 %v3262_v28, %v3261_v40  ;;  %v3863_v25 = vrot.slane %v3862_v20, 4  ;;  %v3269_v46 = vrot.slane %v3268_v30, 1 }
 0xe54   : > { %v3276_v0 = vrot.slane %v3275_v47, 1  ;;  %v3876_v4 = vsel %vm1842_vm10, %v3854_v12, 0.0  ;;  %v3857_v26 = vadd.f32 %v3856_v8, %v3855_v29  ;;  %v3870_v57 = vrot.slane %v3869_v14, 4 }
 0xe55   : > { %v3290_v24 = vsel %vm1993_vm11, %v3263_v52, %v3256_v1  ;;  %v3864_v45 = vadd.f32 %v3863_v25, %v3862_v20  ;;  %v3270_v39 = vadd.f32 %v3269_v46, %v3268_v30  ;;  %v3877_v42 = vrot.slane %v3876_v4, 4 }
 0xe56   : > { %v3277_v21 = vadd.f32 %v3276_v0, %v3275_v47  ;;  %v4168_v56 = vrot.slane %v10433_v27, 1  ;;  %v3858_v59 = vrot.slane %v3857_v26, 2  ;;  %v3871_v48 = vadd.f32 %v3870_v57, %v3869_v14 }
 0xe57   : > { %v3865_v11 = vrot.slane %v3864_v45, 2  ;;  %v4175_v41 = vrot.slane %v10438_v53, 1  ;;  %v3291_v7 = vsel %vm1995_vm12, %v3270_v39, %v3290_v24  ;;  %v3878_v18 = vadd.f32 %v3877_v42, %v3876_v4 }
 0xe58   : > { %v4169_v38 = vadd.f32 %v4168_v56, %v10433_v27  ;;  %v4180_v3 = vrot.slane %v10430_v10, 2  ;;  %v3292_v19 = vsel %vm1997_vm13, %v3277_v21, %v3291_v7  ;;  %v3859_v40 = vadd.f32 %v3858_v59, %v3857_v26 }
 0xe59   : > { %v3866_v63 = vadd.f32 %v3865_v11, %v3864_v45  ;;  %v3872_v54 = vrot.slane %v3871_v48, 2  ;;  %3293 = vrot.lane.b32.xlu0 %v3292_v19, %s12251_s16  ;;  %v3879_v35 = vrot.slane %v3878_v18, 2  ;;  %v4176_v60 = vadd.f32 %v4175_v41, %v10438_v53 }
 0xe5a   : > { %v4181_v17 = vadd.f32 %v4180_v3, %v10430_v10  ;;  %v4186_v44 = vadd.f32 %v4185_v16, %v10420_v61  ;;  %v3860_v28 = vrot.slane %v3859_v40, 1  ;;  %v3529_v12 = vmul.f32 %v10351_v23, %v10227_v50 }
 0xe5b   : > { %v3867_v27 = vrot.slane %v3866_v63, 1  ;;  %v3873_v58 = vadd.f32 %v3872_v54, %v3871_v48  ;;  %v3880_v30 = vadd.f32 %v3879_v35, %v3878_v18  ;;  %v4258_v20 = vsel %vm1993_vm11, %v4176_v60, %v4169_v38 }
 0xe5c   : > { %v4182_v47 = vrot.slane %v4181_v17, 1  ;;  %v4187_v29 = vrot.slane %v4186_v44, 2  ;;  %v3861_v1 = vadd.f32 %v3860_v28, %v3859_v40  ;;  %v3531_v10 = vmul.f32 %v10351_v23, %v10253_v36 }
 0xe5d   : > { %v3868_v52 = vadd.f32 %v3867_v27, %v3866_v63  ;;  %v3874_v53 = vrot.slane %v3873_v58, 1  ;;  %v3881_v8 = vrot.slane %v3880_v30, 1  ;;  %v3533_v16 = vmul.f32 %v10351_v23, %v10333_v34 }
 0xe5e   : > { %v4183_v25 = vadd.f32 %v4182_v47, %v4181_v17  ;;  %v4188_v61 = vadd.f32 %v4187_v29, %v4186_v44  ;;  %v3535_v0 = vmul.f32 %v10351_v23, %v10447_v13  ;;  %v3545_v14 = vrot.slane %v3529_v12, 4 }
 0xe5f   : > { %v3875_v46 = vadd.f32 %v3874_v53, %v3873_v58  ;;  %v3895_v50 = vsel %vm1993_vm11, %v3868_v52, %v3861_v1  ;;  %v3882_v4 = vadd.f32 %v3881_v8, %v3880_v30  ;;  %v3548_v45 = vrot.slane %v3531_v10, 4 }
 0xe60   : > { %v4189_v24 = vrot.slane %v4188_v61, 1  ;;  %v4259_v26 = vsel %vm1995_vm12, %v4183_v25, %v4258_v20  ;;  %v3551_v57 = vrot.slane %v3533_v16, 4  ;;  %v3554_v39 = vrot.slane %v3535_v0, 4 }
 0xe61   : > { %v3896_v36 = vsel %vm1995_vm12, %v3875_v46, %v3895_v50  ;;  %v3534_v21 = vmul.f32 %v10444_v5, %v10281_v31  ;;  %v12252_v56 = vrot.slane %v10300_v55, 4  ;;  %v12253_v59 = vrot.slane %v10308_v62, 4 }
 0xe62   : > { %v3897_v34 = vsel %vm1997_vm13, %v3882_v4, %v3896_v36  ;;  %v4190_v42 = vadd.f32 %v4189_v24, %v4188_v61  ;;  %v12254_v48 = vrot.slane %v10317_v33, 4  ;;  %v3213_v33 = vmul.f32 %v10281_v31, %v10470_v2 }
 0xe63   : > { %v3546_v13 = vsel %vm1222_vm6, %v12252_v56, %v3545_v14  ;;  %v3549_v11 = vsel %vm1222_vm6, %v12253_v59, %v3548_v45  ;;  %3898 = vrot.lane.b32.xlu1 %v3897_v34, %s12251_s16  ;;  %v3553_v7 = vrot.slane %v3534_v21, 4  ;;  %v3214_v63 = vmul.f32 %v10281_v31, %v10474_v49 }
 0xe64   : > { %v3552_v41 = vsel %vm1222_vm6, %v12254_v48, %v3551_v57  ;;  %v3560_v5 = vsel %vm1842_vm10, %v3546_v13, 0.0  ;;  %v3567_v18 = vsel %vm1842_vm10, %v3549_v11, 0.0  ;;  %v10554_v38 = vsel %vm1997_vm13, %v4190_v42, %v4259_v26 }
 0xe65   : > { %v3561_v55 = vrot.slane %v3560_v5, 4  ;;  %v3568_v3 = vrot.slane %v3567_v18, 4  ;;  %v3574_v62 = vsel %vm1842_vm10, %v3552_v41, 0.0  ;;  %v3555_v19 = vsel %vm1222_vm6, %v3553_v7, %v3554_v39 }
 0xe66   : > { %v3575_v40 = vrot.slane %v3574_v62, 4  ;;  %v3581_v60 = vsel %vm1842_vm10, %v3555_v19, 0.0  ;;  %v3215_v17 = vsel %vm1842_vm10, %v10286_v51, 0.0  ;;  %v3222_v58 = vsel %vm1842_vm10, %v10294_v43, 0.0 }
 0xe67   : > { %v3562_v54 = vadd.f32 %v3561_v55, %v3560_v5  ;;  %v3569_v35 = vadd.f32 %v3568_v3, %v3567_v18  ;;  %v3582_v28 = vrot.slane %v3581_v60, 4  ;;  %v3216_v27 = vrot.slane %v3215_v17, 4 }
 0xe68   : > { %v3576_v44 = vadd.f32 %v3575_v40, %v3574_v62  ;;  %v3223_v47 = vrot.slane %v3222_v58, 4  ;;  %v3229_v2 = vsel %vm1842_vm10, %v3213_v33, 0.0  ;;  %v3236_v51 = vsel %vm1842_vm10, %v3214_v63, 0.0 }
 0xe69   : > { %v3563_v12 = vrot.slane %v3562_v54, 2  ;;  %v3570_v30 = vrot.slane %v3569_v35, 2  ;;  %v3583_v31 = vadd.f32 %v3582_v28, %v3581_v60  ;;  %v3217_v49 = vadd.f32 %v3216_v27, %v3215_v17 }
 0xe6a   : > { %v3577_v29 = vrot.slane %v3576_v44, 2  ;;  %v3230_v20 = vrot.slane %v3229_v2, 4  ;;  %v3224_v53 = vadd.f32 %v3223_v47, %v3222_v58  ;;  %v3237_v50 = vrot.slane %v3236_v51, 4 }
 0xe6b   : > { %v3564_v1 = vadd.f32 %v3563_v12, %v3562_v54  ;;  %v3571_v52 = vadd.f32 %v3570_v30, %v3569_v35  ;;  %v3584_v8 = vrot.slane %v3583_v31, 2  ;;  %v3218_v25 = vrot.slane %v3217_v49, 2 }
 0xe6c   : > { %v3578_v10 = vadd.f32 %v3577_v29, %v3576_v44  ;;  %v3231_v61 = vadd.f32 %v3230_v20, %v3229_v2  ;;  %v3225_v46 = vrot.slane %v3224_v53, 2  ;;  %v3238_v57 = vadd.f32 %v3237_v50, %v3236_v51 }
 0xe6d   : > { %v3565_v16 = vrot.slane %v3564_v1, 1  ;;  %v3572_v43 = vrot.slane %v3571_v52, 1  ;;  %v3585_v14 = vadd.f32 %v3584_v8, %v3583_v31  ;;  %v3219_v4 = vadd.f32 %v3218_v25, %v3217_v49 }
 0xe6e   : > { %v3579_v0 = vrot.slane %v3578_v10, 1  ;;  %v3232_v24 = vrot.slane %v3231_v61, 2  ;;  %v3226_v36 = vadd.f32 %v3225_v46, %v3224_v53  ;;  %v3239_v59 = vrot.slane %v3238_v57, 2 }
 0xe6f   : > { %v3566_v26 = vadd.f32 %v3565_v16, %v3564_v1  ;;  %v3573_v45 = vadd.f32 %v3572_v43, %v3571_v52  ;;  %v3586_v21 = vrot.slane %v3585_v14, 1  ;;  %v3220_v34 = vrot.slane %v3219_v4, 1 }
 0xe70   : > { %v3580_v39 = vadd.f32 %v3579_v0, %v3578_v10  ;;  %v3233_v42 = vadd.f32 %v3232_v24, %v3231_v61  ;;  %v3227_v13 = vrot.slane %v3226_v36, 1  ;;  %v3819_v11 = vmul.f32 %v10456_v9, %v10351_v23 }
 0xe71   : > { %v3655_v56 = vsel %vm1993_vm11, %v3573_v45, %v3566_v26  ;;  %v3587_v48 = vadd.f32 %v3586_v21, %v3585_v14  ;;  %v3221_v7 = vadd.f32 %v3220_v34, %v3219_v4  ;;  %v3240_v55 = vadd.f32 %v3239_v59, %v3238_v57  ;;  %v7938_v59 = vld [vmem:[%s12246_s3 + $0x10] ss:$0 sm:$0xff]  ;;  %s12256_s3 = sld [smem:[#allocation19_spill]] }
 0xe72   : > { %v3656_v41 = vsel %vm1995_vm12, %v3580_v39, %v3655_v56  ;;  %v3234_v5 = vrot.slane %v3233_v42, 1  ;;  %v3228_v18 = vadd.f32 %v3227_v13, %v3226_v36  ;;  %v3820_v3 = vmul.f32 %v10407_v32, %v10351_v23 }
 0xe73   : > { %v3821_v62 = vmul.f32 %v10492_v6, %v10351_v23  ;;  %v3657_v19 = vsel %vm1997_vm13, %v3587_v48, %v3656_v41  ;;  %v3822_v33 = vmul.f32 %v10496_v22, %v10351_v23  ;;  %v3823_v9 = vsel %vm1842_vm10, %v3819_v11, 0.0 }
 0xe74   : > { %v3235_v40 = vadd.f32 %v3234_v5, %v3233_v42  ;;  %v3241_v63 = vrot.slane %v3240_v55, 1  ;;  %v3282_v54 = vsel %vm1993_vm11, %v3228_v18, %v3221_v7  ;;  %v3824_v35 = vrot.slane %v3823_v9, 4 }
 0xe75   : > { %v3830_v60 = vsel %vm1842_vm10, %v3820_v3, 0.0  ;;  %v3837_v44 = vsel %vm1842_vm10, %v3821_v62, 0.0  ;;  %v3844_v6 = vsel %vm1842_vm10, %v3822_v33, 0.0 }
 0xe76   : > { %v3283_v17 = vsel %vm1995_vm12, %v3235_v40, %v3282_v54  ;;  %v3831_v32 = vrot.slane %v3830_v60, 4  ;;  %v3242_v28 = vadd.f32 %v3241_v63, %v3240_v55  ;;  %v3825_v27 = vadd.f32 %v3824_v35, %v3823_v9  ;;  %v4410_v35 = vld [vmem:[%s12255_s6 + $0x8] sm:$0xff] }
 0xe77   : > { %v3838_v58 = vrot.slane %v3837_v44, 4  ;;  %v3845_v12 = vrot.slane %v3844_v6, 4  ;;  %8165 = vmatprep.subr.mxu0 %v4410_v35 }
 0xe78   : > { %v3832_v23 = vadd.f32 %v3831_v32, %v3830_v60  ;;  %v3284_v22 = vsel %vm1997_vm13, %v3242_v28, %v3283_v17  ;;  %v3826_v30 = vrot.slane %v3825_v27, 2  ;;  %v4409_v60 = vld [vmem:[%s12255_s6] sm:$0xff]  ;;  %v4502_v17 = vld [vmem:[%s12256_s3 + $0x18] sm:$0xff]  ;;  %v4501_v32 = vld [vmem:[%s12256_s3 + $0x10] sm:$0xff] }
 0xe79   : > { %v3839_v47 = vadd.f32 %v3838_v58, %v3837_v44  ;;  %v3846_v2 = vadd.f32 %v3845_v12, %v3844_v6  ;;  %8172 = vmatprep.subr.mxu1 %v4502_v17  ;;  %v12257_v44 = vmov 0.0  }
 0xe7a   : > { %v3833_v29 = vrot.slane %v3832_v23, 2  ;;  %v3827_v31 = vadd.f32 %v3826_v30, %v3825_v27  ;;  %8173 = vmatpush3.msra.mxu1 %v4502_v17  ;;  %v12258_v30 = vld [vmem:[#allocation32_spill] sm:$0xff] }
 0xe7b   : > { %v3840_v49 = vrot.slane %v3839_v47, 2  ;;  %v3847_v20 = vrot.slane %v3846_v2, 2  ;;  %8174 = vmatprep.subr.mxu1 %v4501_v32 }
 0xe7c   : > { %v3834_v1 = vadd.f32 %v3833_v29, %v3832_v23  ;;  %v3828_v52 = vrot.slane %v3827_v31, 1  ;;  %8175 = vmatpush3.msra.mxu1 %v4501_v32 }
 0xe7d   : > { %v3841_v53 = vadd.f32 %v3840_v49, %v3839_v47  ;;  %v3848_v51 = vadd.f32 %v3847_v20, %v3846_v2 }
 0xe7e   : > { %v3835_v10 = vrot.slane %v3834_v1, 1  ;;  %v3829_v8 = vadd.f32 %v3828_v52, %v3827_v31  ;;  %v12259_v31 = vld [vmem:[#allocation33_spill] sm:$0xff] }
 0xe7f   : > { %v3842_v25 = vrot.slane %v3841_v53, 1  ;;  %v3849_v61 = vrot.slane %v3848_v51, 1 }
 0xe80   : > { %v3836_v16 = vadd.f32 %v3835_v10, %v3834_v1 }
 0xe81   : > { %v3843_v43 = vadd.f32 %v3842_v25, %v3841_v53  ;;  %v3850_v46 = vadd.f32 %v3849_v61, %v3848_v51  ;;  %v4499_v25 = vld [vmem:[%s12256_s3] sm:$0xff]  ;;  %v7941_v61 = vld [vmem:[%s12255_s6 + $0x10] ss:$0 sm:$0xff]  ;;  %s12260_s6 = sld [smem:[#allocation20_spill]] }
 0xe82   : > { %v3887_v50 = vsel %vm1993_vm11, %v3836_v16, %v3829_v8  ;;  %v4500_v8 = vld [vmem:[%s12256_s3 + $0x8] sm:$0xff] }
 0xe83   : > { %v3888_v0 = vsel %vm1995_vm12, %v3843_v43, %v3887_v50  ;;  %8176 = vmatprep.subr.mxu1 %v4500_v8 }
 0xe84   : > { %v3889_v14 = vsel %vm1997_vm13, %v3850_v46, %v3888_v0  ;;  %8177 = vmatpush3.msra.mxu1 %v4500_v8 }
 0xe85   : > { %8178 = vmatprep.subr.mxu1 %v4499_v25 }
 0xe86   : > { %8179 = vmatpush3.msra.mxu1 %v4499_v25 }
 0xeb8   : > { %v4270_v39 = vpop.permute.xlu1 %4269 }
 0xeb9   : > { %v4272_v21 = vsel %vm1842_vm10, %v10554_v38, %v4270_v39 }
 0xeba   : > { %v4277_v34 = vrot.slane %v4272_v21, 4 }
 0xec2   : > { %v3667_v4 = vpop.permute.xlu0 %3666 }
 0xec3   : > { %v3669_v24 = vsel %vm1842_vm10, %v3657_v19, %v3667_v4  ;;  %v7944_v4 = vld [vmem:[%s12256_s3 + $0x20] ss:$0 sm:$0xff]  ;;  %s12261_s3 = sld [smem:[#allocation23_spill]] }
 0xec4   : > { %v4274_v26 = vrot.slane %v3669_v24, 4 }
 0xecb   : > { %v3294_v45 = vpop.permute.xlu0 %3293 }
 0xecc   : > { %v3296_v36 = vsel %vm1842_vm10, %v3284_v22, %v3294_v45  ;;  %v10612_v22 = vld [vmem:[%s8907_s19] sm:$0x3f] }
 0xecd   : > { %v4279_v57 = vsel %vm1222_vm6, %v3296_v36, %v4274_v26  ;;  %v4400_v47 = vrot.slane %v10612_v22, %v12258_v30  ;;  %v4406_v49 = vrot.slane %v10612_v22, %v12259_v31 }
 0xece   : > { %8162 = vmatprep.mubr.msk.f32.mxu0 %vm1677_vm9, %v4279_v57 }
 0xed5   : > { %v3899_v42 = vpop.permute.xlu1 %3898 }
 0xed6   : > { %v3901_v56 = vsel %vm1842_vm10, %v3889_v14, %v3899_v42 }
 0xed7   : > { %v4280_v13 = vsel %vm1222_vm6, %v3901_v56, %v4277_v34 }
 0xed8   : > { %8163 = vmatmul.mubr.msk.f32.vlgmr.msra.gmra.mxu0 %vm1677_vm9, %v4280_v13 }
 0xed9   : > { %8166 = vmatpush3.msra.mxu0 %v4410_v35 }
 0xeda   : > { %8167 = vmatprep.subr.mxu0 %v4409_v60 }
 0xedb   : > { %8168 = vmatpush3.msra.mxu0 %v4409_v60 }
 0xedc   : > { %8183 = vmatprep.subr.mxu0 %v12257_v44 }
 0xf98   : > { %v8164_v11 = vpop.f32.mrf.mxu0 }
 0xf99   : > { %v4366_v48 = vadd.f32 %v8164_v11, %v7938_v59 }
 0xf9a   : > { %v4360_v41 = vpop.f32.mrf.mxu0 }
 0xf9b   : > { %v4361_v7 = vadd.f32 %v7938_v59, %v4360_v41  ;;  %v4370_v5 = vadd.f32 %v4366_v48, %v9835_v37 }
 0xf9d   : > { %v4374_v18 = vsel %vm1677_vm9, %v4370_v5, 0.0  ;;  %v4369_v55 = vadd.f32 %v4361_v7, %v9831_v15 }
 0xf9e   : > { %4375 = vadd.xlane.f32.xlu1 %v4374_v18 }
 0xf9f   : > { %v4371_v38 = vsel %vm1677_vm9, %v4369_v55, 0.0 }
 0xfa0   : > { %4372 = vadd.xlane.f32.xlu0 %v4371_v38  ;;  %v4640_v38 = vld [vmem:[%s12260_s6] sm:$0xff] }
0x1027   : > { %v4376_v3 = vpop.xlane.xlu1 %4375 }
0x1028   : > { %v4378_v62 = vmul.f32 0.0625, %v4376_v3 }
0x1029   : > { %v4373_v19 = vpop.xlane.xlu0 %4372 }
0x102a   : > { %v4377_v40 = vmul.f32 0.0625, %v4373_v19  ;;  %v4380_v33 = vsub.f32 %v4370_v5, %v4378_v62 }
0x102c   : > { %v4379_v9 = vsub.f32 %v4369_v55, %v4377_v40  ;;  %v4382_v54 = vmul.f32 %v4380_v33, %v4380_v33  ;;  %v4641_v55 = vld [vmem:[%s12260_s6 + $0x8] sm:$0xff] }
0x102e   : > { %v4381_v63 = vmul.f32 %v4379_v9, %v4379_v9  ;;  %v4386_v15 = vsel %vm1677_vm9, %v4382_v54, 0.0 }
0x1030   : > { %v4383_v37 = vsel %vm1677_vm9, %v4381_v63, 0.0  ;;  %v12262_v63 = vld [vmem:[#allocation34_spill] sm:$0xff] }
0x1031   : > { %4384 = vadd.xlane.f32.xlu0 %v4383_v37  ;;  %v4620_v37 = vrot.slane %v10612_v22, %v12262_v63 }
0x1035   : > { %4387 = vadd.xlane.f32.xlu0 %v4386_v15  ;;  %v12263_v15 = vld [vmem:[#allocation35_spill] sm:$0xff] }
0x1036   : > { %v4626_v35 = vrot.slane %v10612_v22, %v12263_v15  ;;  %v5928_v22 = vld [vmem:[%s12261_s3] sm:$0xff] }
0x10ba   : > { %v4385_v6 = vpop.xlane.xlu0 %4384 }
0x10bb   : > { %v4389_v28 = vmul.f32 0.0625, %v4385_v6 }
0x10bd   : > { %v4391_v27 = vadd.f32 1e-05, %v4389_v28 }
0x10be   : > { %v4388_v58 = vpop.xlane.xlu0 %4387 }
0x10bf   : > { %8507 = vrsqrt.f32 %v4391_v27  ;;  %v4390_v12 = vmul.f32 0.0625, %v4388_v58 }
0x10c1   : > { %v4392_v23 = vadd.f32 1e-05, %v4390_v12 }
0x10c3   : > { %8509 = vrsqrt.f32 %v4392_v23  ;;  %v1648_v23 = vld [vmem:[%s9198_s2 + $0x8] sm:$0xf]  ;;  %s12269_s2 = smov 120  }
0x10cc   : > { %v8508_v2 = vpop.eup %8507 }
0x10cd   : > { %v4395_v29 = vmul.f32 %v8508_v2, %v4379_v9  ;;  %v5929_v2 = vld [vmem:[%s12261_s3 + $0x8] sm:$0xff] }
0x10cf   : > { %v4401_v20 = vmul.f32 %v4400_v47, %v4395_v29 }
0x10d0   : > { %v8510_v1 = vpop.eup %8509 }
0x10d1   : > { %v4396_v52 = vmul.f32 %v8510_v1, %v4380_v33  ;;  %v4407_v53 = vadd.f32 %v4406_v49, %v4401_v20  ;;  %v12264_v20 = vld [vmem:[#allocation40_spill] sm:$0xff]  ;;  %v12265_v1 = vld [vmem:[#allocation41_spill] sm:$0xff] }
0x10d3   : > { %v4402_v51 = vmul.f32 %v4400_v47, %v4396_v52  ;;  %8169 = vmatprep.mubr.msk.f32.mxu0 %vm1677_vm9, %v4407_v53  ;;  %v12266_v52 = vld [vmem:[#allocation38_spill] sm:$0xff] }
0x10d5   : > { %v4408_v10 = vadd.f32 %v4406_v49, %v4402_v51 }
0x10d7   : > { %8170 = vmatmul.mubr.msk.f32.vlgmr.msra.gmra.mxu0 %vm1677_vm9, %v4408_v10 }
0x10d8   : > { %8187 = vmatprep.mubr.msk.f32.mxu0 %vm8796_vm7, %v12257_v44  ;;  %8184 = vmatpush3.msra.mxu0 %v4641_v55 }
0x10d9   : > { %8185 = vmatprep.subr.mxu0 %v12257_v44 }
0x10da   : > { %8186 = vmatpush3.msra.mxu0 %v4640_v38 }
0x10db   : > { %8210 = vmatprep.subr.mxu0 %v12257_v44 }
0x1197   : > { %v8171_v16 = vpop.f32.mrf.mxu0 }
0x1198   : > { %v4494_v43 = vadd.f32 %v8171_v16, %v7941_v61 }
0x1199   : > { %v4488_v46 = vpop.f32.mrf.mxu0 }
0x119a   : > { %v4489_v50 = vadd.f32 %v7941_v61, %v4488_v46  ;;  %v4498_v14 = vmax.f32 %v4494_v43, 0.0 }
0x119c   : > { %v4497_v0 = vmax.f32 %v4489_v50, 0.0 }
0x119e   : > { %8180 = vmatprep.mubr.msk.f32.mxu1 %vm1042_vm4, %v4497_v0 }
0x119f   : > { %8181 = vmatmul.mubr.msk.f32.vlgmr.msra.gmra.mxu1 %vm1042_vm4, %v4498_v14 }
0x125f   : > { %v8182_v24 = vpop.f32.mrf.mxu1 }
0x1260   : > { %v4586_v26 = vadd.f32 %v8182_v24, %v7944_v4 }
0x1261   : > { %v4580_v45 = vpop.f32.mrf.mxu1 }
0x1262   : > { %v4581_v36 = vadd.f32 %v7944_v4, %v4580_v45  ;;  %v4590_v57 = vadd.f32 %v4586_v26, %v4408_v10 }
0x1264   : > { %v4594_v39 = vsel %vm1677_vm9, %v4590_v57, 0.0  ;;  %v4589_v21 = vadd.f32 %v4581_v36, %v4407_v53  ;;  %v7948_v53 = vld [vmem:[%s12260_s6 + $0x10] ss:$0 sm:$0xff]  ;;  %s12270_s6 = smov 88  }
0x1265   : > { %4595 = vadd.xlane.f32.xlu1 %v4594_v39 }
0x1266   : > { %v4591_v34 = vsel %vm1677_vm9, %v4589_v21, 0.0 }
0x1267   : > { %4592 = vadd.xlane.f32.xlu0 %v4591_v34 }
0x12ee   : > { %v4596_v42 = vpop.xlane.xlu1 %4595 }
0x12ef   : > { %v4598_v56 = vmul.f32 0.0625, %v4596_v42  ;;  %v12267_v42 = vld [vmem:[#allocation39_spill] sm:$0xff] }
0x12f0   : > { %v4593_v13 = vpop.xlane.xlu0 %4592 }
0x12f1   : > { %v4600_v59 = vsub.f32 %v4590_v57, %v4598_v56  ;;  %v4597_v11 = vmul.f32 0.0625, %v4593_v13 }
0x12f3   : > { %v4599_v48 = vsub.f32 %v4589_v21, %v4597_v11  ;;  %v4602_v41 = vmul.f32 %v4600_v59, %v4600_v59 }
0x12f5   : > { %v4606_v7 = vsel %vm1677_vm9, %v4602_v41, 0.0  ;;  %v4601_v5 = vmul.f32 %v4599_v48, %v4599_v48 }
0x12f6   : > { %4607 = vadd.xlane.f32.xlu1 %v4606_v7  ;;  %v12268_v7 = vld [vmem:[#allocation30_spill] sm:$0xff] }
0x12f7   : > { %v4603_v18 = vsel %vm1677_vm9, %v4601_v5, 0.0 }
0x12f8   : > { %4604 = vadd.xlane.f32.xlu0 %v4603_v18 }
0x137f   : > { %v4608_v3 = vpop.xlane.xlu1 %4607 }
0x1380   : > { %v4610_v62 = vmul.f32 0.0625, %v4608_v3 }
0x1381   : > { %v4605_v19 = vpop.xlane.xlu0 %4604 }
0x1382   : > { %v4612_v40 = vadd.f32 1e-05, %v4610_v62  ;;  %v4609_v33 = vmul.f32 0.0625, %v4605_v19 }
0x1384   : > { %8511 = vrsqrt.f32 %v4612_v40  ;;  %v4611_v9 = vadd.f32 1e-05, %v4609_v33 }
0x1386   : > { %8513 = vrsqrt.f32 %v4611_v9 }
0x1391   : > { %v8512_v54 = vpop.eup %8511 }
0x1392   : > { %v4616_v60 = vmul.f32 %v8512_v54, %v4600_v59 }
0x1393   : > { %v8514_v17 = vpop.eup %8513 }
0x1394   : > { %v4615_v32 = vmul.f32 %v8514_v17, %v4599_v48  ;;  %v4622_v6 = vmul.f32 %v4620_v37, %v4616_v60 }
0x1396   : > { %v4621_v28 = vmul.f32 %v4620_v37, %v4615_v32  ;;  %v10640_v27 = vadd.f32 %v4626_v35, %v4622_v6 }
0x1398   : > { %v10642_v58 = vadd.f32 %v4626_v35, %v4621_v28  ;;  %v4633_v12 = vrot.slane %v10640_v27, 4 }
0x139a   : > { %v4632_v47 = vrot.slane %v10642_v58, 4  ;;  %7947 = vst.msk [vmem:[%s9189_s26 + $0x8] sm:$0xf] %vm1657_vm8, %v4633_v12 }
0x139c   : > { %v4637_v29 = vsel %vm1222_vm6, %v1648_v23, %v4632_v47  ;;  %v4634_v49 = vsel %vm1222_vm6, %v4632_v47, %v4633_v12 }
0x139d   : > { %8188 = vmatmul.mubr.msk.f32.vlgmr.msra.gmra.mxu0 %vm1677_vm9, %v4637_v29 }
0x139e   : > { %8190 = vmatprep.mubr.msk.f32.mxu0 %vm8796_vm7, %v12257_v44  ;;  %8211 = vmatpush3.msra.mxu0 %v5929_v2 }
0x139f   : > { %8212 = vmatprep.subr.mxu0 %v12257_v44 }
0x13a0   : > { %8213 = vmatpush3.msra.mxu0 %v5928_v22 }
0x13a1   : > { %8191 = vmatmul.mubr.msk.f32.gmra.mxu0 %vm1677_vm9, %v4634_v49 }
0x13a2   : > { %8193 = vmatprep.mubr.msk.f32.mxu0 %vm8796_vm7, %v12257_v44 }
0x13a5   : > { %8194 = vmatmul.mubr.msk.f32.gmra.mxu0 %vm1677_vm9, %v4633_v12 }
0x13a6   : > { %8214 = vmatprep.mubr.msk.f32.mxu0 %vm8796_vm7, %v12257_v44 }
0x13a9   : > { %8215 = vmatmul.mubr.msk.f32.vlgmr.msra.gmra.mxu0 %vm1677_vm9, %v12264_v20 }
0x13aa   : > { %8217 = vmatprep.mubr.msk.f32.mxu0 %vm8796_vm7, %v12257_v44 }
0x13ad   : > { %8218 = vmatmul.mubr.msk.f32.gmra.mxu0 %vm1677_vm9, %v12265_v1 }
0x13ae   : > { %8220 = vmatprep.mubr.msk.f32.mxu0 %vm8796_vm7, %v12257_v44 }
0x13b1   : > { %8221 = vmatmul.mubr.msk.f32.gmra.mxu0 %vm1677_vm9, %v12266_v52 }
0x145d   : > { %v4720_v51 = vpop.f32.mrf.mxu0 }
0x145e   : > { %v10674_v10 = vadd.f32 %v7948_v53, %v4720_v51 }
0x145f   : > { %v8189_v8 = vpop.f32.mrf.mxu0 }
0x1460   : > { %4780 = vrot.lane.b32.xlu1 %v10674_v10, %s12245_s5  ;;  %v5021_v43 = vrot.slane %v10674_v10, 4  ;;  %v4735_v34 = vcombine.high %v10674_v10, %v10674_v10 }
0x1461   : > { %v4725_v25 = vpop.f32.mrf.mxu0 }
0x1462   : > { %v10678_v61 = vadd.f32 %v7948_v53, %v4725_v25  ;;  %v4742_v56 = vrot.slane %v4735_v34, %v12267_v42 }
0x1463   : > { %v8192_v16 = vpop.f32.mrf.mxu0 }
0x1464   : > { %v5022_v46 = vrot.slane %v10678_v61, 4  ;;  %v4743_v13 = vcombine.high %v4742_v56, %v4742_v56  ;;  %v4750_v59 = vrot.slane %v4742_v56, %v12267_v42  ;;  %v5220_v48 = vcombine.high %v10678_v61, %v10678_v61 }
0x1465   : > { %v4730_v44 = vpop.f32.mrf.mxu0  ;;  %v4983_v9 = vrot.slane %v10678_v61, %v12267_v42 }
0x1466   : > { %v4731_v50 = vadd.f32 %v7948_v53, %v4730_v44  ;;  %v10683_v0 = vsel %vm1222_vm6, %v5021_v43, %v5022_v46  ;;  %v4757_v11 = vrot.slane %v4743_v13, %v12267_v42  ;;  %v4758_v41 = vcombine.high %v4750_v59, %v4750_v59 }
0x1467   : > { %5024 = vrot.lane.b32.xlu0 %v10683_v0, %s12245_s5  ;;  %v8195_v14 = vpop.f32.mrf.mxu0  ;;  %v4763_v5 = vrot.slane %v4750_v59, %v12268_v7  ;;  %v5227_v62 = vrot.slane %v5220_v48, %v12267_v42  ;;  %v4984_v60 = vcombine.high %v4983_v9, %v4983_v9  ;;  %v4991_v28 = vrot.slane %v4983_v9, %v12267_v42 }
0x1468   : > { %v5506_v4 = vrot.slane %v4731_v50, 4  ;;  %v4767_v18 = vrot.slane %v4757_v11, %v12268_v7  ;;  %v4759_v19 = vcombine.high %v4757_v11, %v4757_v11  ;;  %v4771_v40 = vrot.slane %v4758_v41, %v12268_v7 }
0x1469   : > { %v10687_v24 = vpop.f32.mrf.mxu0  ;;  %v5228_v37 = vcombine.high %v5227_v62, %v5227_v62  ;;  %v5235_v17 = vrot.slane %v5227_v62, %v12267_v42  ;;  %v5468_v12 = vrot.slane %v4731_v50, %v12267_v42  ;;  %v4998_v23 = vrot.slane %v4984_v60, %v12267_v42 }
0x146a   : > { %v10690_v26 = vsel %vm1222_vm6, %v5022_v46, %v5506_v4  ;;  %v4775_v54 = vrot.slane %v4759_v19, %v12268_v7  ;;  %v4999_v1 = vcombine.high %v4991_v28, %v4991_v28  ;;  %v5004_v52 = vrot.slane %v4991_v28, %v12268_v7 }
0x146b   : > { %5508 = vrot.lane.b32.xlu1 %v10690_v26, %s12245_s5  ;;  %v8216_v45 = vpop.f32.mrf.mxu0  ;;  %v5242_v32 = vrot.slane %v5228_v37, %v12267_v42  ;;  %v5248_v47 = vrot.slane %v5235_v17, %v12268_v7  ;;  %v5469_v53 = vcombine.high %v5468_v12, %v5468_v12  ;;  %v5000_v51 = vcombine.high %v4998_v23, %v4998_v23 }
0x146c   : > { %v5008_v8 = vrot.slane %v4998_v23, %v12268_v7  ;;  %v5476_v43 = vrot.slane %v5468_v12, %v12267_v42  ;;  %v5012_v44 = vrot.slane %v4999_v1, %v12268_v7 }
0x146d   : > { %v10694_v36 = vpop.f32.mrf.mxu0  ;;  %v5252_v2 = vrot.slane %v5242_v32, %v12268_v7  ;;  %v5483_v46 = vrot.slane %v5469_v53, %v12267_v42  ;;  %v5016_v50 = vrot.slane %v5000_v51, %v12268_v7  ;;  %v5244_v34 = vcombine.high %v5242_v32, %v5242_v32 }
0x146e   : > { %v5484_v45 = vcombine.high %v5476_v43, %v5476_v43 }
0x146f   : > { %5265 = vrot.lane.b32.xlu1 %v10678_v61, %s12245_s5  ;;  %v8219_v57 = vpop.f32.mrf.mxu0  ;;  %v5485_v59 = vcombine.high %v5483_v46, %v5483_v46  ;;  %v5260_v48 = vrot.slane %v5244_v34, %v12268_v7 }
0x1470   : > { %v5489_v57 = vrot.slane %v5476_v43, %v12268_v7  ;;  %v5497_v11 = vrot.slane %v5484_v45, %v12268_v7 }
0x1471   : > { %v10698_v39 = vpop.f32.mrf.mxu0 }
0x1473   : > { %v8222_v21 = vpop.f32.mrf.mxu0 }
0x1474   : > { %v5493_v21 = vrot.slane %v5483_v46, %v12268_v7 }
0x14d2   : > { %v4781_v55 = vpop.permute.xlu1 %4780 }
0x14d3   : > { %v10709_v38 = vmul.f32 %v4781_v55, %v4763_v5  ;;  %v10711_v3 = vmul.f32 %v4781_v55, %v4767_v18  ;;  %v10719_v33 = vmul.f32 %v4781_v55, %v4771_v40  ;;  %v10726_v35 = vmul.f32 %v4781_v55, %v4775_v54 }
0x14d4   : > { %v5501_v18 = vrot.slane %v5485_v59, %v12268_v7  ;;  %v5243_v55 = vcombine.high %v5235_v17, %v5235_v17 }
0x14d5   : > { %4793 = vrot.lane.b32.xlu0 %v10711_v3, %s12269_s2  ;;  %4791 = vrot.lane.b32.xlu1 %v10709_v38, %s12269_s2 }
0x14d6   : > { %v5256_v19 = vrot.slane %v5243_v55, %v12268_v7 }
0x14d9   : > { %4795 = vrot.lane.b32.xlu1 %v10719_v33, %s12269_s2  ;;  %v5025_v20 = vpop.permute.xlu0 %5024 }
0x14da   : > { %v10747_v25 = vmul.f32 %v5025_v20, %v5004_v52  ;;  %v10749_v16 = vmul.f32 %v5025_v20, %v5008_v8  ;;  %v10759_v14 = vmul.f32 %v5025_v20, %v5012_v44  ;;  %v10761_v4 = vmul.f32 %v5025_v20, %v5016_v50 }
0x14dd   : > { %4797 = vrot.lane.b32.xlu1 %v10726_v35, %s12269_s2  ;;  %v5509_v6 = vpop.permute.xlu1 %5508 }
0x14de   : > { %v10769_v56 = vmul.f32 %v5509_v6, %v5489_v57  ;;  %v10771_v13 = vmul.f32 %v5509_v6, %v5493_v21  ;;  %v10779_v41 = vmul.f32 %v5509_v6, %v5497_v11  ;;  %v10788_v62 = vmul.f32 %v5509_v6, %v5501_v18 }
0x14e1   : > { %v5266_v29 = vpop.permute.xlu1 %5265 }
0x14e2   : > { %v10737_v22 = vmul.f32 %v5266_v29, %v5248_v47  ;;  %v10739_v49 = vmul.f32 %v5266_v29, %v5252_v2  ;;  %v10781_v5 = vmul.f32 %v5266_v29, %v5260_v48  ;;  %v10795_v40 = vmul.f32 %v5266_v29, %v5256_v19 }
0x14e4   : > { %5278 = vrot.lane.b32.xlu1 %v10739_v49, %s12269_s2  ;;  %5276 = vrot.lane.b32.xlu0 %v10737_v22, %s12269_s2 }
0x14e8   : > { %5037 = vrot.lane.b32.xlu1 %v10749_v16, %s12269_s2  ;;  %5035 = vrot.lane.b32.xlu0 %v10747_v25, %s12269_s2 }
0x14ec   : > { %5041 = vrot.lane.b32.xlu1 %v10761_v4, %s12269_s2  ;;  %5039 = vrot.lane.b32.xlu0 %v10759_v14, %s12269_s2 }
0x14f0   : > { %5519 = vrot.lane.b32.xlu1 %v10769_v56, %s12269_s2  ;;  %5521 = vrot.lane.b32.xlu0 %v10771_v13, %s12269_s2 }
0x14f4   : > { %5282 = vrot.lane.b32.xlu1 %v10781_v5, %s12269_s2  ;;  %5523 = vrot.lane.b32.xlu0 %v10779_v41, %s12269_s2 }
0x14f8   : > { %5650 = vrot.lane.b32.xlu1 %v10690_v26, %s12270_s6  ;;  %5525 = vrot.lane.b32.xlu0 %v10788_v62, %s12269_s2 }
0x14fc   : > { %5407 = vrot.lane.b32.xlu1 %v10678_v61, %s12270_s6  ;;  %5280 = vrot.lane.b32.xlu0 %v10795_v40, %s12269_s2 }
0x1500   : > { %5615 = vrot.lane.b32.xlu1 %v10690_v26, %s12271_s8  ;;  %5166 = vrot.lane.b32.xlu0 %v10683_v0, %s12270_s6 }
0x1504   : > { %5372 = vrot.lane.b32.xlu1 %v10678_v61, %s12271_s8  ;;  %4922 = vrot.lane.b32.xlu0 %v10674_v10, %s12270_s6  ;;  %s12286_s6 = sld [smem:[#allocation22_spill]] }
0x1508   : > { %5131 = vrot.lane.b32.xlu0 %v10683_v0, %s12271_s8 }
0x150c   : > { %4887 = vrot.lane.b32.xlu0 %v10674_v10, %s12271_s8  ;;  %s12276_s8 = sld [smem:[#allocation21_spill]] }
0x1547   : > { %v4794_v9 = vpop.permute.xlu0 %4793  ;;  %v4792_v37 = vpop.permute.xlu1 %4791 }
0x1548   : > { %v4804_v54 = vadd.f32 %v4794_v9, %v10711_v3  ;;  %v4803_v26 = vadd.f32 %v4792_v37, %v10709_v38 }
0x154a   : > { %v4808_v60 = vmul.f32 0.70710677, %v4804_v54  ;;  %v4807_v17 = vmul.f32 0.70710677, %v4803_v26 }
0x154b   : > { %v4796_v32 = vpop.permute.xlu1 %4795 }
0x154c   : > { %v4818_v61 = vsel %vm1842_vm10, %v4808_v60, -inf  ;;  %v4811_v6 = vsel %vm1842_vm10, %v4807_v17, -inf  ;;  %v4805_v28 = vadd.f32 %v4796_v32, %v10719_v33 }
0x154d   : > { %v4819_v12 = vrot.slane %v4818_v61, 4  ;;  %v4812_v0 = vrot.slane %v4811_v6, 4 }
0x154e   : > { %v4809_v23 = vmul.f32 0.70710677, %v4805_v28 }
0x154f   : > { %v4820_v47 = vmax.f32 %v4818_v61, %v4819_v12  ;;  %v4813_v10 = vmax.f32 %v4811_v6, %v4812_v0  ;;  %v4798_v2 = vpop.permute.xlu1 %4797 }
0x1550   : > { %v4825_v29 = vsel %vm1842_vm10, %v4809_v23, -inf  ;;  %v4806_v3 = vadd.f32 %v4798_v2, %v10726_v35 }
0x1551   : > { %v4821_v38 = vrot.slane %v4820_v47, 2  ;;  %v4814_v20 = vrot.slane %v4813_v10, 2  ;;  %v4826_v1 = vrot.slane %v4825_v29, 4 }
0x1552   : > { %v4810_v52 = vmul.f32 0.70710677, %v4806_v3 }
0x1553   : > { %v4822_v53 = vmax.f32 %v4820_v47, %v4821_v38  ;;  %v4815_v51 = vmax.f32 %v4813_v10, %v4814_v20  ;;  %v4827_v8 = vmax.f32 %v4825_v29, %v4826_v1 }
0x1554   : > { %v4832_v43 = vsel %vm1842_vm10, %v4810_v52, -inf }
0x1555   : > { %v4823_v33 = vrot.slane %v4822_v53, 1  ;;  %v4816_v46 = vrot.slane %v4815_v51, 1  ;;  %v4828_v44 = vrot.slane %v4827_v8, 2  ;;  %v4833_v50 = vrot.slane %v4832_v43, 4 }
0x1556   : > { %v5277_v45 = vpop.permute.xlu0 %5276  ;;  %v5279_v57 = vpop.permute.xlu1 %5278 }
0x1557   : > { %v4824_v21 = vmax.f32 %v4822_v53, %v4823_v33  ;;  %v4817_v34 = vmax.f32 %v4815_v51, %v4816_v46  ;;  %v4829_v59 = vmax.f32 %v4827_v8, %v4828_v44  ;;  %v4834_v11 = vmax.f32 %v4832_v43, %v4833_v50 }
0x1558   : > { %v5288_v35 = vadd.f32 %v5277_v45, %v10737_v22  ;;  %v5289_v48 = vadd.f32 %v5279_v57, %v10739_v49 }
0x1559   : > { %v4840_v18 = vsub.f32 %v4808_v60, %v4824_v21  ;;  %v4839_v55 = vsub.f32 %v4807_v17, %v4817_v34  ;;  %v4830_v19 = vrot.slane %v4829_v59, 1  ;;  %v4835_v9 = vrot.slane %v4834_v11, 2 }
0x155a   : > { %v10823_v37 = vmul.f32 0.70710677, %v5288_v35  ;;  %v10825_v54 = vmul.f32 0.70710677, %v5289_v48  ;;  %v5036_v26 = vpop.permute.xlu0 %5035  ;;  %v5038_v32 = vpop.permute.xlu1 %5037 }
0x155b   : > { %v4845_v61 = vmul.f32 1.442695, %v4840_v18  ;;  %v4843_v6 = vmul.f32 1.442695, %v4839_v55  ;;  %v4831_v28 = vmax.f32 %v4829_v59, %v4830_v19  ;;  %v4836_v12 = vmax.f32 %v4834_v11, %v4835_v9 }
0x155c   : > { %v5296_v0 = vsel %vm1842_vm10, %v10823_v37, -inf  ;;  %v5303_v22 = vsel %vm1842_vm10, %v10825_v54, -inf  ;;  %v5047_v49 = vadd.f32 %v5036_v26, %v10747_v25  ;;  %v5048_v60 = vadd.f32 %v5038_v32, %v10749_v16 }
0x155d   : > { %8515 = vpow2.f32 %v4845_v61  ;;  %v4841_v17 = vsub.f32 %v4809_v23, %v4831_v28  ;;  %v4837_v47 = vrot.slane %v4836_v12, 1  ;;  %v5297_v10 = vrot.slane %v5296_v0, 4 }
0x155e   : > { %8517 = vpow2.f32 %v4843_v6  ;;  %v5304_v2 = vrot.slane %v5303_v22, 4  ;;  %v10833_v29 = vmul.f32 0.70710677, %v5047_v49  ;;  %v10835_v3 = vmul.f32 0.70710677, %v5048_v60  ;;  %v5040_v38 = vpop.permute.xlu0 %5039  ;;  %v5042_v20 = vpop.permute.xlu1 %5041 }
0x155f   : > { %v4847_v1 = vmul.f32 1.442695, %v4841_v17  ;;  %v4838_v53 = vmax.f32 %v4836_v12, %v4837_v47  ;;  %v5298_v51 = vmax.f32 %v5296_v0, %v5297_v10  ;;  %v5049_v8 = vadd.f32 %v5040_v38, %v10759_v14 }
0x1560   : > { %v5305_v25 = vmax.f32 %v5303_v22, %v5304_v2  ;;  %v5055_v16 = vsel %vm1842_vm10, %v10833_v29, -inf  ;;  %v5062_v23 = vsel %vm1842_vm10, %v10835_v3, -inf  ;;  %v5050_v43 = vadd.f32 %v5042_v20, %v10761_v4 }
0x1561   : > { %8519 = vpow2.f32 %v4847_v1  ;;  %v4842_v33 = vsub.f32 %v4810_v52, %v4838_v53  ;;  %v5299_v46 = vrot.slane %v5298_v51, 2  ;;  %v5056_v44 = vrot.slane %v5055_v16, 4 }
0x1562   : > { %v5306_v50 = vrot.slane %v5305_v25, 2  ;;  %v5063_v45 = vrot.slane %v5062_v23, 4  ;;  %v10843_v57 = vmul.f32 0.70710677, %v5049_v8  ;;  %v10845_v21 = vmul.f32 0.70710677, %v5050_v43  ;;  %v5520_v14 = vpop.permute.xlu1 %5519  ;;  %v5522_v55 = vpop.permute.xlu0 %5521 }
0x1563   : > { %v4849_v34 = vmul.f32 1.442695, %v4842_v33  ;;  %v5300_v59 = vmax.f32 %v5298_v51, %v5299_v46  ;;  %v5057_v11 = vmax.f32 %v5055_v16, %v5056_v44  ;;  %v5531_v35 = vadd.f32 %v5520_v14, %v10769_v56 }
0x1564   : > { %v5307_v48 = vmax.f32 %v5305_v25, %v5306_v50  ;;  %v5064_v18 = vmax.f32 %v5062_v23, %v5063_v45  ;;  %v5069_v4 = vsel %vm1842_vm10, %v10843_v57, -inf  ;;  %v5076_v52 = vsel %vm1842_vm10, %v10845_v21, -inf }
0x1565   : > { %8521 = vpow2.f32 %v4849_v34  ;;  %v5301_v19 = vrot.slane %v5300_v59, 1  ;;  %v5058_v9 = vrot.slane %v5057_v11, 2  ;;  %v5070_v26 = vrot.slane %v5069_v4, 4 }
0x1566   : > { %v5308_v32 = vrot.slane %v5307_v48, 1  ;;  %v5065_v61 = vrot.slane %v5064_v18, 2  ;;  %v5077_v6 = vrot.slane %v5076_v52, 4  ;;  %v10852_v28 = vmul.f32 0.70710677, %v5531_v35 }
0x1567   : > { %v5302_v12 = vmax.f32 %v5300_v59, %v5301_v19  ;;  %v5059_v56 = vmax.f32 %v5057_v11, %v5058_v9  ;;  %v5071_v0 = vmax.f32 %v5069_v4, %v5070_v26  ;;  %v5532_v22 = vadd.f32 %v5522_v55, %v10771_v13 }
0x1568   : > { %v5309_v49 = vmax.f32 %v5307_v48, %v5308_v32  ;;  %v5066_v60 = vmax.f32 %v5064_v18, %v5065_v61  ;;  %v5078_v17 = vmax.f32 %v5076_v52, %v5077_v6  ;;  %v5539_v47 = vsel %vm1842_vm10, %v10852_v28, -inf }
0x1569   : > { %v5324_v10 = vsub.f32 %v10823_v37, %v5302_v12  ;;  %v5060_v2 = vrot.slane %v5059_v56, 1  ;;  %v5072_v38 = vrot.slane %v5071_v0, 2  ;;  %v5540_v20 = vrot.slane %v5539_v47, 4  ;;  %v5524_v37 = vpop.permute.xlu0 %5523 }
0x156a   : > { %v10858_v1 = vpop.eup %8515  ;;  %v5325_v53 = vsub.f32 %v10825_v54, %v5309_v49  ;;  %v5067_v51 = vrot.slane %v5066_v60, 1  ;;  %v5079_v8 = vrot.slane %v5078_v17, 2  ;;  %v10861_v25 = vmul.f32 0.70710677, %v5532_v22 }
0x156b   : > { %v10863_v13 = vpop.eup %8517  ;;  %v4858_v16 = vsel %vm1842_vm10, %v10858_v1, 0.0  ;;  %v5328_v23 = vmul.f32 1.442695, %v5324_v10  ;;  %v5061_v43 = vmax.f32 %v5059_v56, %v5060_v2  ;;  %v5073_v33 = vmax.f32 %v5071_v0, %v5072_v38  ;;  %v5283_v38 = vpop.permute.xlu1 %5282 }
0x156c   : > { %v4859_v46 = vrot.slane %v4858_v16, 4  ;;  %v4851_v44 = vsel %vm1842_vm10, %v10863_v13, 0.0  ;;  %v5330_v50 = vmul.f32 1.442695, %v5325_v53  ;;  %v5068_v45 = vmax.f32 %v5066_v60, %v5067_v51 }
0x156d   : > { %v4852_v54 = vrot.slane %v4851_v44, 4  ;;  %8523 = vpow2.f32 %v5328_v23  ;;  %v5083_v14 = vsub.f32 %v10833_v29, %v5061_v43  ;;  %v5074_v34 = vrot.slane %v5073_v33, 1  ;;  %v5526_v12 = vpop.permute.xlu0 %5525 }
0x156e   : > { %v10870_v59 = vpop.eup %8519  ;;  %v4860_v11 = vadd.f32 %v4859_v46, %v4858_v16  ;;  %8525 = vpow2.f32 %v5330_v50  ;;  %v5084_v35 = vsub.f32 %v10835_v3, %v5068_v45  ;;  %v5080_v48 = vmax.f32 %v5078_v17, %v5079_v8 }
0x156f   : > { %v4853_v18 = vadd.f32 %v4852_v54, %v4851_v44  ;;  %v4865_v4 = vsel %vm1842_vm10, %v10870_v59, 0.0  ;;  %v5087_v52 = vmul.f32 1.442695, %v5083_v14  ;;  %v5075_v55 = vmax.f32 %v5073_v33, %v5074_v34 }
0x1570   : > { %v4861_v19 = vrot.slane %v4860_v11, 2  ;;  %v4866_v9 = vrot.slane %v4865_v4, 4  ;;  %v5089_v26 = vmul.f32 1.442695, %v5084_v35  ;;  %v5081_v32 = vrot.slane %v5080_v48, 1 }
0x1571   : > { %v4854_v61 = vrot.slane %v4853_v18, 2  ;;  %8527 = vpow2.f32 %v5087_v52  ;;  %v5085_v29 = vsub.f32 %v10843_v57, %v5075_v55  ;;  %v5541_v6 = vmax.f32 %v5539_v47, %v5540_v20 }
0x1572   : > { %v10876_v56 = vpop.eup %8521  ;;  %v4867_v3 = vadd.f32 %v4866_v9, %v4865_v4  ;;  %8529 = vpow2.f32 %v5089_v26  ;;  %v5082_v0 = vmax.f32 %v5080_v48, %v5081_v32  ;;  %v10880_v17 = vadd.f32 %v4861_v19, %v4860_v11 }
0x1573   : > { %v4872_v22 = vsel %vm1842_vm10, %v10876_v56, 0.0  ;;  %v5091_v49 = vmul.f32 1.442695, %v5085_v29  ;;  %v5542_v60 = vrot.slane %v5541_v6, 2  ;;  %v10883_v53 = vadd.f32 %v4854_v61, %v4853_v18 }
0x1574   : > { %v4873_v10 = vrot.slane %v4872_v22, 4  ;;  %v5086_v2 = vsub.f32 %v10845_v21, %v5082_v0  ;;  %v5546_v47 = vsel %vm1842_vm10, %v10861_v25, -inf  ;;  %v4868_v20 = vrot.slane %v4867_v3, 2  ;;  %v5281_v21 = vpop.permute.xlu0 %5280 }
0x1575   : > { %8531 = vpow2.f32 %v5091_v49  ;;  %v5543_v57 = vmax.f32 %v5541_v6, %v5542_v60  ;;  %v5547_v16 = vrot.slane %v5546_v47, 4  ;;  %v5291_v43 = vadd.f32 %v5283_v38, %v10781_v5 }
0x1576   : > { %v4874_v51 = vadd.f32 %v4873_v10, %v4872_v22  ;;  %v5093_v8 = vmul.f32 1.442695, %v5086_v2  ;;  %v5533_v33 = vadd.f32 %v5524_v37, %v10779_v41  ;;  %v5534_v46 = vadd.f32 %v5526_v12, %v10788_v62 }
0x1577   : > { %v5544_v23 = vrot.slane %v5543_v57, 1  ;;  %v4863_v44 = vrot.slane %v10880_v17, 1  ;;  %v5548_v45 = vmax.f32 %v5546_v47, %v5547_v16  ;;  %v4856_v54 = vrot.slane %v10883_v53, 1 }
0x1578   : > { %v4875_v50 = vrot.slane %v4874_v51, 2  ;;  %8533 = vpow2.f32 %v5093_v8  ;;  %v10892_v34 = vmul.f32 0.70710677, %v5291_v43  ;;  %v10894_v11 = vmul.f32 0.70710677, %v5533_v33 }
0x1579   : > { %v5545_v14 = vmax.f32 %v5543_v57, %v5544_v23  ;;  %v10898_v5 = vadd.f32 %v4868_v20, %v4867_v3  ;;  %v5549_v41 = vrot.slane %v5548_v45, 2  ;;  %v10900_v37 = vmul.f32 0.70710677, %v5534_v46 }
0x157a   : > { %v10896_v35 = vpop.eup %8523  ;;  %v5290_v62 = vadd.f32 %v5281_v21, %v10795_v40  ;;  %v5317_v52 = vsel %vm1842_vm10, %v10892_v34, -inf  ;;  %v5553_v55 = vsel %vm1842_vm10, %v10894_v11, -inf  ;;  %v10912_v19 = vadd.f32 %v4875_v50, %v4874_v51 }
0x157b   : > { %v10903_v48 = vpop.eup %8525  ;;  %v5336_v18 = vsel %vm1842_vm10, %v10896_v35, 0.0  ;;  %v5567_v4 = vsub.f32 %v10852_v28, %v5545_v14  ;;  %v5550_v40 = vmax.f32 %v5548_v45, %v5549_v41  ;;  %v5318_v29 = vrot.slane %v5317_v52, 4 }
0x157c   : > { %v5337_v9 = vrot.slane %v5336_v18, 4  ;;  %v5343_v26 = vsel %vm1842_vm10, %v10903_v48, 0.0  ;;  %v5554_v6 = vrot.slane %v5553_v55, 4  ;;  %v5560_v0 = vsel %vm1842_vm10, %v10900_v37, -inf }
0x157d   : > { %v5344_v32 = vrot.slane %v5343_v26, 4  ;;  %v5571_v61 = vmul.f32 1.442695, %v5567_v4  ;;  %v5551_v3 = vrot.slane %v5550_v40, 1  ;;  %v10920_v22 = vmul.f32 0.70710677, %v5290_v62 }
0x157e   : > { %v10916_v12 = vpop.eup %8527  ;;  %v5338_v28 = vadd.f32 %v5337_v9, %v5336_v18  ;;  %v5319_v2 = vmax.f32 %v5317_v52, %v5318_v29  ;;  %v5555_v23 = vmax.f32 %v5553_v55, %v5554_v6  ;;  %v5561_v50 = vrot.slane %v5560_v0, 4 }
0x157f   : > { %v10922_v49 = vpop.eup %8529  ;;  %v5345_v60 = vadd.f32 %v5344_v32, %v5343_v26  ;;  %v5095_v10 = vsel %vm1842_vm10, %v10916_v12, 0.0  ;;  %8535 = vpow2.f32 %v5571_v61  ;;  %v5552_v20 = vmax.f32 %v5550_v40, %v5551_v3 }
0x1580   : > { %v5339_v38 = vrot.slane %v5338_v28, 2  ;;  %v5096_v57 = vrot.slane %v5095_v10, 4  ;;  %v5102_v47 = vsel %vm1842_vm10, %v10922_v49, 0.0  ;;  %v5320_v16 = vrot.slane %v5319_v2, 2 }
0x1581   : > { %v5346_v51 = vrot.slane %v5345_v60, 2  ;;  %v5103_v8 = vrot.slane %v5102_v47, 4  ;;  %v5568_v21 = vsub.f32 %v10861_v25, %v5552_v20  ;;  %v5556_v61 = vrot.slane %v5555_v23, 2 }
0x1582   : > { %v10928_v43 = vpop.eup %8531  ;;  %v5340_v33 = vadd.f32 %v5339_v38, %v5338_v28  ;;  %v5097_v46 = vadd.f32 %v5096_v57, %v5095_v10  ;;  %v5321_v62 = vmax.f32 %v5319_v2, %v5320_v16  ;;  %v10937_v57 = vpop.permute.xlu1 %5650 }
0x1583   : > { %v5347_v45 = vadd.f32 %v5346_v51, %v5345_v60  ;;  %v5104_v14 = vadd.f32 %v5103_v8, %v5102_v47  ;;  %v5109_v41 = vsel %vm1842_vm10, %v10928_v43, 0.0  ;;  %v5573_v9 = vmul.f32 1.442695, %v5568_v21 }
0x1584   : > { %v5341_v18 = vrot.slane %v5340_v33, 1  ;;  %v5098_v4 = vrot.slane %v5097_v46, 2  ;;  %v5110_v52 = vrot.slane %v5109_v41, 4  ;;  %v5322_v32 = vrot.slane %v5321_v62, 1 }
0x1585   : > { %v10933_v26 = vpop.eup %8533  ;;  %v5348_v55 = vrot.slane %v5347_v45, 1  ;;  %v5105_v40 = vrot.slane %v5104_v14, 2  ;;  %8537 = vpow2.f32 %v5573_v9  ;;  %v5557_v10 = vmax.f32 %v5555_v23, %v5556_v61 }
0x1586   : > { %v5099_v29 = vadd.f32 %v5098_v4, %v5097_v46  ;;  %v5111_v6 = vadd.f32 %v5110_v52, %v5109_v41  ;;  %v5116_v25 = vsel %vm1842_vm10, %v10933_v26, 0.0  ;;  %v5323_v60 = vmax.f32 %v5321_v62, %v5322_v32  ;;  %v10947_v32 = vpop.permute.xlu1 %5407 }
0x1587   : > { %v5106_v28 = vadd.f32 %v5105_v40, %v5104_v14  ;;  %v5117_v3 = vrot.slane %v5116_v25, 4  ;;  %v5562_v47 = vmax.f32 %v5560_v0, %v5561_v50  ;;  %v5342_v20 = vadd.f32 %v5341_v18, %v5340_v33 }
0x1588   : > { %v5100_v2 = vrot.slane %v5099_v29, 1  ;;  %v5112_v38 = vrot.slane %v5111_v6, 2  ;;  %v5327_v16 = vsub.f32 %v10892_v34, %v5323_v60  ;;  %v5558_v46 = vrot.slane %v5557_v10, 1 }
0x1589   : > { %v5107_v51 = vrot.slane %v5106_v28, 1  ;;  %v5118_v8 = vadd.f32 %v5117_v3, %v5116_v25  ;;  %v5563_v41 = vrot.slane %v5562_v47, 2  ;;  %v5349_v4 = vadd.f32 %v5348_v55, %v5347_v45 }
0x158a   : > { %v5113_v21 = vadd.f32 %v5112_v38, %v5111_v6  ;;  %8539 = vrcp.f32 %v5342_v20  ;;  %v5334_v14 = vmul.f32 1.442695, %v5327_v16  ;;  %v5559_v9 = vmax.f32 %v5557_v10, %v5558_v46 }
0x158b   : > { %v5119_v52 = vrot.slane %v5118_v8, 2  ;;  %v5310_v23 = vsel %vm1842_vm10, %v10920_v22, -inf  ;;  %v5564_v0 = vmax.f32 %v5562_v47, %v5563_v41  ;;  %8541 = vrcp.f32 %v5349_v4 }
0x158c   : > { %v10942_v62 = vpop.eup %8535  ;;  %v5114_v40 = vrot.slane %v5113_v21, 1  ;;  %v5311_v33 = vrot.slane %v5310_v23, 4  ;;  %8543 = vpow2.f32 %v5334_v14  ;;  %v5569_v45 = vsub.f32 %v10894_v11, %v5559_v9  ;;  %v10962_v14 = vpop.permute.xlu1 %5615 }
0x158d   : > { %v5120_v50 = vadd.f32 %v5119_v52, %v5118_v8  ;;  %v5579_v34 = vsel %vm1842_vm10, %v10942_v62, 0.0  ;;  %v5565_v55 = vrot.slane %v5564_v0, 1  ;;  %v5101_v6 = vadd.f32 %v5100_v2, %v5099_v29 }
0x158e   : > { %v5580_v18 = vrot.slane %v5579_v34, 4  ;;  %v5312_v61 = vmax.f32 %v5310_v23, %v5311_v33  ;;  %v5575_v3 = vmul.f32 1.442695, %v5569_v45  ;;  %v5108_v60 = vadd.f32 %v5107_v51, %v5106_v28 }
0x158f   : > { %v5121_v25 = vrot.slane %v5120_v50, 1  ;;  %v5115_v10 = vadd.f32 %v5114_v40, %v5113_v21  ;;  %v5566_v47 = vmax.f32 %v5564_v0, %v5565_v55  ;;  %8545 = vrcp.f32 %v5101_v6 }
0x1590   : > { %v5581_v38 = vadd.f32 %v5580_v18, %v5579_v34  ;;  %v5313_v20 = vrot.slane %v5312_v61, 2  ;;  %v4870_v8 = vrot.slane %v10898_v5, 1  ;;  %8547 = vpow2.f32 %v5575_v3  ;;  %v10972_v6 = vpop.permute.xlu1 %5372 }
0x1591   : > { %v5122_v16 = vadd.f32 %v5121_v25, %v5120_v50  ;;  %v5570_v11 = vsub.f32 %v10900_v37, %v5566_v47  ;;  %8549 = vrcp.f32 %v5108_v60  ;;  %v4877_v29 = vrot.slane %v10912_v19, 1 }
0x1592   : > { %v5582_v46 = vrot.slane %v5581_v38, 2  ;;  %v5314_v41 = vmax.f32 %v5312_v61, %v5313_v20  ;;  %v10951_v4 = vpop.eup %8537  ;;  %8551 = vrcp.f32 %v5115_v10  ;;  %v4857_v28 = vadd.f32 %v4856_v54, %v10883_v53 }
0x1593   : > { %v4864_v2 = vadd.f32 %v4863_v44, %v10880_v17  ;;  %v5586_v21 = vsel %vm1842_vm10, %v10951_v4, 0.0  ;;  %v5577_v37 = vmul.f32 1.442695, %v5570_v11  ;;  %8553 = vrcp.f32 %v5122_v16 }
0x1594   : > { %v5583_v51 = vadd.f32 %v5582_v46, %v5581_v38  ;;  %v5315_v52 = vrot.slane %v5314_v41, 1  ;;  %v5587_v9 = vrot.slane %v5586_v21, 4  ;;  %v4871_v23 = vadd.f32 %v4870_v8, %v10898_v5 }
0x1595   : > { %8555 = vpow2.f32 %v5577_v37  ;;  %v4878_v33 = vadd.f32 %v4877_v29, %v10912_v19  ;;  %v5167_v37 = vpop.permute.xlu0 %5166 }
0x1596   : > { %v5584_v40 = vrot.slane %v5583_v51, 1  ;;  %v5316_v0 = vmax.f32 %v5314_v41, %v5315_v52  ;;  %v5588_v54 = vadd.f32 %v5587_v9, %v5586_v21  ;;  %8557 = vrcp.f32 %v4857_v28 }
0x1597   : > { %v8540_v53 = vpop.eup %8539  ;;  %8559 = vrcp.f32 %v4864_v2 }
0x1598   : > { %v5585_v17 = vadd.f32 %v5584_v40, %v5583_v51  ;;  %v5368_v44 = vmul.f32 %v8540_v53, %v10896_v35  ;;  %v5326_v50 = vsub.f32 %v10920_v22, %v5316_v0  ;;  %v8542_v34 = vpop.eup %8541  ;;  %v5589_v45 = vrot.slane %v5588_v54, 2 }
0x1599   : > { %8561 = vrcp.f32 %v4871_v23  ;;  %v10968_v18 = vpop.eup %8543  ;;  %v5369_v5 = vmul.f32 %v8542_v34, %v10903_v48 }
0x159a   : > { %8563 = vrcp.f32 %v5585_v17  ;;  %v5410_v55 = vmul.f32 %v10947_v32, %v5368_v44  ;;  %v5332_v61 = vmul.f32 1.442695, %v5326_v50  ;;  %v5590_v19 = vadd.f32 %v5589_v45, %v5588_v54 }
0x159b   : > { %v5357_v35 = vsel %vm1842_vm10, %v10968_v18, 0.0  ;;  %v5375_v22 = vmul.f32 %v10972_v6, %v5368_v44  ;;  %8565 = vrcp.f32 %v4878_v33  ;;  %v5411_v3 = vmul.f32 %v10947_v32, %v5369_v5 }
0x159c   : > { %v5358_v25 = vrot.slane %v5357_v35, 4  ;;  %v5414_v60 = vsel %vm1842_vm10, %v5410_v55, 0.0  ;;  %8567 = vpow2.f32 %v5332_v61  ;;  %v8546_v10 = vpop.eup %8545  ;;  %v5591_v48 = vrot.slane %v5590_v19, 1 }
0x159d   : > { %v5415_v38 = vrot.slane %v5414_v60, 4  ;;  %v10980_v47 = vmul.f32 %v10972_v6, %v5369_v5  ;;  %v10983_v20 = vsel %vm1842_vm10, %v5375_v22, 0.0  ;;  %v10985_v8 = vpop.eup %8547  ;;  %v5421_v46 = vsel %vm1842_vm10, %v5411_v3, 0.0 }
0x159e   : > { %v5359_v16 = vadd.f32 %v5358_v25, %v5357_v35  ;;  %v10989_v11 = vmul.f32 %v8546_v10, %v10916_v12  ;;  %v5380_v41 = vrot.slane %v10983_v20, 4  ;;  %v8550_v29 = vpop.eup %8549  ;;  %v5593_v28 = vsel %vm1842_vm10, %v10985_v8, 0.0 }
0x159f   : > { %v5592_v2 = vadd.f32 %v5591_v48, %v5590_v19  ;;  %v5416_v51 = vadd.f32 %v5415_v38, %v5414_v60  ;;  %v5422_v21 = vrot.slane %v5421_v46, 4  ;;  %v8552_v52 = vpop.eup %8551  ;;  %v5594_v23 = vrot.slane %v5593_v28, 4 }
0x15a0   : > { %v5360_v9 = vrot.slane %v5359_v16, 2  ;;  %v10995_v40 = vmul.f32 %v8550_v29, %v10922_v49  ;;  %v5169_v0 = vmul.f32 %v5167_v37, %v10989_v11  ;;  %v10999_v54 = vmul.f32 %v8552_v52, %v10928_v43  ;;  %v8554_v33 = vpop.eup %8553 }
0x15a1   : > { %8569 = vrcp.f32 %v5592_v2  ;;  %v5417_v12 = vrot.slane %v5416_v51, 2  ;;  %v5423_v53 = vadd.f32 %v5422_v21, %v5421_v46  ;;  %v5595_v44 = vadd.f32 %v5594_v23, %v5593_v28 }
0x15a2   : > { %v5361_v17 = vadd.f32 %v5360_v9, %v5359_v16  ;;  %v5170_v50 = vmul.f32 %v5167_v37, %v10995_v40  ;;  %v5173_v34 = vsel %vm1842_vm10, %v5169_v0, 0.0  ;;  %v11003_v45 = vpop.eup %8555  ;;  %v11008_v55 = vmul.f32 %v8554_v33, %v10933_v26 }
0x15a3   : > { %v11005_v5 = vadd.f32 %v5417_v12, %v5416_v51  ;;  %v5424_v49 = vrot.slane %v5423_v53, 2  ;;  %v5171_v61 = vmul.f32 %v5167_v37, %v10999_v54  ;;  %v11011_v19 = vpop.eup %8557  ;;  %v5596_v35 = vrot.slane %v5595_v44, 2 }
0x15a4   : > { %v5362_v43 = vrot.slane %v5361_v17, 1  ;;  %v5600_v22 = vsel %vm1842_vm10, %v11003_v45, 0.0  ;;  %v5174_v25 = vrot.slane %v5173_v34, 4  ;;  %v11015_v3 = vpop.eup %8559  ;;  %v5172_v26 = vmul.f32 %v5167_v37, %v11008_v55 }
0x15a5   : > { %v5601_v60 = vrot.slane %v5600_v22, 4  ;;  %v11018_v48 = vadd.f32 %v5424_v49, %v5423_v53  ;;  %v5597_v16 = vadd.f32 %v5596_v35, %v5595_v44  ;;  %v5180_v28 = vsel %vm1842_vm10, %v5170_v50, 0.0 }
0x15a6   : > { %v11021_v38 = vpop.eup %8561  ;;  %v5363_v46 = vadd.f32 %v5362_v43, %v5361_v17  ;;  %v5175_v29 = vadd.f32 %v5174_v25, %v5173_v34  ;;  %v5181_v52 = vrot.slane %v5180_v28, 4  ;;  %v5187_v9 = vsel %vm1842_vm10, %v5171_v61, 0.0 }
0x15a7   : > { %v8564_v2 = vpop.eup %8563  ;;  %v5602_v51 = vadd.f32 %v5601_v60, %v5600_v22  ;;  %v5598_v0 = vrot.slane %v5597_v16, 1  ;;  %v5188_v44 = vrot.slane %v5187_v9, 4  ;;  %v5194_v50 = vsel %vm1842_vm10, %v5172_v26, 0.0 }
0x15a8   : > { %v11026_v23 = vpop.eup %8565  ;;  %v5611_v12 = vmul.f32 %v8564_v2, %v10942_v62  ;;  %8571 = vrcp.f32 %v5363_v46  ;;  %v5176_v37 = vrot.slane %v5175_v29, 2  ;;  %v5182_v17 = vadd.f32 %v5181_v52, %v5180_v28 }
0x15a9   : > { %v11029_v53 = vpop.eup %8567  ;;  %v5603_v33 = vrot.slane %v5602_v51, 2  ;;  %v5599_v34 = vadd.f32 %v5598_v0, %v5597_v16  ;;  %v5189_v28 = vadd.f32 %v5188_v44, %v5187_v9 }
0x15aa   : > { %v5653_v49 = vmul.f32 %v10937_v57, %v5611_v12  ;;  %v5350_v61 = vsel %vm1842_vm10, %v11029_v53, 0.0  ;;  %v5618_v43 = vmul.f32 %v10962_v14, %v5611_v12  ;;  %v11036_v62 = vadd.f32 %v5176_v37, %v5175_v29 }
0x15ab   : > { %v5604_v35 = vadd.f32 %v5603_v33, %v5602_v51  ;;  %v5351_v22 = vrot.slane %v5350_v61, 4  ;;  %v5183_v25 = vrot.slane %v5182_v17, 2  ;;  %8573 = vrcp.f32 %v5599_v34 }
0x15ac   : > { %v5657_v60 = vsel %vm1842_vm10, %v5653_v49, 0.0  ;;  %v5622_v46 = vsel %vm1842_vm10, %v5618_v43, 0.0  ;;  %v5190_v51 = vrot.slane %v5189_v28, 2  ;;  %v5195_v12 = vrot.slane %v5194_v50, 4 }
0x15ad   : > { %v5658_v26 = vrot.slane %v5657_v60, 4  ;;  %v5605_v16 = vrot.slane %v5604_v35, 1  ;;  %v5352_v2 = vadd.f32 %v5351_v22, %v5350_v61  ;;  %v5623_v52 = vrot.slane %v5622_v46, 4 }
0x15ae   : > { %v8570_v0 = vpop.eup %8569  ;;  %v11041_v10 = vadd.f32 %v5183_v25, %v5182_v17  ;;  %v11045_v9 = vadd.f32 %v5190_v51, %v5189_v28  ;;  %v11047_v44 = vadd.f32 %v5195_v12, %v5194_v50  ;;  %v5386_v28 = vsel %vm1842_vm10, %v10980_v47, 0.0 }
0x15af   : > { %v5612_v29 = vmul.f32 %v8570_v0, %v10951_v4  ;;  %v5659_v37 = vadd.f32 %v5658_v26, %v5657_v60  ;;  %v5353_v33 = vrot.slane %v5352_v2, 2  ;;  %v5606_v34 = vadd.f32 %v5605_v16, %v5604_v35 }
0x15b0   : > { %v5624_v49 = vadd.f32 %v5623_v52, %v5622_v46  ;;  %v5381_v35 = vadd.f32 %v5380_v41, %v10983_v20  ;;  %v11065_v47 = vmul.f32 %v11011_v19, %v10863_v13 }
0x15b1   : > { %v5654_v61 = vmul.f32 %v10937_v57, %v5612_v29  ;;  %v5660_v22 = vrot.slane %v5659_v37, 2  ;;  %v5354_v21 = vadd.f32 %v5353_v33, %v5352_v2  ;;  %8575 = vrcp.f32 %v5606_v34 }
0x15b2   : > { %v5619_v17 = vmul.f32 %v10962_v14, %v5612_v29  ;;  %v5625_v25 = vrot.slane %v5624_v49, 2  ;;  %v5382_v52 = vrot.slane %v5381_v35, 2  ;;  %v5387_v33 = vrot.slane %v5386_v28, 4 }
0x15b3   : > { %v11055_v60 = vadd.f32 %v5660_v22, %v5659_v37  ;;  %v5664_v46 = vsel %vm1842_vm10, %v5654_v61, 0.0  ;;  %v5355_v50 = vrot.slane %v5354_v21, 1 }
0x15b4   : > { %v5665_v26 = vrot.slane %v5664_v46, 4  ;;  %v5626_v16 = vadd.f32 %v5625_v25, %v5624_v49  ;;  %v5629_v2 = vsel %vm1842_vm10, %v5619_v17, 0.0  ;;  %v5383_v34 = vadd.f32 %v5382_v52, %v5381_v35 }
0x15b5   : > { %v8572_v0 = vpop.eup %8571  ;;  %v5630_v12 = vrot.slane %v5629_v2, 4  ;;  %v5356_v29 = vadd.f32 %v5355_v50, %v5354_v21  ;;  %v5388_v22 = vadd.f32 %v5387_v33, %v5386_v28  ;;  %v11073_v35 = vmul.f32 %v11015_v3, %v10858_v1 }
0x15b6   : > { %v5666_v20 = vadd.f32 %v5665_v26, %v5664_v46  ;;  %v5371_v41 = vmul.f32 %v8572_v0, %v10968_v18  ;;  %v5627_v37 = vrot.slane %v5626_v16, 1  ;;  %v5384_v26 = vrot.slane %v5383_v34, 1 }
0x15b7   : > { %v5631_v61 = vadd.f32 %v5630_v12, %v5629_v2  ;;  %8577 = vrcp.f32 %v5356_v29  ;;  %v5389_v18 = vrot.slane %v5388_v22, 2 }
0x15b8   : > { %v5667_v49 = vrot.slane %v5666_v20, 2  ;;  %v5413_v17 = vmul.f32 %v10947_v32, %v5371_v41  ;;  %v11068_v25 = vadd.f32 %v5627_v37, %v5626_v16  ;;  %v5378_v21 = vmul.f32 %v10972_v6, %v5371_v41  ;;  %v8574_v50 = vpop.eup %8573 }
0x15b9   : > { %v5632_v46 = vrot.slane %v5631_v61, 2  ;;  %v5613_v28 = vmul.f32 %v8574_v50, %v10985_v8  ;;  %v11080_v0 = vadd.f32 %v5384_v26, %v5383_v34  ;;  %v5390_v12 = vadd.f32 %v5389_v18, %v5388_v22 }
0x15ba   : > { %v11076_v2 = vadd.f32 %v5667_v49, %v5666_v20  ;;  %v5435_v13 = vsel %vm1842_vm10, %v5413_v17, 0.0  ;;  %v5400_v19 = vsel %vm1842_vm10, %v5378_v21, 0.0  ;;  %v11089_v37 = vmul.f32 %v11021_v38, %v10870_v59  ;;  %v4923_v59 = vpop.permute.xlu0 %4922 }
0x15bb   : > { %v5436_v16 = vrot.slane %v5435_v13, 4  ;;  %v5633_v52 = vadd.f32 %v5632_v46, %v5631_v61  ;;  %v5655_v29 = vmul.f32 %v10937_v57, %v5613_v28  ;;  %v5620_v1 = vmul.f32 %v10962_v14, %v5613_v28 }
0x15bc   : > { %v5401_v3 = vrot.slane %v5400_v19, 4  ;;  %v5391_v20 = vrot.slane %v5390_v12, 1  ;;  %v11097_v17 = vmul.f32 %v11026_v23, %v10876_v56  ;;  %v4926_v23 = vmul.f32 %v4923_v59, %v11073_v35 }
0x15bd   : > { %v11085_v41 = vadd.f32 %v5436_v16, %v5435_v13  ;;  %v5634_v8 = vrot.slane %v5633_v52, 1  ;;  %v5671_v34 = vsel %vm1842_vm10, %v5655_v29, 0.0  ;;  %v5636_v61 = vsel %vm1842_vm10, %v5620_v1, 0.0 }
0x15be   : > { %v8576_v49 = vpop.eup %8575  ;;  %v11093_v22 = vadd.f32 %v5401_v3, %v5400_v19  ;;  %v5672_v21 = vrot.slane %v5671_v34, 4  ;;  %v5637_v38 = vrot.slane %v5636_v61, 4  ;;  %v11103_v18 = vadd.f32 %v5391_v20, %v5390_v12 }
0x15bf   : > { %v5614_v46 = vmul.f32 %v8576_v49, %v11003_v45  ;;  %v11101_v26 = vadd.f32 %v5634_v8, %v5633_v52  ;;  %v4925_v13 = vmul.f32 %v4923_v59, %v11065_v47  ;;  %v4927_v45 = vmul.f32 %v4923_v59, %v11089_v37 }
0x15c0   : > { %v5673_v19 = vadd.f32 %v5672_v21, %v5671_v34  ;;  %v5638_v29 = vadd.f32 %v5637_v38, %v5636_v61  ;;  %v4928_v52 = vmul.f32 %v4923_v59, %v11097_v17  ;;  %v4936_v61 = vsel %vm1842_vm10, %v4926_v23, 0.0 }
0x15c1   : > { %v5621_v16 = vmul.f32 %v10962_v14, %v5614_v46  ;;  %v5656_v56 = vmul.f32 %v10937_v57, %v5614_v46  ;;  %v4929_v1 = vsel %vm1842_vm10, %v4925_v13, 0.0  ;;  %v4937_v38 = vrot.slane %v4936_v61, 4 }
0x15c2   : > { %v5674_v12 = vrot.slane %v5673_v19, 2  ;;  %v4930_v20 = vrot.slane %v4929_v1, 4  ;;  %v5639_v14 = vrot.slane %v5638_v29, 2  ;;  %v4950_v28 = vsel %vm1842_vm10, %v4928_v52, 0.0 }
0x15c3   : > { %v5643_v3 = vsel %vm1842_vm10, %v5621_v16, 0.0  ;;  %v11115_v8 = vsel %vm1842_vm10, %v5656_v56, 0.0  ;;  %v4943_v56 = vsel %vm1842_vm10, %v4927_v45, 0.0  ;;  %v4938_v23 = vadd.f32 %v4937_v38, %v4936_v61 }
0x15c4   : > { %v8578_v49 = vpop.eup %8577  ;;  %v5644_v34 = vrot.slane %v5643_v3, 4  ;;  %v11119_v21 = vadd.f32 %v5674_v12, %v5673_v19  ;;  %v4931_v59 = vadd.f32 %v4930_v20, %v4929_v1  ;;  %v11122_v13 = vadd.f32 %v5639_v14, %v5638_v29  ;;  %v5132_v19 = vpop.permute.xlu0 %5131 }
0x15c5   : > { %v5370_v46 = vmul.f32 %v8578_v49, %v11029_v53  ;;  %v4944_v53 = vrot.slane %v4943_v56, 4  ;;  %v4951_v1 = vrot.slane %v4950_v28, 4  ;;  %v5134_v29 = vmul.f32 %v5132_v19, %v10989_v11 }
0x15c6   : > { %v11124_v16 = vadd.f32 %v5644_v34, %v5643_v3  ;;  %v4932_v33 = vrot.slane %v4931_v59, 2  ;;  %v4939_v52 = vrot.slane %v4938_v23, 2  ;;  %v5136_v11 = vmul.f32 %v5132_v19, %v10999_v54 }
0x15c7   : > { %v5377_v50 = vmul.f32 %v10972_v6, %v5370_v46  ;;  %v5412_v57 = vmul.f32 %v10947_v32, %v5370_v46  ;;  %v4945_v14 = vadd.f32 %v4944_v53, %v4943_v56  ;;  %v11136_v32 = vadd.f32 %v4951_v1, %v4950_v28 }
0x15c8   : > { %v11134_v45 = vadd.f32 %v4932_v33, %v4931_v59  ;;  %v11139_v61 = vadd.f32 %v4939_v52, %v4938_v23  ;;  %v5135_v46 = vmul.f32 %v5132_v19, %v10995_v40  ;;  %v5137_v56 = vmul.f32 %v5132_v19, %v11008_v55  ;;  %v4888_v54 = vpop.permute.xlu0 %4887 }
0x15c9   : > { %v5393_v3 = vsel %vm1842_vm10, %v5377_v50, 0.0  ;;  %v5428_v20 = vsel %vm1842_vm10, %v5412_v57, 0.0  ;;  %v4946_v57 = vrot.slane %v4945_v14, 2  ;;  %v5138_v28 = vsel %vm1842_vm10, %v5134_v29, 0.0 }
0x15ca   : > { %v5394_v49 = vrot.slane %v5393_v3, 4  ;;  %v5429_v6 = vrot.slane %v5428_v20, 4  ;;  %v4941_v59 = vrot.slane %v11139_v61, 1  ;;  %v5145_v53 = vsel %vm1842_vm10, %v5135_v46, 0.0 }
0x15cb   : > { %v11150_v1 = vadd.f32 %v4946_v57, %v4945_v14  ;;  %v5139_v40 = vrot.slane %v5138_v28, 4  ;;  %v5146_v52 = vrot.slane %v5145_v53, 4  ;;  %v4892_v14 = vmul.f32 %v4888_v54, %v11089_v37 }
0x15cc   : > { %v5395_v38 = vadd.f32 %v5394_v49, %v5393_v3  ;;  %v11143_v50 = vadd.f32 %v5429_v6, %v5428_v20  ;;  %v5152_v3 = vsel %vm1842_vm10, %v5136_v11, 0.0  ;;  %v5159_v20 = vsel %vm1842_vm10, %v5137_v56, 0.0 }
0x15cd   : > { %v4890_v49 = vmul.f32 %v4888_v54, %v11065_v47  ;;  %v4891_v6 = vmul.f32 %v4888_v54, %v11073_v35  ;;  %v5140_v55 = vadd.f32 %v5139_v40, %v5138_v28  ;;  %v5147_v19 = vadd.f32 %v5146_v52, %v5145_v53 }
0x15ce   : > { %v5396_v23 = vrot.slane %v5395_v38, 2  ;;  %v5153_v29 = vrot.slane %v5152_v3, 4  ;;  %v5160_v46 = vrot.slane %v5159_v20, 4  ;;  %v4893_v57 = vmul.f32 %v4888_v54, %v11097_v17 }
0x15cf   : > { %v4894_v51 = vsel %vm1842_vm10, %v4890_v49, 0.0  ;;  %v5141_v33 = vrot.slane %v5140_v55, 2  ;;  %v5148_v11 = vrot.slane %v5147_v19, 2  ;;  %v4901_v47 = vsel %vm1842_vm10, %v4891_v6, 0.0 }
0x15d0   : > { %v11156_v12 = vadd.f32 %v5396_v23, %v5395_v38  ;;  %v5154_v34 = vadd.f32 %v5153_v29, %v5152_v3  ;;  %v4895_v56 = vrot.slane %v4894_v51, 4  ;;  %v11161_v4 = vadd.f32 %v5160_v46, %v5159_v20 }
0x15d1   : > { %v4908_v35 = vsel %vm1842_vm10, %v4892_v14, 0.0  ;;  %v4915_v38 = vsel %vm1842_vm10, %v4893_v57, 0.0  ;;  %v5142_v28 = vadd.f32 %v5141_v33, %v5140_v55  ;;  %v5149_v53 = vadd.f32 %v5148_v11, %v5147_v19 }
0x15d2   : > { %v5155_v23 = vrot.slane %v5154_v34, 2  ;;  %v4896_v37 = vadd.f32 %v4895_v56, %v4894_v51  ;;  %v5162_v17 = vrot.slane %v11161_v4, 2  ;;  %v4902_v40 = vrot.slane %v4901_v47, 4 }
0x15d3   : > { %v4909_v52 = vrot.slane %v4908_v35, 4  ;;  %v4916_v54 = vrot.slane %v4915_v38, 4  ;;  %v5143_v49 = vrot.slane %v5142_v28, 1  ;;  %v5150_v3 = vrot.slane %v5149_v53, 1 }
0x15d4   : > { %v5156_v29 = vadd.f32 %v5155_v23, %v5154_v34  ;;  %v4897_v20 = vrot.slane %v4896_v37, 2  ;;  %v4903_v46 = vadd.f32 %v4902_v40, %v4901_v47  ;;  %v12272_v14 = vrot.slane %v11036_v62, 1 }
0x15d5   : > { %v4910_v43 = vadd.f32 %v4909_v52, %v4908_v35  ;;  %v11167_v6 = vadd.f32 %v4916_v54, %v4915_v38  ;;  %v5144_v55 = vadd.f32 %v5143_v49, %v5142_v28  ;;  %v5151_v19 = vadd.f32 %v5150_v3, %v5149_v53 }
0x15d6   : > { %v5179_v33 = vadd.f32 %v12272_v14, %v11036_v62  ;;  %v4898_v51 = vadd.f32 %v4897_v20, %v4896_v37  ;;  %v12273_v57 = vrot.slane %v11041_v10, 1  ;;  %v4904_v56 = vrot.slane %v4903_v46, 2 }
0x15d7   : > { %v4911_v15 = vrot.slane %v4910_v43, 2  ;;  %v4918_v34 = vrot.slane %v11167_v6, 2  ;;  %v5192_v47 = vrot.slane %v11045_v9, 1  ;;  %v12274_v38 = vrot.slane %v11047_v44, 2 }
0x15d8   : > { %v5186_v11 = vadd.f32 %v12273_v57, %v11041_v10  ;;  %v4899_v35 = vrot.slane %v4898_v51, 1  ;;  %v12275_v28 = vrot.slane %v11134_v45, 1  ;;  %v4905_v37 = vadd.f32 %v4904_v56, %v4903_v46  ;;  %v5713_v57 = vld [vmem:[%s12276_s8 + $0x8] sm:$0xff] }
0x15d9   : > { %v5198_v23 = vadd.f32 %v12274_v38, %v11047_v44  ;;  %v4912_v10 = vadd.f32 %v4911_v15, %v4910_v43  ;;  %v5193_v40 = vadd.f32 %v5192_v47, %v11045_v9  ;;  %v4942_v52 = vadd.f32 %v4941_v59, %v11139_v61  ;;  %8196 = vmatprep.subr.mxu1 %v5713_v57 }
0x15da   : > { %v5213_v62 = vsel %vm1993_vm11, %v5186_v11, %v5179_v33  ;;  %v4935_v53 = vadd.f32 %v12275_v28, %v11134_v45  ;;  %v4900_v54 = vadd.f32 %v4899_v35, %v4898_v51  ;;  %v4948_v3 = vrot.slane %v11150_v1, 1  ;;  %v5712_v11 = vld [vmem:[%s12276_s8] sm:$0xff]  ;;  %8197 = vmatpush3.msra.mxu1 %v5713_v57 }
0x15db   : > { %v5199_v49 = vrot.slane %v5198_v23, 1  ;;  %v12277_v44 = vrot.slane %v11136_v32, 2  ;;  %v4906_v14 = vrot.slane %v4905_v37, 1  ;;  %v5214_v33 = vsel %vm1995_vm12, %v5193_v40, %v5213_v62  ;;  %8198 = vmatprep.subr.mxu1 %v5712_v11 }
0x15dc   : > { %v4969_v45 = vsel %vm1993_vm11, %v4942_v52, %v4935_v53  ;;  %v12278_v15 = vrot.slane %v11055_v60, 1  ;;  %v4949_v61 = vadd.f32 %v4948_v3, %v11150_v1  ;;  %v12279_v46 = vrot.slane %v11076_v2, 1  ;;  %8199 = vmatpush3.msra.mxu1 %v5712_v11 }
0x15dd   : > { %v4954_v20 = vadd.f32 %v12277_v44, %v11136_v32  ;;  %v5200_v9 = vadd.f32 %v5199_v49, %v5198_v23  ;;  %v4907_v32 = vadd.f32 %v4906_v14, %v4905_v37  ;;  %v5676_v56 = vrot.slane %v11119_v21, 1 }
0x15de   : > { %v5663_v43 = vadd.f32 %v12278_v15, %v11055_v60  ;;  %v5670_v51 = vadd.f32 %v12279_v46, %v11076_v2  ;;  %v12280_v47 = vrot.slane %v11115_v8, 4  ;;  %v12281_v60 = vrot.slane %v11005_v5, 1 }
0x15df   : > { %v4955_v59 = vrot.slane %v4954_v20, 1  ;;  %v5215_v1 = vsel %vm1997_vm13, %v5200_v9, %v5214_v33  ;;  %v4970_v62 = vsel %vm1995_vm12, %v4949_v61, %v4969_v45  ;;  %v5677_v28 = vadd.f32 %v5676_v56, %v11119_v21 }
0x15e0   : > { %v5680_v35 = vadd.f32 %v12280_v47, %v11115_v8  ;;  %v5420_v38 = vadd.f32 %v12281_v60, %v11005_v5  ;;  %v5697_v2 = vsel %vm1993_vm11, %v5670_v51, %v5663_v43  ;;  %5216 = vrot.lane.b32.xlu0 %v5215_v1, %s12251_s16  ;;  %v12282_v8 = vrot.slane %v11018_v48, 1 }
0x15e1   : > { %v4956_v23 = vadd.f32 %v4955_v59, %v4954_v20  ;;  %v5431_v5 = vrot.slane %v11143_v50, 2  ;;  %v12283_v52 = vrot.slane %v11085_v41, 2  ;;  %v5157_v3 = vrot.slane %v5156_v29, 1 }
0x15e2   : > { %v5681_v53 = vrot.slane %v5680_v35, 2  ;;  %v5427_v37 = vadd.f32 %v12282_v8, %v11018_v48  ;;  %v5163_v44 = vadd.f32 %v5162_v17, %v11161_v4  ;;  %v5698_v21 = vsel %vm1995_vm12, %v5677_v28, %v5697_v2 }
0x15e3   : > { %v4971_v40 = vsel %vm1997_vm13, %v4956_v23, %v4970_v62  ;;  %v5439_v49 = vadd.f32 %v12283_v52, %v11085_v41  ;;  %v5432_v14 = vadd.f32 %v5431_v5, %v11143_v50  ;;  %v5158_v45 = vadd.f32 %v5157_v3, %v5156_v29 }
0x15e4   : > { %v5682_v20 = vadd.f32 %v5681_v53, %v5680_v35  ;;  %v5454_v48 = vsel %vm1993_vm11, %v5427_v37, %v5420_v38  ;;  %v5164_v15 = vrot.slane %v5163_v44, 1  ;;  %v5205_v43 = vsel %vm1993_vm11, %v5151_v19, %v5144_v55  ;;  %4972 = vrot.lane.b32.xlu0 %v4971_v40, %s12251_s16 }
0x15e5   : > { %v5440_v33 = vrot.slane %v5439_v49, 1  ;;  %v5433_v41 = vrot.slane %v5432_v14, 1  ;;  %v4913_v61 = vrot.slane %v4912_v10, 1  ;;  %v4919_v4 = vadd.f32 %v4918_v34, %v11167_v6 }
0x15e6   : > { %v5683_v9 = vrot.slane %v5682_v20, 1  ;;  %v5165_v59 = vadd.f32 %v5164_v15, %v5163_v44  ;;  %v5206_v46 = vsel %vm1995_vm12, %v5158_v45, %v5205_v43  ;;  %v4961_v50 = vsel %vm1993_vm11, %v4907_v32, %v4900_v54 }
0x15e7   : > { %v5441_v17 = vadd.f32 %v5440_v33, %v5439_v49  ;;  %v5434_v57 = vadd.f32 %v5433_v41, %v5432_v14  ;;  %v4914_v11 = vadd.f32 %v4913_v61, %v4912_v10  ;;  %v4920_v29 = vrot.slane %v4919_v4, 1 }
0x15e8   : > { %v5684_v51 = vadd.f32 %v5683_v9, %v5682_v20  ;;  %v5207_v56 = vsel %vm1997_vm13, %v5165_v59, %v5206_v46  ;;  %v5641_v55 = vrot.slane %v11122_v13, 1  ;;  %v5689_v19 = vsel %vm1993_vm11, %v11101_v26, %v11068_v25 }
0x15e9   : > { %v12284_v6 = vrot.slane %v11124_v16, 2  ;;  %v5455_v54 = vsel %vm1995_vm12, %v5434_v57, %v5454_v48  ;;  %v4921_v32 = vadd.f32 %v4920_v29, %v4919_v4  ;;  %v4962_v10 = vsel %vm1995_vm12, %v4914_v11, %v4961_v50  ;;  %v7952_v48 = vld [vmem:[%s12276_s8 + $0x10] ss:$0 sm:$0xff]  ;;  %s7688_s8 = scalar_lea.sflag [#allocation5], %s9176_s22 }
0x15ea   : > { %v5699_v47 = vsel %vm1997_vm13, %v5684_v51, %v5698_v21  ;;  %v5642_v35 = vadd.f32 %v5641_v55, %v11122_v13  ;;  %v12285_v38 = vrot.slane %v11093_v22, 2  ;;  %v5456_v26 = vsel %vm1997_vm13, %v5441_v17, %v5455_v54  ;;  %v5840_v55 = vld [vmem:[%s12286_s6] sm:$0xff] }
0x15eb   : > { %v5647_v34 = vadd.f32 %v12284_v6, %v11124_v16  ;;  %5700 = vrot.lane.b32.xlu1 %v5699_v47, %s12251_s16  ;;  %v4963_v16 = vsel %vm1997_vm13, %v4921_v32, %v4962_v10  ;;  %v5446_v1 = vsel %vm1993_vm11, %v11103_v18, %v11080_v0  ;;  %v5398_v23 = vrot.slane %v11156_v12, 1  ;;  %v4629_v10 = vld [vmem:[%s12206_s12] sm:$0x3f] }
0x15ec   : > { %v5404_v25 = vadd.f32 %v12285_v38, %v11093_v22  ;;  %v5690_v62 = vsel %vm1995_vm12, %v5642_v35, %v5689_v19  ;;  %v5831_v35 = vrot.slane %v4629_v10, %v12268_v7 }
0x15ed   : > { %v5648_v60 = vrot.slane %v5647_v34, 1  ;;  %v5399_v13 = vadd.f32 %v5398_v23, %v11156_v12 }
0x15ee   : > { %v5405_v28 = vrot.slane %v5404_v25, 1 }
0x15ef   : > { %v5649_v2 = vadd.f32 %v5648_v60, %v5647_v34  ;;  %5457 = vrot.lane.b32.xlu1 %v5456_v26, %s12251_s16  ;;  %v5447_v8 = vsel %vm1995_vm12, %v5399_v13, %v5446_v1  ;;  %v7955_v13 = vld [vmem:[%s12286_s6 + $0x10] ss:$0 sm:$0xff] }
0x15f0   : > { %v5406_v53 = vadd.f32 %v5405_v28, %v5404_v25  ;;  %v12287_v25 = vld [vmem:[#allocation31_spill] sm:$0xff] }
0x15f1   : > { %v5691_v22 = vsel %vm1997_vm13, %v5649_v2, %v5690_v62  ;;  %v5837_v26 = vrot.slane %v4629_v10, %v12287_v25 }
0x15f2   : > { %v5448_v37 = vsel %vm1997_vm13, %v5406_v53, %v5447_v8 }
0x1652   : > { %v5217_v5 = vpop.permute.xlu0 %5216 }
0x1653   : > { %v5219_v0 = vsel %vm1842_vm10, %v5207_v56, %v5217_v5  ;;  %v5841_v56 = vld [vmem:[%s12286_s6 + $0x8] sm:$0xff] }
0x1654   : > { %v5705_v18 = vrot.slane %v5219_v0, 4  ;;  %8203 = vmatprep.subr.mxu1 %v5841_v56 }
0x1656   : > { %v4973_v40 = vpop.permute.xlu0 %4972 }
0x1657   : > { %v4975_v52 = vsel %vm1842_vm10, %v4963_v16, %v4973_v40 }
0x1658   : > { %v5710_v49 = vsel %vm1222_vm6, %v4975_v52, %v5705_v18 }
0x1659   : > { %8200 = vmatprep.mubr.msk.f32.mxu1 %vm1677_vm9, %v5710_v49 }
0x165d   : > { %v5701_v12 = vpop.permute.xlu1 %5700 }
0x165e   : > { %v5703_v3 = vsel %vm1842_vm10, %v5691_v22, %v5701_v12 }
0x165f   : > { %v5708_v44 = vrot.slane %v5703_v3, 4  ;;  %v7958_v3 = vld [vmem:[%s12261_s3 + $0x10] ss:$0 sm:$0xff]  ;;  %s12288_s3 = smov 104  }
0x1661   : > { %v5458_v20 = vpop.permute.xlu1 %5457 }
0x1662   : > { %v5460_v21 = vsel %vm1842_vm10, %v5448_v37, %v5458_v20  ;;  %v11294_v20 = vadd.f32 %v7958_v3, %v10694_v36  ;;  %v11311_v36 = vadd.f32 %v7958_v3, %v10687_v24 }
0x1663   : > { %v5711_v14 = vsel %vm1222_vm6, %v5460_v21, %v5708_v44 }
0x1664   : > { %8201 = vmatmul.mubr.msk.f32.vlgmr.msra.gmra.mxu1 %vm1677_vm9, %v5711_v14  ;;  %v11298_v14 = vadd.f32 %v7958_v3, %v10698_v39 }
0x1665   : > { %8204 = vmatpush3.msra.mxu1 %v5841_v56 }
0x1666   : > { %8205 = vmatprep.subr.mxu1 %v5840_v55 }
0x1667   : > { %8206 = vmatpush3.msra.mxu1 %v5840_v55 }
0x1724   : > { %v8202_v33 = vpop.f32.mrf.mxu1 }
0x1725   : > { %v5797_v45 = vadd.f32 %v8202_v33, %v7952_v48 }
0x1726   : > { %v5791_v15 = vpop.f32.mrf.mxu1 }
0x1727   : > { %v5801_v43 = vadd.f32 %v5797_v45, %v10640_v27  ;;  %v5792_v9 = vadd.f32 %v7952_v48, %v5791_v15 }
0x1729   : > { %v5800_v41 = vadd.f32 %v5792_v9, %v10642_v58  ;;  %v5805_v61 = vsel %vm1677_vm9, %v5801_v43, 0.0 }
0x172a   : > { %5806 = vadd.xlane.f32.xlu1 %v5805_v61 }
0x172b   : > { %v5802_v4 = vsel %vm1677_vm9, %v5800_v41, 0.0 }
0x172c   : > { %5803 = vadd.xlane.f32.xlu0 %v5802_v4 }
0x17b3   : > { %v5807_v17 = vpop.xlane.xlu1 %5806 }
0x17b4   : > { %v5809_v59 = vmul.f32 0.0625, %v5807_v17 }
0x17b5   : > { %v5804_v46 = vpop.xlane.xlu0 %5803 }
0x17b6   : > { %v5808_v50 = vmul.f32 0.0625, %v5804_v46  ;;  %v5811_v51 = vsub.f32 %v5801_v43, %v5809_v59 }
0x17b8   : > { %v5810_v57 = vsub.f32 %v5800_v41, %v5808_v50  ;;  %v5813_v29 = vmul.f32 %v5811_v51, %v5811_v51 }
0x17ba   : > { %v5812_v11 = vmul.f32 %v5810_v57, %v5810_v57  ;;  %v5817_v58 = vsel %vm1677_vm9, %v5813_v29, 0.0 }
0x17bc   : > { %v5814_v27 = vsel %vm1677_vm9, %v5812_v11, 0.0 }
0x17bd   : > { %5815 = vadd.xlane.f32.xlu0 %v5814_v27 }
0x17c1   : > { %5818 = vadd.xlane.f32.xlu0 %v5817_v58 }
0x1846   : > { %v5816_v19 = vpop.xlane.xlu0 %5815 }
0x1847   : > { %v5820_v6 = vmul.f32 0.0625, %v5816_v19 }
0x1849   : > { %v5822_v34 = vadd.f32 1e-05, %v5820_v6 }
0x184a   : > { %v5819_v47 = vpop.xlane.xlu0 %5818 }
0x184b   : > { %8579 = vrsqrt.f32 %v5822_v34  ;;  %v5821_v54 = vmul.f32 0.0625, %v5819_v47 }
0x184d   : > { %v5823_v32 = vadd.f32 1e-05, %v5821_v54 }
0x184f   : > { %8581 = vrsqrt.f32 %v5823_v32 }
0x1858   : > { %v8580_v60 = vpop.eup %8579 }
0x1859   : > { %v5826_v38 = vmul.f32 %v8580_v60, %v5810_v57 }
0x185b   : > { %v5832_v16 = vmul.f32 %v5831_v35, %v5826_v38 }
0x185c   : > { %v8582_v1 = vpop.eup %8581 }
0x185d   : > { %v5827_v23 = vmul.f32 %v8582_v1, %v5811_v51  ;;  %v11278_v62 = vadd.f32 %v5837_v26, %v5832_v16 }
0x185f   : > { %v5833_v2 = vmul.f32 %v5831_v35, %v5827_v23  ;;  %8207 = vmatprep.mubr.msk.f32.mxu1 %vm1677_vm9, %v11278_v62 }
0x1861   : > { %v11282_v28 = vadd.f32 %v5837_v26, %v5833_v2 }
0x1863   : > { %8208 = vmatmul.mubr.msk.f32.vlgmr.msra.gmra.mxu1 %vm1677_vm9, %v11282_v28 }
0x1923   : > { %v8209_v22 = vpop.f32.mrf.mxu1 }
0x1924   : > { %v5925_v53 = vadd.f32 %v8209_v22, %v7955_v13 }
0x1925   : > { %v5919_v8 = vpop.f32.mrf.mxu1 }
0x1926   : > { %v6857_v37 = vcombine.high %v5925_v53, %v5925_v53  ;;  %v5920_v5 = vadd.f32 %v7955_v13, %v5919_v8  ;;  %v6632_v47 = vrot.slane %v5925_v53, %v12267_v42 }
0x1928   : > { %v6864_v0 = vrot.slane %v6857_v37, %v12267_v42  ;;  %v6022_v18 = vrot.slane %v5920_v5, %v12267_v42  ;;  %v6254_v40 = vcombine.high %v5920_v5, %v5920_v5  ;;  %v6633_v60 = vcombine.high %v6632_v47, %v6632_v47 }
0x1929   : > { %v6640_v1 = vrot.slane %v6632_v47, %v12267_v42 }
0x192a   : > { %v6872_v52 = vrot.slane %v6864_v0, %v12267_v42  ;;  %v6030_v49 = vrot.slane %v6022_v18, %v12267_v42  ;;  %v6261_v12 = vrot.slane %v6254_v40, %v12267_v42  ;;  %v6865_v44 = vcombine.high %v6864_v0, %v6864_v0 }
0x192b   : > { %v6023_v61 = vcombine.high %v6022_v18, %v6022_v18  ;;  %v6647_v23 = vrot.slane %v6633_v60, %v12267_v42  ;;  %v6648_v53 = vcombine.high %v6640_v1, %v6640_v1  ;;  %v6653_v18 = vrot.slane %v6640_v1, %v12268_v7 }
0x192c   : > { %v6885_v21 = vrot.slane %v6872_v52, %v12268_v7  ;;  %v6269_v48 = vrot.slane %v6261_v12, %v12267_v42  ;;  %v6043_v33 = vrot.slane %v6030_v49, %v12268_v7  ;;  %v6879_v15 = vrot.slane %v6865_v44, %v12267_v42 }
0x192d   : > { %v6880_v41 = vcombine.high %v6872_v52, %v6872_v52  ;;  %v6037_v59 = vrot.slane %v6023_v61, %v12267_v42  ;;  %v6262_v46 = vcombine.high %v6261_v12, %v6261_v12  ;;  %v6038_v38 = vcombine.high %v6030_v49, %v6030_v49 }
0x192e   : > { %v11303_v45 = vmul.f32 %v6885_v21, %v11294_v20  ;;  %v6282_v43 = vrot.slane %v6269_v48, %v12268_v7  ;;  %v11308_v9 = vmul.f32 %v6885_v21, %v11298_v14  ;;  %v11318_v39 = vmul.f32 %v6043_v33, %v11311_v36 }
0x192f   : > { %v6889_v17 = vrot.slane %v6879_v15, %v12268_v7  ;;  %v6893_v51 = vrot.slane %v6880_v41, %v12268_v7  ;;  %v6277_v57 = vcombine.high %v6269_v48, %v6269_v48  ;;  %v6047_v27 = vrot.slane %v6037_v59, %v12268_v7 }
0x1930   : > { %6918 = vrot.lane.b32.xlu0 %v11303_v45, %s12269_s2  ;;  %6920 = vrot.lane.b32.xlu1 %v11308_v9, %s12269_s2  ;;  %v11321_v4 = vmul.f32 %v6282_v43, %v11294_v20  ;;  %v11329_v24 = vmul.f32 %v6282_v43, %v11311_v36  ;;  %v6276_v29 = vrot.slane %v6262_v46, %v12267_v42 }
0x1931   : > { %v11333_v50 = vmul.f32 %v6889_v17, %v11298_v14  ;;  %v11341_v11 = vmul.f32 %v6889_v17, %v11294_v20  ;;  %v11346_v58 = vmul.f32 %v6893_v51, %v11298_v14  ;;  %v6881_v56 = vcombine.high %v6879_v15, %v6879_v15 }
0x1932   : > { %v11353_v55 = vmul.f32 %v6893_v51, %v11294_v20  ;;  %v6290_v19 = vrot.slane %v6277_v57, %v12268_v7  ;;  %v11357_v6 = vmul.f32 %v6047_v27, %v11311_v36  ;;  %v6286_v34 = vrot.slane %v6276_v29, %v12268_v7 }
0x1933   : > { %v6278_v54 = vcombine.high %v6276_v29, %v6276_v29  ;;  %v6897_v10 = vrot.slane %v6881_v56, %v12268_v7  ;;  %v6051_v2 = vrot.slane %v6038_v38, %v12268_v7  ;;  %v6657_v8 = vrot.slane %v6647_v23, %v12268_v7 }
0x1934   : > { %6068 = vrot.lane.b32.xlu0 %v11318_v39, %s12269_s2  ;;  %6317 = vrot.lane.b32.xlu1 %v11321_v4, %s12269_s2  ;;  %v11366_v32 = vmul.f32 %v6290_v19, %v11311_v36  ;;  %v11370_v35 = vmul.f32 %v6286_v34, %v11311_v36  ;;  %v11381_v16 = vmul.f32 %v6286_v34, %v11294_v20 }
0x1935   : > { %v11377_v25 = vmul.f32 %v6897_v10, %v11294_v20  ;;  %v6294_v26 = vrot.slane %v6278_v54, %v12268_v7  ;;  %v11394_v22 = vmul.f32 %v6290_v19, %v11294_v20  ;;  %v11402_v37 = vmul.f32 %v6051_v2, %v11311_v36 }
0x1936   : > { %v11405_v42 = vmul.f32 %v6897_v10, %v11298_v14  ;;  %v6661_v5 = vrot.slane %v6648_v53, %v12268_v7  ;;  %v11413_v0 = vmul.f32 %v6657_v8, %v11294_v20  ;;  %v6039_v40 = vcombine.high %v6037_v59, %v6037_v59 }
0x1937   : > { %v11391_v13 = vmul.f32 %v6294_v26, %v11311_v36  ;;  %v11417_v52 = vmul.f32 %v6294_v26, %v11294_v20  ;;  %v6649_v12 = vcombine.high %v6647_v23, %v6647_v23  ;;  %v11427_v3 = vmul.f32 %v6653_v18, %v11294_v20 }
0x1938   : > { %6315 = vrot.lane.b32.xlu0 %v11329_v24, %s12269_s2  ;;  %6924 = vrot.lane.b32.xlu1 %v11333_v50, %s12269_s2  ;;  %v11424_v49 = vmul.f32 %v6661_v5, %v11294_v20  ;;  %v6055_v44 = vrot.slane %v6039_v40, %v12268_v7 }
0x1939   : > { %v6665_v48 = vrot.slane %v6649_v12, %v12268_v7 }
0x193a   : > { %v11435_v21 = vmul.f32 %v6055_v44, %v11311_v36 }
0x193b   : > { %v11443_v33 = vmul.f32 %v6665_v48, %v11294_v20 }
0x193c   : > { %6922 = vrot.lane.b32.xlu0 %v11341_v11, %s12269_s2  ;;  %6928 = vrot.lane.b32.xlu1 %v11346_v58, %s12269_s2 }
0x1940   : > { %6926 = vrot.lane.b32.xlu0 %v11353_v55, %s12269_s2  ;;  %6070 = vrot.lane.b32.xlu1 %v11357_v6, %s12269_s2 }
0x1944   : > { %6323 = vrot.lane.b32.xlu0 %v11366_v32, %s12269_s2  ;;  %6319 = vrot.lane.b32.xlu1 %v11370_v35, %s12269_s2 }
0x1948   : > { %6930 = vrot.lane.b32.xlu0 %v11377_v25, %s12269_s2  ;;  %6321 = vrot.lane.b32.xlu1 %v11381_v16, %s12269_s2 }
0x194c   : > { %6327 = vrot.lane.b32.xlu0 %v11391_v13, %s12269_s2  ;;  %6325 = vrot.lane.b32.xlu1 %v11394_v22, %s12269_s2 }
0x1950   : > { %6072 = vrot.lane.b32.xlu0 %v11402_v37, %s12269_s2  ;;  %6932 = vrot.lane.b32.xlu1 %v11405_v42, %s12269_s2 }
0x1954   : > { %6680 = vrot.lane.b32.xlu0 %v11413_v0, %s12269_s2  ;;  %6329 = vrot.lane.b32.xlu1 %v11417_v52, %s12269_s2 }
0x1958   : > { %6682 = vrot.lane.b32.xlu0 %v11424_v49, %s12269_s2  ;;  %6678 = vrot.lane.b32.xlu1 %v11427_v3, %s12269_s2 }
0x195c   : > { %6200 = vrot.lane.b32.xlu0 %v11311_v36, %s12288_s3  ;;  %6074 = vrot.lane.b32.xlu1 %v11435_v21, %s12269_s2 }
0x1960   : > { %7146 = vrot.lane.b32.xlu0 %v11298_v14, %s12288_s3  ;;  %6684 = vrot.lane.b32.xlu1 %v11443_v33, %s12269_s2  ;;  %s12299_s2 = sld [smem:[#allocation26_spill]] }
0x1964   : > { %6480 = vrot.lane.b32.xlu0 %v11294_v20, %s12245_s5  ;;  %6543 = vrot.lane.b32.xlu1 %v11294_v20, %s12288_s3  ;;  %s12298_s3 = sld [smem:[#allocation25_spill]] }
0x1968   : > { %6165 = vrot.lane.b32.xlu1 %v11311_v36, %s12245_s5 }
0x196c   : > { %7083 = vrot.lane.b32.xlu1 %v11298_v14, %s12245_s5  ;;  %s12294_s5 = sld [smem:[#allocation24_spill]] }
0x19a2   : > { %v6919_v7 = vpop.permute.xlu0 %6918  ;;  %v6921_v43 = vpop.permute.xlu1 %6920 }
0x19a3   : > { %v6942_v15 = vadd.f32 %v6919_v7, %v11303_v45  ;;  %v6943_v41 = vadd.f32 %v6921_v43, %v11308_v9 }
0x19a5   : > { %v6950_v61 = vmul.f32 0.70710677, %v6942_v15  ;;  %v6951_v17 = vmul.f32 0.70710677, %v6943_v41 }
0x19a6   : > { %v6069_v59 = vpop.permute.xlu0 %6068  ;;  %v6318_v20 = vpop.permute.xlu1 %6317 }
0x19a7   : > { %v6958_v46 = vsel %vm3398_vm15, %v6950_v61, -inf  ;;  %v6080_v51 = vadd.f32 %v6069_v59, %v11318_v39  ;;  %v6959_v57 = vsel %vm3400_vm14, %v6951_v17, -inf  ;;  %v6340_v36 = vadd.f32 %v6318_v20, %v11321_v4 }
0x19a8   : > { %v6960_v27 = vmax.f32 %v6958_v46, %v6959_v57 }
0x19a9   : > { %v6084_v14 = vmul.f32 0.70710677, %v6080_v51  ;;  %v11463_v29 = vmul.f32 0.70710677, %v6340_v36 }
0x19aa   : > { %v6316_v45 = vpop.permute.xlu0 %6315  ;;  %v6961_v56 = vrot.slane %v6960_v27, 4  ;;  %v6925_v34 = vpop.permute.xlu1 %6924 }
0x19ab   : > { %v6088_v9 = vsel %vm1842_vm10, %v6084_v14, -inf  ;;  %v6339_v19 = vadd.f32 %v6316_v45, %v11329_v24  ;;  %v6945_v54 = vadd.f32 %v6925_v34, %v11333_v50  ;;  %v6356_v4 = vsel %vm3400_vm14, %v11463_v29, -inf }
0x19ac   : > { %v6089_v47 = vrot.slane %v6088_v9, 4  ;;  %v6962_v39 = vmax.f32 %v6960_v27, %v6961_v56 }
0x19ad   : > { %v11468_v10 = vmul.f32 0.70710677, %v6339_v19  ;;  %v11474_v23 = vmul.f32 0.70710677, %v6945_v54 }
0x19ae   : > { %v6090_v60 = vmax.f32 %v6088_v9, %v6089_v47  ;;  %v6923_v38 = vpop.permute.xlu0 %6922  ;;  %v6963_v26 = vrot.slane %v6962_v39, 2  ;;  %v6929_v2 = vpop.permute.xlu1 %6928 }
0x19af   : > { %v6355_v1 = vsel %vm3398_vm15, %v11468_v10, -inf  ;;  %v6944_v24 = vadd.f32 %v6923_v38, %v11341_v11  ;;  %v6947_v50 = vadd.f32 %v6929_v2, %v11346_v58  ;;  %v6968_v15 = vsel %vm3400_vm14, %v11474_v23, -inf }
0x19b0   : > { %v6091_v53 = vrot.slane %v6090_v60, 2  ;;  %v6357_v8 = vmax.f32 %v6355_v1, %v6356_v4  ;;  %v6964_v5 = vmax.f32 %v6962_v39, %v6963_v26 }
0x19b1   : > { %v11478_v18 = vmul.f32 0.70710677, %v6944_v24  ;;  %v11480_v44 = vmul.f32 0.70710677, %v6947_v50 }
0x19b2   : > { %v6092_v40 = vmax.f32 %v6090_v60, %v6091_v53  ;;  %v6358_v12 = vrot.slane %v6357_v8, 4  ;;  %v6927_v48 = vpop.permute.xlu0 %6926  ;;  %v6965_v7 = vrot.slane %v6964_v5, 1  ;;  %v6071_v41 = vpop.permute.xlu1 %6070 }
0x19b3   : > { %v6967_v11 = vsel %vm3398_vm15, %v11478_v18, -inf  ;;  %v6946_v43 = vadd.f32 %v6927_v48, %v11353_v55  ;;  %v6081_v57 = vadd.f32 %v6071_v41, %v11357_v6  ;;  %v6977_v56 = vsel %vm3400_vm14, %v11480_v44, -inf }
0x19b4   : > { %v6093_v59 = vrot.slane %v6092_v40, 1  ;;  %v6359_v58 = vmax.f32 %v6357_v8, %v6358_v12  ;;  %v6969_v46 = vmax.f32 %v6967_v11, %v6968_v15  ;;  %v6966_v51 = vmax.f32 %v6964_v5, %v6965_v7 }
0x19b5   : > { %v11487_v20 = vmul.f32 0.70710677, %v6946_v43  ;;  %v11494_v47 = vmul.f32 0.70710677, %v6081_v57 }
0x19b6   : > { %v6094_v36 = vmax.f32 %v6092_v40, %v6093_v59  ;;  %v6360_v27 = vrot.slane %v6359_v58, 2  ;;  %v6970_v45 = vrot.slane %v6969_v46, 4  ;;  %v6324_v9 = vpop.permute.xlu0 %6323  ;;  %v6994_v19 = vsub.f32 %v6950_v61, %v6966_v51  ;;  %v6320_v54 = vpop.permute.xlu1 %6319 }
0x19b7   : > { %v6995_v34 = vsub.f32 %v6951_v17, %v6966_v51  ;;  %v6976_v55 = vsel %vm3398_vm15, %v11487_v20, -inf  ;;  %v6095_v1 = vsel %vm1842_vm10, %v11494_v47, -inf  ;;  %v6343_v24 = vadd.f32 %v6324_v9, %v11366_v32 }
0x19b8   : > { %v6116_v39 = vsub.f32 %v6084_v14, %v6094_v36  ;;  %v6361_v60 = vmax.f32 %v6359_v58, %v6360_v27  ;;  %v6971_v4 = vmax.f32 %v6969_v46, %v6970_v45  ;;  %v6978_v38 = vmax.f32 %v6976_v55, %v6977_v56 }
0x19b9   : > { %v7002_v6 = vmul.f32 1.442695, %v6994_v19  ;;  %v7004_v26 = vmul.f32 1.442695, %v6995_v34  ;;  %v6096_v50 = vrot.slane %v6095_v1, 4  ;;  %v6341_v14 = vadd.f32 %v6320_v54, %v11370_v35 }
0x19ba   : > { %v6120_v2 = vmul.f32 1.442695, %v6116_v39  ;;  %v6362_v61 = vrot.slane %v6361_v60, 1  ;;  %v6972_v17 = vrot.slane %v6971_v4, 2  ;;  %v6979_v53 = vrot.slane %v6978_v38, 4  ;;  %v6931_v8 = vpop.permute.xlu0 %6930  ;;  %v6322_v40 = vpop.permute.xlu1 %6321 }
0x19bb   : > { %8583 = vpow2.f32 %v7002_v6  ;;  %v11499_v5 = vmul.f32 0.70710677, %v6343_v24  ;;  %v6097_v15 = vmax.f32 %v6095_v1, %v6096_v50  ;;  %v11504_v11 = vmul.f32 0.70710677, %v6341_v14 }
0x19bc   : > { %8585 = vpow2.f32 %v7004_v26  ;;  %v6363_v12 = vmax.f32 %v6361_v60, %v6362_v61  ;;  %v6973_v48 = vmax.f32 %v6971_v4, %v6972_v17  ;;  %v6980_v7 = vmax.f32 %v6978_v38, %v6979_v53 }
0x19bd   : > { %8587 = vpow2.f32 %v6120_v2  ;;  %v6373_v32 = vsel %vm3398_vm15, %v11499_v5, -inf  ;;  %v6098_v35 = vrot.slane %v6097_v15, 2  ;;  %v6364_v51 = vsel %vm3398_vm15, %v11504_v11, -inf }
0x19be   : > { %v6391_v43 = vsub.f32 %v11468_v10, %v6363_v12  ;;  %v6392_v41 = vsub.f32 %v11463_v29, %v6363_v12  ;;  %v6974_v59 = vrot.slane %v6973_v48, 1  ;;  %v6981_v58 = vrot.slane %v6980_v7, 2  ;;  %v6328_v46 = vpop.permute.xlu0 %6327  ;;  %v6326_v19 = vpop.permute.xlu1 %6325 }
0x19bf   : > { %v6948_v57 = vadd.f32 %v6931_v8, %v11377_v25  ;;  %v6342_v36 = vadd.f32 %v6322_v40, %v11381_v16  ;;  %v6099_v34 = vmax.f32 %v6097_v15, %v6098_v35  ;;  %v6345_v55 = vadd.f32 %v6328_v46, %v11391_v13 }
0x19c0   : > { %v6399_v27 = vmul.f32 1.442695, %v6391_v43  ;;  %v6401_v45 = vmul.f32 1.442695, %v6392_v41  ;;  %v6975_v56 = vmax.f32 %v6973_v48, %v6974_v59  ;;  %v6982_v9 = vmax.f32 %v6980_v7, %v6981_v58 }
0x19c1   : > { %v11512_v10 = vmul.f32 0.70710677, %v6948_v57  ;;  %v11514_v29 = vmul.f32 0.70710677, %v6342_v36  ;;  %v6100_v16 = vrot.slane %v6099_v34, 1 }
0x19c2   : > { %8589 = vpow2.f32 %v6399_v27  ;;  %v6996_v54 = vsub.f32 %v11478_v18, %v6975_v56  ;;  %v6997_v39 = vsub.f32 %v11474_v23, %v6975_v56  ;;  %v6983_v25 = vrot.slane %v6982_v9, 1  ;;  %v6073_v60 = vpop.permute.xlu0 %6072  ;;  %v6933_v8 = vpop.permute.xlu1 %6932 }
0x19c3   : > { %8591 = vpow2.f32 %v6401_v45  ;;  %v6985_v4 = vsel %vm3398_vm15, %v11512_v10, -inf  ;;  %v6365_v38 = vsel %vm3400_vm14, %v11514_v29, -inf  ;;  %v6101_v13 = vmax.f32 %v6099_v34, %v6100_v16 }
0x19c4   : > { %v7006_v6 = vmul.f32 1.442695, %v6996_v54  ;;  %v7008_v26 = vmul.f32 1.442695, %v6997_v39  ;;  %v6984_v1 = vmax.f32 %v6982_v9, %v6983_v25  ;;  %v6366_v24 = vmax.f32 %v6364_v51, %v6365_v38 }
0x19c5   : > { %v11523_v2 = vmul.f32 0.70710677, %v6345_v55  ;;  %v6344_v18 = vadd.f32 %v6326_v19, %v11394_v22  ;;  %v6082_v23 = vadd.f32 %v6073_v60, %v11402_v37  ;;  %v6117_v50 = vsub.f32 %v11494_v47, %v6101_v13 }
0x19c6   : > { %8593 = vpow2.f32 %v7006_v6  ;;  %v6998_v61 = vsub.f32 %v11487_v20, %v6984_v1  ;;  %v6999_v17 = vsub.f32 %v11480_v44, %v6984_v1  ;;  %v6367_v53 = vrot.slane %v6366_v24, 4  ;;  %v6681_v45 = vpop.permute.xlu0 %6680  ;;  %v6330_v56 = vpop.permute.xlu1 %6329 }
0x19c7   : > { %8595 = vpow2.f32 %v7008_v26  ;;  %v11532_v14 = vsel %vm3398_vm15, %v11523_v2, -inf  ;;  %v11534_v40 = vmul.f32 0.70710677, %v6344_v18  ;;  %v11538_v7 = vmul.f32 0.70710677, %v6082_v23 }
0x19c8   : > { %v11536_v12 = vpop.eup %8583  ;;  %v7010_v22 = vmul.f32 1.442695, %v6998_v61  ;;  %v7012_v37 = vmul.f32 1.442695, %v6999_v17  ;;  %v6368_v48 = vmax.f32 %v6366_v24, %v6367_v53  ;;  %v6122_v15 = vmul.f32 1.442695, %v6117_v50 }
0x19c9   : > { %v11540_v20 = vpop.eup %8585  ;;  %v7026_v44 = vrot.slane %v11536_v12, 4  ;;  %v6374_v47 = vsel %vm3400_vm14, %v11534_v40, -inf  ;;  %v6949_v43 = vadd.f32 %v6933_v8, %v11405_v42  ;;  %v6102_v51 = vsel %vm1842_vm10, %v11538_v7, -inf }
0x19ca   : > { %v11546_v41 = vpop.eup %8587  ;;  %v7027_v59 = vrot.slane %v11540_v20, 4  ;;  %8597 = vpow2.f32 %v7010_v22  ;;  %v6369_v58 = vrot.slane %v6368_v48, 2  ;;  %v6375_v46 = vmax.f32 %v6373_v32, %v6374_v47 }
0x19cb   : > { %v6128_v35 = vsel %vm1842_vm10, %v11546_v41, 0.0  ;;  %8599 = vpow2.f32 %v7012_v37  ;;  %v11553_v57 = vmul.f32 0.70710677, %v6949_v43  ;;  %v6103_v32 = vrot.slane %v6102_v51, 4 }
0x19cc   : > { %v7028_v36 = vsel %vm1222_vm6, %v7026_v44, %v7027_v59  ;;  %v6129_v27 = vrot.slane %v6128_v35, 4  ;;  %8601 = vpow2.f32 %v6122_v15  ;;  %v6370_v42 = vmax.f32 %v6368_v48, %v6369_v58 }
0x19cd   : > { %v7042_v9 = vsel %vm1842_vm10, %v7028_v36, 0.0  ;;  %v6376_v19 = vrot.slane %v6375_v46, 4  ;;  %v6986_v34 = vsel %vm3400_vm14, %v11553_v57, -inf  ;;  %v6104_v38 = vmax.f32 %v6102_v51, %v6103_v32 }
0x19ce   : > { %v7043_v55 = vrot.slane %v7042_v9, 4  ;;  %v6130_v54 = vadd.f32 %v6129_v27, %v6128_v35  ;;  %v6371_v39 = vrot.slane %v6370_v42, 1  ;;  %v6987_v25 = vmax.f32 %v6985_v4, %v6986_v34 }
0x19cf   : > { %v11559_v60 = vpop.eup %8589  ;;  %v6377_v16 = vmax.f32 %v6375_v46, %v6376_v19  ;;  %v6691_v6 = vadd.f32 %v6681_v45, %v11413_v0  ;;  %v11563_v26 = vadd.f32 %v6330_v56, %v11417_v52  ;;  %v6105_v17 = vrot.slane %v6104_v38, 2 }
0x19d0   : > { %v11565_v1 = vpop.eup %8591  ;;  %v11567_v24 = vadd.f32 %v7043_v55, %v7042_v9  ;;  %v6131_v13 = vrot.slane %v6130_v54, 2  ;;  %v6423_v18 = vrot.slane %v11559_v60, 4  ;;  %v6372_v23 = vmax.f32 %v6370_v42, %v6371_v39 }
0x19d1   : > { %v6424_v61 = vrot.slane %v11565_v1, 4  ;;  %v6378_v4 = vrot.slane %v6377_v16, 2  ;;  %v6988_v53 = vrot.slane %v6987_v25, 4  ;;  %v11573_v52 = vmul.f32 0.70710677, %v6691_v6 }
0x19d2   : > { %v6132_v8 = vadd.f32 %v6131_v13, %v6130_v54  ;;  %v6393_v50 = vsub.f32 %v11504_v11, %v6372_v23  ;;  %v6394_v0 = vsub.f32 %v11514_v29, %v6372_v23  ;;  %v6106_v44 = vmax.f32 %v6104_v38, %v6105_v17 }
0x19d3   : > { %v11575_v22 = vpop.eup %8593  ;;  %v6425_v37 = vsel %vm1222_vm6, %v6423_v18, %v6424_v61  ;;  %v6379_v48 = vmax.f32 %v6377_v16, %v6378_v4  ;;  %v6989_v15 = vmax.f32 %v6987_v25, %v6988_v53  ;;  %v6679_v4 = vpop.permute.xlu1 %6678 }
0x19d4   : > { %v11578_v47 = vpop.eup %8595  ;;  %v6133_v43 = vrot.slane %v6132_v8, 1  ;;  %v6439_v59 = vsel %vm1842_vm10, %v6425_v37, 0.0  ;;  %v7029_v58 = vrot.slane %v11575_v22, 4  ;;  %v6403_v46 = vmul.f32 1.442695, %v6393_v50 }
0x19d5   : > { %v6440_v11 = vrot.slane %v6439_v59, 4  ;;  %v7030_v29 = vrot.slane %v11578_v47, 4  ;;  %v6405_v35 = vmul.f32 1.442695, %v6394_v0  ;;  %v6380_v51 = vrot.slane %v6379_v48, 1 }
0x19d6   : > { %v6134_v36 = vadd.f32 %v6133_v43, %v6132_v8  ;;  %8603 = vpow2.f32 %v6403_v46  ;;  %v6107_v27 = vrot.slane %v6106_v44, 1  ;;  %v6990_v42 = vrot.slane %v6989_v15, 2  ;;  %v6683_v46 = vpop.permute.xlu0 %6682 }
0x19d7   : > { %v11583_v45 = vpop.eup %8597  ;;  %v6441_v56 = vadd.f32 %v6440_v11, %v6439_v59  ;;  %v7031_v9 = vsel %vm1222_vm6, %v7029_v58, %v7030_v29  ;;  %8605 = vpow2.f32 %v6405_v35  ;;  %v6381_v19 = vmax.f32 %v6379_v48, %v6380_v51 }
0x19d8   : > { %v11586_v32 = vpop.eup %8599  ;;  %8607 = vrcp.f32 %v6134_v36  ;;  %v7049_v34 = vsel %vm1842_vm10, %v7031_v9, 0.0  ;;  %v7032_v55 = vrot.slane %v11583_v45, 4  ;;  %v6108_v54 = vmax.f32 %v6106_v44, %v6107_v27 }
0x19d9   : > { %v11590_v39 = vpop.eup %8601  ;;  %v6442_v25 = vrot.slane %v6441_v56, 2  ;;  %v7050_v16 = vrot.slane %v7049_v34, 4  ;;  %v7033_v38 = vrot.slane %v11586_v32, 4  ;;  %v6395_v6 = vsub.f32 %v11499_v5, %v6381_v19 }
0x19da   : > { %v6135_v13 = vsel %vm1842_vm10, %v11590_v39, 0.0  ;;  %v6396_v18 = vsub.f32 %v11534_v40, %v6381_v19  ;;  %v6118_v23 = vsub.f32 %v11538_v7, %v6108_v54  ;;  %v6991_v61 = vmax.f32 %v6989_v15, %v6990_v42  ;;  %v6075_v42 = vpop.permute.xlu1 %6074 }
0x19db   : > { %v6443_v17 = vadd.f32 %v6442_v25, %v6441_v56  ;;  %v11598_v53 = vadd.f32 %v7050_v16, %v7049_v34  ;;  %v7034_v8 = vsel %vm1222_vm6, %v7032_v55, %v7033_v38  ;;  %v6136_v50 = vrot.slane %v6135_v13, 4 }
0x19dc   : > { %v7056_v0 = vsel %vm1842_vm10, %v7034_v8, 0.0  ;;  %v6407_v37 = vmul.f32 1.442695, %v6395_v6  ;;  %v6409_v48 = vmul.f32 1.442695, %v6396_v18  ;;  %v6992_v5 = vrot.slane %v6991_v61, 1 }
0x19dd   : > { %v6444_v44 = vrot.slane %v6443_v17, 1  ;;  %v7057_v43 = vrot.slane %v7056_v0, 4  ;;  %v6137_v59 = vadd.f32 %v6136_v50, %v6135_v13  ;;  %v6124_v58 = vmul.f32 1.442695, %v6118_v23 }
0x19de   : > { %8609 = vpow2.f32 %v6407_v37  ;;  %v6993_v40 = vmax.f32 %v6991_v61, %v6992_v5  ;;  %v6705_v7 = vsel %vm1842_vm10, %v11573_v52, -inf  ;;  %v11605_v15 = vmul.f32 0.70710677, %v11563_v26 }
0x19df   : > { %v6445_v11 = vadd.f32 %v6444_v44, %v6443_v17  ;;  %v11607_v29 = vadd.f32 %v7057_v43, %v7056_v0  ;;  %v6138_v35 = vrot.slane %v6137_v59, 2  ;;  %8611 = vpow2.f32 %v6409_v48 }
0x19e0   : > { %8613 = vpow2.f32 %v6124_v58  ;;  %v7000_v51 = vsub.f32 %v11512_v10, %v6993_v40  ;;  %v7001_v36 = vsub.f32 %v11553_v57, %v6993_v40  ;;  %v6706_v27 = vrot.slane %v6705_v7, 4 }
0x19e1   : > { %8615 = vrcp.f32 %v6445_v11  ;;  %v6139_v56 = vadd.f32 %v6138_v35, %v6137_v59  ;;  %v6383_v9 = vsel %vm3400_vm14, %v11605_v15, -inf  ;;  %v6692_v26 = vadd.f32 %v6683_v46, %v11424_v49 }
0x19e2   : > { %v7014_v19 = vmul.f32 1.442695, %v7000_v51  ;;  %v7016_v34 = vmul.f32 1.442695, %v7001_v36  ;;  %v6707_v55 = vmax.f32 %v6705_v7, %v6706_v27  ;;  %v6384_v54 = vmax.f32 %v11532_v14, %v6383_v9 }
0x19e3   : > { %v11615_v25 = vpop.eup %8603  ;;  %v6140_v16 = vrot.slane %v6139_v56, 1  ;;  %v11617_v10 = vmul.f32 0.70710677, %v6692_v26  ;;  %v6690_v57 = vadd.f32 %v6679_v4, %v11427_v3  ;;  %v6083_v38 = vadd.f32 %v6075_v42, %v11435_v21 }
0x19e4   : > { %v11621_v6 = vpop.eup %8605  ;;  %v6426_v13 = vrot.slane %v11615_v25, 4  ;;  %8617 = vpow2.f32 %v7014_v19  ;;  %v6708_v49 = vrot.slane %v6707_v55, 2  ;;  %v6385_v18 = vrot.slane %v6384_v54, 4 }
0x19e5   : > { %v8608_v23 = vpop.eup %8607  ;;  %v6141_v61 = vadd.f32 %v6140_v16, %v6139_v56  ;;  %v6427_v14 = vrot.slane %v11621_v6, 4  ;;  %8619 = vpow2.f32 %v7016_v34  ;;  %v6712_v17 = vsel %vm1842_vm10, %v11617_v10, -inf }
0x19e6   : > { %v11628_v8 = vmul.f32 %v8608_v23, %v11546_v41  ;;  %v6709_v3 = vmax.f32 %v6707_v55, %v6708_v49  ;;  %v6386_v21 = vmax.f32 %v6384_v54, %v6385_v18  ;;  %v6713_v4 = vrot.slane %v6712_v17, 4 }
0x19e7   : > { %8621 = vrcp.f32 %v6141_v61  ;;  %v6428_v50 = vsel %vm1222_vm6, %v6426_v13, %v6427_v14  ;;  %v11631_v0 = vmul.f32 0.70710677, %v6690_v57  ;;  %v11633_v37 = vmul.f32 0.70710677, %v6083_v38 }
0x19e8   : > { %v6446_v48 = vsel %vm1842_vm10, %v6428_v50, 0.0  ;;  %v6710_v5 = vrot.slane %v6709_v3, 1  ;;  %v6387_v44 = vrot.slane %v6386_v21, 2  ;;  %v6714_v43 = vmax.f32 %v6712_v17, %v6713_v4 }
0x19e9   : > { %v6447_v59 = vrot.slane %v6446_v48, 4  ;;  %v6698_v41 = vsel %vm1842_vm10, %v11631_v0, -inf  ;;  %v6109_v58 = vsel %vm1842_vm10, %v11633_v37, -inf  ;;  %v7045_v40 = vrot.slane %v11567_v24, 2 }
0x19ea   : > { %v6711_v7 = vmax.f32 %v6709_v3, %v6710_v5  ;;  %v6388_v46 = vmax.f32 %v6386_v21, %v6387_v44  ;;  %v6715_v11 = vrot.slane %v6714_v43, 2  ;;  %v6699_v35 = vrot.slane %v6698_v41, 4 }
0x19eb   : > { %v11641_v51 = vpop.eup %8609  ;;  %v6448_v36 = vadd.f32 %v6447_v59, %v6446_v48  ;;  %v6110_v27 = vrot.slane %v6109_v58, 4  ;;  %v11644_v42 = vadd.f32 %v7045_v40, %v11567_v24  ;;  %v7052_v56 = vrot.slane %v11598_v53, 2 }
0x19ec   : > { %v11647_v9 = vpop.eup %8611  ;;  %v6429_v26 = vrot.slane %v11641_v51, 4  ;;  %v6727_v19 = vsub.f32 %v11573_v52, %v6711_v7  ;;  %v6389_v34 = vrot.slane %v6388_v46, 1  ;;  %v6716_v55 = vmax.f32 %v6714_v43, %v6715_v11 }
0x19ed   : > { %v11651_v54 = vpop.eup %8613  ;;  %v6449_v16 = vrot.slane %v6448_v36, 2  ;;  %v6430_v57 = vrot.slane %v11647_v9, 4  ;;  %v6700_v38 = vmax.f32 %v6698_v41, %v6699_v35  ;;  %v6111_v13 = vmax.f32 %v6109_v58, %v6110_v27 }
0x19ee   : > { %v8616_v49 = vpop.eup %8615  ;;  %v6142_v24 = vsel %vm1842_vm10, %v11651_v54, 0.0  ;;  %v6732_v18 = vmul.f32 1.442695, %v6727_v19  ;;  %v6390_v23 = vmax.f32 %v6388_v46, %v6389_v34  ;;  %v6717_v61 = vrot.slane %v6716_v55, 1 }
0x19ef   : > { %v11657_v14 = vmul.f32 %v8616_v49, %v11559_v60  ;;  %v11660_v52 = vmul.f32 %v8616_v49, %v11565_v1  ;;  %v6450_v17 = vadd.f32 %v6449_v16, %v6448_v36  ;;  %v6431_v3 = vsel %vm1222_vm6, %v6429_v26, %v6430_v57 }
0x19f0   : > { %v6453_v21 = vsel %vm1842_vm10, %v6431_v3, 0.0  ;;  %v6143_v4 = vrot.slane %v6142_v24, 4  ;;  %8623 = vpow2.f32 %v6732_v18  ;;  %v6397_v50 = vsub.f32 %v11523_v2, %v6390_v23  ;;  %v6685_v2 = vpop.permute.xlu1 %6684 }
0x19f1   : > { %v11665_v48 = vpop.eup %8617  ;;  %v6451_v5 = vrot.slane %v6450_v17, 1  ;;  %v6454_v44 = vrot.slane %v6453_v21, 4  ;;  %v6398_v43 = vsub.f32 %v11605_v15, %v6390_v23  ;;  %v6718_v60 = vmax.f32 %v6716_v55, %v6717_v61 }
0x19f2   : > { %v11668_v59 = vpop.eup %8619  ;;  %v6144_v1 = vadd.f32 %v6143_v4, %v6142_v24  ;;  %v7035_v41 = vrot.slane %v11665_v48, 4  ;;  %v6411_v58 = vmul.f32 1.442695, %v6397_v50  ;;  %v6701_v40 = vrot.slane %v6700_v38, 2  ;;  %v11678_v24 = vpop.permute.xlu0 %6200 }
0x19f3   : > { %v6452_v7 = vadd.f32 %v6451_v5, %v6450_v17  ;;  %v6455_v46 = vadd.f32 %v6454_v44, %v6453_v21  ;;  %v7036_v11 = vrot.slane %v11668_v59, 4  ;;  %v6413_v35 = vmul.f32 1.442695, %v6398_v43 }
0x19f4   : > { %v8622_v36 = vpop.eup %8621  ;;  %v6145_v27 = vrot.slane %v6144_v1, 2  ;;  %8625 = vpow2.f32 %v6411_v58  ;;  %v6728_v26 = vsub.f32 %v11617_v10, %v6718_v60  ;;  %v6702_v15 = vmax.f32 %v6700_v38, %v6701_v40  ;;  %v11686_v5 = vpop.permute.xlu1 %6543 }
0x19f5   : > { %v11674_v19 = vmul.f32 %v8622_v36, %v11590_v39  ;;  %8627 = vrcp.f32 %v6452_v7  ;;  %v6456_v34 = vrot.slane %v6455_v46, 2  ;;  %v7037_v55 = vsel %vm1222_vm6, %v7035_v41, %v7036_v11 }
0x19f6   : > { %v6146_v16 = vadd.f32 %v6145_v27, %v6144_v1  ;;  %v7063_v57 = vsel %vm1842_vm10, %v7037_v55, 0.0  ;;  %8629 = vpow2.f32 %v6413_v35  ;;  %v6734_v49 = vmul.f32 1.442695, %v6728_v26 }
0x19f7   : > { %v6457_v18 = vadd.f32 %v6456_v34, %v6455_v46  ;;  %v7064_v23 = vrot.slane %v7063_v57, 4  ;;  %v6703_v61 = vrot.slane %v6702_v15, 1  ;;  %v11682_v10 = vmul.f32 %v11657_v14, %v11678_v24 }
0x19f8   : > { %v6147_v39 = vrot.slane %v6146_v16, 1  ;;  %8631 = vpow2.f32 %v6734_v49  ;;  %v6112_v38 = vrot.slane %v6111_v13, 2  ;;  %v7047_v17 = vrot.slane %v11644_v42, 1  ;;  %v11700_v55 = vpop.permute.xlu1 %6165 }
0x19f9   : > { %v6458_v3 = vrot.slane %v6457_v18, 1  ;;  %v7065_v21 = vadd.f32 %v7064_v23, %v7063_v57  ;;  %v6704_v4 = vmax.f32 %v6702_v15, %v6703_v61  ;;  %v7053_v1 = vadd.f32 %v7052_v56, %v11598_v53 }
0x19fa   : > { %v6148_v44 = vadd.f32 %v6147_v39, %v6146_v16  ;;  %v6113_v43 = vmax.f32 %v6111_v13, %v6112_v38  ;;  %v7048_v60 = vadd.f32 %v7047_v17, %v11644_v42  ;;  %v7059_v40 = vrot.slane %v11607_v29, 2 }
0x19fb   : > { %v6459_v41 = vadd.f32 %v6458_v3, %v6457_v18  ;;  %v6726_v58 = vsub.f32 %v11631_v0, %v6704_v4  ;;  %v7066_v7 = vrot.slane %v7065_v21, 2  ;;  %v7054_v11 = vrot.slane %v7053_v1, 1 }
0x19fc   : > { %8633 = vrcp.f32 %v6148_v44  ;;  %v6114_v46 = vrot.slane %v6113_v43, 1  ;;  %v6693_v35 = vadd.f32 %v6685_v2, %v11443_v33  ;;  %v7060_v42 = vadd.f32 %v7059_v40, %v11607_v29 }
0x19fd   : > { %v11695_v36 = vpop.eup %8623  ;;  %8635 = vrcp.f32 %v6459_v41  ;;  %v6730_v13 = vmul.f32 1.442695, %v6726_v58  ;;  %v7067_v27 = vadd.f32 %v7066_v7, %v7065_v21  ;;  %v7055_v0 = vadd.f32 %v7054_v11, %v7053_v1 }
0x19fe   : > { %v6745_v53 = vsel %vm1842_vm10, %v11695_v36, 0.0  ;;  %v6115_v56 = vmax.f32 %v6113_v43, %v6114_v46  ;;  %8637 = vrcp.f32 %v7048_v60  ;;  %v7061_v15 = vrot.slane %v7060_v42, 1 }
0x19ff   : > { %v6746_v26 = vrot.slane %v6745_v53, 4  ;;  %8639 = vpow2.f32 %v6730_v13  ;;  %v7068_v34 = vrot.slane %v7067_v27, 1  ;;  %v11703_v2 = vmul.f32 0.70710677, %v6693_v35 }
0x1a00   : > { %v6119_v33 = vsub.f32 %v11633_v37, %v6115_v56  ;;  %8641 = vrcp.f32 %v7055_v0  ;;  %v11707_v29 = vmul.f32 %v11700_v55, %v11628_v8  ;;  %v7062_v49 = vadd.f32 %v7061_v15, %v7060_v42 }
0x1a01   : > { %v11709_v16 = vpop.eup %8625  ;;  %v6747_v57 = vadd.f32 %v6746_v26, %v6745_v53  ;;  %v7069_v18 = vadd.f32 %v7068_v34, %v7067_v27  ;;  %v11713_v23 = vmul.f32 %v11700_v55, %v11674_v19  ;;  %v6719_v38 = vsel %vm1842_vm10, %v11703_v2, -inf }
0x1a02   : > { %v8628_v61 = vpop.eup %8627  ;;  %v6432_v39 = vrot.slane %v11709_v16, 4  ;;  %v6126_v37 = vmul.f32 1.442695, %v6119_v33  ;;  %v11720_v17 = vmul.f32 %v11657_v14, %v11700_v55  ;;  %8643 = vrcp.f32 %v7062_v49  ;;  %v7084_v33 = vpop.permute.xlu1 %7083 }
0x1a03   : > { %v11722_v3 = vpop.eup %8629  ;;  %v11725_v21 = vmul.f32 %v8628_v61, %v11621_v6  ;;  %v6748_v4 = vrot.slane %v6747_v57, 2  ;;  %v6473_v44 = vmul.f32 %v8628_v61, %v11615_v25  ;;  %v6720_v60 = vrot.slane %v6719_v38, 4 }
0x1a04   : > { %v6433_v43 = vrot.slane %v11722_v3, 4  ;;  %8645 = vpow2.f32 %v6126_v37  ;;  %v11743_v46 = vmul.f32 %v11686_v5, %v11660_v52 }
0x1a05   : > { %v11730_v41 = vpop.eup %8631  ;;  %v6749_v58 = vadd.f32 %v6748_v4, %v6747_v57  ;;  %v11733_v14 = vmul.f32 %v6473_v44, %v11678_v24  ;;  %8647 = vrcp.f32 %v7069_v18  ;;  %v11736_v6 = vmul.f32 %v6473_v44, %v11700_v55 }
0x1a06   : > { %v6434_v40 = vsel %vm1222_vm6, %v6432_v39, %v6433_v43  ;;  %v6752_v25 = vsel %vm1842_vm10, %v11730_v41, 0.0  ;;  %v6721_v7 = vmax.f32 %v6719_v38, %v6720_v60  ;;  %v11750_v0 = vmul.f32 %v11686_v5, %v11725_v21 }
0x1a07   : > { %v6750_v11 = vrot.slane %v6749_v58, 1  ;;  %v6460_v35 = vsel %vm1842_vm10, %v6434_v40, 0.0  ;;  %v6753_v13 = vrot.slane %v6752_v25, 4  ;;  %v11755_v57 = vmul.f32 %v11678_v24, %v11628_v8 }
0x1a08   : > { %v6461_v27 = vrot.slane %v6460_v35, 4  ;;  %v6722_v53 = vrot.slane %v6721_v7, 2 }
0x1a09   : > { %v8634_v26 = vpop.eup %8633  ;;  %v6751_v15 = vadd.f32 %v6750_v11, %v6749_v58  ;;  %v6754_v34 = vadd.f32 %v6753_v13, %v6752_v25 }
0x1a0a   : > { %v8636_v49 = vpop.eup %8635  ;;  %v11758_v18 = vmul.f32 %v8634_v26, %v11651_v54  ;;  %v6462_v61 = vadd.f32 %v6461_v27, %v6460_v35  ;;  %v6723_v39 = vmax.f32 %v6721_v7, %v6722_v53  ;;  %v7147_v35 = vpop.permute.xlu0 %7146 }
0x1a0b   : > { %v8638_v38 = vpop.eup %8637  ;;  %v11762_v4 = vmul.f32 %v8636_v49, %v11647_v9  ;;  %8649 = vrcp.f32 %v6751_v15  ;;  %v6755_v44 = vrot.slane %v6754_v34, 2  ;;  %v6475_v43 = vmul.f32 %v8636_v49, %v11641_v51 }
0x1a0c   : > { %v11765_v60 = vpop.eup %8639  ;;  %v6463_v8 = vrot.slane %v6462_v61, 2  ;;  %v11768_v58 = vmul.f32 %v8638_v38, %v11540_v20  ;;  %v6724_v54 = vrot.slane %v6723_v39, 1  ;;  %v7074_v40 = vmul.f32 %v8638_v38, %v11536_v12 }
0x1a0d   : > { %v8642_v25 = vpop.eup %8641  ;;  %v6756_v7 = vadd.f32 %v6755_v44, %v6754_v34  ;;  %v6738_v11 = vsel %vm1842_vm10, %v11765_v60, 0.0  ;;  %v11774_v9 = vmul.f32 %v6475_v43, %v11678_v24  ;;  %v11777_v51 = vmul.f32 %v6475_v43, %v11700_v55 }
0x1a0e   : > { %v6464_v13 = vadd.f32 %v6463_v8, %v6462_v61  ;;  %v6739_v27 = vrot.slane %v6738_v11, 4  ;;  %v7077_v20 = vmul.f32 %v8642_v25, %v11578_v47  ;;  %v11781_v53 = vmul.f32 %v7147_v35, %v11768_v58 }
0x1a0f   : > { %v6757_v12 = vrot.slane %v6756_v7, 1  ;;  %v6725_v15 = vmax.f32 %v6723_v39, %v6724_v54  ;;  %v8644_v49 = vpop.eup %8643  ;;  %v7076_v42 = vmul.f32 %v8642_v25, %v11575_v22 }
0x1a10   : > { %v6465_v38 = vrot.slane %v6464_v13, 1  ;;  %v6740_v44 = vadd.f32 %v6739_v27, %v6738_v11  ;;  %v11785_v56 = vmul.f32 %v7147_v35, %v7077_v20  ;;  %v7166_v43 = vrot.slane %v11781_v53, 4 }
0x1a11   : > { %v11788_v61 = vpop.eup %8645  ;;  %v6758_v8 = vadd.f32 %v6757_v12, %v6756_v7  ;;  %v7079_v47 = vmul.f32 %v8644_v49, %v11586_v32  ;;  %v6729_v1 = vsub.f32 %v11703_v2, %v6725_v15  ;;  %v7078_v2 = vmul.f32 %v8644_v49, %v11583_v45 }
0x1a12   : > { %v8648_v26 = vpop.eup %8647  ;;  %v6466_v39 = vadd.f32 %v6465_v38, %v6464_v13  ;;  %v6741_v54 = vrot.slane %v6740_v44, 2  ;;  %v6149_v34 = vsel %vm1842_vm10, %v11788_v61, 0.0  ;;  %v7169_v11 = vrot.slane %v11785_v56, 4  ;;  %v11800_v13 = vpop.permute.xlu0 %6480 }
0x1a13   : > { %8651 = vrcp.f32 %v6758_v8  ;;  %v6150_v27 = vrot.slane %v6149_v34, 4  ;;  %v7081_v53 = vmul.f32 %v8648_v26, %v11668_v59  ;;  %v7154_v37 = vmul.f32 %v7147_v35, %v7079_v47 }
0x1a14   : > { %8653 = vrcp.f32 %v6466_v39  ;;  %v6742_v7 = vadd.f32 %v6741_v54, %v6740_v44  ;;  %v6736_v32 = vmul.f32 1.442695, %v6729_v1  ;;  %v7080_v15 = vmul.f32 %v8648_v26, %v11665_v48 }
0x1a15   : > { %v6151_v12 = vadd.f32 %v6150_v27, %v6149_v34  ;;  %v11798_v22 = vmul.f32 %v7147_v35, %v7081_v53  ;;  %v7172_v25 = vrot.slane %v7154_v37, 4  ;;  %v7086_v56 = vmul.f32 %v7074_v40, %v11800_v13 }
0x1a16   : > { %v6743_v38 = vrot.slane %v6742_v7, 1  ;;  %8655 = vpow2.f32 %v6736_v32  ;;  %v7088_v59 = vmul.f32 %v7076_v42, %v11800_v13  ;;  %v7090_v1 = vmul.f32 %v7078_v2, %v11800_v13 }
0x1a17   : > { %v6152_v8 = vrot.slane %v6151_v12, 2  ;;  %v7175_v44 = vrot.slane %v11798_v22, 4  ;;  %v7092_v45 = vmul.f32 %v7080_v15, %v11800_v13  ;;  %v7102_v37 = vrot.slane %v7086_v56, 4 }
0x1a18   : > { %v8650_v35 = vpop.eup %8649  ;;  %v6744_v34 = vadd.f32 %v6743_v38, %v6742_v7  ;;  %v7105_v49 = vrot.slane %v7088_v59, 4  ;;  %v7149_v39 = vmul.f32 %v7074_v40, %v11686_v5  ;;  %v7108_v54 = vrot.slane %v7090_v1, 4 }
0x1a19   : > { %v11810_v48 = vmul.f32 %v8650_v35, %v11695_v36  ;;  %v6153_v26 = vadd.f32 %v6152_v8, %v6151_v12  ;;  %v7111_v27 = vrot.slane %v7092_v45, 4  ;;  %v7151_v32 = vmul.f32 %v7076_v42, %v11686_v5 }
0x1a1a   : > { %8657 = vrcp.f32 %v6744_v34  ;;  %v7153_v22 = vmul.f32 %v7078_v2, %v11686_v5  ;;  %v7165_v50 = vrot.slane %v7149_v39, 4  ;;  %v7087_v7 = vmul.f32 %v7084_v33, %v11768_v58 }
0x1a1b   : > { %v6154_v63 = vrot.slane %v6153_v26, 1  ;;  %v7089_v38 = vmul.f32 %v7084_v33, %v7077_v20  ;;  %v7091_v56 = vmul.f32 %v7084_v33, %v7079_v47  ;;  %v7168_v59 = vrot.slane %v7151_v32, 4 }
0x1a1c   : > { %v7171_v40 = vrot.slane %v7153_v22, 4  ;;  %v7093_v31 = vmul.f32 %v7084_v33, %v7081_v53  ;;  %v7155_v36 = vmul.f32 %v7080_v15, %v11686_v5  ;;  %v7103_v8 = vrot.slane %v7087_v7, 4 }
0x1a1d   : > { %v6155_v12 = vadd.f32 %v6154_v63, %v6153_v26  ;;  %v7106_v1 = vrot.slane %v7089_v38, 4  ;;  %v7109_v45 = vrot.slane %v7091_v56, 4  ;;  %v7167_v42 = vsel %vm1222_vm6, %v7165_v50, %v7166_v43 }
0x1a1e   : > { %v7112_v35 = vrot.slane %v7093_v31, 4  ;;  %v7170_v2 = vsel %vm1222_vm6, %v7168_v59, %v7169_v11  ;;  %v7173_v34 = vsel %vm1222_vm6, %v7171_v40, %v7172_v25  ;;  %v7104_v58 = vsel %vm1222_vm6, %v7102_v37, %v7103_v8 }
0x1a1f   : > { %8659 = vrcp.f32 %v6155_v12  ;;  %v7107_v20 = vsel %vm1222_vm6, %v7105_v49, %v7106_v1  ;;  %v7110_v33 = vsel %vm1222_vm6, %v7108_v54, %v7109_v45  ;;  %v7118_v53 = vsel %vm1842_vm10, %v7104_v58, 0.0 }
0x1a20   : > { %v8652_v47 = vpop.eup %8651  ;;  %v7113_v63 = vsel %vm1222_vm6, %v7111_v27, %v7112_v35  ;;  %v7125_v31 = vsel %vm1842_vm10, %v7107_v20, 0.0  ;;  %v7132_v50 = vsel %vm1842_vm10, %v7110_v33, 0.0  ;;  %v7119_v25 = vrot.slane %v7118_v53, 4 }
0x1a21   : > { %v8654_v43 = vpop.eup %8653  ;;  %v11827_v11 = vmul.f32 %v8652_v47, %v11730_v41  ;;  %v7126_v15 = vrot.slane %v7125_v31, 4  ;;  %v7133_v37 = vrot.slane %v7132_v50, 4  ;;  %v11833_v39 = vsel %vm1842_vm10, %v7113_v63, 0.0 }
0x1a22   : > { %v11830_v49 = vmul.f32 %v8654_v43, %v11722_v3  ;;  %v7174_v26 = vrot.slane %v7155_v36, 4  ;;  %v7181_v54 = vsel %vm1842_vm10, %v7167_v42, 0.0  ;;  %v7120_v32 = vadd.f32 %v7119_v25, %v7118_v53 }
0x1a23   : > { %v11836_v27 = vpop.eup %8655  ;;  %v7127_v22 = vadd.f32 %v7126_v15, %v7125_v31  ;;  %v11838_v7 = vadd.f32 %v7133_v37, %v7132_v50  ;;  %v7140_v41 = vrot.slane %v11833_v39, 4  ;;  %v7182_v56 = vrot.slane %v7181_v54, 4 }
0x1a24   : > { %v6759_v38 = vsel %vm1842_vm10, %v11836_v27, 0.0  ;;  %v7176_v3 = vsel %vm1222_vm6, %v7174_v26, %v7175_v44  ;;  %v7188_v59 = vsel %vm1842_vm10, %v7170_v2, 0.0  ;;  %v7121_v36 = vrot.slane %v7120_v32, 2 }
0x1a25   : > { %v6760_v40 = vrot.slane %v6759_v38, 4  ;;  %v7128_v12 = vrot.slane %v7127_v22, 2  ;;  %v7189_v8 = vrot.slane %v7188_v59, 4  ;;  %v7183_v1 = vadd.f32 %v7182_v56, %v7181_v54 }
0x1a26   : > { %v7195_v45 = vsel %vm1842_vm10, %v7173_v34, 0.0  ;;  %v7202_v35 = vsel %vm1842_vm10, %v7176_v3, 0.0  ;;  %v11848_v42 = vmul.f32 %v8654_v43, %v11709_v16  ;;  %v11850_v33 = vadd.f32 %v7121_v36, %v7120_v32 }
0x1a27   : > { %v8658_v58 = vpop.eup %8657  ;;  %v6761_v20 = vadd.f32 %v6760_v40, %v6759_v38  ;;  %v11852_v44 = vadd.f32 %v7128_v12, %v7127_v22  ;;  %v7190_v47 = vadd.f32 %v7189_v8, %v7188_v59  ;;  %v7184_v63 = vrot.slane %v7183_v1, 2 }
0x1a28   : > { %v11855_v2 = vmul.f32 %v8658_v58, %v11765_v60  ;;  %v7196_v53 = vrot.slane %v7195_v45, 4  ;;  %v7203_v31 = vrot.slane %v7202_v35, 4  ;;  %v6551_v25 = vmul.f32 %v11686_v5, %v11762_v4 }
0x1a29   : > { %v6762_v50 = vrot.slane %v6761_v20, 2  ;;  %v7191_v34 = vrot.slane %v7190_v47, 2  ;;  %v6552_v16 = vmul.f32 %v11848_v42, %v11678_v24  ;;  %v7185_v43 = vadd.f32 %v7184_v63, %v7183_v1 }
0x1a2a   : > { %v7197_v15 = vadd.f32 %v7196_v53, %v7195_v45  ;;  %v7204_v37 = vadd.f32 %v7203_v31, %v7202_v35  ;;  %v6553_v26 = vmul.f32 %v11686_v5, %v11830_v49  ;;  %v12289_v32 = vrot.slane %v11743_v46, 4 }
0x1a2b   : > { %v6763_v54 = vadd.f32 %v6762_v50, %v6761_v20  ;;  %v7192_v60 = vadd.f32 %v7191_v34, %v7190_v47  ;;  %v12290_v22 = vrot.slane %v11682_v10, 4  ;;  %v12291_v3 = vrot.slane %v11750_v0, 4 }
0x1a2c   : > { %v12292_v56 = vrot.slane %v11733_v14, 4  ;;  %v8660_v40 = vpop.eup %8659  ;;  %v7186_v36 = vrot.slane %v7185_v43, 1  ;;  %v7198_v12 = vrot.slane %v7197_v15, 2  ;;  %v7205_v8 = vrot.slane %v7204_v37, 2 }
0x1a2d   : > { %v6564_v38 = vsel %vm1222_vm6, %v12290_v22, %v12289_v32  ;;  %v6569_v1 = vrot.slane %v6551_v25, 4  ;;  %v6764_v45 = vrot.slane %v6763_v54, 1  ;;  %v7193_v35 = vrot.slane %v7192_v60, 1 }
0x1a2e   : > { %v6567_v59 = vsel %vm1222_vm6, %v12292_v56, %v12291_v3  ;;  %v6571_v58 = vrot.slane %v6552_v16, 4  ;;  %v6572_v20 = vrot.slane %v6553_v26, 4  ;;  %v7187_v46 = vadd.f32 %v7186_v36, %v7185_v43 }
0x1a2f   : > { %v7199_v47 = vadd.f32 %v7198_v12, %v7197_v15  ;;  %v7206_v10 = vadd.f32 %v7205_v8, %v7204_v37  ;;  %v12293_v63 = vrot.slane %v11774_v9, 4  ;;  %v6765_v53 = vadd.f32 %v6764_v45, %v6763_v54 }
0x1a30   : > { %v7194_v14 = vadd.f32 %v7193_v35, %v7192_v60  ;;  %v6573_v31 = vsel %vm1222_vm6, %v6571_v58, %v6572_v20  ;;  %v6578_v50 = vsel %vm1842_vm10, %v6564_v38, 0.0  ;;  %v6585_v22 = vsel %vm1842_vm10, %v6567_v59, 0.0  ;;  %v7237_v20 = vld [vmem:[%s12294_s5 + $0x8] sm:$0xff] }
0x1a31   : > { %v6570_v0 = vsel %vm1222_vm6, %v12293_v63, %v6569_v1  ;;  %v7200_v34 = vrot.slane %v7199_v47, 1  ;;  %v7207_v32 = vrot.slane %v7206_v10, 1  ;;  %v6579_v25 = vrot.slane %v6578_v50, 4  ;;  %8223 = vmatprep.subr.mxu1 %v7237_v20 }
0x1a32   : > { %8661 = vrcp.f32 %v6765_v53  ;;  %v7221_v16 = vsel %vm1993_vm11, %v7194_v14, %v7187_v46  ;;  %v6586_v43 = vrot.slane %v6585_v22, 4  ;;  %v6592_v15 = vsel %vm1842_vm10, %v6570_v0, 0.0  ;;  %8224 = vmatpush3.msra.mxu1 %v7237_v20 }
0x1a33   : > { %v7201_v9 = vadd.f32 %v7200_v34, %v7199_v47  ;;  %v7208_v37 = vadd.f32 %v7207_v32, %v7206_v10  ;;  %v6580_v26 = vadd.f32 %v6579_v25, %v6578_v50  ;;  %v6593_v54 = vrot.slane %v6592_v15, 4 }
0x1a34   : > { %v6587_v60 = vadd.f32 %v6586_v43, %v6585_v22  ;;  %v6599_v3 = vsel %vm1842_vm10, %v6573_v31, 0.0  ;;  %v11883_v38 = vmul.f32 %v8660_v40, %v11788_v61  ;;  %v6204_v56 = vmul.f32 %v11678_v24, %v11674_v19 }
0x1a35   : > { %v7222_v59 = vsel %vm1995_vm12, %v7201_v9, %v7221_v16  ;;  %v6581_v36 = vrot.slane %v6580_v26, 2  ;;  %v6594_v12 = vadd.f32 %v6593_v54, %v6592_v15  ;;  %v6600_v8 = vrot.slane %v6599_v3, 4 }
0x1a36   : > { %v7223_v1 = vsel %vm1997_vm13, %v7208_v37, %v7222_v59  ;;  %v6588_v45 = vrot.slane %v6587_v60, 2  ;;  %v6205_v35 = vmul.f32 %v11678_v24, %v11758_v18  ;;  %v6206_v58 = vmul.f32 %v11678_v24, %v11883_v38 }
0x1a37   : > { %7224 = vrot.lane.b32.xlu1 %v7223_v1, %s12251_s16  ;;  %v6582_v61 = vadd.f32 %v6581_v36, %v6580_v26  ;;  %v6595_v40 = vrot.slane %v6594_v12, 2  ;;  %v6601_v19 = vadd.f32 %v6600_v8, %v6599_v3  ;;  %v6207_v46 = vsel %vm1842_vm10, %v11755_v57, 0.0 }
0x1a38   : > { %v6589_v47 = vadd.f32 %v6588_v45, %v6587_v60  ;;  %v6208_v10 = vrot.slane %v6207_v46, 4  ;;  %v6214_v63 = vsel %vm1842_vm10, %v6204_v56, 0.0  ;;  %v6221_v0 = vsel %vm1842_vm10, %v6205_v35, 0.0 }
0x1a39   : > { %v6583_v53 = vrot.slane %v6582_v61, 1  ;;  %v6596_v14 = vadd.f32 %v6595_v40, %v6594_v12  ;;  %v6602_v24 = vrot.slane %v6601_v19, 2  ;;  %v6215_v31 = vrot.slane %v6214_v63, 4 }
0x1a3a   : > { %v6590_v50 = vrot.slane %v6589_v47, 1  ;;  %v6209_v34 = vadd.f32 %v6208_v10, %v6207_v46  ;;  %v6222_v32 = vrot.slane %v6221_v0, 4  ;;  %v6228_v25 = vsel %vm1842_vm10, %v6206_v58, 0.0 }
0x1a3b   : > { %v6584_v22 = vadd.f32 %v6583_v53, %v6582_v61  ;;  %v6597_v16 = vrot.slane %v6596_v14, 1  ;;  %v6603_v57 = vadd.f32 %v6602_v24, %v6601_v19  ;;  %v6216_v43 = vadd.f32 %v6215_v31, %v6214_v63 }
0x1a3c   : > { %v6591_v15 = vadd.f32 %v6590_v50, %v6589_v47  ;;  %v6210_v9 = vrot.slane %v6209_v34, 2  ;;  %v6223_v37 = vadd.f32 %v6222_v32, %v6221_v0  ;;  %v6229_v26 = vrot.slane %v6228_v25, 4 }
0x1a3d   : > { %v6598_v54 = vadd.f32 %v6597_v16, %v6596_v14  ;;  %v6604_v60 = vrot.slane %v6603_v57, 1  ;;  %v6217_v3 = vrot.slane %v6216_v43, 2  ;;  %v6806_v56 = vmul.f32 %v11855_v2, %v11686_v5 }
0x1a3e   : > { %v6618_v59 = vsel %vm1993_vm11, %v6591_v15, %v6584_v22  ;;  %v6211_v36 = vadd.f32 %v6210_v9, %v6209_v34  ;;  %v6224_v12 = vrot.slane %v6223_v37, 2  ;;  %v6230_v8 = vadd.f32 %v6229_v26, %v6228_v25 }
0x1a3f   : > { %v8662_v1 = vpop.eup %8661  ;;  %v6605_v45 = vadd.f32 %v6604_v60, %v6603_v57  ;;  %v6619_v35 = vsel %vm1995_vm12, %v6598_v54, %v6618_v59  ;;  %v6218_v58 = vadd.f32 %v6217_v3, %v6216_v43  ;;  %v6807_v20 = vmul.f32 %v11810_v48, %v11686_v5 }
0x1a40   : > { %v6212_v61 = vrot.slane %v6211_v36, 1  ;;  %v6225_v40 = vadd.f32 %v6224_v12, %v6223_v37  ;;  %v6231_v19 = vrot.slane %v6230_v8, 2  ;;  %v11907_v46 = vmul.f32 %v8662_v1, %v11836_v27 }
0x1a41   : > { %v6620_v47 = vsel %vm1997_vm13, %v6605_v45, %v6619_v35  ;;  %v6219_v10 = vrot.slane %v6218_v58, 1  ;;  %v6808_v63 = vmul.f32 %v11827_v11, %v11686_v5  ;;  %v6810_v0 = vsel %vm1842_vm10, %v6806_v56, 0.0  ;;  %v7236_v35 = vld [vmem:[%s12294_s5] sm:$0xff] }
0x1a42   : > { %6621 = vrot.lane.b32.xlu0 %v6620_v47, %s12251_s16  ;;  %v6213_v53 = vadd.f32 %v6212_v61, %v6211_v36  ;;  %v6226_v14 = vrot.slane %v6225_v40, 1  ;;  %v6232_v24 = vadd.f32 %v6231_v19, %v6230_v8  ;;  %v6809_v31 = vmul.f32 %v11907_v46, %v11686_v5  ;;  %8225 = vmatprep.subr.mxu1 %v7236_v35 }
0x1a43   : > { %v6220_v50 = vadd.f32 %v6219_v10, %v6218_v58  ;;  %v6811_v34 = vrot.slane %v6810_v0, 4  ;;  %v6817_v27 = vsel %vm1842_vm10, %v6807_v20, 0.0  ;;  %v6824_v32 = vsel %vm1842_vm10, %v6808_v63, 0.0  ;;  %8226 = vmatpush3.msra.mxu1 %v7236_v35 }
0x1a44   : > { %v6227_v25 = vadd.f32 %v6226_v14, %v6225_v40  ;;  %v6233_v22 = vrot.slane %v6232_v24, 1  ;;  %v6818_v16 = vrot.slane %v6817_v27, 4  ;;  %v6825_v57 = vrot.slane %v6824_v32, 4 }
0x1a45   : > { %v6247_v43 = vsel %vm1993_vm11, %v6220_v50, %v6213_v53  ;;  %v6812_v15 = vadd.f32 %v6811_v34, %v6810_v0  ;;  %v6831_v9 = vsel %vm1842_vm10, %v6809_v31, 0.0  ;;  %v7123_v37 = vrot.slane %v11850_v33, 1 }
0x1a46   : > { %v6234_v26 = vadd.f32 %v6233_v22, %v6232_v24  ;;  %v6248_v5 = vsel %vm1995_vm12, %v6227_v25, %v6247_v43  ;;  %v6819_v54 = vadd.f32 %v6818_v16, %v6817_v27  ;;  %v6826_v60 = vadd.f32 %v6825_v57, %v6824_v32 }
0x1a47   : > { %v6813_v3 = vrot.slane %v6812_v15, 2  ;;  %v6832_v56 = vrot.slane %v6831_v9, 4  ;;  %v7124_v59 = vadd.f32 %v7123_v37, %v11850_v33  ;;  %v7130_v36 = vrot.slane %v11852_v44, 1 }
0x1a48   : > { %v6249_v12 = vsel %vm1997_vm13, %v6234_v26, %v6248_v5  ;;  %v6820_v8 = vrot.slane %v6819_v54, 2  ;;  %v6827_v1 = vrot.slane %v6826_v60, 2  ;;  %v7135_v45 = vrot.slane %v11838_v7, 2 }
0x1a49   : > { %6250 = vrot.lane.b32.xlu0 %v6249_v12, %s12251_s16  ;;  %v6814_v58 = vadd.f32 %v6813_v3, %v6812_v15  ;;  %v6833_v20 = vadd.f32 %v6832_v56, %v6831_v9  ;;  %v7131_v61 = vadd.f32 %v7130_v36, %v11852_v44  ;;  %v7141_v40 = vadd.f32 %v7140_v41, %v11833_v39 }
0x1a4a   : > { %v6821_v33 = vadd.f32 %v6820_v8, %v6819_v54  ;;  %v6828_v19 = vadd.f32 %v6827_v1, %v6826_v60  ;;  %v7136_v47 = vadd.f32 %v7135_v45, %v11838_v7  ;;  %v6484_v10 = vmul.f32 %v11800_v13, %v11660_v52 }
0x1a4b   : > { %v6815_v63 = vrot.slane %v6814_v58, 1  ;;  %v6834_v0 = vrot.slane %v6833_v20, 2  ;;  %v7142_v53 = vrot.slane %v7141_v40, 2  ;;  %v7213_v14 = vsel %vm1993_vm11, %v7131_v61, %v7124_v59 }
0x1a4c   : > { %v6822_v24 = vrot.slane %v6821_v33, 1  ;;  %v6829_v44 = vrot.slane %v6828_v19, 1  ;;  %v7137_v31 = vrot.slane %v7136_v47, 1  ;;  %v6486_v39 = vmul.f32 %v11800_v13, %v11725_v21 }
0x1a4d   : > { %v6816_v41 = vadd.f32 %v6815_v63, %v6814_v58  ;;  %v6835_v50 = vadd.f32 %v6834_v0, %v6833_v20  ;;  %v7143_v34 = vadd.f32 %v7142_v53, %v7141_v40  ;;  %v6488_v7 = vmul.f32 %v11800_v13, %v11762_v4 }
0x1a4e   : > { %v6823_v52 = vadd.f32 %v6822_v24, %v6821_v33  ;;  %v6830_v27 = vadd.f32 %v6829_v44, %v6828_v19  ;;  %v7138_v32 = vadd.f32 %v7137_v31, %v7136_v47  ;;  %v6490_v25 = vmul.f32 %v11800_v13, %v11830_v49 }
0x1a4f   : > { %v6836_v22 = vrot.slane %v6835_v50, 1  ;;  %v7144_v16 = vrot.slane %v7143_v34, 1  ;;  %v6500_v57 = vrot.slane %v6484_v10, 4  ;;  %v6503_v43 = vrot.slane %v6486_v39, 4 }
0x1a50   : > { %v6850_v15 = vsel %vm1993_vm11, %v6823_v52, %v6816_v41  ;;  %v7214_v21 = vsel %vm1995_vm12, %v7138_v32, %v7213_v14  ;;  %v6506_v9 = vrot.slane %v6488_v7, 4  ;;  %v6509_v37 = vrot.slane %v6490_v25, 4 }
0x1a51   : > { %v6837_v26 = vadd.f32 %v6836_v22, %v6835_v50  ;;  %v6851_v5 = vsel %vm1995_vm12, %v6830_v27, %v6850_v15  ;;  %v7145_v4 = vadd.f32 %v7144_v16, %v7143_v34  ;;  %v6489_v54 = vmul.f32 %v11848_v42, %v11700_v55 }
0x1a52   : > { %v12295_v60 = vrot.slane %v11720_v17, 4  ;;  %v12296_v3 = vrot.slane %v11736_v6, 4  ;;  %v12297_v59 = vrot.slane %v11777_v51, 4  ;;  %v6170_v12 = vmul.f32 %v11700_v55, %v11758_v18 }
0x1a53   : > { %v6852_v8 = vsel %vm1997_vm13, %v6837_v26, %v6851_v5  ;;  %v11960_v1 = vsel %vm1997_vm13, %v7145_v4, %v7214_v21  ;;  %v6508_v42 = vrot.slane %v6489_v54, 4  ;;  %v6171_v35 = vmul.f32 %v11700_v55, %v11883_v38 }
0x1a54   : > { %v6501_v49 = vsel %vm1222_vm6, %v12295_v60, %v6500_v57  ;;  %v6504_v56 = vsel %vm1222_vm6, %v12296_v3, %v6503_v43  ;;  %v6507_v36 = vsel %vm1222_vm6, %v12297_v59, %v6506_v9  ;;  %6853 = vrot.lane.b32.xlu1 %v6852_v8, %s12251_s16  ;;  %v6172_v61 = vsel %vm1842_vm10, %v11707_v29, 0.0 }
0x1a55   : > { %v6515_v17 = vsel %vm1842_vm10, %v6501_v49, 0.0  ;;  %v6522_v45 = vsel %vm1842_vm10, %v6504_v56, 0.0  ;;  %v6529_v51 = vsel %vm1842_vm10, %v6507_v36, 0.0  ;;  %v6510_v18 = vsel %vm1222_vm6, %v6508_v42, %v6509_v37 }
0x1a56   : > { %v6516_v6 = vrot.slane %v6515_v17, 4  ;;  %v6523_v58 = vrot.slane %v6522_v45, 4  ;;  %v6530_v20 = vrot.slane %v6529_v51, 4  ;;  %v6536_v33 = vsel %vm1842_vm10, %v6510_v18, 0.0 }
0x1a57   : > { %v6173_v19 = vrot.slane %v6172_v61, 4  ;;  %v6179_v47 = vsel %vm1842_vm10, %v11713_v23, 0.0  ;;  %v6537_v0 = vrot.slane %v6536_v33, 4  ;;  %v6186_v38 = vsel %vm1842_vm10, %v6170_v12, 0.0 }
0x1a58   : > { %v6517_v40 = vadd.f32 %v6516_v6, %v6515_v17  ;;  %v6524_v10 = vadd.f32 %v6523_v58, %v6522_v45  ;;  %v6531_v63 = vadd.f32 %v6530_v20, %v6529_v51  ;;  %v6180_v53 = vrot.slane %v6179_v47, 4 }
0x1a59   : > { %v6174_v55 = vadd.f32 %v6173_v19, %v6172_v61  ;;  %v6193_v24 = vsel %vm1842_vm10, %v6171_v35, 0.0  ;;  %v6538_v29 = vadd.f32 %v6537_v0, %v6536_v33  ;;  %v6187_v34 = vrot.slane %v6186_v38, 4 }
0x1a5a   : > { %v6518_v14 = vrot.slane %v6517_v40, 2  ;;  %v6525_v44 = vrot.slane %v6524_v10, 2  ;;  %v6532_v31 = vrot.slane %v6531_v63, 2  ;;  %v6181_v39 = vadd.f32 %v6180_v53, %v6179_v47 }
0x1a5b   : > { %v6175_v50 = vrot.slane %v6174_v55, 2  ;;  %v6194_v7 = vrot.slane %v6193_v24, 4  ;;  %v6539_v27 = vrot.slane %v6538_v29, 2  ;;  %v6188_v16 = vadd.f32 %v6187_v34, %v6186_v38 }
0x1a5c   : > { %v6519_v41 = vadd.f32 %v6518_v14, %v6517_v40  ;;  %v6526_v52 = vadd.f32 %v6525_v44, %v6524_v10  ;;  %v6533_v23 = vadd.f32 %v6532_v31, %v6531_v63  ;;  %v6182_v32 = vrot.slane %v6181_v39, 2 }
0x1a5d   : > { %v6176_v22 = vadd.f32 %v6175_v50, %v6174_v55  ;;  %v6195_v57 = vadd.f32 %v6194_v7, %v6193_v24  ;;  %v6540_v21 = vadd.f32 %v6539_v27, %v6538_v29  ;;  %v6189_v5 = vrot.slane %v6188_v16, 2 }
0x1a5e   : > { %v6520_v25 = vrot.slane %v6519_v41, 1  ;;  %v6527_v43 = vrot.slane %v6526_v52, 1  ;;  %v6534_v15 = vrot.slane %v6533_v23, 1  ;;  %v6183_v9 = vadd.f32 %v6182_v32, %v6181_v39 }
0x1a5f   : > { %v6177_v26 = vrot.slane %v6176_v22, 1  ;;  %v6196_v4 = vrot.slane %v6195_v57, 2  ;;  %v6541_v49 = vrot.slane %v6540_v21, 1  ;;  %v6190_v59 = vadd.f32 %v6189_v5, %v6188_v16 }
0x1a60   : > { %v6521_v37 = vadd.f32 %v6520_v25, %v6519_v41  ;;  %v6528_v54 = vadd.f32 %v6527_v43, %v6526_v52  ;;  %v6535_v60 = vadd.f32 %v6534_v15, %v6533_v23  ;;  %v6184_v3 = vrot.slane %v6183_v9, 1 }
0x1a61   : > { %v6178_v56 = vadd.f32 %v6177_v26, %v6176_v22  ;;  %v6197_v36 = vadd.f32 %v6196_v4, %v6195_v57  ;;  %v6774_v12 = vmul.f32 %v11855_v2, %v11800_v13  ;;  %v6542_v8 = vadd.f32 %v6541_v49, %v6540_v21 }
0x1a62   : > { %v6610_v42 = vsel %vm1993_vm11, %v6528_v54, %v6521_v37  ;;  %v6185_v17 = vadd.f32 %v6184_v3, %v6183_v9  ;;  %v6775_v6 = vmul.f32 %v11810_v48, %v11800_v13  ;;  %v6191_v51 = vrot.slane %v6190_v59, 1 }
0x1a63   : > { %v6611_v45 = vsel %vm1995_vm12, %v6535_v60, %v6610_v42  ;;  %v6198_v35 = vrot.slane %v6197_v36, 1  ;;  %v6776_v18 = vmul.f32 %v11827_v11, %v11800_v13  ;;  %v6777_v2 = vmul.f32 %v11907_v46, %v11800_v13 }
0x1a64   : > { %v6612_v58 = vsel %vm1997_vm13, %v6542_v8, %v6611_v45  ;;  %v6239_v20 = vsel %vm1993_vm11, %v6185_v17, %v6178_v56  ;;  %v6778_v61 = vsel %vm1842_vm10, %v6774_v12, 0.0  ;;  %v6192_v40 = vadd.f32 %v6191_v51, %v6190_v59 }
0x1a65   : > { %v6199_v33 = vadd.f32 %v6198_v35, %v6197_v36  ;;  %v6779_v19 = vrot.slane %v6778_v61, 4  ;;  %v6785_v48 = vsel %vm1842_vm10, %v6775_v6, 0.0  ;;  %v6792_v10 = vsel %vm1842_vm10, %v6776_v18, 0.0  ;;  %v7962_v36 = vld [vmem:[%s12294_s5 + $0x10] ss:$0 sm:$0xff]  ;;  %s7720_s5 = sshll.u32 %s9189_s26, 4  ;;  %s12049_s5 = int_to_ptr.vmem [resolvable:$true] %s7720_s5 }
0x1a66   : > { %v6786_v47 = vrot.slane %v6785_v48, 4  ;;  %v6799_v63 = vsel %vm1842_vm10, %v6777_v2, 0.0  ;;  %v6240_v11 = vsel %vm1995_vm12, %v6192_v40, %v6239_v20  ;;  %v6793_v53 = vrot.slane %v6792_v10, 4  ;;  %s8674_s9 = scalar_lea.vmem %s12049_s5, 192 }
0x1a67   : > { %v6780_v0 = vadd.f32 %v6779_v19, %v6778_v61  ;;  %v6800_v14 = vrot.slane %v6799_v63, 4  ;;  %v6241_v55 = vsel %vm1997_vm13, %v6199_v33, %v6240_v11  ;;  %v7365_v19 = vld [vmem:[%s12298_s3 + $0x8] sm:$0xff]  ;;  %p8675_p11 = scmp.ne.s32.totalorder %s12049_s5, %s8674_s9 }
0x1a68   : > { %v6787_v13 = vadd.f32 %v6786_v47, %v6785_v48  ;;  %v6794_v38 = vadd.f32 %v6793_v53, %v6792_v10  ;;  %8230 = vmatprep.subr.mxu1 %v7365_v19  ;;  %v7364_v48 = vld [vmem:[%s12298_s3] sm:$0xff]  ;;  %v7457_v47 = vld [vmem:[%s12299_s2 + $0x18] sm:$0xff]  ;;  %v7456_v10 = vld [vmem:[%s12299_s2 + $0x10] sm:$0xff] }
0x1a69   : > { %v6781_v46 = vrot.slane %v6780_v0, 2  ;;  %v6801_v24 = vadd.f32 %v6800_v14, %v6799_v63  ;;  %8237 = vmatprep.subr.mxu0 %v7457_v47  ;;  %p8676_p12 = pnand %p8675_p11, %p9002_p5 }
0x1a6a   : > { %v6788_v44 = vrot.slane %v6787_v13, 2  ;;  %v6795_v29 = vrot.slane %v6794_v38, 2  ;;  %8238 = vmatpush3.msra.mxu0 %v7457_v47 }
0x1a6b   : > { %v6782_v31 = vadd.f32 %v6781_v46, %v6780_v0  ;;  %v6802_v39 = vrot.slane %v6801_v24, 2  ;;  %8239 = vmatprep.subr.mxu0 %v7456_v10  ;;  %p8677_p13 = pneg %p8676_p12 }
0x1a6c   : > { %v6789_v41 = vadd.f32 %v6788_v44, %v6787_v13  ;;  %v6796_v34 = vadd.f32 %v6795_v29, %v6794_v38  ;;  %8240 = vmatpush3.msra.mxu0 %v7456_v10  ;;  %v12018_v13 = vld [vmem:[%s12206_s12] sm:$0x3f]  ;;  %v12300_v44 = vld [vmem:[#allocation33_spill] sm:$0xff]  ;;  %s8804_s12 = smov [#allocation4]  }
0x1a6d   : > { %v6783_v50 = vrot.slane %v6782_v31, 1  ;;  %v6803_v7 = vadd.f32 %v6802_v39, %v6801_v24  ;;  %v7355_v46 = vrot.slane %v12018_v13, %v12258_v30  ;;  %v7454_v30 = vld [vmem:[%s12299_s2] sm:$0xff]  ;;  %s8678_s13 = sshll.u32 %s8804_s12, 4  ;;  %s8679_s13 = int_to_ptr.vmem [resolvable:$false] %s8678_s13 }
0x1a6e   : > { %v6790_v52 = vrot.slane %v6789_v41, 1  ;;  %v6797_v27 = vrot.slane %v6796_v34, 1  ;;  %s8680_s14 = scalar_lea.vmem %s8679_s13, 384  ;;  %p8681_p0 = scmp.lt.s32.totalorder %s12049_s5, %s8679_s13 }
0x1a6f   : > { %v6784_v23 = vadd.f32 %v6783_v50, %v6782_v31  ;;  %v6804_v32 = vrot.slane %v6803_v7, 1  ;;  %v7361_v31 = vrot.slane %v12018_v13, %v12300_v44  ;;  %p8682_p1 = scmp.lt.s32.totalorder %s8680_s14, %s8674_s9 }
0x1a70   : > { %v6791_v25 = vadd.f32 %v6790_v52, %v6789_v41  ;;  %v6798_v22 = vadd.f32 %v6797_v27, %v6796_v34  ;;  %v7455_v52 = vld [vmem:[%s12299_s2 + $0x8] sm:$0xff] }
0x1a71   : > { %v6805_v16 = vadd.f32 %v6804_v32, %v6803_v7  ;;  %8241 = vmatprep.subr.mxu0 %v7455_v52  ;;  %p8683_p2 = por %p8682_p1, %p8681_p0 }
0x1a72   : > { %v6842_v57 = vsel %vm1993_vm11, %v6791_v25, %v6784_v23  ;;  %8242 = vmatpush3.msra.mxu0 %v7455_v52  ;;  %v7965_v23 = vld [vmem:[%s12298_s3 + $0x10] ss:$0 sm:$0xff]  ;;  %s12301_s3 = sld [smem:[#allocation14_spill]] }
0x1a73   : > { %v6843_v43 = vsel %vm1995_vm12, %v6798_v22, %v6842_v57  ;;  %8243 = vmatprep.subr.mxu0 %v7454_v30  ;;  %p8684_p3 = pnand %p8683_p2, %p8677_p13 }
0x1a74   : > { %v6844_v15 = vsel %vm1997_vm13, %v6805_v16, %v6843_v43  ;;  %8244 = vmatpush3.msra.mxu0 %v7454_v30  ;;  %v7968_v43 = vld [vmem:[%s12299_s2 + $0x20] ss:$0 sm:$0xff]  ;;  %s8257_s2 = smul.u32 192, %s8985_s0 }
0x1a76   : > { %s12047_s6 = scalar_lea.hbm %s12204_s4, %s8257_s2 }
0x1aa9   : > { %v7225_v54 = vpop.permute.xlu1 %7224 }
0x1aaa   : > { %v7227_v60 = vsel %vm1842_vm10, %v11960_v1, %v7225_v54 }
0x1aab   : > { %v7232_v49 = vrot.slane %v7227_v60, 4 }
0x1ab4   : > { %v6622_v21 = vpop.permute.xlu0 %6621 }
0x1ab5   : > { %v6624_v9 = vsel %vm1842_vm10, %v6612_v58, %v6622_v21 }
0x1ab6   : > { %v7229_v37 = vrot.slane %v6624_v9, 4 }
0x1abb   : > { %v6251_v26 = vpop.permute.xlu0 %6250 }
0x1abc   : > { %v6253_v5 = vsel %vm1842_vm10, %v6241_v55, %v6251_v26 }
0x1abd   : > { %v7234_v4 = vsel %vm1222_vm6, %v6253_v5, %v7229_v37 }
0x1abe   : > { %8227 = vmatprep.mubr.msk.f32.mxu1 %vm1677_vm9, %v7234_v4 }
0x1ac6   : > { %v6854_v3 = vpop.permute.xlu1 %6853 }
0x1ac7   : > { %v6856_v56 = vsel %vm1842_vm10, %v6844_v15, %v6854_v3 }
0x1ac8   : > { %v7235_v59 = vsel %vm1222_vm6, %v6856_v56, %v7232_v49 }
0x1ac9   : > { %8228 = vmatmul.mubr.msk.f32.vlgmr.msra.gmra.mxu1 %vm1677_vm9, %v7235_v59 }
0x1aca   : > { %8231 = vmatpush3.msra.mxu1 %v7365_v19 }
0x1acb   : > { %8232 = vmatprep.subr.mxu1 %v7364_v48 }
0x1acc   : > { %8233 = vmatpush3.msra.mxu1 %v7364_v48  ;;  %v12303_v48 = vld [vmem:[#allocation35_spill] sm:$0xff] }
0x1acd   : > { %v7581_v47 = vrot.slane %v12018_v13, %v12303_v48 }
0x1b89   : > { %v8229_v12 = vpop.f32.mrf.mxu1 }
0x1b8a   : > { %v7321_v8 = vadd.f32 %v8229_v12, %v7962_v36 }
0x1b8b   : > { %v7315_v42 = vpop.f32.mrf.mxu1 }
0x1b8c   : > { %v7325_v17 = vadd.f32 %v7321_v8, %v11282_v28  ;;  %v7316_v6 = vadd.f32 %v7962_v36, %v7315_v42 }
0x1b8e   : > { %v7324_v45 = vadd.f32 %v7316_v6, %v11278_v62  ;;  %v7329_v51 = vsel %vm1677_vm9, %v7325_v17, 0.0  ;;  %v7585_v6 = vld [vmem:[%s12301_s3 + $0x8] sm:$0xff] }
0x1b8f   : > { %7330 = vadd.xlane.f32.xlu1 %v7329_v51  ;;  %8248 = vmatprep.subr.mxu1 %v7585_v6 }
0x1b90   : > { %v7326_v1 = vsel %vm1677_vm9, %v7324_v45, 0.0 }
0x1b91   : > { %7327 = vadd.xlane.f32.xlu0 %v7326_v1 }
0x1c18   : > { %v7331_v35 = vpop.xlane.xlu1 %7330 }
0x1c19   : > { %v7333_v18 = vmul.f32 0.0625, %v7331_v35 }
0x1c1a   : > { %v7328_v58 = vpop.xlane.xlu0 %7327 }
0x1c1b   : > { %v7332_v20 = vmul.f32 0.0625, %v7328_v58  ;;  %v7335_v2 = vsub.f32 %v7325_v17, %v7333_v18 }
0x1c1d   : > { %v7334_v61 = vsub.f32 %v7324_v45, %v7332_v20  ;;  %v7337_v62 = vmul.f32 %v7335_v2, %v7335_v2  ;;  %v7584_v45 = vld [vmem:[%s12301_s3] sm:$0xff] }
0x1c1f   : > { %v7336_v28 = vmul.f32 %v7334_v61, %v7334_v61  ;;  %v7341_v33 = vsel %vm1677_vm9, %v7337_v62, 0.0 }
0x1c21   : > { %v7338_v40 = vsel %vm1677_vm9, %v7336_v28, 0.0 }
0x1c22   : > { %7339 = vadd.xlane.f32.xlu0 %v7338_v40 }
0x1c26   : > { %7342 = vadd.xlane.f32.xlu0 %v7341_v33 }
0x1cab   : > { %v7340_v63 = vpop.xlane.xlu0 %7339 }
0x1cac   : > { %v7344_v11 = vmul.f32 0.0625, %v7340_v63 }
0x1cae   : > { %v7346_v0 = vadd.f32 1e-05, %v7344_v11 }
0x1caf   : > { %v7343_v53 = vpop.xlane.xlu0 %7342 }
0x1cb0   : > { %8663 = vrsqrt.f32 %v7346_v0  ;;  %v7345_v14 = vmul.f32 0.0625, %v7343_v53 }
0x1cb2   : > { %v7347_v55 = vadd.f32 1e-05, %v7345_v14 }
0x1cb4   : > { %8665 = vrsqrt.f32 %v7347_v55 }
0x1cbd   : > { %v8664_v38 = vpop.eup %8663 }
0x1cbe   : > { %v7350_v24 = vmul.f32 %v8664_v38, %v7334_v61  ;;  %v12302_v61 = vld [vmem:[#allocation34_spill] sm:$0xff] }
0x1cbf   : > { %v7575_v28 = vrot.slane %v12018_v13, %v12302_v61 }
0x1cc0   : > { %v7356_v29 = vmul.f32 %v7355_v46, %v7350_v24 }
0x1cc1   : > { %v8666_v39 = vpop.eup %8665 }
0x1cc2   : > { %v7351_v41 = vmul.f32 %v8666_v39, %v7335_v2  ;;  %v7362_v50 = vadd.f32 %v7361_v31, %v7356_v29 }
0x1cc4   : > { %v7357_v34 = vmul.f32 %v7355_v46, %v7351_v41  ;;  %8234 = vmatprep.mubr.msk.f32.mxu1 %vm1677_vm9, %v7362_v50 }
0x1cc6   : > { %v7363_v7 = vadd.f32 %v7361_v31, %v7357_v34 }
0x1cc8   : > { %8235 = vmatmul.mubr.msk.f32.vlgmr.msra.gmra.mxu1 %vm1677_vm9, %v7363_v7 }
0x1cc9   : > { %8249 = vmatpush3.msra.mxu1 %v7585_v6 }
0x1cca   : > { %8250 = vmatprep.subr.mxu1 %v7584_v45 }
0x1ccb   : > { %8251 = vmatpush3.msra.mxu1 %v7584_v45 }
0x1d88   : > { %v8236_v27 = vpop.f32.mrf.mxu1 }
0x1d89   : > { %v7449_v32 = vadd.f32 %v8236_v27, %v7965_v23 }
0x1d8a   : > { %v7443_v25 = vpop.f32.mrf.mxu1 }
0x1d8b   : > { %v7444_v22 = vadd.f32 %v7965_v23, %v7443_v25  ;;  %v7453_v57 = vmax.f32 %v7449_v32, 0.0 }
0x1d8d   : > { %v7452_v16 = vmax.f32 %v7444_v22, 0.0 }
0x1d8f   : > { %8245 = vmatprep.mubr.msk.f32.mxu0 %vm1042_vm4, %v7452_v16 }
0x1d90   : > { %8246 = vmatmul.mubr.msk.f32.vlgmr.msra.gmra.mxu0 %vm1042_vm4, %v7453_v57 }
0x1e50   : > { %v8247_v15 = vpop.f32.mrf.mxu0 }
0x1e51   : > { %v7541_v21 = vadd.f32 %v8247_v15, %v7968_v43 }
0x1e52   : > { %v7535_v9 = vpop.f32.mrf.mxu0 }
0x1e53   : > { %v7545_v37 = vadd.f32 %v7541_v21, %v7363_v7  ;;  %v7536_v26 = vadd.f32 %v7968_v43, %v7535_v9 }
0x1e55   : > { %v7544_v5 = vadd.f32 %v7536_v26, %v7362_v50  ;;  %v7549_v4 = vsel %vm1677_vm9, %v7545_v37, 0.0 }
0x1e56   : > { %7550 = vadd.xlane.f32.xlu1 %v7549_v4 }
0x1e57   : > { %v7546_v54 = vsel %vm1677_vm9, %v7544_v5, 0.0 }
0x1e58   : > { %7547 = vadd.xlane.f32.xlu0 %v7546_v54 }
0x1edf   : > { %v7551_v60 = vpop.xlane.xlu1 %7550 }
0x1ee0   : > { %v7553_v49 = vmul.f32 0.0625, %v7551_v60 }
0x1ee1   : > { %v7548_v3 = vpop.xlane.xlu0 %7547 }
0x1ee2   : > { %v7555_v56 = vsub.f32 %v7545_v37, %v7553_v49  ;;  %v7552_v59 = vmul.f32 0.0625, %v7548_v3 }
0x1ee4   : > { %v7554_v36 = vsub.f32 %v7544_v5, %v7552_v59  ;;  %v7557_v12 = vmul.f32 %v7555_v56, %v7555_v56 }
0x1ee6   : > { %v7561_v8 = vsel %vm1677_vm9, %v7557_v12, 0.0  ;;  %v7556_v42 = vmul.f32 %v7554_v36, %v7554_v36 }
0x1ee7   : > { %7562 = vadd.xlane.f32.xlu1 %v7561_v8 }
0x1ee8   : > { %v7558_v17 = vsel %vm1677_vm9, %v7556_v42, 0.0 }
0x1ee9   : > { %7559 = vadd.xlane.f32.xlu0 %v7558_v17 }
0x1f70   : > { %v7563_v51 = vpop.xlane.xlu1 %7562 }
0x1f71   : > { %v7565_v1 = vmul.f32 0.0625, %v7563_v51 }
0x1f72   : > { %v7560_v35 = vpop.xlane.xlu0 %7559 }
0x1f73   : > { %v7567_v18 = vadd.f32 1e-05, %v7565_v1  ;;  %v7564_v58 = vmul.f32 0.0625, %v7560_v35 }
0x1f75   : > { %8667 = vrsqrt.f32 %v7567_v18  ;;  %v7566_v20 = vadd.f32 1e-05, %v7564_v58 }
0x1f77   : > { %8669 = vrsqrt.f32 %v7566_v20 }
0x1f82   : > { %v8668_v2 = vpop.eup %8667 }
0x1f83   : > { %v7571_v40 = vmul.f32 %v8668_v2, %v7555_v56 }
0x1f84   : > { %v8670_v62 = vpop.eup %8669 }
0x1f85   : > { %v7570_v33 = vmul.f32 %v8670_v62, %v7554_v36  ;;  %v7577_v19 = vmul.f32 %v7575_v28, %v7571_v40 }
0x1f87   : > { %v7576_v10 = vmul.f32 %v7575_v28, %v7570_v33  ;;  %v7583_v11 = vadd.f32 %v7581_v47, %v7577_v19 }
0x1f89   : > { %v7582_v63 = vadd.f32 %v7581_v47, %v7576_v10 }
0x1f8b   : > { %8252 = vmatprep.mubr.msk.f32.mxu1 %vm1677_vm9, %v7582_v63 }
0x1f8c   : > { %8253 = vmatmul.mubr.msk.f32.vlgmr.msra.gmra.mxu1 %vm1677_vm9, %v7583_v11 }
0x1f8d   : > { %8687 = shalt.err (!%p8684_p3)
}
0x1f8e   : > { %s8688_s26 = scalar_lea.hbm %s12047_s6, 192  ;;  %s8692_s2 = scalar_lea.hbm %s12204_s4, 384 }
0x1f8f   : > { %p8689_p4 = scmp.ne.s32.totalorder %s12047_s6, %s8688_s26  ;;  %p8693_p9 = scmp.lt.s32.totalorder %s12047_s6, %s12204_s4 }
0x1f90   : > { %p8694_p10 = scmp.lt.s32.totalorder %s8692_s2, %s8688_s26 }
0x1f91   : > { %p8690_p7 = pnand %p8689_p4, %p9002_p5 }
0x1f92   : > { %p8695_p11 = por %p8694_p10, %p8693_p9 }
0x1f93   : > { %p8691_p8 = pneg %p8690_p7 }
0x1f95   : > { %p8696_p12 = pnand %p8695_p11, %p8691_p8 }
0x1f97   : > { %8699 = shalt.err (!%p8696_p12)
}
0x1f98   : > { %s8805_s9 = smov 64   ;;  %s8806_s13 = smov 4   ;;  %v7971_v0 = vld [vmem:[%s12301_s3 + $0x10] ss:$0 sm:$0xff]  ;;  %v12305_v31 = vld [vmem:[#allocation36_spill] sm:$0xff] }
0x1f99   : > { %8259 = dma.vmem_to_hbm [thread:$0]  (%p9002_p5), %s12049_s5, 192, %s12047_s6, %s7688_s8, %s8805_s9, %s8805_s9, %s8806_s13   ;;  %v12304_v38 = vld [vmem:[#allocation37_spill] sm:$0xff] }
0x1f9a   : > { %s7904_s14 = sshll.u32 %s9176_s22, 4  ;;  %s7981_s12 = sshll.u32 %s8985_s0, 8 }
0x1f9b   : > { %s938_s26 = scalar_lea.vmem [#allocation2], %s7904_s14  ;;  %s12075_s4 = scalar_lea.hbm %s8952_s20, %s7981_s12 }
0x1f9c   : > { %s7701_s2 = sshll.u32 %s938_s26, 4  ;;  %s7679_s8 = scalar_lea.sflag [#allocation3], %s9176_s22  ;;  %s12079_s2 = int_to_ptr.vmem [resolvable:$true] %s7701_s2 }
0x1f9d   : > { %s8700_s0 = scalar_lea.vmem %s12079_s2, 256  ;;  %s8807_s6 = smov [#allocation2]  }
0x1f9e   : > { %p8701_p13 = scmp.ne.s32.totalorder %s12079_s2, %s8700_s0  ;;  %s8704_s5 = sshll.u32 %s8807_s6, 4  ;;  %s8705_s5 = int_to_ptr.vmem [resolvable:$false] %s8704_s5 }
0x1f9f   : > { %s8706_s9 = scalar_lea.vmem %s8705_s5, 512  ;;  %p8707_p2 = scmp.lt.s32.totalorder %s12079_s2, %s8705_s5 }
0x1fa0   : > { %p8702_p0 = pnand %p8701_p13, %p9002_p5  ;;  %p8708_p3 = scmp.lt.s32.totalorder %s8706_s9, %s8700_s0 }
0x1fa2   : > { %p8703_p1 = pneg %p8702_p0  ;;  %p8709_p4 = por %p8708_p3, %p8707_p2 }
0x1fa4   : > { %p8710_p7 = pnand %p8709_p4, %p8703_p1 }
0x204c   : > { %v8254_v53 = vpop.f32.mrf.mxu1 }
0x204d   : > { %v7669_v14 = vadd.f32 %v8254_v53, %v7971_v0 }
0x204e   : > { %v7663_v55 = vpop.f32.mrf.mxu1 }
0x204f   : > { %v7673_v13 = vmax.f32 %v7669_v14, 0.0  ;;  %v7664_v46 = vadd.f32 %v7971_v0, %v7663_v55 }
0x2051   : > { %v7675_v24 = vadd.f32 %v7673_v13, %v12304_v38  ;;  %v7672_v44 = vmax.f32 %v7664_v46, 0.0 }
0x2053   : > { %7677 = vst.msk [vmem:[%s938_s26 + $0x8] sm:$0xff] %vm1042_vm4, %v7675_v24  ;;  %v7674_v29 = vadd.f32 %v7672_v44, %v12305_v31 }
0x2055   : > { %7676 = vst.msk [vmem:[%s938_s26] sm:$0xff] %vm1042_vm4, %v7674_v29 }
0x2056   : > { %8713 = shalt.err (!%p8710_p7)
}
0x2057   : > { %s8714_s13 = scalar_lea.hbm %s12075_s4, 256  ;;  %s8718_s14 = scalar_lea.hbm %s8952_s20, 512 }
0x2058   : > { %p8715_p8 = scmp.ne.s32.totalorder %s12075_s4, %s8714_s13  ;;  %p8719_p11 = scmp.lt.s32.totalorder %s12075_s4, %s8952_s20 }
0x2059   : > { %p8720_p12 = scmp.lt.s32.totalorder %s8718_s14, %s8714_s13 }
0x205a   : > { %p8716_p9 = pnand %p8715_p8, %p9002_p5 }
0x205b   : > { %p8721_p13 = por %p8720_p12, %p8719_p11 }
0x205c   : > { %p8717_p10 = pneg %p8716_p9 }
0x205e   : > { %p8722_p0 = pnand %p8721_p13, %p8717_p10 }
0x2060   : > { %8725 = shalt.err (!%p8722_p0)
}
0x2061   : > { %s8808_s12 = smov 128  }
0x2062   : > { %8258 = dma.vmem_to_hbm [thread:$0]  (%p9002_p5), %s12079_s2, 256, %s12075_s4, %s7679_s8, %s8808_s12, %s8808_s12, %s12251_s16  }
0x2063 PF: > { %p8269_p1 = scmp.ge.s32.totalorder %s8764_s15, 2  ;;  %s7735_s26 = sand.u32 1, %s8752_s7  }
0x2064   : > { %s7736_s0 = scalar_lea.sflag [#allocation3], %s7735_s26 }
0x2065   : > { %p8263_p2 = pnand %p8269_p1, %p9006_p6 }
0x2067   : > { %p8264_p3 = pneg %p8263_p2 }
0x2069   : > { %8743 = dma.done.wait (%p8264_p3), %s7736_s0, 256  }
0x206a   : > { %8745 = vsyncadd (%p8264_p3), %s7736_s0, 4294967040  ;;  %s7752_s6 = scalar_lea.sflag [#allocation5], %s7735_s26 }
0x206b   : > { %8747 = dma.done.wait (%p8264_p3), %s7752_s6, 192  }
0x206c   : > { %8749 = vsyncadd (%p8264_p3), %s7752_s6, 4294967104  ;;  %s12306_s28 = sld [smem:[#allocation29_spill]]  ;;  %p73_p5 = scmp.ge.s32.totalorder %s8989_s18, 4  }
0x206d   : > { %s12307_s7 = smov %s8756_s10  ;;  %s12308_s10 = smov %s8760_s11 }
0x206e   : > { %s12310_s15 = smov %s8989_s18  ;;  %75 = sbr.rel (!%p73_p5) target bundleno = 66 (0x42), region = 232 }
0x2072   : > { %s12309_s11 = smov %s12306_s28 }
0x2073   :  { %7757 = vsyncpa [#allocation3], 1 }
0x2074   :  { %7759 = vsyncpa [#allocation3 + $0x1], 1 }
0x2075   :  { %7760 = vsyncpa [#allocation5], 1 }
0x2076   :  { %7762 = vsyncpa [#allocation5 + $0x1], 1 }

</bundles_post_ra>
